<compile_context>
chip_gen: v7x
topology: tpu7x:2x2x1
jax: 0.10.0
libtpu: 0.0.40
codegen_flags: <defaults>
</compile_context>

<pallas_src>
import functools

import jax
import jax.numpy as jnp
from jax import lax
from jax.experimental import pallas as pl
from jax.experimental.pallas import tpu as pltpu

_EPS = 1e-5  # PyTorch GroupNorm default


def _groupnorm_swish(x, gamma, beta, mg, mgt, ones_row, count):
    """GroupNorm (affine) + Swish on a zero-padded channels-last (L, C) f32 slab.

    Pad entries of `x` are exactly zero so they do not perturb the sums; `count`
    is the number of *valid* elements per group.  Per-channel sums are computed
    on the MXU (ones-row matmuls); group aggregation / broadcast uses tiny
    one-hot matmuls (mg: (C, G), mgt: (G, C)) to avoid lane reshapes.
    Note: variance uses E[x^2]-E[x]^2 in f32 (fine for unit-scale activations).
    """
    s = jnp.dot(ones_row, x, preferred_element_type=jnp.float32)        # (1, C)
    sq = jnp.dot(ones_row, x * x, preferred_element_type=jnp.float32)   # (1, C)
    inv_n = 1.0 / count
    gmean = jnp.dot(s, mg, preferred_element_type=jnp.float32) * inv_n            # (1, G)
    gvar = jnp.dot(sq, mg, preferred_element_type=jnp.float32) * inv_n - gmean * gmean
    mean_c = jnp.dot(gmean, mgt, preferred_element_type=jnp.float32)              # (1, C)
    var_c = jnp.dot(gvar, mgt, preferred_element_type=jnp.float32)                # (1, C)
    xn = (x - mean_c) * lax.rsqrt(var_c + _EPS) * gamma + beta
    return xn * (1.0 / (1.0 + jnp.exp(-xn)))       # Swish: x * sigmoid(x)  (exp on the EUP)


def _conv3x3_taps(z_ref, w_ref, h, wp, c_out):
    """'Same' 3x3 conv over the zero-padded bf16 flat slab in `z_ref`.

    z_ref : VMEM ((h+4)*wp, c_in) bf16; image interior occupies flat rows
            [2*wp, 2*wp + h*wp) with one zero column left/right of each row and
            >= 1 zero row above/below, so every tap is one contiguous slice.
    w_ref : VMEM (9, c_in, c_out) bf16 tap-major conv weights.
    Returns (h*wp, c_out) f32; the pad columns of each row hold garbage and are
    masked / dropped by the caller.  Three independent partial accumulators
    break the serial MXU-result dependency chain.
    """
    l = h * wp
    accs = [None, None, None]
    for t in range(9):
        dy, dx = t // 3, t % 3
        start = (dy + 1) * wp + dx - 1
        d = jnp.dot(z_ref[start:start + l, :], w_ref[t],
                    preferred_element_type=jnp.float32)
        i = t % 3
        accs[i] = d if accs[i] is None else accs[i] + d
    return (accs[0] + accs[1]) + accs[2]


def _fused_resblock_kernel(x_ref, te_ref,
                           g1_ref, b1_ref, mg1_ref, mg1t_ref, w1_ref, cb1_ref,
                           wn_ref, bn_ref,
                           g2_ref, b2_ref, mg2_ref, mg2t_ref, w2_ref, cb2_ref,
                           wres_ref, bres_ref,
                           o_ref,
                           z1_ref, z2_ref,
                           *, h, w, count1, count2):
    f32 = jnp.float32
    wp = w + 2
    lout = h * wp
    top = 2 * wp                       # first interior flat row of the padded slab
    bot = top + lout                   # first bottom-halo flat row

    # Interior-column validity mask built in-kernel (iota + f32 "mod", no HBM input).
    r = lax.broadcasted_iota(jnp.int32, (lout, 1), 0).astype(f32)
    col = r - jnp.floor(r * (1.0 / wp)) * wp
    mask = jnp.where((col >= 0.5) & (col <= w + 0.5), 1.0, 0.0).astype(f32)  # (lout, 1)

    ones_row = jnp.ones((1, lout), f32)

    # Interior of the zero-padded x slab (pad columns are exactly zero).
    x_int = x_ref[0, top:top + lout, :].astype(f32)                      # (lout, Cin)

    # ---- Block 1: GroupNorm -> Swish -> (mask pad) -> padded bf16 slab ----
    z1 = _groupnorm_swish(x_int, g1_ref[...], b1_ref[...],
                          mg1_ref[...], mg1t_ref[...], ones_row, count1)
    z1_ref[0:top, :] = jnp.zeros((top, z1_ref.shape[1]), z1_ref.dtype)       # top halo
    z1_ref[bot:, :] = jnp.zeros((z1_ref.shape[0] - bot, z1_ref.shape[1]), z1_ref.dtype)
    z1_ref[top:bot, :] = (z1 * mask).astype(z1_ref.dtype)                    # interior

    # ---- Block 1: Conv3x3 + bias + FeatureWiseAffine(time_emb) ----
    acc1 = _conv3x3_taps(z1_ref, w1_ref, h, wp, cb1_ref.shape[-1]) + cb1_ref[...]
    noise = jnp.dot(te_ref[0].astype(f32), wn_ref[...],
                    preferred_element_type=f32) + bn_ref[...]                # (1, Cmid)
    h_int = (acc1 + noise) * mask                                            # zero pad cols

    # ---- Block 2: GroupNorm -> Swish -> (mask pad) -> padded bf16 slab ----
    z2 = _groupnorm_swish(h_int, g2_ref[...], b2_ref[...],
                          mg2_ref[...], mg2t_ref[...], ones_row, count2)
    z2_ref[0:top, :] = jnp.zeros((top, z2_ref.shape[1]), z2_ref.dtype)
    z2_ref[bot:, :] = jnp.zeros((z2_ref.shape[0] - bot, z2_ref.shape[1]), z2_ref.dtype)
    z2_ref[top:bot, :] = (z2 * mask).astype(z2_ref.dtype)

    # ---- Block 2: Conv3x3 + bias, residual 1x1 conv (MXU), sum ----
    acc2 = _conv3x3_taps(z2_ref, w2_ref, h, wp, cb2_ref.shape[-1]) + cb2_ref[...]
    res = jnp.dot(x_int.astype(jnp.bfloat16), wres_ref[...],
                  preferred_element_type=f32) + bres_ref[...]
    o_ref[0] = (acc2 + res).astype(o_ref.dtype)   # pad columns hold garbage, dropped outside


def resnet_block_forward(x, time_emb, params, *, norm_groups):
    """Forward of ResnetBlock(dim, dim_out, time_emb_dim, dropout=0, norm_groups)."""
    n, c_in, h, w = x.shape
    c_mid = params["conv1_w"].shape[0]       # dim_out
    c_out = params["conv2_w"].shape[0]       # dim_out
    t_dim = time_emb.shape[-1]
    ng = norm_groups
    wp = w + 2
    lpad = (h + 4) * wp
    lout = h * wp
    f32 = jnp.float32
    bf16 = jnp.bfloat16

    # ---- layout glue (pure data movement; all FLOPs are inside the kernel) ----
    x_nhwc = jnp.transpose(x, (0, 2, 3, 1)).astype(f32)
    # zero halo: 2 rows top/bottom and 1 column left/right, flattened (H+4, W+2) -> 1 axis,
    # so each 3x3 tap becomes a single contiguous slice of the flat slab.
    x_flat = jnp.pad(x_nhwc, ((0, 0), (2, 2), (1, 1), (0, 0))).reshape(n, lpad, c_in)
    te = time_emb.astype(f32).reshape(n, 1, t_dim)

    def conv_taps(w_oihw, dtype):             # OIHW -> tap-major (9, Cin, Cout)
        co, ci, _, _ = w_oihw.shape
        return jnp.transpose(w_oihw.astype(f32), (2, 3, 1, 0)).reshape(9, ci, co).astype(dtype)

    def group_mats(c):                        # one-hot channel -> group membership
        cg = c // ng
        mg = (jnp.arange(c)[:, None] // cg == jnp.arange(ng)[None, :]).astype(f32)
        return mg, mg.T

    mg1, mg1t = group_mats(c_in)
    mg2, mg2t = group_mats(c_mid)

    w1 = conv_taps(params["conv1_w"], bf16)                      # bf16 MXU operands
    cb1 = params["conv1_b"].astype(f32).reshape(1, c_mid)
    w2 = conv_taps(params["conv2_w"], bf16)
    cb2 = params["conv2_b"].astype(f32).reshape(1, c_out)
    gn1_g = params["gn1_g"].astype(f32).reshape(1, c_in)
    gn1_b = params["gn1_b"].astype(f32).reshape(1, c_in)
    gn2_g = params["gn2_g"].astype(f32).reshape(1, c_mid)
    gn2_b = params["gn2_b"].astype(f32).reshape(1, c_mid)
    wn = params["noise_w"].astype(f32).T                         # (T, Cmid)
    bn = params["noise_b"].astype(f32).reshape(1, c_mid)
    if params.get("res_w") is not None:                          # Conv2d(dim, dim_out, 1)
        wres = params["res_w"].astype(f32)[:, :, 0, 0].T.astype(bf16)   # (Cin, Cout)
        bres = params["res_b"].astype(f32).reshape(1, c_out)
    else:                                                        # nn.Identity residual
        assert c_in == c_out, "identity residual requires dim == dim_out"
        wres = jnp.eye(c_in, dtype=bf16)
        bres = jnp.zeros((1, c_out), f32)

    # ---- VMEM budget from the slab math (double-buffered pipelined slabs + scratch) ----
    def nbytes(shape, dt):
        sz = 1
        for d_ in shape:
            sz *= d_
        return sz * jnp.dtype(dt).itemsize

    needed = (
        2 * nbytes((lpad, c_in), f32)                            # x slab (double-buffered)
        + 2 * nbytes((lout, c_out), f32)                         # output slab
        + nbytes((lpad, c_in), bf16) + nbytes((lpad, c_mid), bf16)   # z1/z2 scratch
        + 2 * (nbytes((9, c_in, c_mid), bf16) + nbytes((9, c_mid, c_out), bf16)
               + nbytes((c_in, c_out), bf16) + nbytes((t_dim, c_mid), f32))
        + 6 * nbytes((lout, c_out), f32)                         # conv accumulators / temps
    )
    vmem_limit = int(min(max(2 * needed, 32 * 1024 * 1024), 64 * 1024 * 1024))

    cparams = pltpu.CompilerParams(
        dimension_semantics=("parallel",),        # batch axis -> shard across v7x TCs
        vmem_limit_bytes=vmem_limit,
    )

    kern = functools.partial(
        _fused_resblock_kernel, h=h, w=w,
        count1=float(h * w * (c_in // ng)),
        count2=float(h * w * (c_mid // ng)))

    out_flat = pl.pallas_call(
        kern,
        out_shape=jax.ShapeDtypeStruct((n, lout, c_out), f32),
        grid=(n,),
        in_specs=[
            pl.BlockSpec((1, lpad, c_in), lambda b: (b, 0, 0)),    # x (padded flat, channels-last)
            pl.BlockSpec((1, 1, t_dim), lambda b: (b, 0, 0)),      # time_emb
            pl.BlockSpec((1, c_in), lambda b: (0, 0)),             # gn1 gamma
            pl.BlockSpec((1, c_in), lambda b: (0, 0)),             # gn1 beta
            pl.BlockSpec((c_in, ng), lambda b: (0, 0)),            # group membership (block1)
            pl.BlockSpec((ng, c_in), lambda b: (0, 0)),            # its transpose
            pl.BlockSpec((9, c_in, c_mid), lambda b: (0, 0, 0)),   # conv1 taps (bf16, VMEM)
            pl.BlockSpec((1, c_mid), lambda b: (0, 0)),            # conv1 bias
            pl.BlockSpec((t_dim, c_mid), lambda b: (0, 0)),        # noise Linear weight
            pl.BlockSpec((1, c_mid), lambda b: (0, 0)),            # noise Linear bias
            pl.BlockSpec((1, c_mid), lambda b: (0, 0)),            # gn2 gamma
            pl.BlockSpec((1, c_mid), lambda b: (0, 0)),            # gn2 beta
            pl.BlockSpec((c_mid, ng), lambda b: (0, 0)),           # group membership (block2)
            pl.BlockSpec((ng, c_mid), lambda b: (0, 0)),           # its transpose
            pl.BlockSpec((9, c_mid, c_out), lambda b: (0, 0, 0)),  # conv2 taps (bf16)
            pl.BlockSpec((1, c_out), lambda b: (0, 0)),            # conv2 bias
            pl.BlockSpec((c_in, c_out), lambda b: (0, 0)),         # residual 1x1 weight (or I)
            pl.BlockSpec((1, c_out), lambda b: (0, 0)),            # residual bias
        ],
        out_specs=pl.BlockSpec((1, lout, c_out), lambda b: (b, 0, 0)),
        scratch_shapes=[pltpu.VMEM((lpad, c_in), bf16),            # padded Swish(GN1(x)) slab
                        pltpu.VMEM((lpad, c_mid), bf16)],          # padded Swish(GN2(h)) slab
        compiler_params=cparams,
    )(x_flat, te, gn1_g, gn1_b, mg1, mg1t, w1, cb1, wn, bn,
      gn2_g, gn2_b, mg2, mg2t, w2, cb2, wres, bres)

    out = out_flat.reshape(n, h, wp, c_out)[:, :, 1:1 + w, :]      # drop pad columns
    return jnp.transpose(out, (0, 3, 1, 2)).astype(x.dtype)        # back to NCHW


if __name__ == "__main__":
    key = jax.random.PRNGKey(0)
    ks = jax.random.split(key, 11)

    batch, dim, dim_out, spatial, t_dim, groups = 2, 4, 8, 16, 32, 2

    x = jax.random.normal(ks[0], (batch, dim, spatial, spatial), jnp.float32)
    time_emb = jax.random.normal(ks[1], (batch, t_dim), jnp.float32)

    def conv_init(k, co, ci, kh, kw):
        bound = 1.0 / jnp.sqrt(jnp.float32(ci * kh * kw))
        kw_, kb_ = jax.random.split(k)
        return (jax.random.uniform(kw_, (co, ci, kh, kw), jnp.float32, -bound, bound),
                jax.random.uniform(kb_, (co,), jnp.float32, -bound, bound))

    conv1_w, conv1_b = conv_init(ks[2], dim_out, dim, 3, 3)
    conv2_w, conv2_b = conv_init(ks[3], dim_out, dim_out, 3, 3)
    res_w, res_b = conv_init(ks[4], dim_out, dim, 1, 1)
    nb = 1.0 / jnp.sqrt(jnp.float32(t_dim))
    noise_w = jax.random.uniform(ks[5], (dim_out, t_dim), jnp.float32, -nb, nb)
    noise_b = jax.random.uniform(ks[6], (dim_out,), jnp.float32, -nb, nb)
    gn1_g = 1.0 + 0.1 * jax.random.normal(ks[7], (dim,), jnp.float32)
    gn1_b = 0.1 * jax.random.normal(ks[8], (dim,), jnp.float32)
    gn2_g = 1.0 + 0.1 * jax.random.normal(ks[9], (dim_out,), jnp.float32)
    gn2_b = 0.1 * jax.random.normal(ks[10], (dim_out,), jnp.float32)

    params = dict(conv1_w=conv1_w, conv1_b=conv1_b, conv2_w=conv2_w, conv2_b=conv2_b,
                  res_w=res_w, res_b=res_b, noise_w=noise_w, noise_b=noise_b,
                  gn1_g=gn1_g, gn1_b=gn1_b, gn2_g=gn2_g, gn2_b=gn2_b)

    out = jax.block_until_ready(
        resnet_block_forward(x, time_emb, params, norm_groups=groups))

    # ---- pure-JAX reference (same math as the PyTorch module, f32 / HIGHEST precision) ----
    def ref_gn(v, gamma, beta, ngr, eps=1e-5):
        n_, c_, hh, ww = v.shape
        vg = v.reshape(n_, ngr, (c_ // ngr) * hh * ww)
        mean = vg.mean(axis=2, keepdims=True)
        var = vg.var(axis=2, keepdims=True)
        vn = ((vg - mean) * lax.rsqrt(var + eps)).reshape(n_, c_, hh, ww)
        return vn * gamma[None, :, None, None] + beta[None, :, None, None]

    def ref_swish(v):
        return v * (1.0 / (1.0 + jnp.exp(-v)))

    def ref_conv(v, wgt, bias, pad):
        y = lax.conv_general_dilated(v, wgt, (1, 1), ((pad, pad), (pad, pad)),
                                     dimension_numbers=("NCHW", "OIHW", "NCHW"),
                                     precision=lax.Precision.HIGHEST)
        return y + bias[None, :, None, None]

    h1 = ref_conv(ref_swish(ref_gn(x, gn1_g, gn1_b, groups)), conv1_w, conv1_b, 1)
    h1 = h1 + (time_emb @ noise_w.T + noise_b)[:, :, None, None]
    h2 = ref_conv(ref_swish(ref_gn(h1, gn2_g, gn2_b, groups)), conv2_w, conv2_b, 1)
    ref = h2 + ref_conv(x, res_w, res_b, 0)

    assert out.shape == (batch, dim_out, spatial, spatial)
    # Tolerance accounts for bf16 MXU operands in the kernel vs. the f32 HIGHEST reference.
    assert jnp.allclose(out, ref, rtol=5e-2, atol=5e-2), (
        f"max abs err {jnp.max(jnp.abs(out - ref))}")
    print("KERNEL_OK")
</pallas_src>

<mosaic_0001>
module attributes {stable_mosaic.version = 11 : i64} {
  func.func @_fused_resblock_kernel(%arg0: i32, %arg1: memref<1x360x4xf32, #tpu.memory_space<vmem>>, %arg2: memref<1x1x32xf32, #tpu.memory_space<vmem>>, %arg3: memref<1x4xf32, #tpu.memory_space<vmem>>, %arg4: memref<1x4xf32, #tpu.memory_space<vmem>>, %arg5: memref<4x2xf32, #tpu.memory_space<vmem>>, %arg6: memref<2x4xf32, #tpu.memory_space<vmem>>, %arg7: memref<9x4x8xbf16, #tpu.memory_space<vmem>>, %arg8: memref<1x8xf32, #tpu.memory_space<vmem>>, %arg9: memref<32x8xf32, #tpu.memory_space<vmem>>, %arg10: memref<1x8xf32, #tpu.memory_space<vmem>>, %arg11: memref<1x8xf32, #tpu.memory_space<vmem>>, %arg12: memref<1x8xf32, #tpu.memory_space<vmem>>, %arg13: memref<8x2xf32, #tpu.memory_space<vmem>>, %arg14: memref<2x8xf32, #tpu.memory_space<vmem>>, %arg15: memref<9x8x8xbf16, #tpu.memory_space<vmem>>, %arg16: memref<1x8xf32, #tpu.memory_space<vmem>>, %arg17: memref<4x8xbf16, #tpu.memory_space<vmem>>, %arg18: memref<1x8xf32, #tpu.memory_space<vmem>>, %arg19: memref<1x288x8xf32, #tpu.memory_space<vmem>>, %arg20: memref<360x4xbf16, #tpu.memory_space<vmem>>, %arg21: memref<360x8xbf16, #tpu.memory_space<vmem>>) attributes {dimension_semantics = [#tpu.dimension_semantics<parallel>], iteration_bounds = array<i64: 2>, scalar_prefetch = 0 : i64, scratch_operands = 2 : i64, tpu.core_type = #tpu.core_type<tc>, window_params = [{transform_indices = @transform_0, window_bounds = array<i64: 1, 360, 4>}, {transform_indices = @transform_1, window_bounds = array<i64: 1, 1, 32>}, {pipeline_mode = #tpu.pipeline_mode<synchronous>, transform_indices = @transform_2, window_bounds = array<i64: 1, 4>}, {pipeline_mode = #tpu.pipeline_mode<synchronous>, transform_indices = @transform_3, window_bounds = array<i64: 1, 4>}, {pipeline_mode = #tpu.pipeline_mode<synchronous>, transform_indices = @transform_4, window_bounds = array<i64: 4, 2>}, {pipeline_mode = #tpu.pipeline_mode<synchronous>, transform_indices = @transform_5, window_bounds = array<i64: 2, 4>}, {pipeline_mode = #tpu.pipeline_mode<synchronous>, transform_indices = @transform_6, window_bounds = array<i64: 9, 4, 8>}, {pipeline_mode = #tpu.pipeline_mode<synchronous>, transform_indices = @transform_7, window_bounds = array<i64: 1, 8>}, {pipeline_mode = #tpu.pipeline_mode<synchronous>, transform_indices = @transform_8, window_bounds = array<i64: 32, 8>}, {pipeline_mode = #tpu.pipeline_mode<synchronous>, transform_indices = @transform_9, window_bounds = array<i64: 1, 8>}, {pipeline_mode = #tpu.pipeline_mode<synchronous>, transform_indices = @transform_10, window_bounds = array<i64: 1, 8>}, {pipeline_mode = #tpu.pipeline_mode<synchronous>, transform_indices = @transform_11, window_bounds = array<i64: 1, 8>}, {pipeline_mode = #tpu.pipeline_mode<synchronous>, transform_indices = @transform_12, window_bounds = array<i64: 8, 2>}, {pipeline_mode = #tpu.pipeline_mode<synchronous>, transform_indices = @transform_13, window_bounds = array<i64: 2, 8>}, {pipeline_mode = #tpu.pipeline_mode<synchronous>, transform_indices = @transform_14, window_bounds = array<i64: 9, 8, 8>}, {pipeline_mode = #tpu.pipeline_mode<synchronous>, transform_indices = @transform_15, window_bounds = array<i64: 1, 8>}, {pipeline_mode = #tpu.pipeline_mode<synchronous>, transform_indices = @transform_16, window_bounds = array<i64: 4, 8>}, {pipeline_mode = #tpu.pipeline_mode<synchronous>, transform_indices = @transform_17, window_bounds = array<i64: 1, 8>}, {transform_indices = @transform_18, window_bounds = array<i64: 1, 288, 8>}]} {
    %0 = tpu.iota {dimensions = array<i32: 0>} : vector<288x1xi32>
    %1 = arith.sitofp %0 : vector<288x1xi32> to vector<288x1xf32>
    %cst = arith.constant 0.055555556 : f32
    %2 = vector.broadcast %cst : f32 to vector<288x1xf32>
    %3 = arith.mulf %1, %2 : vector<288x1xf32>
    %4 = math.floor %3 : vector<288x1xf32>
    %cst_0 = arith.constant 1.800000e+01 : f32
    %5 = vector.broadcast %cst_0 : f32 to vector<288x1xf32>
    %6 = arith.mulf %4, %5 : vector<288x1xf32>
    %7 = arith.subf %1, %6 : vector<288x1xf32>
    %cst_1 = arith.constant 5.000000e-01 : f32
    %8 = vector.broadcast %cst_1 : f32 to vector<288x1xf32>
    %9 = arith.cmpf oge, %7, %8 : vector<288x1xf32>
    %cst_2 = arith.constant 1.650000e+01 : f32
    %10 = vector.broadcast %cst_2 : f32 to vector<288x1xf32>
    %11 = arith.cmpf ole, %7, %10 : vector<288x1xf32>
    %12 = arith.andi %9, %11 : vector<288x1xi1>
    %cst_3 = arith.constant 1.000000e+00 : f32
    %cst_4 = arith.constant 0.000000e+00 : f32
    %13 = vector.broadcast %cst_3 : f32 to vector<288x1xf32>
    %14 = vector.broadcast %cst_4 : f32 to vector<288x1xf32>
    %15 = arith.select %12, %13, %14 : vector<288x1xi1>, vector<288x1xf32>
    %cst_5 = arith.constant 1.000000e+00 : f32
    %16 = vector.broadcast %cst_5 : f32 to vector<1x288xf32>
    %c0 = arith.constant 0 : index
    %c36 = arith.constant 36 : index
    %c0_6 = arith.constant 0 : index
    %17 = vector.load %arg1[%c0, %c36, %c0_6] : memref<1x360x4xf32, #tpu.memory_space<vmem>>, vector<1x288x4xf32>
    %18 = vector.shape_cast %17 : vector<1x288x4xf32> to vector<288x4xf32>
    %c0_7 = arith.constant 0 : index
    %c0_8 = arith.constant 0 : index
    %19 = vector.load %arg3[%c0_7, %c0_8] : memref<1x4xf32, #tpu.memory_space<vmem>>, vector<1x4xf32>
    %c0_9 = arith.constant 0 : index
    %c0_10 = arith.constant 0 : index
    %20 = vector.load %arg4[%c0_9, %c0_10] : memref<1x4xf32, #tpu.memory_space<vmem>>, vector<1x4xf32>
    %c0_11 = arith.constant 0 : index
    %c0_12 = arith.constant 0 : index
    %21 = vector.load %arg5[%c0_11, %c0_12] : memref<4x2xf32, #tpu.memory_space<vmem>>, vector<4x2xf32>
    %c0_13 = arith.constant 0 : index
    %c0_14 = arith.constant 0 : index
    %22 = vector.load %arg6[%c0_13, %c0_14] : memref<2x4xf32, #tpu.memory_space<vmem>>, vector<2x4xf32>
    %cst_15 = arith.constant dense<0.000000e+00> : vector<1x4xf32>
    %23 = tpu.matmul %16, %18, %cst_15 {dimension_numbers = #tpu.dot_dimension_numbers<[1], [0], [0], [1], [0, 0, 1, 1], [], []>} : vector<1x288xf32>, vector<288x4xf32>, vector<1x4xf32> -> vector<1x4xf32>
    %24 = arith.mulf %18, %18 : vector<288x4xf32>
    %cst_16 = arith.constant dense<0.000000e+00> : vector<1x4xf32>
    %25 = tpu.matmul %16, %24, %cst_16 {dimension_numbers = #tpu.dot_dimension_numbers<[1], [0], [0], [1], [0, 0, 1, 1], [], []>} : vector<1x288xf32>, vector<288x4xf32>, vector<1x4xf32> -> vector<1x4xf32>
    %cst_17 = arith.constant dense<0.000000e+00> : vector<1x2xf32>
    %26 = tpu.matmul %23, %21, %cst_17 {dimension_numbers = #tpu.dot_dimension_numbers<[1], [0], [0], [1], [0, 0, 1, 1], [], []>} : vector<1x4xf32>, vector<4x2xf32>, vector<1x2xf32> -> vector<1x2xf32>
    %cst_18 = arith.constant 0.001953125 : f32
    %27 = vector.broadcast %cst_18 : f32 to vector<1x2xf32>
    %28 = arith.mulf %26, %27 : vector<1x2xf32>
    %cst_19 = arith.constant dense<0.000000e+00> : vector<1x2xf32>
    %29 = tpu.matmul %25, %21, %cst_19 {dimension_numbers = #tpu.dot_dimension_numbers<[1], [0], [0], [1], [0, 0, 1, 1], [], []>} : vector<1x4xf32>, vector<4x2xf32>, vector<1x2xf32> -> vector<1x2xf32>
    %cst_20 = arith.constant 0.001953125 : f32
    %30 = vector.broadcast %cst_20 : f32 to vector<1x2xf32>
    %31 = arith.mulf %29, %30 : vector<1x2xf32>
    %32 = arith.mulf %28, %28 : vector<1x2xf32>
    %33 = arith.subf %31, %32 : vector<1x2xf32>
    %cst_21 = arith.constant dense<0.000000e+00> : vector<1x4xf32>
    %34 = tpu.matmul %28, %22, %cst_21 {dimension_numbers = #tpu.dot_dimension_numbers<[1], [0], [0], [1], [0, 0, 1, 1], [], []>} : vector<1x2xf32>, vector<2x4xf32>, vector<1x4xf32> -> vector<1x4xf32>
    %cst_22 = arith.constant dense<0.000000e+00> : vector<1x4xf32>
    %35 = tpu.matmul %33, %22, %cst_22 {dimension_numbers = #tpu.dot_dimension_numbers<[1], [0], [0], [1], [0, 0, 1, 1], [], []>} : vector<1x2xf32>, vector<2x4xf32>, vector<1x4xf32> -> vector<1x4xf32>
    %36 = vector.broadcast %34 : vector<1x4xf32> to vector<288x4xf32>
    %37 = arith.subf %18, %36 : vector<288x4xf32>
    %cst_23 = arith.constant 9.99999974E-6 : f32
    %38 = vector.broadcast %cst_23 : f32 to vector<1x4xf32>
    %39 = arith.addf %35, %38 : vector<1x4xf32>
    %40 = math.rsqrt %39 : vector<1x4xf32>
    %41 = vector.broadcast %40 : vector<1x4xf32> to vector<288x4xf32>
    %42 = arith.mulf %37, %41 : vector<288x4xf32>
    %43 = vector.broadcast %19 : vector<1x4xf32> to vector<288x4xf32>
    %44 = arith.mulf %42, %43 : vector<288x4xf32>
    %45 = vector.broadcast %20 : vector<1x4xf32> to vector<288x4xf32>
    %46 = arith.addf %44, %45 : vector<288x4xf32>
    %cst_24 = arith.constant 0.000000e+00 : f32
    %47 = vector.broadcast %cst_24 : f32 to vector<288x4xf32>
    %48 = arith.subf %47, %46 : vector<288x4xf32>
    %49 = math.exp %48 : vector<288x4xf32>
    %cst_25 = arith.constant 1.000000e+00 : f32
    %50 = vector.broadcast %cst_25 : f32 to vector<288x4xf32>
    %51 = arith.addf %50, %49 : vector<288x4xf32>
    %cst_26 = arith.constant 1.000000e+00 : f32
    %52 = vector.broadcast %cst_26 : f32 to vector<288x4xf32>
    %53 = arith.divf %52, %51 : vector<288x4xf32>
    %54 = arith.mulf %46, %53 : vector<288x4xf32>
    %cst_27 = arith.constant 0.000000e+00 : bf16
    %55 = vector.broadcast %cst_27 : bf16 to vector<36x4xbf16>
    %c0_28 = arith.constant 0 : index
    %c0_29 = arith.constant 0 : index
    %56 = vector.load %arg20[%c0_28, %c0_29] : memref<360x4xbf16, #tpu.memory_space<vmem>>, vector<36x4xbf16>
    tpu.vector_store %arg20[%c0_28, %c0_29], %55 {strides = array<i32>} : memref<360x4xbf16, #tpu.memory_space<vmem>>, vector<36x4xbf16>,
    %cst_30 = arith.constant 0.000000e+00 : bf16
    %57 = vector.broadcast %cst_30 : bf16 to vector<36x4xbf16>
    %c324 = arith.constant 324 : index
    %c0_31 = arith.constant 0 : index
    %58 = vector.load %arg20[%c324, %c0_31] : memref<360x4xbf16, #tpu.memory_space<vmem>>, vector<36x4xbf16>
    tpu.vector_store %arg20[%c324, %c0_31], %57 {strides = array<i32>} : memref<360x4xbf16, #tpu.memory_space<vmem>>, vector<36x4xbf16>,
    %59 = vector.broadcast %15 : vector<288x1xf32> to vector<288x4xf32>
    %60 = arith.mulf %54, %59 : vector<288x4xf32>
    %61 = arith.truncf %60 : vector<288x4xf32> to vector<288x4xbf16>
    %c36_32 = arith.constant 36 : index
    %c0_33 = arith.constant 0 : index
    %62 = vector.load %arg20[%c36_32, %c0_33] : memref<360x4xbf16, #tpu.memory_space<vmem>>, vector<288x4xbf16>
    tpu.vector_store %arg20[%c36_32, %c0_33], %61 {strides = array<i32>} : memref<360x4xbf16, #tpu.memory_space<vmem>>, vector<288x4xbf16>,
    %c17 = arith.constant 17 : index
    %c0_34 = arith.constant 0 : index
    %63 = vector.load %arg20[%c17, %c0_34] : memref<360x4xbf16, #tpu.memory_space<vmem>>, vector<288x4xbf16>
    %c0_35 = arith.constant 0 : index
    %c0_36 = arith.constant 0 : index
    %c0_37 = arith.constant 0 : index
    %64 = vector.load %arg7[%c0_35, %c0_36, %c0_37] : memref<9x4x8xbf16, #tpu.memory_space<vmem>>, vector<1x4x8xbf16>
    %65 = vector.shape_cast %64 : vector<1x4x8xbf16> to vector<4x8xbf16>
    %cst_38 = arith.constant dense<0.000000e+00> : vector<288x8xf32>
    %66 = tpu.matmul %63, %65, %cst_38 {dimension_numbers = #tpu.dot_dimension_numbers<[1], [0], [0], [1], [0, 0, 1, 1], [], []>} : vector<288x4xbf16>, vector<4x8xbf16>, vector<288x8xf32> -> vector<288x8xf32>
    %c18 = arith.constant 18 : index
    %c0_39 = arith.constant 0 : index
    %67 = vector.load %arg20[%c18, %c0_39] : memref<360x4xbf16, #tpu.memory_space<vmem>>, vector<288x4xbf16>
    %c1 = arith.constant 1 : index
    %c0_40 = arith.constant 0 : index
    %c0_41 = arith.constant 0 : index
    %68 = vector.load %arg7[%c1, %c0_40, %c0_41] : memref<9x4x8xbf16, #tpu.memory_space<vmem>>, vector<1x4x8xbf16>
    %69 = vector.shape_cast %68 : vector<1x4x8xbf16> to vector<4x8xbf16>
    %cst_42 = arith.constant dense<0.000000e+00> : vector<288x8xf32>
    %70 = tpu.matmul %67, %69, %cst_42 {dimension_numbers = #tpu.dot_dimension_numbers<[1], [0], [0], [1], [0, 0, 1, 1], [], []>} : vector<288x4xbf16>, vector<4x8xbf16>, vector<288x8xf32> -> vector<288x8xf32>
    %c19 = arith.constant 19 : index
    %c0_43 = arith.constant 0 : index
    %71 = vector.load %arg20[%c19, %c0_43] : memref<360x4xbf16, #tpu.memory_space<vmem>>, vector<288x4xbf16>
    %c2 = arith.constant 2 : index
    %c0_44 = arith.constant 0 : index
    %c0_45 = arith.constant 0 : index
    %72 = vector.load %arg7[%c2, %c0_44, %c0_45] : memref<9x4x8xbf16, #tpu.memory_space<vmem>>, vector<1x4x8xbf16>
    %73 = vector.shape_cast %72 : vector<1x4x8xbf16> to vector<4x8xbf16>
    %cst_46 = arith.constant dense<0.000000e+00> : vector<288x8xf32>
    %74 = tpu.matmul %71, %73, %cst_46 {dimension_numbers = #tpu.dot_dimension_numbers<[1], [0], [0], [1], [0, 0, 1, 1], [], []>} : vector<288x4xbf16>, vector<4x8xbf16>, vector<288x8xf32> -> vector<288x8xf32>
    %c35 = arith.constant 35 : index
    %c0_47 = arith.constant 0 : index
    %75 = vector.load %arg20[%c35, %c0_47] : memref<360x4xbf16, #tpu.memory_space<vmem>>, vector<288x4xbf16>
    %c3 = arith.constant 3 : index
    %c0_48 = arith.constant 0 : index
    %c0_49 = arith.constant 0 : index
    %76 = vector.load %arg7[%c3, %c0_48, %c0_49] : memref<9x4x8xbf16, #tpu.memory_space<vmem>>, vector<1x4x8xbf16>
    %77 = vector.shape_cast %76 : vector<1x4x8xbf16> to vector<4x8xbf16>
    %cst_50 = arith.constant dense<0.000000e+00> : vector<288x8xf32>
    %78 = tpu.matmul %75, %77, %cst_50 {dimension_numbers = #tpu.dot_dimension_numbers<[1], [0], [0], [1], [0, 0, 1, 1], [], []>} : vector<288x4xbf16>, vector<4x8xbf16>, vector<288x8xf32> -> vector<288x8xf32>
    %79 = arith.addf %66, %78 : vector<288x8xf32>
    %c36_51 = arith.constant 36 : index
    %c0_52 = arith.constant 0 : index
    %80 = vector.load %arg20[%c36_51, %c0_52] : memref<360x4xbf16, #tpu.memory_space<vmem>>, vector<288x4xbf16>
    %c4 = arith.constant 4 : index
    %c0_53 = arith.constant 0 : index
    %c0_54 = arith.constant 0 : index
    %81 = vector.load %arg7[%c4, %c0_53, %c0_54] : memref<9x4x8xbf16, #tpu.memory_space<vmem>>, vector<1x4x8xbf16>
    %82 = vector.shape_cast %81 : vector<1x4x8xbf16> to vector<4x8xbf16>
    %cst_55 = arith.constant dense<0.000000e+00> : vector<288x8xf32>
    %83 = tpu.matmul %80, %82, %cst_55 {dimension_numbers = #tpu.dot_dimension_numbers<[1], [0], [0], [1], [0, 0, 1, 1], [], []>} : vector<288x4xbf16>, vector<4x8xbf16>, vector<288x8xf32> -> vector<288x8xf32>
    %84 = arith.addf %70, %83 : vector<288x8xf32>
    %c37 = arith.constant 37 : index
    %c0_56 = arith.constant 0 : index
    %85 = vector.load %arg20[%c37, %c0_56] : memref<360x4xbf16, #tpu.memory_space<vmem>>, vector<288x4xbf16>
    %c5 = arith.constant 5 : index
    %c0_57 = arith.constant 0 : index
    %c0_58 = arith.constant 0 : index
    %86 = vector.load %arg7[%c5, %c0_57, %c0_58] : memref<9x4x8xbf16, #tpu.memory_space<vmem>>, vector<1x4x8xbf16>
    %87 = vector.shape_cast %86 : vector<1x4x8xbf16> to vector<4x8xbf16>
    %cst_59 = arith.constant dense<0.000000e+00> : vector<288x8xf32>
    %88 = tpu.matmul %85, %87, %cst_59 {dimension_numbers = #tpu.dot_dimension_numbers<[1], [0], [0], [1], [0, 0, 1, 1], [], []>} : vector<288x4xbf16>, vector<4x8xbf16>, vector<288x8xf32> -> vector<288x8xf32>
    %89 = arith.addf %74, %88 : vector<288x8xf32>
    %c53 = arith.constant 53 : index
    %c0_60 = arith.constant 0 : index
    %90 = vector.load %arg20[%c53, %c0_60] : memref<360x4xbf16, #tpu.memory_space<vmem>>, vector<288x4xbf16>
    %c6 = arith.constant 6 : index
    %c0_61 = arith.constant 0 : index
    %c0_62 = arith.constant 0 : index
    %91 = vector.load %arg7[%c6, %c0_61, %c0_62] : memref<9x4x8xbf16, #tpu.memory_space<vmem>>, vector<1x4x8xbf16>
    %92 = vector.shape_cast %91 : vector<1x4x8xbf16> to vector<4x8xbf16>
    %cst_63 = arith.constant dense<0.000000e+00> : vector<288x8xf32>
    %93 = tpu.matmul %90, %92, %cst_63 {dimension_numbers = #tpu.dot_dimension_numbers<[1], [0], [0], [1], [0, 0, 1, 1], [], []>} : vector<288x4xbf16>, vector<4x8xbf16>, vector<288x8xf32> -> vector<288x8xf32>
    %94 = arith.addf %79, %93 : vector<288x8xf32>
    %c54 = arith.constant 54 : index
    %c0_64 = arith.constant 0 : index
    %95 = vector.load %arg20[%c54, %c0_64] : memref<360x4xbf16, #tpu.memory_space<vmem>>, vector<288x4xbf16>
    %c7 = arith.constant 7 : index
    %c0_65 = arith.constant 0 : index
    %c0_66 = arith.constant 0 : index
    %96 = vector.load %arg7[%c7, %c0_65, %c0_66] : memref<9x4x8xbf16, #tpu.memory_space<vmem>>, vector<1x4x8xbf16>
    %97 = vector.shape_cast %96 : vector<1x4x8xbf16> to vector<4x8xbf16>
    %cst_67 = arith.constant dense<0.000000e+00> : vector<288x8xf32>
    %98 = tpu.matmul %95, %97, %cst_67 {dimension_numbers = #tpu.dot_dimension_numbers<[1], [0], [0], [1], [0, 0, 1, 1], [], []>} : vector<288x4xbf16>, vector<4x8xbf16>, vector<288x8xf32> -> vector<288x8xf32>
    %99 = arith.addf %84, %98 : vector<288x8xf32>
    %c55 = arith.constant 55 : index
    %c0_68 = arith.constant 0 : index
    %100 = vector.load %arg20[%c55, %c0_68] : memref<360x4xbf16, #tpu.memory_space<vmem>>, vector<288x4xbf16>
    %c8 = arith.constant 8 : index
    %c0_69 = arith.constant 0 : index
    %c0_70 = arith.constant 0 : index
    %101 = vector.load %arg7[%c8, %c0_69, %c0_70] : memref<9x4x8xbf16, #tpu.memory_space<vmem>>, vector<1x4x8xbf16>
    %102 = vector.shape_cast %101 : vector<1x4x8xbf16> to vector<4x8xbf16>
    %cst_71 = arith.constant dense<0.000000e+00> : vector<288x8xf32>
    %103 = tpu.matmul %100, %102, %cst_71 {dimension_numbers = #tpu.dot_dimension_numbers<[1], [0], [0], [1], [0, 0, 1, 1], [], []>} : vector<288x4xbf16>, vector<4x8xbf16>, vector<288x8xf32> -> vector<288x8xf32>
    %104 = arith.addf %89, %103 : vector<288x8xf32>
    %105 = arith.addf %94, %99 : vector<288x8xf32>
    %106 = arith.addf %105, %104 : vector<288x8xf32>
    %c0_72 = arith.constant 0 : index
    %c0_73 = arith.constant 0 : index
    %107 = vector.load %arg8[%c0_72, %c0_73] : memref<1x8xf32, #tpu.memory_space<vmem>>, vector<1x8xf32>
    %108 = vector.broadcast %107 : vector<1x8xf32> to vector<288x8xf32>
    %109 = arith.addf %106, %108 : vector<288x8xf32>
    %c0_74 = arith.constant 0 : index
    %c0_75 = arith.constant 0 : index
    %c0_76 = arith.constant 0 : index
    %110 = vector.load %arg2[%c0_74, %c0_75, %c0_76] : memref<1x1x32xf32, #tpu.memory_space<vmem>>, vector<1x1x32xf32>
    %111 = vector.shape_cast %110 : vector<1x1x32xf32> to vector<1x32xf32>
    %c0_77 = arith.constant 0 : index
    %c0_78 = arith.constant 0 : index
    %112 = vector.load %arg9[%c0_77, %c0_78] : memref<32x8xf32, #tpu.memory_space<vmem>>, vector<32x8xf32>
    %cst_79 = arith.constant dense<0.000000e+00> : vector<1x8xf32>
    %113 = tpu.matmul %111, %112, %cst_79 {dimension_numbers = #tpu.dot_dimension_numbers<[1], [0], [0], [1], [0, 0, 1, 1], [], []>} : vector<1x32xf32>, vector<32x8xf32>, vector<1x8xf32> -> vector<1x8xf32>
    %c0_80 = arith.constant 0 : index
    %c0_81 = arith.constant 0 : index
    %114 = vector.load %arg10[%c0_80, %c0_81] : memref<1x8xf32, #tpu.memory_space<vmem>>, vector<1x8xf32>
    %115 = arith.addf %113, %114 : vector<1x8xf32>
    %116 = vector.broadcast %115 : vector<1x8xf32> to vector<288x8xf32>
    %117 = arith.addf %109, %116 : vector<288x8xf32>
    %118 = vector.broadcast %15 : vector<288x1xf32> to vector<288x8xf32>
    %119 = arith.mulf %117, %118 : vector<288x8xf32>
    %c0_82 = arith.constant 0 : index
    %c0_83 = arith.constant 0 : index
    %120 = vector.load %arg11[%c0_82, %c0_83] : memref<1x8xf32, #tpu.memory_space<vmem>>, vector<1x8xf32>
    %c0_84 = arith.constant 0 : index
    %c0_85 = arith.constant 0 : index
    %121 = vector.load %arg12[%c0_84, %c0_85] : memref<1x8xf32, #tpu.memory_space<vmem>>, vector<1x8xf32>
    %c0_86 = arith.constant 0 : index
    %c0_87 = arith.constant 0 : index
    %122 = vector.load %arg13[%c0_86, %c0_87] : memref<8x2xf32, #tpu.memory_space<vmem>>, vector<8x2xf32>
    %c0_88 = arith.constant 0 : index
    %c0_89 = arith.constant 0 : index
    %123 = vector.load %arg14[%c0_88, %c0_89] : memref<2x8xf32, #tpu.memory_space<vmem>>, vector<2x8xf32>
    %cst_90 = arith.constant dense<0.000000e+00> : vector<1x8xf32>
    %124 = tpu.matmul %16, %119, %cst_90 {dimension_numbers = #tpu.dot_dimension_numbers<[1], [0], [0], [1], [0, 0, 1, 1], [], []>} : vector<1x288xf32>, vector<288x8xf32>, vector<1x8xf32> -> vector<1x8xf32>
    %125 = arith.mulf %119, %119 : vector<288x8xf32>
    %cst_91 = arith.constant dense<0.000000e+00> : vector<1x8xf32>
    %126 = tpu.matmul %16, %125, %cst_91 {dimension_numbers = #tpu.dot_dimension_numbers<[1], [0], [0], [1], [0, 0, 1, 1], [], []>} : vector<1x288xf32>, vector<288x8xf32>, vector<1x8xf32> -> vector<1x8xf32>
    %cst_92 = arith.constant dense<0.000000e+00> : vector<1x2xf32>
    %127 = tpu.matmul %124, %122, %cst_92 {dimension_numbers = #tpu.dot_dimension_numbers<[1], [0], [0], [1], [0, 0, 1, 1], [], []>} : vector<1x8xf32>, vector<8x2xf32>, vector<1x2xf32> -> vector<1x2xf32>
    %cst_93 = arith.constant 9.765625E-4 : f32
    %128 = vector.broadcast %cst_93 : f32 to vector<1x2xf32>
    %129 = arith.mulf %127, %128 : vector<1x2xf32>
    %cst_94 = arith.constant dense<0.000000e+00> : vector<1x2xf32>
    %130 = tpu.matmul %126, %122, %cst_94 {dimension_numbers = #tpu.dot_dimension_numbers<[1], [0], [0], [1], [0, 0, 1, 1], [], []>} : vector<1x8xf32>, vector<8x2xf32>, vector<1x2xf32> -> vector<1x2xf32>
    %cst_95 = arith.constant 9.765625E-4 : f32
    %131 = vector.broadcast %cst_95 : f32 to vector<1x2xf32>
    %132 = arith.mulf %130, %131 : vector<1x2xf32>
    %133 = arith.mulf %129, %129 : vector<1x2xf32>
    %134 = arith.subf %132, %133 : vector<1x2xf32>
    %cst_96 = arith.constant dense<0.000000e+00> : vector<1x8xf32>
    %135 = tpu.matmul %129, %123, %cst_96 {dimension_numbers = #tpu.dot_dimension_numbers<[1], [0], [0], [1], [0, 0, 1, 1], [], []>} : vector<1x2xf32>, vector<2x8xf32>, vector<1x8xf32> -> vector<1x8xf32>
    %cst_97 = arith.constant dense<0.000000e+00> : vector<1x8xf32>
    %136 = tpu.matmul %134, %123, %cst_97 {dimension_numbers = #tpu.dot_dimension_numbers<[1], [0], [0], [1], [0, 0, 1, 1], [], []>} : vector<1x2xf32>, vector<2x8xf32>, vector<1x8xf32> -> vector<1x8xf32>
    %137 = vector.broadcast %135 : vector<1x8xf32> to vector<288x8xf32>
    %138 = arith.subf %119, %137 : vector<288x8xf32>
    %cst_98 = arith.constant 9.99999974E-6 : f32
    %139 = vector.broadcast %cst_98 : f32 to vector<1x8xf32>
    %140 = arith.addf %136, %139 : vector<1x8xf32>
    %141 = math.rsqrt %140 : vector<1x8xf32>
    %142 = vector.broadcast %141 : vector<1x8xf32> to vector<288x8xf32>
    %143 = arith.mulf %138, %142 : vector<288x8xf32>
    %144 = vector.broadcast %120 : vector<1x8xf32> to vector<288x8xf32>
    %145 = arith.mulf %143, %144 : vector<288x8xf32>
    %146 = vector.broadcast %121 : vector<1x8xf32> to vector<288x8xf32>
    %147 = arith.addf %145, %146 : vector<288x8xf32>
    %cst_99 = arith.constant 0.000000e+00 : f32
    %148 = vector.broadcast %cst_99 : f32 to vector<288x8xf32>
    %149 = arith.subf %148, %147 : vector<288x8xf32>
    %150 = math.exp %149 : vector<288x8xf32>
    %cst_100 = arith.constant 1.000000e+00 : f32
    %151 = vector.broadcast %cst_100 : f32 to vector<288x8xf32>
    %152 = arith.addf %151, %150 : vector<288x8xf32>
    %cst_101 = arith.constant 1.000000e+00 : f32
    %153 = vector.broadcast %cst_101 : f32 to vector<288x8xf32>
    %154 = arith.divf %153, %152 : vector<288x8xf32>
    %155 = arith.mulf %147, %154 : vector<288x8xf32>
    %cst_102 = arith.constant 0.000000e+00 : bf16
    %156 = vector.broadcast %cst_102 : bf16 to vector<36x8xbf16>
    %c0_103 = arith.constant 0 : index
    %c0_104 = arith.constant 0 : index
    %157 = vector.load %arg21[%c0_103, %c0_104] : memref<360x8xbf16, #tpu.memory_space<vmem>>, vector<36x8xbf16>
    tpu.vector_store %arg21[%c0_103, %c0_104], %156 {strides = array<i32>} : memref<360x8xbf16, #tpu.memory_space<vmem>>, vector<36x8xbf16>,
    %cst_105 = arith.constant 0.000000e+00 : bf16
    %158 = vector.broadcast %cst_105 : bf16 to vector<36x8xbf16>
    %c324_106 = arith.constant 324 : index
    %c0_107 = arith.constant 0 : index
    %159 = vector.load %arg21[%c324_106, %c0_107] : memref<360x8xbf16, #tpu.memory_space<vmem>>, vector<36x8xbf16>
    tpu.vector_store %arg21[%c324_106, %c0_107], %158 {strides = array<i32>} : memref<360x8xbf16, #tpu.memory_space<vmem>>, vector<36x8xbf16>,
    %160 = vector.broadcast %15 : vector<288x1xf32> to vector<288x8xf32>
    %161 = arith.mulf %155, %160 : vector<288x8xf32>
    %162 = arith.truncf %161 : vector<288x8xf32> to vector<288x8xbf16>
    %c36_108 = arith.constant 36 : index
    %c0_109 = arith.constant 0 : index
    %163 = vector.load %arg21[%c36_108, %c0_109] : memref<360x8xbf16, #tpu.memory_space<vmem>>, vector<288x8xbf16>
    tpu.vector_store %arg21[%c36_108, %c0_109], %162 {strides = array<i32>} : memref<360x8xbf16, #tpu.memory_space<vmem>>, vector<288x8xbf16>,
    %c17_110 = arith.constant 17 : index
    %c0_111 = arith.constant 0 : index
    %164 = vector.load %arg21[%c17_110, %c0_111] : memref<360x8xbf16, #tpu.memory_space<vmem>>, vector<288x8xbf16>
    %c0_112 = arith.constant 0 : index
    %c0_113 = arith.constant 0 : index
    %c0_114 = arith.constant 0 : index
    %165 = vector.load %arg15[%c0_112, %c0_113, %c0_114] : memref<9x8x8xbf16, #tpu.memory_space<vmem>>, vector<1x8x8xbf16>
    %166 = vector.shape_cast %165 : vector<1x8x8xbf16> to vector<8x8xbf16>
    %cst_115 = arith.constant dense<0.000000e+00> : vector<288x8xf32>
    %167 = tpu.matmul %164, %166, %cst_115 {dimension_numbers = #tpu.dot_dimension_numbers<[1], [0], [0], [1], [0, 0, 1, 1], [], []>} : vector<288x8xbf16>, vector<8x8xbf16>, vector<288x8xf32> -> vector<288x8xf32>
    %c18_116 = arith.constant 18 : index
    %c0_117 = arith.constant 0 : index
    %168 = vector.load %arg21[%c18_116, %c0_117] : memref<360x8xbf16, #tpu.memory_space<vmem>>, vector<288x8xbf16>
    %c1_118 = arith.constant 1 : index
    %c0_119 = arith.constant 0 : index
    %c0_120 = arith.constant 0 : index
    %169 = vector.load %arg15[%c1_118, %c0_119, %c0_120] : memref<9x8x8xbf16, #tpu.memory_space<vmem>>, vector<1x8x8xbf16>
    %170 = vector.shape_cast %169 : vector<1x8x8xbf16> to vector<8x8xbf16>
    %cst_121 = arith.constant dense<0.000000e+00> : vector<288x8xf32>
    %171 = tpu.matmul %168, %170, %cst_121 {dimension_numbers = #tpu.dot_dimension_numbers<[1], [0], [0], [1], [0, 0, 1, 1], [], []>} : vector<288x8xbf16>, vector<8x8xbf16>, vector<288x8xf32> -> vector<288x8xf32>
    %c19_122 = arith.constant 19 : index
    %c0_123 = arith.constant 0 : index
    %172 = vector.load %arg21[%c19_122, %c0_123] : memref<360x8xbf16, #tpu.memory_space<vmem>>, vector<288x8xbf16>
    %c2_124 = arith.constant 2 : index
    %c0_125 = arith.constant 0 : index
    %c0_126 = arith.constant 0 : index
    %173 = vector.load %arg15[%c2_124, %c0_125, %c0_126] : memref<9x8x8xbf16, #tpu.memory_space<vmem>>, vector<1x8x8xbf16>
    %174 = vector.shape_cast %173 : vector<1x8x8xbf16> to vector<8x8xbf16>
    %cst_127 = arith.constant dense<0.000000e+00> : vector<288x8xf32>
    %175 = tpu.matmul %172, %174, %cst_127 {dimension_numbers = #tpu.dot_dimension_numbers<[1], [0], [0], [1], [0, 0, 1, 1], [], []>} : vector<288x8xbf16>, vector<8x8xbf16>, vector<288x8xf32> -> vector<288x8xf32>
    %c35_128 = arith.constant 35 : index
    %c0_129 = arith.constant 0 : index
    %176 = vector.load %arg21[%c35_128, %c0_129] : memref<360x8xbf16, #tpu.memory_space<vmem>>, vector<288x8xbf16>
    %c3_130 = arith.constant 3 : index
    %c0_131 = arith.constant 0 : index
    %c0_132 = arith.constant 0 : index
    %177 = vector.load %arg15[%c3_130, %c0_131, %c0_132] : memref<9x8x8xbf16, #tpu.memory_space<vmem>>, vector<1x8x8xbf16>
    %178 = vector.shape_cast %177 : vector<1x8x8xbf16> to vector<8x8xbf16>
    %cst_133 = arith.constant dense<0.000000e+00> : vector<288x8xf32>
    %179 = tpu.matmul %176, %178, %cst_133 {dimension_numbers = #tpu.dot_dimension_numbers<[1], [0], [0], [1], [0, 0, 1, 1], [], []>} : vector<288x8xbf16>, vector<8x8xbf16>, vector<288x8xf32> -> vector<288x8xf32>
    %180 = arith.addf %167, %179 : vector<288x8xf32>
    %c36_134 = arith.constant 36 : index
    %c0_135 = arith.constant 0 : index
    %181 = vector.load %arg21[%c36_134, %c0_135] : memref<360x8xbf16, #tpu.memory_space<vmem>>, vector<288x8xbf16>
    %c4_136 = arith.constant 4 : index
    %c0_137 = arith.constant 0 : index
    %c0_138 = arith.constant 0 : index
    %182 = vector.load %arg15[%c4_136, %c0_137, %c0_138] : memref<9x8x8xbf16, #tpu.memory_space<vmem>>, vector<1x8x8xbf16>
    %183 = vector.shape_cast %182 : vector<1x8x8xbf16> to vector<8x8xbf16>
    %cst_139 = arith.constant dense<0.000000e+00> : vector<288x8xf32>
    %184 = tpu.matmul %181, %183, %cst_139 {dimension_numbers = #tpu.dot_dimension_numbers<[1], [0], [0], [1], [0, 0, 1, 1], [], []>} : vector<288x8xbf16>, vector<8x8xbf16>, vector<288x8xf32> -> vector<288x8xf32>
    %185 = arith.addf %171, %184 : vector<288x8xf32>
    %c37_140 = arith.constant 37 : index
    %c0_141 = arith.constant 0 : index
    %186 = vector.load %arg21[%c37_140, %c0_141] : memref<360x8xbf16, #tpu.memory_space<vmem>>, vector<288x8xbf16>
    %c5_142 = arith.constant 5 : index
    %c0_143 = arith.constant 0 : index
    %c0_144 = arith.constant 0 : index
    %187 = vector.load %arg15[%c5_142, %c0_143, %c0_144] : memref<9x8x8xbf16, #tpu.memory_space<vmem>>, vector<1x8x8xbf16>
    %188 = vector.shape_cast %187 : vector<1x8x8xbf16> to vector<8x8xbf16>
    %cst_145 = arith.constant dense<0.000000e+00> : vector<288x8xf32>
    %189 = tpu.matmul %186, %188, %cst_145 {dimension_numbers = #tpu.dot_dimension_numbers<[1], [0], [0], [1], [0, 0, 1, 1], [], []>} : vector<288x8xbf16>, vector<8x8xbf16>, vector<288x8xf32> -> vector<288x8xf32>
    %190 = arith.addf %175, %189 : vector<288x8xf32>
    %c53_146 = arith.constant 53 : index
    %c0_147 = arith.constant 0 : index
    %191 = vector.load %arg21[%c53_146, %c0_147] : memref<360x8xbf16, #tpu.memory_space<vmem>>, vector<288x8xbf16>
    %c6_148 = arith.constant 6 : index
    %c0_149 = arith.constant 0 : index
    %c0_150 = arith.constant 0 : index
    %192 = vector.load %arg15[%c6_148, %c0_149, %c0_150] : memref<9x8x8xbf16, #tpu.memory_space<vmem>>, vector<1x8x8xbf16>
    %193 = vector.shape_cast %192 : vector<1x8x8xbf16> to vector<8x8xbf16>
    %cst_151 = arith.constant dense<0.000000e+00> : vector<288x8xf32>
    %194 = tpu.matmul %191, %193, %cst_151 {dimension_numbers = #tpu.dot_dimension_numbers<[1], [0], [0], [1], [0, 0, 1, 1], [], []>} : vector<288x8xbf16>, vector<8x8xbf16>, vector<288x8xf32> -> vector<288x8xf32>
    %195 = arith.addf %180, %194 : vector<288x8xf32>
    %c54_152 = arith.constant 54 : index
    %c0_153 = arith.constant 0 : index
    %196 = vector.load %arg21[%c54_152, %c0_153] : memref<360x8xbf16, #tpu.memory_space<vmem>>, vector<288x8xbf16>
    %c7_154 = arith.constant 7 : index
    %c0_155 = arith.constant 0 : index
    %c0_156 = arith.constant 0 : index
    %197 = vector.load %arg15[%c7_154, %c0_155, %c0_156] : memref<9x8x8xbf16, #tpu.memory_space<vmem>>, vector<1x8x8xbf16>
    %198 = vector.shape_cast %197 : vector<1x8x8xbf16> to vector<8x8xbf16>
    %cst_157 = arith.constant dense<0.000000e+00> : vector<288x8xf32>
    %199 = tpu.matmul %196, %198, %cst_157 {dimension_numbers = #tpu.dot_dimension_numbers<[1], [0], [0], [1], [0, 0, 1, 1], [], []>} : vector<288x8xbf16>, vector<8x8xbf16>, vector<288x8xf32> -> vector<288x8xf32>
    %200 = arith.addf %185, %199 : vector<288x8xf32>
    %c55_158 = arith.constant 55 : index
    %c0_159 = arith.constant 0 : index
    %201 = vector.load %arg21[%c55_158, %c0_159] : memref<360x8xbf16, #tpu.memory_space<vmem>>, vector<288x8xbf16>
    %c8_160 = arith.constant 8 : index
    %c0_161 = arith.constant 0 : index
    %c0_162 = arith.constant 0 : index
    %202 = vector.load %arg15[%c8_160, %c0_161, %c0_162] : memref<9x8x8xbf16, #tpu.memory_space<vmem>>, vector<1x8x8xbf16>
    %203 = vector.shape_cast %202 : vector<1x8x8xbf16> to vector<8x8xbf16>
    %cst_163 = arith.constant dense<0.000000e+00> : vector<288x8xf32>
    %204 = tpu.matmul %201, %203, %cst_163 {dimension_numbers = #tpu.dot_dimension_numbers<[1], [0], [0], [1], [0, 0, 1, 1], [], []>} : vector<288x8xbf16>, vector<8x8xbf16>, vector<288x8xf32> -> vector<288x8xf32>
    %205 = arith.addf %190, %204 : vector<288x8xf32>
    %206 = arith.addf %195, %200 : vector<288x8xf32>
    %207 = arith.addf %206, %205 : vector<288x8xf32>
    %c0_164 = arith.constant 0 : index
    %c0_165 = arith.constant 0 : index
    %208 = vector.load %arg16[%c0_164, %c0_165] : memref<1x8xf32, #tpu.memory_space<vmem>>, vector<1x8xf32>
    %209 = vector.broadcast %208 : vector<1x8xf32> to vector<288x8xf32>
    %210 = arith.addf %207, %209 : vector<288x8xf32>
    %211 = arith.truncf %18 : vector<288x4xf32> to vector<288x4xbf16>
    %c0_166 = arith.constant 0 : index
    %c0_167 = arith.constant 0 : index
    %212 = vector.load %arg17[%c0_166, %c0_167] : memref<4x8xbf16, #tpu.memory_space<vmem>>, vector<4x8xbf16>
    %cst_168 = arith.constant dense<0.000000e+00> : vector<288x8xf32>
    %213 = tpu.matmul %211, %212, %cst_168 {dimension_numbers = #tpu.dot_dimension_numbers<[1], [0], [0], [1], [0, 0, 1, 1], [], []>} : vector<288x4xbf16>, vector<4x8xbf16>, vector<288x8xf32> -> vector<288x8xf32>
    %c0_169 = arith.constant 0 : index
    %c0_170 = arith.constant 0 : index
    %214 = vector.load %arg18[%c0_169, %c0_170] : memref<1x8xf32, #tpu.memory_space<vmem>>, vector<1x8xf32>
    %215 = vector.broadcast %214 : vector<1x8xf32> to vector<288x8xf32>
    %216 = arith.addf %213, %215 : vector<288x8xf32>
    %217 = arith.addf %210, %216 : vector<288x8xf32>
    %c0_171 = arith.constant 0 : index
    %c0_172 = arith.constant 0 : index
    %c0_173 = arith.constant 0 : index
    %218 = vector.load %arg19[%c0_171, %c0_172, %c0_173] : memref<1x288x8xf32, #tpu.memory_space<vmem>>, vector<1x288x8xf32>
    %219 = vector.shape_cast %218 : vector<1x288x8xf32> to vector<288x8xf32>
    %220 = vector.shape_cast %217 : vector<288x8xf32> to vector<1x288x8xf32>
    tpu.vector_store %arg19[%c0_171, %c0_172, %c0_173], %220 {strides = array<i32>} : memref<1x288x8xf32, #tpu.memory_space<vmem>>, vector<1x288x8xf32>,
    return
  }
  func.func @transform_0(%arg0: i32) -> (i32, i32, i32) {
    %c0_i32 = arith.constant 0 : i32
    %c0_i32_0 = arith.constant 0 : i32
    %c0_i32_1 = arith.constant 0 : i32
    return %arg0, %c0_i32, %c0_i32_0 : i32, i32, i32
  }
  func.func @transform_1(%arg0: i32) -> (i32, i32, i32) {
    %c0_i32 = arith.constant 0 : i32
    %c0_i32_0 = arith.constant 0 : i32
    %c0_i32_1 = arith.constant 0 : i32
    return %arg0, %c0_i32, %c0_i32_0 : i32, i32, i32
  }
  func.func @transform_2(%arg0: i32) -> (i32, i32) {
    %c0_i32 = arith.constant 0 : i32
    %c0_i32_0 = arith.constant 0 : i32
    %c0_i32_1 = arith.constant 0 : i32
    return %c0_i32, %c0_i32_0 : i32, i32
  }
  func.func @transform_3(%arg0: i32) -> (i32, i32) {
    %c0_i32 = arith.constant 0 : i32
    %c0_i32_0 = arith.constant 0 : i32
    %c0_i32_1 = arith.constant 0 : i32
    return %c0_i32, %c0_i32_0 : i32, i32
  }
  func.func @transform_4(%arg0: i32) -> (i32, i32) {
    %c0_i32 = arith.constant 0 : i32
    %c0_i32_0 = arith.constant 0 : i32
    %c0_i32_1 = arith.constant 0 : i32
    return %c0_i32, %c0_i32_0 : i32, i32
  }
  func.func @transform_5(%arg0: i32) -> (i32, i32) {
    %c0_i32 = arith.constant 0 : i32
    %c0_i32_0 = arith.constant 0 : i32
    %c0_i32_1 = arith.constant 0 : i32
    return %c0_i32, %c0_i32_0 : i32, i32
  }
  func.func @transform_6(%arg0: i32) -> (i32, i32, i32) {
    %c0_i32 = arith.constant 0 : i32
    %c0_i32_0 = arith.constant 0 : i32
    %c0_i32_1 = arith.constant 0 : i32
    %c0_i32_2 = arith.constant 0 : i32
    return %c0_i32, %c0_i32_0, %c0_i32_1 : i32, i32, i32
  }
  func.func @transform_7(%arg0: i32) -> (i32, i32) {
    %c0_i32 = arith.constant 0 : i32
    %c0_i32_0 = arith.constant 0 : i32
    %c0_i32_1 = arith.constant 0 : i32
    return %c0_i32, %c0_i32_0 : i32, i32
  }
  func.func @transform_8(%arg0: i32) -> (i32, i32) {
    %c0_i32 = arith.constant 0 : i32
    %c0_i32_0 = arith.constant 0 : i32
    %c0_i32_1 = arith.constant 0 : i32
    return %c0_i32, %c0_i32_0 : i32, i32
  }
  func.func @transform_9(%arg0: i32) -> (i32, i32) {
    %c0_i32 = arith.constant 0 : i32
    %c0_i32_0 = arith.constant 0 : i32
    %c0_i32_1 = arith.constant 0 : i32
    return %c0_i32, %c0_i32_0 : i32, i32
  }
  func.func @transform_10(%arg0: i32) -> (i32, i32) {
    %c0_i32 = arith.constant 0 : i32
    %c0_i32_0 = arith.constant 0 : i32
    %c0_i32_1 = arith.constant 0 : i32
    return %c0_i32, %c0_i32_0 : i32, i32
  }
  func.func @transform_11(%arg0: i32) -> (i32, i32) {
    %c0_i32 = arith.constant 0 : i32
    %c0_i32_0 = arith.constant 0 : i32
    %c0_i32_1 = arith.constant 0 : i32
    return %c0_i32, %c0_i32_0 : i32, i32
  }
  func.func @transform_12(%arg0: i32) -> (i32, i32) {
    %c0_i32 = arith.constant 0 : i32
    %c0_i32_0 = arith.constant 0 : i32
    %c0_i32_1 = arith.constant 0 : i32
    return %c0_i32, %c0_i32_0 : i32, i32
  }
  func.func @transform_13(%arg0: i32) -> (i32, i32) {
    %c0_i32 = arith.constant 0 : i32
    %c0_i32_0 = arith.constant 0 : i32
    %c0_i32_1 = arith.constant 0 : i32
    return %c0_i32, %c0_i32_0 : i32, i32
  }
  func.func @transform_14(%arg0: i32) -> (i32, i32, i32) {
    %c0_i32 = arith.constant 0 : i32
    %c0_i32_0 = arith.constant 0 : i32
    %c0_i32_1 = arith.constant 0 : i32
    %c0_i32_2 = arith.constant 0 : i32
    return %c0_i32, %c0_i32_0, %c0_i32_1 : i32, i32, i32
  }
  func.func @transform_15(%arg0: i32) -> (i32, i32) {
    %c0_i32 = arith.constant 0 : i32
    %c0_i32_0 = arith.constant 0 : i32
    %c0_i32_1 = arith.constant 0 : i32
    return %c0_i32, %c0_i32_0 : i32, i32
  }
  func.func @transform_16(%arg0: i32) -> (i32, i32) {
    %c0_i32 = arith.constant 0 : i32
    %c0_i32_0 = arith.constant 0 : i32
    %c0_i32_1 = arith.constant 0 : i32
    return %c0_i32, %c0_i32_0 : i32, i32
  }
  func.func @transform_17(%arg0: i32) -> (i32, i32) {
    %c0_i32 = arith.constant 0 : i32
    %c0_i32_0 = arith.constant 0 : i32
    %c0_i32_1 = arith.constant 0 : i32
    return %c0_i32, %c0_i32_0 : i32, i32
  }
  func.func @transform_18(%arg0: i32) -> (i32, i32, i32) {
    %c0_i32 = arith.constant 0 : i32
    %c0_i32_0 = arith.constant 0 : i32
    %c0_i32_1 = arith.constant 0 : i32
    return %arg0, %c0_i32, %c0_i32_0 : i32, i32, i32
  }
}

</mosaic_0001>

<bundles_post_ra>
// kernel: tpu_custom_call.1
= control target key start
LH: loop header
LB: loop body
LE: loop exit
PB: predicated region body
PF: predicated region fallthrough
CT: control target
= control target key end

     0   :  { %s14293_s27 = smov 0   ;;  %s20469_s0 = inlined_call_operand.vmem [shape: f32[2,360,4], index: 0, kind: input, shape index: {}]   ;;  %s20470_s1 = inlined_call_operand.vmem [shape: f32[2,1,32], index: 1, kind: input, shape index: {}]   ;;  %s20471_s2 = inlined_call_operand.vmem [shape: f32[1,4], index: 2, kind: input, shape index: {}]   ;;  %s20472_s3 = inlined_call_operand.vmem [shape: f32[1,4], index: 3, kind: input, shape index: {}]   ;;  %s20473_s4 = inlined_call_operand.vmem [shape: f32[4,2], index: 4, kind: input, shape index: {}]   ;;  %s20474_s5 = inlined_call_operand.vmem [shape: f32[2,4], index: 5, kind: input, shape index: {}]   ;;  %s20475_s6 = inlined_call_operand.vmem [shape: bf16[9,4,8], index: 6, kind: input, shape index: {}]   ;;  %s20476_s7 = inlined_call_operand.vmem [shape: f32[1,8], index: 7, kind: input, shape index: {}]   ;;  %s20477_s8 = inlined_call_operand.vmem [shape: f32[32,8], index: 8, kind: input, shape index: {}]   ;;  %s20478_s9 = inlined_call_operand.vmem [shape: f32[1,8], index: 9, kind: input, shape index: {}]   ;;  %s20479_s10 = inlined_call_operand.vmem [shape: f32[1,8], index: 10, kind: input, shape index: {}]   ;;  %s20480_s11 = inlined_call_operand.vmem [shape: f32[1,8], index: 11, kind: input, shape index: {}]   ;;  %s20481_s12 = inlined_call_operand.vmem [shape: f32[8,2], index: 12, kind: input, shape index: {}]   ;;  %s20482_s13 = inlined_call_operand.vmem [shape: f32[2,8], index: 13, kind: input, shape index: {}]   ;;  %s20483_s14 = inlined_call_operand.vmem [shape: bf16[9,8,8], index: 14, kind: input, shape index: {}]   ;;  %s20484_s15 = inlined_call_operand.vmem [shape: f32[1,8], index: 15, kind: input, shape index: {}]   ;;  %s20485_s16 = inlined_call_operand.vmem [shape: bf16[4,8], index: 16, kind: input, shape index: {}]   ;;  %s20486_s17 = inlined_call_operand.vmem [shape: f32[1,8], index: 17, kind: input, shape index: {}]   ;;  %s20487_s18 = inlined_call_operand.vmem [shape: f32[2,288,8], index: 18, kind: output, shape index: {}]  }
   0x1   :  { %20749 = sst [smem:[#allocation140_spill]] %s20469_s0 }
   0x2   :  { %20750 = sst [smem:[#allocation141_spill]] %s20470_s1 }
   0x3   :  { %20751 = sst [smem:[#allocation142_spill]] %s20471_s2 }
   0x4 LB: > { %s10931_s28 = sadd.s32 4294967295, %s14191_s27   ;;  %p10935_p0 = scmp.ge.s32.totalorder %s14191_s27, 1  ;;  %s14191_s27 = sphi %s14293_s27, %s28_s27  }
   0x5   : > { %p520_p1 = scmp.lt.s32.totalorder %s14191_s27, 3 }
   0x7   : > { %p521_p2 = pnand %p10935_p0, %p520_p1 }
   0x9   : > { %524 = sbr.rel (%p521_p2) target bundleno = 3466 (0xd8a), region = 92 }
  0x10   : > { %p577_p3 = scmp.lt.s32.totalorder %s10931_s28, 1  ;;  %vm20533_vm0 = vcmask 27648   ;;  %v20494_v0 = vmov 0.0|0.0   ;;  %vm20534_vm1 = vcmask 27650   ;;  %vm20525_vm2 = vcmask 60416   ;;  %s20752_s19 = sld [smem:[#allocation140_spill]] }
  0x11   : > { %12953 = vmatprep.subr.bf16.mxu1 %v20494_v0  ;;  %vm20532_vm3 = vcmask 25600   ;;  %v20488_v1 = vmov 0   ;;  %vm20528_vm4 = vmmov 0   ;;  %v20490_v2 = vmov 0.0   ;;  %s20904_s25 = sld [smem:[#allocation142_spill]] }
  0x12   : > { %s22085_s28 = smov (!%p577_p3, %s10931_s28), 1  ;;  %2043 = vst.msk [vmem:[#allocation2 + $0xa0] sm:$0xc] %vm20534_vm1, %v20488_v1  ;;  %12112 = vmatprep.mubr.msk.f32.mxu1 %vm20528_vm4, %v20490_v2  ;;  %v20499_v3 = vmov 1.0   ;;  %vm20530_vm5 = vcmask 261120   ;;  %vm20526_vm6 = vcmask 1043456  }
  0x13   : > { %2038 = vst.msk [vmem:[#allocation2 + $0x8] sm:$0xf] %vm20533_vm0, %v20488_v1  ;;  %2039 = vst.msk [vmem:[#allocation2 + $0xc] sm:$0xf] %vm20533_vm0, %v20488_v1  ;;  %1060 = vmatprep.mubr.f32.mxu0 %v20499_v3  ;;  %s13782_s29 = smul.u32 360, %s22085_s28  ;;  %vm20531_vm7 = vcmask 31744  }
  0x14   : > { %2044 = vst.msk [vmem:[#allocation2 + $0xa4] sm:$0xf] %vm20533_vm0, %v20488_v1  ;;  %2045 = vst.msk [vmem:[#allocation2 + $0xa8] sm:$0xf] %vm20533_vm0, %v20488_v1  ;;  %vm20535_vm8 = vcmask 1041408   ;;  %vm20527_vm9 = vcmask 15360  }
  0x15   : > { %6889 = vst.msk [vmem:[#allocation3 + $0x8] sm:$0xf] %vm20525_vm2, %v20488_v1  ;;  %6890 = vst.msk [vmem:[#allocation3 + $0xc] sm:$0xf] %vm20525_vm2, %v20488_v1 }
  0x16   : > { %6895 = vst.msk [vmem:[#allocation3 + $0xa4] sm:$0xf] %vm20525_vm2, %v20488_v1  ;;  %6896 = vst.msk [vmem:[#allocation3 + $0xa8] sm:$0xf] %vm20525_vm2, %v20488_v1  ;;  %s14331_s1 = scalar_lea.vmem %s20752_s19, %s13782_s29  ;;  %s21490_s19 = sld [smem:[#allocation141_spill]] }
  0x17   : > { %2041 = vst.msk [vmem:[#allocation2 + $0x10] sm:$0x3] %vm20532_vm3, %v20488_v1  ;;  %v14334_v4 = vld [vmem:[%s14331_s1 + $0xa4] sm:$0xff]  ;;  %v14337_v5 = vld [vmem:[%s14331_s1 + $0xac] sm:$0xff]  ;;  %v14368_v13 = vld [vmem:[%s14331_s1 + $0xb4] sm:$0xff]  ;;  %s13783_s29 = smul.u32 288, %s22085_s28 }
  0x18   : > { %v14340_v6 = vld [vmem:[%s14331_s1 + $0x124] sm:$0xff]  ;;  %v14344_v7 = vpack.c.bf16 %v14337_v5, %v14334_v4  ;;  %v14347_v8 = vld [vmem:[%s14331_s1 + $0x12c] sm:$0xff]  ;;  %v14371_v14 = vld [vmem:[%s14331_s1 + $0xbc] sm:$0xff]  ;;  %v1152_v22 = vmul.f32 %v14334_v4, %v14334_v4  ;;  %v1153_v23 = vmul.f32 %v14337_v5, %v14337_v5  ;;  %v1154_v34 = vmul.f32 %v14368_v13, %v14368_v13 }
  0x19   : > { %20753 = vst [vmem:[#allocation4_spill] sm:$0xff] %v14340_v6  ;;  %20755 = vst [vmem:[#allocation6_spill] sm:$0xff] %v14347_v8  ;;  %v14350_v9 = vld [vmem:[%s14331_s1 + $0x24] sm:$0xff]  ;;  %v14355_v10 = vpack.c.bf16 %v14347_v8, %v14340_v6  ;;  %v14358_v11 = vld [vmem:[%s14331_s1 + $0x2c] sm:$0xff]  ;;  %v14381_v17 = vpack.c.bf16 %v14371_v14, %v14368_v13  ;;  %v1155_v37 = vmul.f32 %v14371_v14, %v14371_v14 }
  0x1a   : > { %20754 = vst [vmem:[#allocation5_spill] sm:$0xff] %v14344_v7  ;;  %12922 = vmatprep.subr.bf16.mxu0 %v14344_v7  ;;  %v14363_v12 = vpack.c.bf16 %v14358_v11, %v14350_v9  ;;  %v14374_v15 = vld [vmem:[%s14331_s1 + $0x134] sm:$0xff]  ;;  %v14377_v16 = vld [vmem:[%s14331_s1 + $0x13c] sm:$0xff]  ;;  %v1136_v24 = vmul.f32 %v14350_v9, %v14350_v9  ;;  %v1137_v25 = vmul.f32 %v14358_v11, %v14358_v11  ;;  %v14412_v27 = vld [vmem:[%s14331_s1 + $0xc4] sm:$0xff] }
  0x1b   : > { %20756 = vst [vmem:[#allocation7_spill] sm:$0xff] %v14355_v10  ;;  %12955 = vmatpush3.bf16.msra.mxu1 %v14355_v10  ;;  %20758 = vst [vmem:[#allocation9_spill] sm:$0xff] %v14374_v15  ;;  %v14385_v18 = vpack.c.bf16 %v14377_v16, %v14374_v15  ;;  %v14389_v19 = vld [vmem:[%s14331_s1 + $0x34] sm:$0xff]  ;;  %v14392_v20 = vld [vmem:[%s14331_s1 + $0x3c] sm:$0xff]  ;;  %v12959_v26 = vpack.c.bf16 %v1153_v23, %v1152_v22  ;;  %v12963_v40 = vpack.c.bf16 %v1155_v37, %v1154_v34  ;;  %v20782_v10 = vmov 0.0  }
  0x1c   : > { %20757 = vst [vmem:[#allocation8_spill] sm:$0xff] %v14363_v12  ;;  %12956 = vmatprep.subr.bf16.mxu1 %v20494_v0  ;;  %12924 = vmatpush3.bf16.msra.mxu0 %v14363_v12  ;;  %20759 = vst [vmem:[#allocation10_spill] sm:$0xff] %v14377_v16  ;;  %v14397_v21 = vpack.c.bf16 %v14392_v20, %v14389_v19  ;;  %v14415_v28 = vld [vmem:[%s14331_s1 + $0xcc] sm:$0xff]  ;;  %v14418_v29 = vld [vmem:[%s14331_s1 + $0x44] sm:$0xff]  ;;  %v12961_v32 = vpack.c.bf16 %v1137_v25, %v1136_v24 }
  0x1d   : > { %20760 = vst [vmem:[#allocation11_spill] sm:$0xff] %v14381_v17  ;;  %20761 = vst [vmem:[#allocation12_spill] sm:$0xff] %v14385_v18  ;;  %12926 = vmatprep.subr.bf16.mxu0 %v14381_v17  ;;  %v14421_v30 = vld [vmem:[%s14331_s1 + $0x4c] sm:$0xff]  ;;  %v14425_v31 = vpack.c.bf16 %v14415_v28, %v14412_v27  ;;  %v1138_v35 = vmul.f32 %v14389_v19, %v14389_v19  ;;  %v1139_v36 = vmul.f32 %v14392_v20, %v14392_v20  ;;  %v14442_v38 = vld [vmem:[%s14331_s1 + $0xd4] sm:$0xff] }
  0x1e   : > { %20762 = vst [vmem:[#allocation13_spill] sm:$0xff] %v14397_v21  ;;  %v14430_v33 = vpack.c.bf16 %v14421_v30, %v14418_v29  ;;  %v14445_v39 = vld [vmem:[%s14331_s1 + $0xdc] sm:$0xff]  ;;  %v14448_v41 = vld [vmem:[%s14331_s1 + $0x54] sm:$0xff]  ;;  %v1156_v46 = vmul.f32 %v14412_v27, %v14412_v27  ;;  %v1157_v47 = vmul.f32 %v14415_v28, %v14415_v28  ;;  %v1140_v48 = vmul.f32 %v14418_v29, %v14418_v29  ;;  %v14472_v50 = vld [vmem:[%s14331_s1 + $0xe4] sm:$0xff] }
  0x1f   : > { %12958 = vmatpush3.bf16.msra.mxu1 %v14385_v18  ;;  %20763 = vst [vmem:[#allocation14_spill] sm:$0xff] %v14425_v31  ;;  %v14451_v42 = vld [vmem:[%s14331_s1 + $0x5c] sm:$0xff]  ;;  %v14455_v43 = vpack.c.bf16 %v14445_v39, %v14442_v38  ;;  %v12965_v44 = vpack.c.bf16 %v1139_v36, %v1138_v35  ;;  %v1141_v49 = vmul.f32 %v14421_v30, %v14421_v30  ;;  %v14475_v51 = vld [vmem:[%s14331_s1 + $0xec] sm:$0xff]  ;;  %v14483_v55 = vld [vmem:[%s14331_s1 + $0x64] sm:$0xff] }
  0x20   : > { %12928 = vmatpush3.bf16.msra.mxu0 %v14397_v21  ;;  %12960 = vmatprep.subr.bf16.mxu1 %v12959_v26  ;;  %20764 = vst [vmem:[#allocation15_spill] sm:$0xff] %v14430_v33  ;;  %v14460_v45 = vpack.c.bf16 %v14451_v42, %v14448_v41  ;;  %20767 = vst [vmem:[#allocation18_spill] sm:$0xff] %v14475_v51  ;;  %v12967_v52 = vpack.c.bf16 %v1157_v47, %v1156_v46  ;;  %v14486_v56 = vld [vmem:[%s14331_s1 + $0x6c] sm:$0xff]  ;;  %v14493_v58 = vld [vmem:[%s14331_s1 + $0xf4] sm:$0xff] }
  0x21   : > { %12930 = vmatprep.subr.bf16.mxu0 %v14425_v31  ;;  %20765 = vst [vmem:[#allocation16_spill] sm:$0xff] %v14455_v43  ;;  %v14479_v53 = vpack.c.bf16 %v14475_v51, %v14472_v50  ;;  %v12969_v54 = vpack.c.bf16 %v1141_v49, %v1140_v48  ;;  %v14490_v57 = vpack.c.bf16 %v14486_v56, %v14483_v55  ;;  %20770 = vst [vmem:[#allocation21_spill] sm:$0xff] %v14493_v58  ;;  %v14496_v59 = vld [vmem:[%s14331_s1 + $0xfc] sm:$0xff]  ;;  %v14513_v24 = vld [vmem:[%s14331_s1 + $0x74] sm:$0xff] }
  0x22   : > { %12113 = vmatmul.mubr.msk.f32.vlgmr.msra.gmra.mrb[0].mxu1 %vm20530_vm5, %v20499_v3  ;;  %20766 = vst [vmem:[#allocation17_spill] sm:$0xff] %v14460_v45  ;;  %20771 = vst [vmem:[#allocation22_spill] sm:$0xff] %v14496_v59  ;;  %v1158_v60 = vmul.f32 %v14442_v38, %v14442_v38  ;;  %v1159_v61 = vmul.f32 %v14445_v39, %v14445_v39  ;;  %v1142_v62 = vmul.f32 %v14448_v41, %v14448_v41  ;;  %v14516_v25 = vld [vmem:[%s14331_s1 + $0x7c] sm:$0xff]  ;;  %v14542_v48 = vld [vmem:[%s14331_s1 + $0x84] sm:$0xff] }
  0x23   : > { %1236 = vmatprep.mubr.f32.mxu1 %v20499_v3  ;;  %12962 = vmatpush3.bf16.msra.mxu1 %v12961_v32  ;;  %20768 = vst [vmem:[#allocation19_spill] sm:$0xff] %v14479_v53  ;;  %20769 = vst [vmem:[#allocation20_spill] sm:$0xff] %v14490_v57  ;;  %v1143_v63 = vmul.f32 %v14451_v42, %v14451_v42  ;;  %v14509_v23 = vpack.c.bf16 %v14496_v59, %v14493_v58  ;;  %v14545_v49 = vld [vmem:[%s14331_s1 + $0x8c] sm:$0xff] }
  0x24   : > { %12932 = vmatpush3.bf16.msra.mxu0 %v14430_v33  ;;  %12964 = vmatprep.subr.bf16.mxu1 %v12963_v40  ;;  %v12971_v22 = vpack.c.bf16 %v1159_v61, %v1158_v60  ;;  %v14520_v32 = vpack.c.bf16 %v14516_v25, %v14513_v24  ;;  %v1160_v34 = vmul.f32 %v14472_v50, %v14472_v50  ;;  %v14532_v40 = vld [vmem:[%s14331_s1 + $0x104] sm:$0xff]  ;;  %v14553_v60 = vld [vmem:[%s14331_s1 + $0x114] sm:$0xff]  ;;  %v14556_v61 = vld [vmem:[%s14331_s1 + $0x11c] sm:$0xff] }
  0x25   : > { %12934 = vmatprep.subr.bf16.mxu0 %v14455_v43  ;;  %20772 = vst [vmem:[#allocation23_spill] sm:$0xff] %v14509_v23  ;;  %v12973_v26 = vpack.c.bf16 %v1143_v63, %v1142_v62  ;;  %v1161_v35 = vmul.f32 %v14475_v51, %v14475_v51  ;;  %v1144_v36 = vmul.f32 %v14483_v55, %v14483_v55  ;;  %20774 = vst [vmem:[#allocation25_spill] sm:$0xff] %v14532_v40 }
  0x26   : > { %20773 = vst [vmem:[#allocation24_spill] sm:$0xff] %v14520_v32  ;;  %v1145_v37 = vmul.f32 %v14486_v56, %v14486_v56  ;;  %20778 = vst [vmem:[#allocation29_spill] sm:$0xff] %v14553_v60  ;;  %v1162_v62 = vmul.f32 %v14493_v58, %v14493_v58  ;;  %v1146_v63 = vmul.f32 %v14513_v24, %v14513_v24 }
  0x27   : > { %12966 = vmatpush3.bf16.msra.mxu1 %v12965_v44  ;;  %v14535_v44 = vld [vmem:[%s14331_s1 + $0x10c] sm:$0xff]  ;;  %v12975_v46 = vpack.c.bf16 %v1161_v35, %v1160_v34  ;;  %20779 = vst [vmem:[#allocation30_spill] sm:$0xff] %v14556_v61  ;;  %v14569_v34 = vpack.c.bf16 %v14556_v61, %v14553_v60  ;;  %v1148_v1 = vmul.f32 %v14542_v48, %v14542_v48 }
  0x28   : > { %12936 = vmatpush3.bf16.msra.mxu0 %v14460_v45  ;;  %12968 = vmatprep.subr.bf16.mxu1 %v12967_v52  ;;  %20775 = vst [vmem:[#allocation26_spill] sm:$0xff] %v14535_v44  ;;  %v14539_v47 = vpack.c.bf16 %v14535_v44, %v14532_v40  ;;  %v12977_v52 = vpack.c.bf16 %v1145_v37, %v1144_v36  ;;  %v14573_v36 = vld [vmem:[%s14331_s1 + $0x94] sm:$0xff]  ;;  %v14576_v37 = vld [vmem:[%s14331_s1 + $0x9c] sm:$0xff]  ;;  %s584_s1 = scalar_lea.vmem %s21490_s19, %s22085_s28  ;;  %s20293_s28 = scalar_lea.vmem %s20487_s18, %s13783_s29 }
  0x29   : > { %12938 = vmatprep.subr.bf16.mxu0 %v14479_v53  ;;  %20780 = vst [vmem:[#allocation31_spill] sm:$0xff] %v14569_v34  ;;  %v1149_v2 = vmul.f32 %v14545_v49, %v14545_v49  ;;  %v1167_v53 = vmul.f32 %v14556_v61, %v14556_v61 }
  0x2a   : > { %20776 = vst [vmem:[#allocation27_spill] sm:$0xff] %v14539_v47 }
  0x2b   : > { %12970 = vmatpush3.bf16.msra.mxu1 %v12969_v54  ;;  %v14550_v54 = vpack.c.bf16 %v14545_v49, %v14542_v48  ;;  %v12985_v18 = vpack.c.bf16 %v1149_v2, %v1148_v1  ;;  %v20783_v1 = vmov 0.0|0.0  }
  0x2c   : > { %12940 = vmatpush3.bf16.msra.mxu0 %v14490_v57  ;;  %12972 = vmatprep.subr.bf16.mxu1 %v12971_v22  ;;  %v1147_v22 = vmul.f32 %v14516_v25, %v14516_v25 }
  0x2d   : > { %12942 = vmatprep.subr.bf16.mxu0 %v14509_v23  ;;  %20777 = vst [vmem:[#allocation28_spill] sm:$0xff] %v14550_v54 }
  0x2f   : > { %12974 = vmatpush3.bf16.msra.mxu1 %v12973_v26  ;;  %v1163_v26 = vmul.f32 %v14496_v59, %v14496_v59 }
  0x30   : > { %12944 = vmatpush3.bf16.msra.mxu0 %v14520_v32  ;;  %12976 = vmatprep.subr.bf16.mxu1 %v12975_v46  ;;  %v12981_v46 = vpack.c.bf16 %v1147_v22, %v1146_v63  ;;  %v1169_v63 = vmul.f32 %v14347_v8, %v14347_v8  ;;  %v1164_v22 = vmul.f32 %v14532_v40, %v14532_v40 }
  0x31   : > { %12946 = vmatprep.subr.bf16.mxu0 %v14539_v47  ;;  %v12979_v35 = vpack.c.bf16 %v1163_v26, %v1162_v62  ;;  %v1168_v62 = vmul.f32 %v14340_v6, %v14340_v6  ;;  %v1165_v26 = vmul.f32 %v14535_v44, %v14535_v44 }
  0x33   : > { %12978 = vmatpush3.bf16.msra.mxu1 %v12977_v52  ;;  %v14580_v52 = vpack.c.bf16 %v14576_v37, %v14573_v36  ;;  %v12983_v47 = vpack.c.bf16 %v1165_v26, %v1164_v22  ;;  %v12992_v23 = vpack.c.bf16 %v1169_v63, %v1168_v62  ;;  %v20784_v62 = vmov 1.0  }
  0x34   : > { %12948 = vmatpush3.bf16.msra.mxu0 %v14550_v54  ;;  %12980 = vmatprep.subr.bf16.mxu1 %v12979_v35  ;;  %v1170_v35 = vmul.f32 %v14374_v15, %v14374_v15 }
  0x35   : > { %12950 = vmatprep.subr.bf16.mxu0 %v14569_v34  ;;  %20781 = vst [vmem:[#allocation32_spill] sm:$0xff] %v14580_v52  ;;  %v1151_v34 = vmul.f32 %v14576_v37, %v14576_v37 }
  0x37   : > { %12982 = vmatpush3.bf16.msra.mxu1 %v12981_v46  ;;  %v1171_v46 = vmul.f32 %v14377_v16, %v14377_v16 }
  0x38   : > { %12952 = vmatpush3.bf16.msra.mxu0 %v14580_v52  ;;  %12984 = vmatprep.subr.bf16.mxu1 %v12983_v47 }
  0x39   : > { %12991 = vmatprep.subr.bf16.mxu0 %v20494_v0  ;;  %v1150_v0 = vmul.f32 %v14573_v36, %v14573_v36  ;;  %v12995_v2 = vpack.c.bf16 %v1171_v46, %v1170_v35  ;;  %v991_v46 = vld [vmem:[%s20474_s5] sm:$0x3] }
  0x3b   : > { %1061 = vmatmul.mubr.f32.vlgmr.msra.gmra.mrb[0].mxu0 %v20499_v3  ;;  %v1166_v3 = vmul.f32 %v14553_v60, %v14553_v60  ;;  %12986 = vmatpush3.bf16.msra.mxu1 %v12985_v18  ;;  %v12989_v43 = vpack.c.bf16 %v1151_v34, %v1150_v0  ;;  %v990_v0 = vld [vmem:[%s20473_s4] sm:$0xf] }
  0x3c   : > { %12123 = vmatprep.mubr.msk.f32.mxu0 %vm20528_vm4, %v20782_v10  ;;  %12993 = vmatpush3.bf16.msra.mxu0 %v12992_v23 }
  0x3d   : > { %12994 = vmatprep.subr.bf16.mxu0 %v20783_v1  ;;  %v12987_v31 = vpack.c.bf16 %v1167_v53, %v1166_v3 }
  0x3f   : > { %12988 = vmatprep.subr.bf16.mxu1 %v12987_v31 }
  0x40   : > { %12996 = vmatpush3.bf16.msra.mxu0 %v12995_v2  ;;  %12990 = vmatpush3.bf16.msra.mxu1 %v12989_v43 }
  0x41   : > { %12126 = vmatprep.subr.mxu0 %v20782_v10  ;;  %12131 = vmatprep.subr.mxu1 %v20782_v10 }
  0x43   : > { %12124 = vmatmul.mubr.msk.f32.vlgmr.msra.gmra.mrb[2].mxu0 %vm20530_vm5, %v20784_v62  ;;  %1237 = vmatmul.mubr.f32.vlgmr.msra.gmra.mrb[2].mxu1 %v20784_v62 }
  0x44   : > { %12128 = vmatprep.mubr.msk.f32.mxu0 %vm20528_vm4, %v20782_v10  ;;  %12133 = vmatprep.mubr.msk.f32.mxu1 %vm20528_vm4, %v20782_v10 }
  0x45   : > { %12127 = vmatpush3.msk.msra.mxu0 %vm20526_vm6, %v990_v0  ;;  %12132 = vmatpush3.msk.msra.mxu1 %vm20526_vm6, %v990_v0 }
  0x46   : > { %12136 = vmatprep.subr.mxu0 %v20782_v10  ;;  %12141 = vmatprep.subr.mxu1 %v20782_v10 }
  0xf5   : > { %v1132_v3 = vpop.f32.mrb[0].mxu1 }
  0xf6   : > { %v12114_v18 = vpop.f32.mrb[1].mxu1 }
 0x10e   : > { %v11594_v31 = vpop.f32.mrb[0].mxu0 }
 0x10f   : > { %v11595_v43 = vpop.f32.mrb[1].mxu0 }
 0x110   : > { %v11596_v53 = vadd.f32 %v11595_v43, %v11594_v31 }
 0x112   : > { %v1133_v23 = vadd.f32 %v11596_v53, %v1132_v3 }
 0x114   : > { %12129 = vmatmul.mubr.msk.f32.vlgmr.msra.gmra.mrb[4].mxu0 %vm20531_vm7, %v1133_v23 }
 0x115   : > { %12138 = vmatprep.mubr.msk.f32.mxu0 %vm20528_vm4, %v20782_v10  ;;  %12137 = vmatpush3.msk.msra.mxu0 %vm20535_vm8, %v991_v46 }
 0x116   : > { %v1308_v47 = vpop.f32.mrb[2].mxu0  ;;  %v11634_v63 = vpop.f32.mrb[2].mxu1 }
 0x117   : > { %v12125_v34 = vpop.f32.mrb[3].mxu0  ;;  %v11635_v22 = vpop.f32.mrb[3].mxu1 }
 0x118   : > { %v11636_v26 = vadd.f32 %v11635_v22, %v11634_v63 }
 0x11a   : > { %v1309_v35 = vadd.f32 %v11636_v26, %v1308_v47  ;;  %v591_v47 = vlaneseq }
 0x11c   : > { %12134 = vmatmul.mubr.msk.f32.vlgmr.msra.gmra.mrb[4].mxu1 %vm20531_vm7, %v1309_v35  ;;  %v14644_v34 = vshrl.u32 %v591_v47, 7 }
 0x11d   : > { %12143 = vmatprep.mubr.msk.f32.mxu1 %vm20528_vm4, %v20782_v10  ;;  %12142 = vmatpush3.msk.msra.mxu1 %vm20535_vm8, %v991_v46 }
 0x11e   : > { %12997 = vmatprep.subr.bf16.mxu1 %v20783_v1  ;;  %v608_v63 = vadd.s32 128, %v14644_v34  ;;  %v609_v22 = vadd.s32 136, %v14644_v34  ;;  %v624_v26 = vadd.s32 256, %v14644_v34  ;;  %v625_v35 = vadd.s32 264, %v14644_v34 }
 0x11f   : > { %v593_v46 = vadd.s32 8, %v14644_v34  ;;  %v14654_v47 = vadd.s32 152, %v14644_v34  ;;  %v14657_v7 = vadd.s32 272, %v14644_v34  ;;  %v14662_v12 = vadd.s32 280, %v14644_v34 }
 0x120   : > { %v14665_v16 = vadd.s32 16, %v14644_v34  ;;  %v14668_v15 = vadd.s32 24, %v14644_v34  ;;  %v14674_v40 = vadd.s32 160, %v14644_v34 }
 0x122   : > { %v20785_v61 = vcvt.s32.f32 %v14665_v16 }
 0x1e7   : > { %v1386_v2 = vpop.f32.mrb[4].mxu0 }
 0x1e8   : > { %v1390_v0 = vmul.f32 0.001953125, %v1386_v2  ;;  %v12130_v3 = vpop.f32.mrb[5].mxu0  ;;  %v628_v2 = vcvt.s32.f32 %v14644_v34 }
 0x1e9   : > { %v645_v3 = vcvt.s32.f32 %v609_v22  ;;  %v647_v22 = vcvt.s32.f32 %v14654_v47 }
 0x1ea   : > { %12139 = vmatmul.mubr.msk.f32.vlgmr.msra.gmra.mrb[6].mxu0 %vm20527_vm9, %v1390_v0  ;;  %v1465_v31 = vmul.f32 %v1390_v0, %v1390_v0  ;;  %v644_v0 = vcvt.s32.f32 %v608_v63 }
 0x1eb   : > { %v681_v52 = vmul.f32 0.055555556, %v645_v3 }
 0x1ec   : > { %v680_v17 = vmul.f32 0.055555556, %v644_v0 }
 0x1ef   : > { %v1460_v18 = vpop.f32.mrb[4].mxu1 }
 0x1f0   : > { %v1464_v43 = vmul.f32 0.001953125, %v1460_v18  ;;  %v12135_v53 = vpop.f32.mrb[5].mxu1  ;;  %v660_v18 = vcvt.s32.f32 %v624_v26  ;;  %v716_v26 = vfloor.f32 %v680_v17 }
 0x1f1   : > { %v610_v53 = vadd.s32 144, %v14644_v34 }
 0x1f2   : > { %v1466_v23 = vsub.f32 %v1464_v43, %v1465_v31  ;;  %v661_v31 = vcvt.s32.f32 %v625_v35  ;;  %v629_v43 = vcvt.s32.f32 %v593_v46  ;;  %v696_v54 = vmul.f32 0.055555556, %v660_v18 }
 0x1f3   : > { %v646_v45 = vcvt.s32.f32 %v610_v53  ;;  %v662_v35 = vcvt.s32.f32 %v14657_v7  ;;  %v717_v46 = vfloor.f32 %v681_v52  ;;  %v752_v47 = vmul.f32 18.0, %v716_v26 }
 0x1f4   : > { %12144 = vmatmul.mubr.msk.f32.vlgmr.msra.gmra.mrb[6].mxu1 %vm20527_vm9, %v1466_v23  ;;  %v664_v23 = vmul.f32 0.055555556, %v628_v2  ;;  %v697_v32 = vmul.f32 0.055555556, %v661_v31  ;;  %v665_v57 = vmul.f32 0.055555556, %v629_v43  ;;  %v732_v33 = vfloor.f32 %v696_v54 }
 0x1f5   : > { %12496 = vmatprep.mubr.msk.f32.mxu1 %vm20528_vm4, %v20782_v10  ;;  %v682_v1 = vmul.f32 0.055555556, %v646_v45  ;;  %v698_v17 = vmul.f32 0.055555556, %v662_v35  ;;  %v753_v8 = vmul.f32 18.0, %v717_v46  ;;  %v14677_v26 = vadd.s32 168, %v14644_v34 }
 0x1f6   : > { %v700_v63 = vfloor.f32 %v664_v23  ;;  %v733_v21 = vfloor.f32 %v697_v32  ;;  %v701_v62 = vfloor.f32 %v665_v57  ;;  %v683_v23 = vmul.f32 0.055555556, %v647_v22 }
 0x1f7   : > { %v768_v7 = vmul.f32 18.0, %v732_v33  ;;  %v663_v32 = vcvt.s32.f32 %v14662_v12  ;;  %v718_v6 = vfloor.f32 %v682_v1  ;;  %v734_v59 = vfloor.f32 %v698_v17 }
 0x1f8   : > { %v736_v53 = vmul.f32 18.0, %v700_v63  ;;  %v769_v52 = vmul.f32 18.0, %v733_v21  ;;  %v737_v54 = vmul.f32 18.0, %v701_v62  ;;  %v719_v44 = vfloor.f32 %v683_v23 }
 0x1f9   : > { %v788_v63 = vsub.f32 %v644_v0, %v752_v47  ;;  %v789_v33 = vsub.f32 %v645_v3, %v753_v8  ;;  %v804_v21 = vsub.f32 %v660_v18, %v768_v7  ;;  %v699_v1 = vmul.f32 0.055555556, %v663_v32 }
 0x1fa   : > { %v772_v60 = vsub.f32 %v628_v2, %v736_v53  ;;  %v805_v46 = vsub.f32 %v661_v31, %v769_v52  ;;  %v773_v62 = vsub.f32 %v629_v43, %v737_v54  ;;  %v754_v57 = vmul.f32 18.0, %v718_v6 }
 0x1fb   : > { %v666_v2 = vmul.f32 0.055555556, %v20785_v61  ;;  %v20786_v53 = vcvt.s32.f32 %v14668_v15  ;;  %v755_v0 = vmul.f32 18.0, %v719_v44  ;;  %v648_v47 = vcvt.s32.f32 %v14674_v40 }
 0x1fc   : > { %vm808_vm10 = vcmp.ge.f32.partialorder %v772_v60, 0.5  ;;  %v14687_v17 = vadd.s32 32, %v14644_v34  ;;  %vm824_vm11 = vcmp.ge.f32.partialorder %v788_v63, 0.5  ;;  %vm844_vm12 = vcmp.le.f32.partialorder %v772_v60, 16.5 }
 0x1fd   : > { %v667_v23 = vmul.f32 0.055555556, %v20786_v53  ;;  %v770_v8 = vmul.f32 18.0, %v734_v59  ;;  %v649_v3 = vcvt.s32.f32 %v14677_v26  ;;  %vm825_vm13 = vcmp.ge.f32.partialorder %v789_v33, 0.5  ;;  %vm14691_vm9 = vmand %vm808_vm10, %vm844_vm12 }
 0x1fe   : > { %vm860_vm14 = vcmp.le.f32.partialorder %v788_v63, 16.5  ;;  %vm861_vm15 = vcmp.le.f32.partialorder %v789_v33, 16.5  ;;  %v735_v6 = vfloor.f32 %v699_v1  ;;  %vm840_vm2 = vcmp.ge.f32.partialorder %v804_v21, 0.5 }
 0x1ff   : > { %v790_v61 = vsub.f32 %v646_v45, %v754_v57  ;;  %v702_v18 = vfloor.f32 %v666_v2  ;;  %v703_v31 = vfloor.f32 %v667_v23  ;;  %vm876_vm6 = vcmp.le.f32.partialorder %v804_v21, 16.5  ;;  %vm14699_vm4 = vmand %vm824_vm11, %vm860_vm14 }
 0x200   : > { %v791_v43 = vsub.f32 %v647_v22, %v755_v0  ;;  %v684_v59 = vmul.f32 0.055555556, %v648_v47  ;;  %v632_v7 = vcvt.s32.f32 %v14687_v17  ;;  %vm841_vm5 = vcmp.ge.f32.partialorder %v805_v46, 0.5  ;;  %vm14707_vm10 = vmand %vm825_vm13, %vm861_vm15 }
 0x201   : > { %vm877_vm7 = vcmp.le.f32.partialorder %v805_v46, 16.5  ;;  %v806_v45 = vsub.f32 %v662_v35, %v770_v8  ;;  %v685_v60 = vmul.f32 0.055555556, %v649_v3  ;;  %vm809_vm12 = vcmp.ge.f32.partialorder %v773_v62, 0.5  ;;  %vm14712_vm11 = vmand %vm840_vm2, %vm876_vm6 }
 0x202   : > { %vm845_vm3 = vcmp.le.f32.partialorder %v773_v62, 16.5  ;;  %v771_v54 = vmul.f32 18.0, %v735_v6  ;;  %vm826_vm14 = vcmp.ge.f32.partialorder %v790_v61, 0.5  ;;  %vm862_vm0 = vcmp.le.f32.partialorder %v790_v61, 16.5  ;;  %vm14716_vm1 = vmand %vm841_vm5, %vm877_vm7 }
 0x203   : > { %v738_v35 = vmul.f32 18.0, %v702_v18  ;;  %v739_v63 = vmul.f32 18.0, %v703_v31  ;;  %vm827_vm13 = vcmp.ge.f32.partialorder %v791_v43, 0.5  ;;  %vm863_vm15 = vcmp.le.f32.partialorder %v791_v43, 16.5  ;;  %vm14722_vm8 = vmand %vm809_vm12, %vm845_vm3 }
 0x204   : > { %v720_v33 = vfloor.f32 %v684_v59  ;;  %v668_v1 = vmul.f32 0.055555556, %v632_v7  ;;  %vm842_vm2 = vcmp.ge.f32.partialorder %v806_v45, 0.5  ;;  %vm878_vm6 = vcmp.le.f32.partialorder %v806_v45, 16.5  ;;  %vm898_vm3 = vmand %vm826_vm14, %vm862_vm0 }
 0x205   : > { %v721_v62 = vfloor.f32 %v685_v60  ;;  %v14729_v2 = vsel %vm14699_vm4, 1.0, %v20782_v10  ;;  %v14734_v53 = vsel %vm14707_vm10, 1.0, %v20782_v10  ;;  %v14739_v23 = vsel %vm14691_vm9, 1.0, %v20782_v10  ;;  %vm899_vm4 = vmand %vm827_vm13, %vm863_vm15 }
 0x206   : > { %20799 = vst [vmem:[#allocation33_spill] sm:$0xff] %v14729_v2  ;;  %20800 = vst [vmem:[#allocation34_spill] sm:$0xff] %v14734_v53  ;;  %v807_v0 = vsub.f32 %v663_v32, %v771_v54  ;;  %v14748_v8 = vsel %vm14712_vm11, 1.0, %v20782_v10  ;;  %v20803_v6 = vcvt.s32.f32 %v14665_v16  ;;  %v20804_v31 = vcvt.s32.f32 %v14668_v15 }
 0x207   : > { %20801 = vst [vmem:[#allocation35_spill] sm:$0xff] %v14739_v23  ;;  %20802 = vst [vmem:[#allocation36_spill] sm:$0xff] %v14748_v8  ;;  %v14755_v43 = vadd.s32 40, %v14644_v34  ;;  %v756_v61 = vmul.f32 18.0, %v720_v33  ;;  %v704_v59 = vfloor.f32 %v668_v1  ;;  %v14758_v12 = vadd.s32 176, %v14644_v34 }
 0x208   : > { %v774_v18 = vsub.f32 %v20803_v6, %v738_v35  ;;  %v775_v44 = vsub.f32 %v20804_v31, %v739_v63  ;;  %vm914_vm5 = vmand %vm842_vm2, %vm878_vm6  ;;  %v14761_v32 = vadd.s32 184, %v14644_v34  ;;  %v14766_v16 = vsel %vm14716_vm1, 1.0, %v20782_v10 }
 0x209   : > { %20805 = vst [vmem:[#allocation37_spill] sm:$0xff] %v14766_v16  ;;  %v14771_v15 = vsel %vm14722_vm8, 1.0, %v20782_v10  ;;  %v14774_v52 = vsel %vm898_vm3, 1.0, %v20782_v10  ;;  %v757_v45 = vmul.f32 18.0, %v721_v62  ;;  %v14777_v60 = vsel %vm899_vm4, 1.0, %v20782_v10 }
 0x20a   : > { %20806 = vst [vmem:[#allocation38_spill] sm:$0xff] %v14771_v15  ;;  %20807 = vst [vmem:[#allocation39_spill] sm:$0xff] %v14774_v52  ;;  %vm843_vm0 = vcmp.ge.f32.partialorder %v807_v0, 0.5  ;;  %vm879_vm7 = vcmp.le.f32.partialorder %v807_v0, 16.5  ;;  %v14780_v22 = vadd.s32 48, %v14644_v34  ;;  %v14783_v54 = vsel %vm914_vm5, 1.0, %v20782_v10 }
 0x20b   : > { %20808 = vst [vmem:[#allocation40_spill] sm:$0xff] %v14777_v60  ;;  %20809 = vst [vmem:[#allocation41_spill] sm:$0xff] %v14783_v54  ;;  %vm810_vm1 = vcmp.ge.f32.partialorder %v774_v18, 0.5  ;;  %vm811_vm9 = vcmp.ge.f32.partialorder %v775_v44, 0.5  ;;  %v20537_v57 = vcvt.s32.f32 %v14755_v43  ;;  %v792_v35 = vsub.f32 %v648_v47, %v756_v61 }
 0x20c   : > { %v740_v63 = vmul.f32 18.0, %v704_v59  ;;  %v20540_v46 = vcvt.s32.f32 %v14758_v12  ;;  %v20541_v33 = vcvt.s32.f32 %v14761_v32  ;;  %v793_v1 = vsub.f32 %v649_v3, %v757_v45  ;;  %vm915_vm11 = vmand %vm843_vm0, %vm879_vm7 }
 0x20d   : > { %v14793_v21 = vadd.s32 56, %v14644_v34  ;;  %v14796_v62 = vadd.s32 192, %v14644_v34  ;;  %v14799_v6 = vadd.s32 200, %v14644_v34  ;;  %vm846_vm8 = vcmp.le.f32.partialorder %v774_v18, 16.5 }
 0x20e   : > { %v14803_v47 = vadd.s32 64, %v14644_v34  ;;  %v14806_v31 = vadd.s32 72, %v14644_v34  ;;  %vm847_vm10 = vcmp.le.f32.partialorder %v775_v44, 16.5  ;;  %v669_v26 = vmul.f32 0.055555556, %v20537_v57  ;;  %vm14835_vm15 = vmand %vm810_vm1, %vm846_vm8 }
 0x20f   : > { %v14811_v3 = vadd.s32 208, %v14644_v34  ;;  %v14814_v61 = vadd.s32 216, %v14644_v34  ;;  %vm828_vm12 = vcmp.ge.f32.partialorder %v792_v35, 0.5  ;;  %v776_v59 = vsub.f32 %v632_v7, %v740_v63  ;;  %vm14846_vm6 = vmand %vm811_vm9, %vm847_vm10 }
 0x210   : > { %v686_v45 = vmul.f32 0.055555556, %v20540_v46  ;;  %v687_v40 = vmul.f32 0.055555556, %v20541_v33  ;;  %vm829_vm14 = vcmp.ge.f32.partialorder %v793_v1, 0.5  ;;  %vm864_vm13 = vcmp.le.f32.partialorder %v792_v35, 16.5 }
 0x211   : > { %v20810_v7 = vcvt.s32.f32 %v14780_v22  ;;  %vm865_vm2 = vcmp.le.f32.partialorder %v793_v1, 16.5  ;;  %v705_v57 = vfloor.f32 %v669_v26  ;;  %v14842_v8 = vsel %vm915_vm11, 1.0, %v20782_v10  ;;  %vm900_vm4 = vmand %vm828_vm12, %vm864_vm13 }
 0x212   : > { %20813 = vst [vmem:[#allocation42_spill] sm:$0xff] %v14842_v8  ;;  %vm812_vm3 = vcmp.ge.f32.partialorder %v776_v59, 0.5  ;;  %v722_v18 = vfloor.f32 %v686_v45  ;;  %v723_v33 = vfloor.f32 %v687_v40  ;;  %v20816_v26 = vcvt.s32.f32 %v14793_v21  ;;  %vm901_vm5 = vmand %vm829_vm14, %vm865_vm2 }
 0x213   : > { %v670_v63 = vmul.f32 0.055555556, %v20810_v7  ;;  %v20817_v16 = vcvt.s32.f32 %v14796_v62  ;;  %v20818_v60 = vcvt.s32.f32 %v14799_v6  ;;  %vm848_vm0 = vcmp.le.f32.partialorder %v776_v59, 16.5 }
 0x214   : > { %v671_v46 = vmul.f32 0.055555556, %v20816_v26  ;;  %v20819_v52 = vcvt.s32.f32 %v14803_v47  ;;  %v20820_v40 = vcvt.s32.f32 %v14806_v31  ;;  %v14865_v45 = vsel %vm14835_vm15, 1.0, %v20782_v10  ;;  %vm884_vm7 = vmand %vm812_vm3, %vm848_vm0 }
 0x215   : > { %v689_v8 = vmul.f32 0.055555556, %v20818_v60  ;;  %v706_v44 = vfloor.f32 %v670_v63  ;;  %20821 = vst [vmem:[#allocation43_spill] sm:$0xff] %v14865_v45  ;;  %v741_v26 = vmul.f32 18.0, %v705_v57  ;;  %v20823_v60 = vcvt.s32.f32 %v14814_v61 }
 0x216   : > { %v672_v53 = vmul.f32 0.055555556, %v20819_v52  ;;  %v673_v35 = vmul.f32 0.055555556, %v20820_v40  ;;  %v14874_v63 = vsel %vm14846_vm6, 1.0, %v20782_v10  ;;  %v14877_v52 = vsel %vm900_vm4, 1.0, %v20782_v10 }
 0x217   : > { %v691_v1 = vmul.f32 0.055555556, %v20823_v60  ;;  %20824 = vst [vmem:[#allocation44_spill] sm:$0xff] %v14874_v63  ;;  %20825 = vst [vmem:[#allocation45_spill] sm:$0xff] %v14877_v52  ;;  %v758_v40 = vmul.f32 18.0, %v722_v18  ;;  %v759_v15 = vmul.f32 18.0, %v723_v33  ;;  %v707_v57 = vfloor.f32 %v671_v46 }
 0x218   : > { %v14880_v0 = vsel %vm901_vm5, 1.0, %v20782_v10  ;;  %v725_v45 = vfloor.f32 %v689_v8  ;;  %v742_v23 = vmul.f32 18.0, %v706_v44  ;;  %v708_v60 = vfloor.f32 %v672_v53 }
 0x219   : > { %20826 = vst [vmem:[#allocation46_spill] sm:$0xff] %v14880_v0  ;;  %v709_v58 = vfloor.f32 %v673_v35  ;;  %v14884_v7 = vadd.s32 80, %v14644_v34  ;;  %v20828_v63 = vcvt.s32.f32 %v14755_v43  ;;  %v727_v33 = vfloor.f32 %v691_v1 }
 0x21a   : > { %v14891_v52 = vadd.s32 88, %v14644_v34  ;;  %v14894_v59 = vsel %vm884_vm7, 1.0, %v20782_v10  ;;  %v20831_v8 = vcvt.s32.f32 %v14758_v12  ;;  %v20832_v53 = vcvt.s32.f32 %v14761_v32 }
 0x21b   : > { %20827 = vst [vmem:[#allocation47_spill] sm:$0xff] %v14884_v7  ;;  %v14888_v51 = vsub.f32 %v20828_v63, %v741_v26  ;;  %20830 = vst [vmem:[#allocation49_spill] sm:$0xff] %v14894_v59  ;;  %v14905_v43 = vadd.s32 224, %v14644_v34  ;;  %v743_v44 = vmul.f32 18.0, %v707_v57  ;;  %v761_v35 = vmul.f32 18.0, %v725_v45 }
 0x21c   : > { %20829 = vst [vmem:[#allocation48_spill] sm:$0xff] %v14891_v52  ;;  %v14898_v46 = vsub.f32 %v20831_v8, %v758_v40  ;;  %v14908_v26 = vsub.s32 0, %v14644_v34  ;;  %v20835_v1 = vcvt.s32.f32 %v14780_v22  ;;  %v744_v12 = vmul.f32 18.0, %v708_v60 }
 0x21d   : > { %20833 = vst [vmem:[#allocation50_spill] sm:$0xff] %v14905_v43  ;;  %v745_v40 = vmul.f32 18.0, %v709_v58  ;;  %v14917_v0 = vadd.s32 232, %v14644_v34  ;;  %v20836_v60 = vcvt.s32.f32 %v14793_v21  ;;  %v20839_v59 = vcvt.s32.f32 %v14803_v47 }
 0x21e   : > { %20834 = vst [vmem:[#allocation51_spill] sm:$0xff] %v14908_v26  ;;  %v14912_v63 = vsub.f32 %v20835_v1, %v742_v23  ;;  %v14924_v23 = vadd.s32 104, %v14644_v34  ;;  %v20840_v21 = vcvt.s32.f32 %v14806_v31  ;;  %v20845_v47 = vcvt.s32.f32 %v14891_v52  ;;  %v20854_v31 = vld [vmem:[#allocation29_spill] sm:$0xff] }
 0x21f   : > { %vm813_vm1 = vcmp.ge.f32.partialorder %v14888_v51, 0.5  ;;  %vm849_vm9 = vcmp.le.f32.partialorder %v14888_v51, 16.5  ;;  %vm830_vm8 = vcmp.ge.f32.partialorder %v14898_v46, 0.5  ;;  %vm866_vm10 = vcmp.le.f32.partialorder %v14898_v46, 16.5 }
 0x220   : > { %vm814_vm14 = vcmp.ge.f32.partialorder %v14912_v63, 0.5  ;;  %vm850_vm13 = vcmp.le.f32.partialorder %v14912_v63, 16.5  ;;  %vm15134_vm7 = vmand %vm813_vm1, %vm849_vm9  ;;  %v20872_v46 = vcvt.s32.f32 %v14917_v0 }
 0x221   : > { %vm15150_vm0 = vmand %vm830_vm8, %vm866_vm10 }
 0x222   : > { %vm15181_vm9 = vmand %vm814_vm14, %vm850_vm13 }
 0x2bd   : > { %v14822_v54 = vpop.f32.mrb[6].mxu0 }
 0x2be   : > { %v12140_v17 = vpop.f32.mrb[7].mxu0  ;;  %v14940_v45 = vrot.slane %v14822_v54, %v14908_v26  ;;  %v20843_v54 = vcvt.s32.f32 %v14814_v61  ;;  %v14977_v61 = vadd.s32 248, %v14644_v34 }
 0x2bf   : > { %v688_v17 = vmul.f32 0.055555556, %v20817_v16  ;;  %v20822_v16 = vcvt.s32.f32 %v14811_v3 }
 0x2c1   : > { %v690_v2 = vmul.f32 0.055555556, %v20822_v16  ;;  %v724_v16 = vfloor.f32 %v688_v17  ;;  %v14902_v17 = vsub.f32 %v20832_v53, %v759_v15  ;;  %v763_v15 = vmul.f32 18.0, %v727_v33 }
 0x2c2   : > { %v20837_v33 = vcvt.s32.f32 %v14796_v62  ;;  %v20838_v53 = vcvt.s32.f32 %v14799_v6  ;;  %v20841_v62 = vcvt.s32.f32 %v14884_v7  ;;  %v20842_v6 = vcvt.s32.f32 %v14811_v3  ;;  %v20852_v3 = vld [vmem:[#allocation25_spill] sm:$0xff]  ;;  %v20857_v7 = vld [vmem:[#allocation6_spill] sm:$0xff] }
 0x2c3   : > { %v726_v18 = vfloor.f32 %v690_v2  ;;  %v760_v2 = vmul.f32 18.0, %v724_v16  ;;  %v14921_v16 = vadd.s32 96, %v14644_v34  ;;  %vm831_vm12 = vcmp.ge.f32.partialorder %v14902_v17, 0.5 }
 0x2c4   : > { %v14936_v8 = vsub.f32 %v20838_v53, %v761_v35  ;;  %v14960_v53 = vsub.f32 %v20843_v54, %v763_v15  ;;  %v14980_v15 = vadd.s32 112, %v14644_v34  ;;  %v1554_v54 = vsub.f32 %v14421_v30, %v14940_v45 }
 0x2c5   : > { %v762_v32 = vmul.f32 18.0, %v726_v18  ;;  %v14928_v18 = vsub.f32 %v20836_v60, %v743_v44  ;;  %v14932_v1 = vsub.f32 %v20837_v33, %v760_v2  ;;  %v14948_v44 = vsub.f32 %v20840_v21, %v745_v40 }
 0x2c6   : > { %v14952_v2 = vmul.f32 0.055555556, %v20841_v62  ;;  %20844 = vst [vmem:[#allocation52_spill] sm:$0xff] %v14960_v53  ;;  %v1549_v60 = vsub.f32 %v14350_v9, %v14940_v45  ;;  %v1550_v33 = vsub.f32 %v14358_v11, %v14940_v45  ;;  %v1551_v21 = vsub.f32 %v14389_v19, %v14940_v45 }
 0x2c7   : > { %v1654_v57 = vpop.f32.mrb[6].mxu1  ;;  %v14956_v35 = vsub.f32 %v20842_v6, %v762_v32  ;;  %v14974_v32 = vadd.s32 240, %v14644_v34  ;;  %v1552_v62 = vsub.f32 %v14392_v20, %v14940_v45  ;;  %v1553_v6 = vsub.f32 %v14418_v29, %v14940_v45 }
 0x2c8   : > { %v1655_v22 = vadd.f32 1e-05, %v1654_v57  ;;  %v12145_v58 = vpop.f32.mrb[7].mxu1  ;;  %v14944_v57 = vsub.f32 %v20839_v59, %v744_v12  ;;  %v14964_v59 = vmul.f32 0.055555556, %v20845_v47  ;;  %v20846_v12 = vcvt.s32.f32 %v14905_v43  ;;  %v20850_v47 = vld [vmem:[#allocation21_spill] sm:$0xff] }
 0x2c9   : > { %v14983_v58 = vadd.s32 120, %v14644_v34  ;;  %v1555_v34 = vsub.f32 %v14448_v41, %v14940_v45  ;;  %v1556_v9 = vsub.f32 %v14451_v42, %v14940_v45  ;;  %v1557_v11 = vsub.f32 %v14483_v55, %v14940_v45 }
 0x2ca   : > { %13891 = vrsqrt.f32 %v1655_v22  ;;  %v14969_v40 = vmul.f32 0.055555556, %v20846_v12  ;;  %v1558_v19 = vsub.f32 %v14486_v56, %v14940_v45  ;;  %v1559_v20 = vsub.f32 %v14513_v24, %v14940_v45  ;;  %v20851_v12 = vld [vmem:[#allocation22_spill] sm:$0xff] }
 0x2cb   : > { %20848 = vst [vmem:[#allocation54_spill] sm:$0xff] %v14983_v58  ;;  %v1560_v29 = vsub.f32 %v14516_v25, %v14940_v45  ;;  %v1561_v30 = vsub.f32 %v14542_v48, %v14940_v45  ;;  %v1562_v41 = vsub.f32 %v14545_v49, %v14940_v45  ;;  %v1563_v42 = vsub.f32 %v14573_v36, %v14940_v45 }
 0x2cc   : > { %20847 = vst [vmem:[#allocation53_spill] sm:$0xff] %v14969_v40  ;;  %v1564_v55 = vsub.f32 %v14576_v37, %v14940_v45  ;;  %v1565_v56 = vsub.f32 %v14334_v4, %v14940_v45  ;;  %v1566_v24 = vsub.f32 %v14337_v5, %v14940_v45  ;;  %v1567_v25 = vsub.f32 %v14368_v13, %v14940_v45 }
 0x2cd   : > { %v1568_v48 = vsub.f32 %v14371_v14, %v14940_v45  ;;  %v1569_v49 = vsub.f32 %v14412_v27, %v14940_v45  ;;  %v1570_v36 = vsub.f32 %v14415_v28, %v14940_v45  ;;  %v1571_v4 = vsub.f32 %v14442_v38, %v14940_v45  ;;  %v20849_v27 = vld [vmem:[#allocation18_spill] sm:$0xff] }
 0x2ce   : > { %v1572_v5 = vsub.f32 %v14445_v39, %v14940_v45  ;;  %v1573_v13 = vsub.f32 %v14472_v50, %v14940_v45  ;;  %v1574_v37 = vsub.f32 %v20849_v27, %v14940_v45  ;;  %v1575_v28 = vsub.f32 %v20850_v47, %v14940_v45  ;;  %v20853_v50 = vld [vmem:[#allocation26_spill] sm:$0xff] }
 0x2cf   : > { %v1576_v38 = vsub.f32 %v20851_v12, %v14940_v45  ;;  %v1577_v39 = vsub.f32 %v20852_v3, %v14940_v45  ;;  %vm867_vm11 = vcmp.le.f32.partialorder %v14902_v17, 16.5  ;;  %v1578_v22 = vsub.f32 %v20853_v50, %v14940_v45  ;;  %v20855_v27 = vld [vmem:[#allocation30_spill] sm:$0xff]  ;;  %v20856_v3 = vld [vmem:[#allocation4_spill] sm:$0xff]  ;;  %v20858_v50 = vld [vmem:[#allocation9_spill] sm:$0xff] }
 0x2d0   : > { %v1579_v43 = vsub.f32 %v20854_v31, %v14940_v45  ;;  %v1580_v52 = vsub.f32 %v20855_v27, %v14940_v45  ;;  %v1581_v12 = vsub.f32 %v20856_v3, %v14940_v45  ;;  %v1582_v10 = vsub.f32 %v20857_v7, %v14940_v45  ;;  %v20859_v31 = vld [vmem:[#allocation10_spill] sm:$0xff]  ;;  %vm15166_vm1 = vmand %vm831_vm12, %vm867_vm11 }
 0x2d1   : > { %v1583_v40 = vsub.f32 %v20858_v50, %v14940_v45  ;;  %v1584_v53 = vsub.f32 %v20859_v31, %v14940_v45  ;;  %vm815_vm15 = vcmp.ge.f32.partialorder %v14928_v18, 0.5  ;;  %vm851_vm2 = vcmp.le.f32.partialorder %v14928_v18, 16.5  ;;  %v20881_v18 = vld [vmem:[#allocation52_spill] sm:$0xff] }
 0x2d2   : > { %vm832_vm6 = vcmp.ge.f32.partialorder %v14932_v1, 0.5  ;;  %vm868_vm3 = vcmp.le.f32.partialorder %v14932_v1, 16.5  ;;  %vm833_vm4 = vcmp.ge.f32.partialorder %v14936_v8, 0.5  ;;  %vm869_vm5 = vcmp.le.f32.partialorder %v14936_v8, 16.5  ;;  %vm15193_vm10 = vmand %vm815_vm15, %vm851_vm2 }
 0x2d3   : > { %vm852_vm8 = vcmp.le.f32.partialorder %v14944_v57, 16.5  ;;  %vm853_vm12 = vcmp.le.f32.partialorder %v14948_v44, 16.5  ;;  %v710_v63 = vfloor.f32 %v14952_v2  ;;  %vm15205_vm14 = vmand %vm832_vm6, %vm868_vm3  ;;  %vm835_vm13 = vcmp.ge.f32.partialorder %v20881_v18, 0.5  ;;  %v20912_v2 = vld [vmem:[#allocation48_spill] sm:$0xff] }
 0x2d4   : > { %v13892_v14 = vpop.eup %13891  ;;  %vm870_vm15 = vcmp.le.f32.partialorder %v14956_v35, 16.5  ;;  %vm871_vm2 = vcmp.le.f32.partialorder %v20881_v18, 16.5  ;;  %vm15217_vm11 = vmand %vm833_vm4, %vm869_vm5  ;;  %vm20885_vm6 = vcmp.ge.f32.partialorder %v14944_v57, 0.5  ;;  %v20888_v8 = vcvt.s32.f32 %v14977_v61 }
 0x2d5   : > { %v1662_v47 = vrot.slane %v13892_v14, %v14908_v26  ;;  %vm15227_vm3 = vmand %vm20885_vm6, %vm852_vm8  ;;  %vm20896_vm4 = vcmp.ge.f32.partialorder %v14948_v44, 0.5  ;;  %v746_v17 = vmul.f32 18.0, %v710_v63 }
 0x2d6   : > { %vm15261_vm5 = vmand %vm20896_vm4, %vm853_vm12 }
 0x2d7   : > { %v15068_v14 = vmul.f32 %v1662_v47, %v1549_v60  ;;  %v15070_v27 = vmul.f32 %v1662_v47, %v1550_v33  ;;  %v15072_v26 = vmul.f32 %v1662_v47, %v1551_v21  ;;  %v15074_v3 = vmul.f32 %v1662_v47, %v1552_v62 }
 0x2d8   : > { %v15078_v7 = vmul.f32 %v1662_v47, %v1553_v6  ;;  %v15080_v50 = vmul.f32 %v1662_v47, %v1554_v54  ;;  %v15082_v45 = vmul.f32 %v1662_v47, %v1555_v34  ;;  %v15084_v31 = vmul.f32 %v1662_v47, %v1556_v9 }
 0x2d9   : > { %v15088_v60 = vmul.f32 %v1662_v47, %v1557_v11  ;;  %v15090_v33 = vmul.f32 %v1662_v47, %v1558_v19  ;;  %v15092_v21 = vmul.f32 %v1662_v47, %v1559_v20  ;;  %v15094_v62 = vmul.f32 %v1662_v47, %v1560_v29 }
 0x2da   : > { %v15097_v6 = vmul.f32 %v1662_v47, %v1561_v30  ;;  %v15099_v54 = vmul.f32 %v1662_v47, %v1562_v41  ;;  %v15101_v34 = vmul.f32 %v1662_v47, %v1563_v42  ;;  %v15103_v9 = vmul.f32 %v1662_v47, %v1564_v55 }
 0x2db   : > { %20860 = vst [vmem:[#allocation18_spill] sm:$0xff] %v15094_v62  ;;  %v15106_v11 = vmul.f32 %v1662_v47, %v1565_v56  ;;  %v15108_v19 = vmul.f32 %v1662_v47, %v1566_v24  ;;  %v15110_v20 = vmul.f32 %v1662_v47, %v1567_v25  ;;  %v15112_v29 = vmul.f32 %v1662_v47, %v1568_v48 }
 0x2dc   : > { %20861 = vst [vmem:[#allocation21_spill] sm:$0xff] %v15103_v9  ;;  %v15114_v62 = vmul.f32 %v1662_v47, %v1569_v49  ;;  %v15116_v30 = vmul.f32 %v1662_v47, %v1570_v36  ;;  %v15118_v41 = vmul.f32 %v1662_v47, %v1571_v4  ;;  %v15120_v42 = vmul.f32 %v1662_v47, %v1572_v5 }
 0x2dd   : > { %v15122_v55 = vmul.f32 %v1662_v47, %v1573_v13  ;;  %v15124_v9 = vmul.f32 %v1662_v47, %v1574_v37  ;;  %v15126_v56 = vmul.f32 %v1662_v47, %v1575_v28  ;;  %v15128_v24 = vmul.f32 %v1662_v47, %v1576_v38 }
 0x2de   : > { %v15138_v48 = vmul.f32 %v1662_v47, %v1577_v39  ;;  %v15140_v49 = vmul.f32 %v1662_v47, %v1578_v22  ;;  %v15142_v36 = vmul.f32 %v1662_v47, %v1579_v43  ;;  %v15144_v4 = vmul.f32 %v1662_v47, %v1580_v52  ;;  %v15330_v52 = vld [vmem:[%s20475_s6 + $0x6] sm:$0x3] }
 0x2df   : > { %v15154_v51 = vmul.f32 %v1662_v47, %v1581_v12  ;;  %v15156_v13 = vmul.f32 %v1662_v47, %v1582_v10  ;;  %v15158_v37 = vmul.f32 %v1662_v47, %v1583_v40  ;;  %v15160_v22 = vmul.f32 %v1662_v47, %v1584_v53  ;;  %v20882_v12 = vld [vmem:[#allocation53_spill] sm:$0xff] }
 0x2e0   : > { %v693_v43 = vmul.f32 0.055555556, %v20872_v46  ;;  %v20873_v28 = vcvt.s32.f32 %v14921_v16  ;;  %v20874_v10 = vcvt.s32.f32 %v14924_v23  ;;  %v20563_v53 = vcvt.s32.f32 %v14974_v32 }
 0x2e1   : > { %20866 = vst [vmem:[#allocation22_spill] sm:$0xff] %v15154_v51  ;;  %20867 = vst [vmem:[#allocation25_spill] sm:$0xff] %v15156_v13  ;;  %v728_v47 = vfloor.f32 %v20882_v12  ;;  %v20889_v13 = vcvt.s32.f32 %v14980_v15  ;;  %v20914_v12 = vld [vmem:[#allocation50_spill] sm:$0xff] }
 0x2e2   : > { %20868 = vst [vmem:[#allocation26_spill] sm:$0xff] %v15158_v37  ;;  %20869 = vst [vmem:[#allocation29_spill] sm:$0xff] %v15160_v22  ;;  %v676_v38 = vmul.f32 0.055555556, %v20873_v28  ;;  %v677_v40 = vmul.f32 0.055555556, %v20874_v10  ;;  %v711_v28 = vfloor.f32 %v14964_v59  ;;  %v729_v1 = vfloor.f32 %v693_v43 }
 0x2e3   : > { %v694_v22 = vmul.f32 0.055555556, %v20563_v53  ;;  %v695_v37 = vmul.f32 0.055555556, %v20888_v8  ;;  %v678_v51 = vmul.f32 0.055555556, %v20889_v13  ;;  %v20890_v43 = vcvt.s32.f32 %v14983_v58 }
 0x2e4   : > { %v712_v59 = vfloor.f32 %v676_v38  ;;  %v713_v39 = vfloor.f32 %v677_v40  ;;  %v20891_v40 = vmov 0.0   ;;  %v764_v44 = vmul.f32 18.0, %v728_v47  ;;  %v15290_v47 = vld [vmem:[%s20904_s25] ss:$0 sm:$0xff] }
 0x2e5   : > { %v679_v38 = vmul.f32 0.055555556, %v20890_v43  ;;  %v15240_v53 = vsel %vm15134_vm7, 1.0, %v20891_v40  ;;  %v15245_v57 = vsel %vm15150_vm0, 1.0, %v20891_v40  ;;  %v15250_v8 = vsel %vm15166_vm1, 1.0, %v20891_v40  ;;  %vm907_vm1 = vmand %vm835_vm13, %vm871_vm2 }
 0x2e6   : > { %20892 = vst [vmem:[#allocation30_spill] sm:$0xff] %v15240_v53  ;;  %20893 = vst [vmem:[#allocation4_spill] sm:$0xff] %v15245_v57  ;;  %v15255_v13 = vsel %vm15181_vm9, 1.0, %v20891_v40  ;;  %v15268_v5 = vsel %vm15193_vm10, 1.0, %v20891_v40  ;;  %vm20900_vm0 = vcmp.ge.f32.partialorder %v14956_v35, 0.5  ;;  %v747_v43 = vmul.f32 18.0, %v711_v28 }
 0x2e7   : > { %20894 = vst [vmem:[#allocation6_spill] sm:$0xff] %v15250_v8  ;;  %20895 = vst [vmem:[#allocation9_spill] sm:$0xff] %v15255_v13  ;;  %v765_v8 = vmul.f32 18.0, %v729_v1  ;;  %v748_v46 = vmul.f32 18.0, %v712_v59  ;;  %v749_v57 = vmul.f32 18.0, %v713_v39  ;;  %v15285_v35 = vsel %vm15205_vm14, 1.0, %v20891_v40 }
 0x2e8   : > { %20899 = vst [vmem:[#allocation10_spill] sm:$0xff] %v15268_v5  ;;  %vm15274_vm7 = vmand %vm20900_vm0, %vm870_vm15  ;;  %v730_v5 = vfloor.f32 %v694_v22  ;;  %v731_v13 = vfloor.f32 %v695_v37  ;;  %v714_v53 = vfloor.f32 %v678_v51  ;;  %v715_v58 = vfloor.f32 %v679_v38  ;;  %v20910_v28 = vld [vmem:[#allocation47_spill] sm:$0xff] }
 0x2e9   : > { %20903 = vst [vmem:[#allocation52_spill] sm:$0xff] %v15285_v35  ;;  %v15295_v63 = vsel %vm15217_vm11, 1.0, %v20891_v40  ;;  %v15300_v22 = vsel %vm15227_vm3, 1.0, %v20891_v40  ;;  %v15305_v51 = vsel %vm15261_vm5, 1.0, %v20891_v40  ;;  %v15310_v37 = vsel %vm15274_vm7, 1.0, %v20891_v40 }
 0x2ea   : > { %20905 = vst [vmem:[#allocation53_spill] sm:$0xff] %v15295_v63  ;;  %20906 = vst [vmem:[#allocation55_spill] sm:$0xff] %v15300_v22  ;;  %v15313_v39 = vsel %vm907_vm1, 1.0, %v20891_v40  ;;  %v20911_v10 = vcvt.s32.f32 %v20910_v28  ;;  %v20913_v1 = vcvt.s32.f32 %v20912_v2  ;;  %v20915_v38 = vcvt.s32.f32 %v20914_v12 }
 0x2eb   : > { %20907 = vst [vmem:[#allocation56_spill] sm:$0xff] %v15305_v51  ;;  %20908 = vst [vmem:[#allocation57_spill] sm:$0xff] %v15310_v37  ;;  %v20916_v37 = vcvt.s32.f32 %v14917_v0  ;;  %v15344_v2 = vmul.f32 18.0, %v730_v5  ;;  %vm20919_vm9 = vcmask 1041408   ;;  %v15352_v0 = vmul.f32 18.0, %v715_v58 }
 0x2ec   : > { %20909 = vst [vmem:[#allocation58_spill] sm:$0xff] %v15313_v39  ;;  %v15317_v18 = vsub.f32 %v20911_v10, %v746_v17  ;;  %v15321_v59 = vsub.f32 %v20913_v1, %v747_v43  ;;  %v15325_v25 = vsub.f32 %v20915_v38, %v764_v44  ;;  %v20917_v17 = vcvt.s32.f32 %v14921_v16  ;;  %13763 = vmatprep.subr.msk.bf16.mxu0 %vm20919_vm9, %v15330_v52  ;;  %vm20937_vm8 = vmmov %vm20919_vm9 }
 0x2ed   : > { %v15334_v39 = vsub.f32 %v20916_v37, %v765_v8  ;;  %v20918_v43 = vcvt.s32.f32 %v14924_v23  ;;  %v15348_v44 = vmul.f32 18.0, %v731_v13  ;;  %v15350_v1 = vmul.f32 18.0, %v714_v53  ;;  %vm20940_vm10 = vmmov %vm20937_vm8 }
 0x2ee   : > { %v15338_v28 = vsub.f32 %v20917_v17, %v748_v46  ;;  %v1705_v16 = vmul.f32 %v15290_v47, %v15068_v14  ;;  %v1706_v8 = vmul.f32 %v15290_v47, %v15070_v27  ;;  %v1707_v23 = vmul.f32 %v15290_v47, %v15072_v26  ;;  %v15375_v26 = vld [vmem:[%s20472_s3] ss:$0 sm:$0xff]  ;;  %v20921_v46 = vld [vmem:[#allocation21_spill] sm:$0xff] }
 0x2ef   : > { %v15342_v10 = vsub.f32 %v20918_v43, %v749_v57  ;;  %v1708_v57 = vmul.f32 %v15290_v47, %v15074_v3  ;;  %v1709_v13 = vmul.f32 %v15290_v47, %v15078_v7  ;;  %v1710_v53 = vmul.f32 %v15290_v47, %v15080_v50  ;;  %v20920_v50 = vld [vmem:[#allocation18_spill] sm:$0xff] }
 0x2f0   : > { %v1711_v58 = vmul.f32 %v15290_v47, %v15082_v45  ;;  %v1712_v14 = vmul.f32 %v15290_v47, %v15084_v31  ;;  %v1713_v27 = vmul.f32 %v15290_v47, %v15088_v60  ;;  %v1714_v3 = vmul.f32 %v15290_v47, %v15090_v33 }
 0x2f1   : > { %v1715_v7 = vmul.f32 %v15290_v47, %v15092_v21  ;;  %v1716_v45 = vmul.f32 %v15290_v47, %v20920_v50  ;;  %v1717_v31 = vmul.f32 %v15290_v47, %v15097_v6  ;;  %v1718_v60 = vmul.f32 %v15290_v47, %v15099_v54 }
 0x2f2   : > { %v1719_v5 = vmul.f32 %v15290_v47, %v15101_v34  ;;  %v1720_v37 = vmul.f32 %v15290_v47, %v20921_v46  ;;  %v1721_v33 = vmul.f32 %v15290_v47, %v15106_v11  ;;  %v1722_v21 = vmul.f32 %v15290_v47, %v15108_v19  ;;  %v20929_v46 = vld [vmem:[#allocation26_spill] sm:$0xff] }
 0x2f3   : > { %v15397_v12 = vmul.f32 %v15290_v47, %v15110_v20  ;;  %v15401_v6 = vmul.f32 %v15290_v47, %v15112_v29  ;;  %v15405_v54 = vmul.f32 %v15290_v47, %v15114_v62  ;;  %v15409_v34 = vmul.f32 %v15290_v47, %v15116_v30 }
 0x2f4   : > { %v15412_v11 = vadd.f32 %v15375_v26, %v1705_v16  ;;  %v15415_v19 = vadd.f32 %v15375_v26, %v1706_v8  ;;  %v15418_v20 = vadd.f32 %v15375_v26, %v1707_v23  ;;  %v15422_v29 = vmul.f32 %v15290_v47, %v15118_v41 }
 0x2f5   : > { %v15426_v62 = vmul.f32 %v15290_v47, %v15120_v42  ;;  %v15430_v30 = vmul.f32 %v15290_v47, %v15122_v55  ;;  %v15433_v38 = vadd.f32 %v15375_v26, %v1708_v57  ;;  %v15437_v17 = vmul.f32 %v15290_v47, %v15124_v9  ;;  %v20927_v57 = vld [vmem:[#allocation22_spill] sm:$0xff] }
 0x2f6   : > { %20922 = vst [vmem:[#allocation47_spill] sm:$0xff] %v15415_v19  ;;  %20923 = vst [vmem:[#allocation48_spill] sm:$0xff] %v15418_v20  ;;  %v15441_v43 = vmul.f32 %v15290_v47, %v15126_v56  ;;  %v15445_v41 = vmul.f32 %v15290_v47, %v15128_v24  ;;  %v15448_v42 = vadd.f32 %v15375_v26, %v1709_v13  ;;  %v1783_v8 = vsub.f32 0.0, %v15412_v11 }
 0x2f7   : > { %20924 = vst [vmem:[#allocation50_spill] sm:$0xff] %v15433_v38  ;;  %v15452_v55 = vmul.f32 %v15290_v47, %v15138_v48  ;;  %v15456_v16 = vmul.f32 %v15290_v47, %v15140_v49  ;;  %v15459_v9 = vadd.f32 %v15375_v26, %v1710_v53  ;;  %v15462_v56 = vadd.f32 %v15375_v26, %v1711_v58  ;;  %v20928_v58 = vld [vmem:[#allocation25_spill] sm:$0xff] }
 0x2f8   : > { %20925 = vst [vmem:[#allocation18_spill] sm:$0xff] %v15448_v42  ;;  %v15466_v24 = vmul.f32 %v15290_v47, %v15142_v36  ;;  %v1784_v23 = vsub.f32 0.0, %v15415_v19  ;;  %v1785_v48 = vsub.f32 0.0, %v15418_v20  ;;  %v15473_v49 = vmul.f32 %v15290_v47, %v15144_v4 }
 0x2f9   : > { %20926 = vst [vmem:[#allocation21_spill] sm:$0xff] %v15462_v56  ;;  %v15477_v13 = vmul.f32 %v15290_v47, %v20927_v57  ;;  %v15480_v53 = vadd.f32 %v15375_v26, %v1712_v14  ;;  %v1786_v36 = vsub.f32 0.0, %v15433_v38  ;;  %v15485_v50 = vmul.f32 %v15290_v47, %v20928_v58  ;;  %v20930_v57 = vld [vmem:[#allocation29_spill] sm:$0xff] }
 0x2fa   : > { %v15489_v63 = vmul.f32 %v15290_v47, %v20929_v46  ;;  %v15492_v4 = vadd.f32 %v15375_v26, %v1713_v27  ;;  %v1787_v35 = vsub.f32 0.0, %v15448_v42  ;;  %v15497_v51 = vmul.f32 %v15290_v47, %v20930_v57 }
 0x2fb   : > { %v15500_v14 = vadd.f32 %v15375_v26, %v1714_v3  ;;  %v1788_v22 = vsub.f32 0.0, %v15459_v9  ;;  %v1789_v58 = vsub.f32 0.0, %v15462_v56  ;;  %v15505_v38 = vadd.f32 %v15375_v26, %v1715_v7 }
 0x2fc   : > { %v1819_v46 = vmul.f32 1.442695, %v1783_v8  ;;  %v1821_v20 = vmul.f32 1.442695, %v1784_v23  ;;  %v1823_v27 = vmul.f32 1.442695, %v1785_v48  ;;  %v15508_v19 = vadd.f32 %v15375_v26, %v1716_v45 }
 0x2fd   : > { %v15511_v42 = vadd.f32 %v15375_v26, %v1717_v31  ;;  %v1790_v47 = vsub.f32 0.0, %v15480_v53  ;;  %v1825_v3 = vmul.f32 1.442695, %v1786_v36  ;;  %v15515_v57 = vadd.f32 %v15375_v26, %v1718_v60 }
 0x2fe   : > { %v1791_v56 = vsub.f32 0.0, %v15492_v4  ;;  %13893 = vpow2.f32 %v1819_v46  ;;  %v1827_v7 = vmul.f32 1.442695, %v1787_v35  ;;  %v15519_v8 = vadd.f32 %v15375_v26, %v1719_v5 }
 0x2ff   : > { %v1792_v23 = vsub.f32 0.0, %v15500_v14  ;;  %13895 = vpow2.f32 %v1821_v20  ;;  %v1829_v45 = vmul.f32 1.442695, %v1788_v22  ;;  %v15523_v31 = vadd.f32 %v15375_v26, %v1720_v37 }
 0x300   : > { %v1793_v48 = vsub.f32 0.0, %v15505_v38  ;;  %13897 = vpow2.f32 %v1823_v27  ;;  %v1831_v36 = vmul.f32 1.442695, %v1789_v58  ;;  %v15527_v60 = vadd.f32 %v15375_v26, %v1721_v33 }
 0x301   : > { %v1794_v46 = vsub.f32 0.0, %v15508_v19  ;;  %13899 = vpow2.f32 %v1825_v3  ;;  %v1833_v35 = vmul.f32 1.442695, %v1790_v47  ;;  %v15531_v5 = vadd.f32 %v15375_v26, %v1722_v21 }
 0x302   : > { %v1795_v20 = vsub.f32 0.0, %v15511_v42  ;;  %13901 = vpow2.f32 %v1827_v7  ;;  %v1835_v22 = vmul.f32 1.442695, %v1791_v56  ;;  %v15536_v37 = vadd.f32 %v15375_v26, %v15397_v12 }
 0x303   : > { %20931 = vst [vmem:[#allocation22_spill] sm:$0xff] %v15531_v5  ;;  %v1796_v58 = vsub.f32 0.0, %v15515_v57  ;;  %13903 = vpow2.f32 %v1829_v45  ;;  %v1837_v33 = vmul.f32 1.442695, %v1792_v23  ;;  %v15541_v27 = vadd.f32 %v15375_v26, %v15401_v6 }
 0x304   : > { %20932 = vst [vmem:[#allocation25_spill] sm:$0xff] %v15536_v37  ;;  %v1797_v47 = vsub.f32 0.0, %v15519_v8  ;;  %13905 = vpow2.f32 %v1831_v36  ;;  %v1839_v21 = vmul.f32 1.442695, %v1793_v48  ;;  %v15546_v3 = vadd.f32 %v15375_v26, %v15405_v54  ;;  %v15562_v36 = vld [vmem:[%s20475_s6] sm:$0x3] }
 0x305   : > { %20933 = vst [vmem:[#allocation26_spill] sm:$0xff] %v15541_v27  ;;  %v1798_v56 = vsub.f32 0.0, %v15523_v31  ;;  %13907 = vpow2.f32 %v1833_v35  ;;  %v1841_v12 = vmul.f32 1.442695, %v1794_v46  ;;  %v15551_v7 = vadd.f32 %v15375_v26, %v15409_v34 }
 0x306   : > { %20934 = vst [vmem:[#allocation29_spill] sm:$0xff] %v15546_v3  ;;  %v1799_v23 = vsub.f32 0.0, %v15527_v60  ;;  %13909 = vpow2.f32 %v1835_v22  ;;  %v1843_v6 = vmul.f32 1.442695, %v1795_v20  ;;  %v15556_v45 = vadd.f32 %v15375_v26, %v15422_v29 }
 0x307   : > { %20935 = vst [vmem:[#allocation59_spill] sm:$0xff] %v15551_v7  ;;  %v1800_v48 = vsub.f32 0.0, %v15531_v5  ;;  %13911 = vpow2.f32 %v1837_v33  ;;  %v1845_v54 = vmul.f32 1.442695, %v1796_v58  ;;  %v1801_v34 = vsub.f32 0.0, %v15536_v37 }
 0x308   : > { %20936 = vst [vmem:[#allocation60_spill] sm:$0xff] %v15556_v45  ;;  %v15564_v46 = vpop.eup %13893  ;;  %13913 = vpow2.f32 %v1839_v21  ;;  %v1847_v35 = vmul.f32 1.442695, %v1797_v47  ;;  %v2745_v20 = vsel %vm20937_vm8, %v15330_v52, 0  ;;  %v15573_v22 = vadd.f32 %v15375_v26, %v15426_v62 }
 0x309   : > { %v15569_v29 = vpop.eup %13895  ;;  %v1802_v58 = vsub.f32 0.0, %v15541_v27  ;;  %13915 = vpow2.f32 %v1841_v12  ;;  %v1849_v33 = vmul.f32 1.442695, %v1798_v56  ;;  %12147 = vmatpush3.bf16.msra.mxu0 %v2745_v20  ;;  %v15580_v21 = vadd.f32 %v15375_v26, %v15430_v30 }
 0x30a   : > { %20938 = vst [vmem:[#allocation61_spill] sm:$0xff] %v15573_v22  ;;  %v15576_v5 = vpop.eup %13897  ;;  %v1803_v47 = vsub.f32 0.0, %v15546_v3  ;;  %13917 = vpow2.f32 %v1843_v6  ;;  %v1851_v52 = vmul.f32 1.442695, %v1799_v23  ;;  %13764 = vmatprep.subr.msk.bf16.mxu0 %vm20940_vm10, %v15562_v36  ;;  %v15589_v12 = vadd.f32 %v15375_v26, %v15437_v17 }
 0x30b   : > { %20939 = vst [vmem:[#allocation62_spill] sm:$0xff] %v15580_v21  ;;  %v15585_v62 = vpop.eup %13899  ;;  %v1804_v56 = vsub.f32 0.0, %v15551_v7  ;;  %13919 = vpow2.f32 %v1845_v54  ;;  %v1853_v20 = vmul.f32 1.442695, %v1800_v48  ;;  %vm818_vm12 = vcmp.ge.f32.partialorder %v15317_v18, 0.5 }
 0x30c   : > { %20941 = vst [vmem:[#allocation63_spill] sm:$0xff] %v15589_v12  ;;  %v15592_v27 = vpop.eup %13901  ;;  %vm854_vm11 = vcmp.le.f32.partialorder %v15317_v18, 16.5  ;;  %v15598_v30 = vadd.f32 %v15375_v26, %v15441_v43  ;;  %v1805_v23 = vsub.f32 0.0, %v15556_v45  ;;  %13921 = vpow2.f32 %v1847_v35 }
 0x30d   : > { %v1855_v6 = vmul.f32 1.442695, %v1801_v34  ;;  %v15601_v17 = vpop.eup %13903  ;;  %vm819_vm14 = vcmp.ge.f32.partialorder %v15321_v59, 0.5  ;;  %vm855_vm13 = vcmp.le.f32.partialorder %v15321_v59, 16.5  ;;  %v15607_v48 = vadd.f32 %v15375_v26, %v15445_v41  ;;  %vm15686_vm1 = vmand %vm818_vm12, %vm854_vm11 }
 0x30e   : > { %20942 = vst [vmem:[#allocation64_spill] sm:$0xff] %v15598_v30  ;;  %v1806_v54 = vsub.f32 0.0, %v15573_v22  ;;  %13923 = vpow2.f32 %v1849_v33  ;;  %v1857_v7 = vmul.f32 1.442695, %v1802_v58  ;;  %v15610_v43 = vpop.eup %13905  ;;  %vm836_vm15 = vcmp.ge.f32.partialorder %v15325_v25, 0.5  ;;  %vm15700_vm9 = vmand %vm819_vm14, %vm855_vm13 }
 0x30f   : > { %20943 = vst [vmem:[#allocation65_spill] sm:$0xff] %v15607_v48  ;;  %vm872_vm2 = vcmp.le.f32.partialorder %v15325_v25, 16.5  ;;  %v15616_v34 = vadd.f32 %v15375_v26, %v15452_v55  ;;  %v1807_v35 = vsub.f32 0.0, %v15580_v21  ;;  %13925 = vpow2.f32 %v1851_v52  ;;  %v15619_v41 = vpop.eup %13907 }
 0x310   : > { %v1859_v45 = vmul.f32 1.442695, %v1803_v47  ;;  %vm837_vm6 = vcmp.ge.f32.partialorder %v15334_v39, 0.5  ;;  %vm873_vm3 = vcmp.le.f32.partialorder %v15334_v39, 16.5  ;;  %v15625_v58 = vadd.f32 %v15375_v26, %v15456_v16  ;;  %v15628_v55 = vpop.eup %13909  ;;  %vm15714_vm8 = vmand %vm836_vm15, %vm872_vm2 }
 0x311   : > { %20944 = vst [vmem:[#allocation66_spill] sm:$0xff] %v15616_v34  ;;  %v1808_v33 = vsub.f32 0.0, %v15589_v12  ;;  %13927 = vpow2.f32 %v1853_v20  ;;  %v1861_v22 = vmul.f32 1.442695, %v1804_v56  ;;  %vm820_vm4 = vcmp.ge.f32.partialorder %v15338_v28, 0.5  ;;  %v15637_v16 = vpop.eup %13911  ;;  %vm15728_vm10 = vmand %vm837_vm6, %vm873_vm3 }
 0x312   : > { %20945 = vst [vmem:[#allocation67_spill] sm:$0xff] %v15625_v58  ;;  %vm856_vm5 = vcmp.le.f32.partialorder %v15338_v28, 16.5  ;;  %v15634_v47 = vadd.f32 %v15375_v26, %v15466_v24  ;;  %v1809_v52 = vsub.f32 0.0, %v15598_v30  ;;  %13929 = vpow2.f32 %v1855_v6  ;;  %v15646_v24 = vpop.eup %13913 }
 0x313   : > { %v1863_v21 = vmul.f32 1.442695, %v1805_v23  ;;  %vm821_vm0 = vcmp.ge.f32.partialorder %v15342_v10, 0.5  ;;  %vm857_vm7 = vcmp.le.f32.partialorder %v15342_v10, 16.5  ;;  %v15643_v56 = vadd.f32 %v15375_v26, %v15473_v49  ;;  %v15653_v3 = vpop.eup %13915  ;;  %vm15738_vm14 = vmand %vm820_vm4, %vm856_vm5 }
 0x314   : > { %20946 = vst [vmem:[#allocation68_spill] sm:$0xff] %v15634_v47  ;;  %v1810_v20 = vsub.f32 0.0, %v15607_v48  ;;  %13931 = vpow2.f32 %v1857_v7  ;;  %v1865_v12 = vmul.f32 1.442695, %v1806_v54  ;;  %v15650_v6 = vadd.f32 %v15375_v26, %v15477_v13  ;;  %v15660_v54 = vpop.eup %13917  ;;  %vm15748_vm2 = vmand %vm821_vm0, %vm857_vm7 }
 0x315   : > { %v1811_v23 = vsub.f32 0.0, %v15616_v34  ;;  %13933 = vpow2.f32 %v1859_v45  ;;  %v1867_v30 = vmul.f32 1.442695, %v1807_v35  ;;  %v15657_v49 = vadd.f32 %v15375_v26, %v15485_v50  ;;  %v15667_v35 = vpop.eup %13919 }
 0x316   : > { %v1812_v48 = vsub.f32 0.0, %v15625_v58  ;;  %13935 = vpow2.f32 %v1861_v22  ;;  %v1869_v7 = vmul.f32 1.442695, %v1808_v33  ;;  %v15664_v13 = vadd.f32 %v15375_v26, %v15489_v63  ;;  %v15674_v33 = vpop.eup %13921 }
 0x317   : > { %v1813_v34 = vsub.f32 0.0, %v15634_v47  ;;  %13937 = vpow2.f32 %v1863_v21  ;;  %v1871_v45 = vmul.f32 1.442695, %v1809_v52  ;;  %v15671_v50 = vadd.f32 %v15375_v26, %v15497_v51 }
 0x318   : > { %20947 = vst [vmem:[#allocation69_spill] sm:$0xff] %v15664_v13  ;;  %v1814_v58 = vsub.f32 0.0, %v15643_v56  ;;  %13939 = vpow2.f32 %v1865_v12  ;;  %v1873_v22 = vmul.f32 1.442695, %v1810_v20  ;;  %v20949_v63 = vcvt.s32.f32 %v14974_v32  ;;  %v15680_v52 = vpop.eup %13923 }
 0x319   : > { %20948 = vst [vmem:[#allocation70_spill] sm:$0xff] %v15671_v50  ;;  %v1815_v47 = vsub.f32 0.0, %v15650_v6  ;;  %13941 = vpow2.f32 %v1867_v30  ;;  %v1875_v21 = vmul.f32 1.442695, %v1811_v23  ;;  %v20952_v26 = vcvt.s32.f32 %v14977_v61  ;;  %v15694_v30 = vpop.eup %13925 }
 0x31a   : > { %v802_v37 = vsub.f32 %v20949_v63, %v15344_v2  ;;  %v1816_v32 = vsub.f32 0.0, %v15657_v49  ;;  %13943 = vpow2.f32 %v1869_v7  ;;  %v1877_v2 = vmul.f32 1.442695, %v1812_v48  ;;  %v20958_v48 = vld [vmem:[#allocation54_spill] sm:$0xff] }
 0x31b   : > { %v803_v12 = vsub.f32 %v20952_v26, %v15348_v44  ;;  %v20955_v20 = vcvt.s32.f32 %v14980_v15  ;;  %v1817_v61 = vsub.f32 0.0, %v15664_v13  ;;  %13945 = vpow2.f32 %v1871_v45  ;;  %v15708_v7 = vpop.eup %13927  ;;  %v20988_v13 = vld [vmem:[#allocation35_spill] sm:$0xff] }
 0x31c   : > { %v1879_v44 = vmul.f32 1.442695, %v1813_v34  ;;  %v20959_v63 = vcvt.s32.f32 %v20958_v48  ;;  %v1818_v15 = vsub.f32 0.0, %v15671_v50  ;;  %13947 = vpow2.f32 %v1873_v22  ;;  %v15722_v45 = vpop.eup %13929  ;;  %v2377_v48 = vld [vmem:[#allocation2 + $0xc] sm:$0xf] }
 0x31d   : > { %v786_v23 = vsub.f32 %v20955_v20, %v15350_v1  ;;  %v1881_v1 = vmul.f32 1.442695, %v1814_v58  ;;  %vm838_vm12 = vcmp.ge.f32.partialorder %v802_v37, 0.5  ;;  %vm874_vm11 = vcmp.le.f32.partialorder %v802_v37, 16.5 }
 0x31e   : > { %v787_v26 = vsub.f32 %v20959_v63, %v15352_v0  ;;  %13949 = vpow2.f32 %v1875_v21  ;;  %v1883_v34 = vmul.f32 1.442695, %v1815_v47  ;;  %v15732_v20 = vpop.eup %13931  ;;  %vm875_vm15 = vcmp.le.f32.partialorder %v803_v12, 16.5  ;;  %vm15756_vm4 = vmand %vm838_vm12, %vm874_vm11 }
 0x31f   : > { %13951 = vpow2.f32 %v1877_v2  ;;  %v1885_v39 = vmul.f32 1.442695, %v1816_v32  ;;  %v15742_v58 = vpop.eup %13933  ;;  %vm822_vm6 = vcmp.ge.f32.partialorder %v786_v23, 0.5  ;;  %vm858_vm3 = vcmp.le.f32.partialorder %v786_v23, 16.5 }
 0x320   : > { %13953 = vpow2.f32 %v1879_v44  ;;  %v1887_v28 = vmul.f32 1.442695, %v1817_v61  ;;  %v15752_v22 = vpop.eup %13935  ;;  %vm823_vm5 = vcmp.ge.f32.partialorder %v787_v26, 0.5  ;;  %vm859_vm13 = vcmp.le.f32.partialorder %v787_v26, 16.5  ;;  %v2376_v44 = vld [vmem:[#allocation2 + $0x8] sm:$0xf] }
 0x321   : > { %13955 = vpow2.f32 %v1881_v1  ;;  %v1889_v10 = vmul.f32 1.442695, %v1818_v15  ;;  %v15760_v32 = vpop.eup %13937  ;;  %v15765_v2 = vsel %vm15686_vm1, 1.0, %v20891_v40  ;;  %vm20969_vm0 = vcmp.ge.f32.partialorder %v803_v12, 0.5  ;;  %vm15786_vm1 = vmand %vm822_vm6, %vm858_vm3 }
 0x322   : > { %20968 = vst [vmem:[#allocation54_spill] sm:$0xff] %v15765_v2  ;;  %vm15769_vm7 = vmand %vm20969_vm0, %vm875_vm15  ;;  %13957 = vpow2.f32 %v1883_v34  ;;  %v1891_v37 = vadd.f32 1.0, %v15564_v46  ;;  %v13940_v63 = vpop.eup %13939  ;;  %v15777_v15 = vsel %vm15700_vm9, 1.0, %v20891_v40  ;;  %v15782_v51 = vsel %vm15714_vm8, 1.0, %v20891_v40 }
 0x323   : > { %20972 = vst [vmem:[#allocation71_spill] sm:$0xff] %v15777_v15  ;;  %20973 = vst [vmem:[#allocation72_spill] sm:$0xff] %v15782_v51  ;;  %13959 = vpow2.f32 %v1885_v39  ;;  %v1892_v46 = vadd.f32 1.0, %v15569_v29  ;;  %v13942_v1 = vpop.eup %13941  ;;  %v15794_v18 = vsel %vm15728_vm10, 1.0, %v20891_v40  ;;  %v15799_v59 = vsel %vm15738_vm14, 1.0, %v20891_v40 }
 0x324   : > { %20976 = vst [vmem:[#allocation73_spill] sm:$0xff] %v15794_v18  ;;  %20977 = vst [vmem:[#allocation74_spill] sm:$0xff] %v15799_v59  ;;  %13961 = vpow2.f32 %v1887_v28  ;;  %v1893_v23 = vadd.f32 1.0, %v15576_v5  ;;  %v13944_v34 = vpop.eup %13943  ;;  %v15807_v29 = vsel %vm15748_vm2, 1.0, %v20891_v40  ;;  %v1894_v25 = vadd.f32 1.0, %v15585_v62 }
 0x325   : > { %vm895_vm9 = vmand %vm823_vm5, %vm859_vm13  ;;  %20978 = vst [vmem:[#allocation75_spill] sm:$0xff] %v15807_v29  ;;  %13963 = vpow2.f32 %v1889_v10  ;;  %v15810_v39 = vcombine.low %v2376_v44, %v2377_v48  ;;  %v13946_v0 = vpop.eup %13945  ;;  %v15815_v26 = vsel %vm15756_vm4, 1.0, %v20891_v40  ;;  %v15820_v5 = vsel %vm15769_vm7, 1.0, %v20891_v40 }
 0x326   : > { %20980 = vst [vmem:[#allocation77_spill] sm:$0xff] %v15815_v26  ;;  %20981 = vst [vmem:[#allocation78_spill] sm:$0xff] %v15820_v5  ;;  %v1895_v47 = vadd.f32 1.0, %v15592_v27  ;;  %13965 = vrcp.f32 %v1891_v37  ;;  %v13948_v28 = vpop.eup %13947  ;;  %v15826_v62 = vsel %vm15786_vm1, 1.0, %v20891_v40  ;;  %v15829_v10 = vsel %vm895_vm9, 1.0, %v20891_v40 }
 0x327   : > { %20979 = vst [vmem:[#allocation76_spill] sm:$0xff] %v15810_v39  ;;  %20982 = vst [vmem:[#allocation79_spill] sm:$0xff] %v15826_v62  ;;  %v1896_v21 = vadd.f32 1.0, %v15601_v17  ;;  %13967 = vrcp.f32 %v1892_v46  ;;  %v1897_v61 = vadd.f32 1.0, %v15610_v43  ;;  %vm20984_vm8 = vcmask 1041408  }
 0x328   : > { %20983 = vst [vmem:[#allocation80_spill] sm:$0xff] %v15829_v10  ;;  %v13950_v44 = vpop.eup %13949  ;;  %13969 = vrcp.f32 %v1893_v23  ;;  %v15835_v27 = vsel %vm20984_vm8, %v15562_v36, 0  ;;  %v1898_v12 = vadd.f32 1.0, %v15619_v41  ;;  %v1899_v50 = vadd.f32 1.0, %v15628_v55  ;;  %vm21019_vm12 = vmmov %vm20984_vm8 }
 0x329   : > { %20985 = vst [vmem:[#allocation81_spill] sm:$0xff] %v15835_v27  ;;  %v13952_v48 = vpop.eup %13951  ;;  %13971 = vrcp.f32 %v1894_v25  ;;  %v1900_v46 = vadd.f32 1.0, %v15637_v16  ;;  %v1901_v43 = vadd.f32 1.0, %v15646_v24  ;;  %v1902_v23 = vadd.f32 1.0, %v15653_v3 }
 0x32a   : > { %v13954_v17 = vpop.eup %13953  ;;  %13973 = vrcp.f32 %v1895_v47  ;;  %v1903_v27 = vadd.f32 1.0, %v15660_v54  ;;  %v1904_v37 = vadd.f32 1.0, %v15667_v35  ;;  %v1905_v41 = vadd.f32 1.0, %v15674_v33 }
 0x32b   : > { %v13956_v36 = vpop.eup %13955  ;;  %13975 = vrcp.f32 %v1896_v21  ;;  %v1906_v25 = vadd.f32 1.0, %v15680_v52  ;;  %v1907_v40 = vadd.f32 1.0, %v15694_v30  ;;  %v1908_v16 = vadd.f32 1.0, %v15708_v7 }
 0x32c   : > { %v13958_v55 = vpop.eup %13957  ;;  %13977 = vrcp.f32 %v1897_v61  ;;  %v1909_v3 = vadd.f32 1.0, %v15722_v45  ;;  %v1910_v47 = vadd.f32 1.0, %v15732_v20  ;;  %v1911_v54 = vadd.f32 1.0, %v15742_v58 }
 0x32d   : > { %v13960_v24 = vpop.eup %13959  ;;  %13979 = vrcp.f32 %v1898_v12  ;;  %v15854_v33 = vadd.f32 1.0, %v15752_v22  ;;  %v15857_v21 = vadd.f32 1.0, %v15760_v32  ;;  %v15859_v52 = vadd.f32 1.0, %v13940_v63 }
 0x32e   : > { %v13962_v35 = vpop.eup %13961  ;;  %13981 = vrcp.f32 %v1899_v50  ;;  %v15861_v7 = vadd.f32 1.0, %v13942_v1  ;;  %v15863_v61 = vadd.f32 1.0, %v13944_v34  ;;  %v15865_v45 = vadd.f32 1.0, %v13946_v0 }
 0x32f   : > { %v13964_v30 = vpop.eup %13963  ;;  %13983 = vrcp.f32 %v1900_v46  ;;  %v15867_v58 = vadd.f32 1.0, %v13948_v28  ;;  %v15869_v12 = vadd.f32 1.0, %v13950_v44  ;;  %v15871_v22 = vadd.f32 1.0, %v13952_v48  ;;  %v20986_v28 = vld [vmem:[#allocation47_spill] sm:$0xff] }
 0x330   : > { %v13966_v20 = vpop.eup %13965  ;;  %13985 = vrcp.f32 %v1901_v43  ;;  %v15873_v63 = vadd.f32 1.0, %v13954_v17  ;;  %v15875_v50 = vadd.f32 1.0, %v13956_v36  ;;  %v15878_v0 = vadd.f32 1.0, %v13958_v55  ;;  %v20987_v43 = vld [vmem:[#allocation48_spill] sm:$0xff] }
 0x331   : > { %v13968_v32 = vpop.eup %13967  ;;  %13987 = vrcp.f32 %v1902_v23  ;;  %v1999_v1 = vmul.f32 %v13966_v20, %v15412_v11  ;;  %v15880_v46 = vadd.f32 1.0, %v13960_v24  ;;  %v15883_v48 = vadd.f32 1.0, %v13962_v35  ;;  %v20989_v11 = vld [vmem:[#allocation50_spill] sm:$0xff] }
 0x332   : > { %v13970_v34 = vpop.eup %13969  ;;  %13989 = vrcp.f32 %v1903_v27  ;;  %v2000_v44 = vmul.f32 %v13968_v32, %v20986_v28  ;;  %v15889_v5 = vadd.f32 1.0, %v13964_v30  ;;  %v20990_v24 = vld [vmem:[#allocation38_spill] sm:$0xff]  ;;  %v20992_v28 = vld [vmem:[#allocation43_spill] sm:$0xff]  ;;  %vm2193_vm10 = vcmask 1045508  }
 0x333   : > { %v13972_v39 = vpop.eup %13971  ;;  %13991 = vrcp.f32 %v1904_v37  ;;  %v2001_v17 = vmul.f32 %v13970_v34, %v20987_v43  ;;  %v15887_v36 = vmul.f32 %v1999_v1, %v20988_v13  ;;  %v20991_v32 = vld [vmem:[#allocation18_spill] sm:$0xff]  ;;  %vm16047_vm11 = vmor %vm21019_vm12, %vm2193_vm10  ;;  %vm21028_vm14 = vcmask 27650  }
 0x334   : > { %v13974_v23 = vpop.eup %13973  ;;  %13993 = vrcp.f32 %v1905_v41  ;;  %v2002_v55 = vmul.f32 %v13972_v39, %v20989_v11  ;;  %v15893_v20 = vmul.f32 %v2000_v44, %v20990_v24  ;;  %v20993_v41 = vld [vmem:[#allocation44_spill] sm:$0xff]  ;;  %v20995_v11 = vld [vmem:[#allocation49_spill] sm:$0xff]  ;;  %vm21035_vm13 = vcmask 27648  }
 0x335   : > { %v13976_v27 = vpop.eup %13975  ;;  %13995 = vrcp.f32 %v1906_v25  ;;  %v2003_v35 = vmul.f32 %v13974_v23, %v20991_v32  ;;  %v15897_v37 = vmul.f32 %v2001_v17, %v20992_v28  ;;  %v20994_v25 = vld [vmem:[#allocation21_spill] sm:$0xff]  ;;  %vm21038_vm15 = vmmov %vm21035_vm13 }
 0x336   : > { %v13978_v34 = vpop.eup %13977  ;;  %13997 = vrcp.f32 %v1907_v40  ;;  %v2004_v30 = vmul.f32 %v13976_v27, %v15459_v9  ;;  %v15903_v43 = vmul.f32 %v2002_v55, %v20993_v41  ;;  %v20996_v9 = vld [vmem:[#allocation30_spill] sm:$0xff]  ;;  %vm21046_vm2 = vmmov %vm21035_vm13 }
 0x337   : > { %v13980_v44 = vpop.eup %13979  ;;  %13999 = vrcp.f32 %v1908_v16  ;;  %v2005_v23 = vmul.f32 %v13978_v34, %v20994_v25  ;;  %v15909_v17 = vmul.f32 %v2003_v35, %v20995_v11  ;;  %v20997_v34 = vld [vmem:[#allocation9_spill] sm:$0xff]  ;;  %vm21051_vm6 = vmmov %vm21046_vm2 }
 0x338   : > { %v13982_v1 = vpop.eup %13981  ;;  %14001 = vrcp.f32 %v1909_v3  ;;  %v2006_v40 = vmul.f32 %v13980_v44, %v15480_v53  ;;  %v15915_v55 = vmul.f32 %v2004_v30, %v20996_v9  ;;  %v20998_v3 = vld [vmem:[#allocation10_spill] sm:$0xff]  ;;  %vm21055_vm3 = vmmov %vm21046_vm2 }
 0x339   : > { %v13984_v39 = vpop.eup %13983  ;;  %14003 = vrcp.f32 %v1910_v47  ;;  %v2007_v16 = vmul.f32 %v13982_v1, %v15492_v4  ;;  %v15921_v35 = vmul.f32 %v2005_v23, %v20997_v34  ;;  %v20999_v47 = vld [vmem:[#allocation55_spill] sm:$0xff]  ;;  %vm21056_vm4 = vmmov %vm21046_vm2 }
 0x33a   : > { %v13986_v32 = vpop.eup %13985  ;;  %14005 = vrcp.f32 %v1911_v54  ;;  %v2008_v53 = vmul.f32 %v13984_v39, %v15500_v14  ;;  %v15927_v30 = vmul.f32 %v2006_v40, %v20998_v3  ;;  %v21000_v39 = vld [vmem:[#allocation56_spill] sm:$0xff]  ;;  %vm21059_vm5 = vmmov %vm21046_vm2 }
 0x33b   : > { %v13988_v27 = vpop.eup %13987  ;;  %14007 = vrcp.f32 %v15854_v33  ;;  %v2009_v4 = vmul.f32 %v13986_v32, %v15505_v38  ;;  %v15934_v1 = vmul.f32 %v2007_v16, %v20999_v47  ;;  %vm21060_vm0 = vmmov %vm21046_vm2 }
 0x33c   : > { %v13990_v54 = vpop.eup %13989  ;;  %14009 = vrcp.f32 %v15857_v21  ;;  %v2010_v14 = vmul.f32 %v13988_v27, %v15508_v19  ;;  %v15941_v40 = vmul.f32 %v2008_v53, %v21000_v39  ;;  %vm21063_vm7 = vmmov %vm21060_vm0 }
 0x33d   : > { %v13992_v33 = vpop.eup %13991  ;;  %14011 = vrcp.f32 %v15859_v52  ;;  %v2011_v38 = vmul.f32 %v13990_v54, %v15511_v42  ;;  %v15948_v32 = vmul.f32 %v2009_v4, %v15765_v2  ;;  %vm21065_vm1 = vmmov %vm21060_vm0 }
 0x33e   : > { %v13994_v21 = vpop.eup %13993  ;;  %14013 = vrcp.f32 %v15861_v7  ;;  %v2012_v19 = vmul.f32 %v13992_v33, %v15515_v57  ;;  %v15955_v27 = vmul.f32 %v2010_v14, %v15777_v15  ;;  %v21027_v15 = vld [vmem:[#allocation53_spill] sm:$0xff]  ;;  %vm21066_vm9 = vmmov %vm21060_vm0 }
 0x33f   : > { %v13996_v52 = vpop.eup %13995  ;;  %14015 = vrcp.f32 %v15863_v61  ;;  %v2013_v42 = vmul.f32 %v13994_v21, %v15519_v8  ;;  %v15962_v4 = vmul.f32 %v2011_v38, %v15799_v59  ;;  %v21025_v61 = vpack.c.bf16 %v15893_v20, %v15893_v20  ;;  %vm21069_vm8 = vmmov %vm21060_vm0 }
 0x340   : > { %v13998_v7 = vpop.eup %13997  ;;  %14017 = vrcp.f32 %v15865_v45  ;;  %v2014_v57 = vmul.f32 %v13996_v52, %v15523_v31  ;;  %v15969_v14 = vmul.f32 %v2012_v19, %v15807_v29  ;;  %v21001_v31 = vld [vmem:[#allocation22_spill] sm:$0xff]  ;;  %v21026_v29 = vld [vmem:[#allocation65_spill] sm:$0xff]  ;;  %vm21071_vm10 = vmmov %vm21060_vm0 }
 0x341   : > { %v14000_v33 = vpop.eup %13999  ;;  %14019 = vrcp.f32 %v15867_v58  ;;  %v2015_v8 = vmul.f32 %v13998_v7, %v15527_v60  ;;  %v15976_v38 = vmul.f32 %v2013_v42, %v15826_v62  ;;  %v21002_v60 = vld [vmem:[#allocation25_spill] sm:$0xff]  ;;  %vm21072_vm12 = vmmov %vm21060_vm0 }
 0x342   : > { %v14002_v45 = vpop.eup %14001  ;;  %14021 = vrcp.f32 %v15869_v12  ;;  %v2016_v19 = vmul.f32 %v14000_v33, %v21001_v31  ;;  %v15983_v52 = vmul.f32 %v2014_v57, %v15829_v10  ;;  %v21003_v7 = vld [vmem:[#allocation33_spill] sm:$0xff]  ;;  %v21004_v33 = vld [vmem:[#allocation26_spill] sm:$0xff]  ;;  %v21016_v10 = vld [vmem:[#allocation63_spill] sm:$0xff] }
 0x343   : > { %v14004_v58 = vpop.eup %14003  ;;  %14023 = vrcp.f32 %v15871_v22  ;;  %v2017_v42 = vmul.f32 %v14002_v45, %v21002_v60  ;;  %v15990_v54 = vmul.f32 %v2015_v8, %v21003_v7  ;;  %v21005_v31 = vld [vmem:[#allocation34_spill] sm:$0xff]  ;;  %v21006_v45 = vld [vmem:[#allocation29_spill] sm:$0xff]  ;;  %v21007_v60 = vld [vmem:[#allocation39_spill] sm:$0xff] }
 0x344   : > { %v14006_v12 = vpop.eup %14005  ;;  %14025 = vrcp.f32 %v15873_v63  ;;  %v2018_v57 = vmul.f32 %v14004_v58, %v21004_v33  ;;  %v15997_v53 = vmul.f32 %v2016_v19, %v21005_v31  ;;  %v21008_v58 = vld [vmem:[#allocation59_spill] sm:$0xff]  ;;  %v21009_v33 = vld [vmem:[#allocation40_spill] sm:$0xff] }
 0x345   : > { %v14008_v22 = vpop.eup %14007  ;;  %14027 = vrcp.f32 %v15875_v50  ;;  %v2019_v8 = vmul.f32 %v14006_v12, %v21006_v45  ;;  %v16004_v16 = vmul.f32 %v2017_v42, %v21007_v60  ;;  %v21010_v12 = vld [vmem:[#allocation60_spill] sm:$0xff]  ;;  %v21011_v45 = vld [vmem:[#allocation45_spill] sm:$0xff] }
 0x346   : > { %v14010_v63 = vpop.eup %14009  ;;  %14029 = vrcp.f32 %v15878_v0  ;;  %v2020_v19 = vmul.f32 %v14008_v22, %v21008_v58  ;;  %v16011_v44 = vmul.f32 %v2018_v57, %v21009_v33  ;;  %v21012_v22 = vld [vmem:[#allocation61_spill] sm:$0xff]  ;;  %v21013_v58 = vld [vmem:[#allocation46_spill] sm:$0xff] }
 0x347   : > { %v14012_v50 = vpop.eup %14011  ;;  %14031 = vrcp.f32 %v15880_v46  ;;  %v2021_v42 = vmul.f32 %v14010_v63, %v21010_v12  ;;  %v16018_v23 = vmul.f32 %v2019_v8, %v21011_v45  ;;  %v21014_v63 = vld [vmem:[#allocation62_spill] sm:$0xff]  ;;  %v21015_v12 = vld [vmem:[#allocation4_spill] sm:$0xff] }
 0x348   : > { %v14014_v0 = vpop.eup %14013  ;;  %14033 = vrcp.f32 %v15883_v48  ;;  %v2022_v57 = vmul.f32 %v14012_v50, %v21012_v22  ;;  %v16025_v25 = vmul.f32 %v2020_v19, %v21013_v58  ;;  %v21017_v22 = vld [vmem:[#allocation6_spill] sm:$0xff] }
 0x349   : > { %v14016_v46 = vpop.eup %14015  ;;  %14035 = vrcp.f32 %v15889_v5  ;;  %v2023_v8 = vmul.f32 %v14014_v0, %v21014_v63  ;;  %v16032_v62 = vmul.f32 %v2021_v42, %v21015_v12  ;;  %v21018_v5 = vpack.c.bf16 %v15887_v36, %v15887_v36  ;;  %v21023_v63 = vld [vmem:[#allocation64_spill] sm:$0xff] }
 0x34a   : > { %v14018_v48 = vpop.eup %14017  ;;  %v2024_v50 = vmul.f32 %v14016_v46, %v21016_v10  ;;  %v16038_v19 = vmul.f32 %v2022_v57, %v21017_v22  ;;  %v21020_v42 = vmov 0  ;;  %v21024_v10 = vld [vmem:[#allocation52_spill] sm:$0xff]  ;;  %v2197_v36 = vrot.slane %v21025_v61, 6  ;;  %v21030_v57 = vld [vmem:[#allocation57_spill] sm:$0xff] }
 0x34b   : > { %v2195_v59 = vrot.slane %v21018_v5, 6  ;;  %v14020_v0 = vpop.eup %14019  ;;  %v21021_v42 = vsel %vm16047_vm11, 4294967295, %v21020_v42  ;;  %v2025_v21 = vmul.f32 %v14018_v48, %v21023_v63  ;;  %v16053_v46 = vmul.f32 %v2023_v8, %v21024_v10  ;;  %v21029_v63 = vld [vmem:[#allocation66_spill] sm:$0xff] }
 0x34c   : > { %21022 = vst [vmem:[#allocation47_spill] sm:$0xff] %v21021_v42  ;;  %v14022_v5 = vpop.eup %14021  ;;  %v2026_v2 = vmul.f32 %v14020_v0, %v21026_v29  ;;  %v16062_v47 = vmul.f32 %v2024_v50, %v21027_v15  ;;  %v2199_v61 = vrot.slane %v2197_v36, 4  ;;  %v21031_v0 = vld [vmem:[#allocation67_spill] sm:$0xff]  ;;  %v21032_v15 = vld [vmem:[#allocation58_spill] sm:$0xff] }
 0x34d   : > { %v2196_v48 = vrot.slane %v2195_v59, 4  ;;  %2339 = vst.msk [vmem:[#allocation2 + $0x10] sm:$0xc] %vm21028_vm14, %v2195_v59  ;;  %v14024_v8 = vpop.eup %14023  ;;  %v2027_v10 = vmul.f32 %v14022_v5, %v21029_v63  ;;  %v16069_v34 = vmul.f32 %v2025_v21, %v21030_v57  ;;  %v21033_v63 = vld [vmem:[#allocation68_spill] sm:$0xff]  ;;  %vm21075_vm14 = vmmov %vm21060_vm0 }
 0x34e   : > { %v14026_v29 = vpop.eup %14025  ;;  %v2028_v50 = vmul.f32 %v14024_v8, %v21031_v0  ;;  %v16075_v3 = vmul.f32 %v2026_v2, %v21032_v15  ;;  %v21034_v8 = vpack.c.bf16 %v15897_v37, %v15897_v37 }
 0x34f   : > { %v2198_v59 = vsel %vm16047_vm11, %v2196_v48, %v2197_v36  ;;  %v14028_v5 = vpop.eup %14027  ;;  %v2029_v21 = vmul.f32 %v14026_v29, %v21033_v63  ;;  %v16083_v57 = vmul.f32 %v2027_v10, %v15782_v51  ;;  %v21036_v10 = vpack.c.bf16 %v15903_v43, %v15903_v43  ;;  %v21043_v43 = vld [vmem:[#allocation41_spill] sm:$0xff] }
 0x350   : > { %v2200_v2 = vrot.slane %v21034_v8, 6  ;;  %2340 = vst.msk [vmem:[#allocation2 + $0x14] sm:$0xf] %vm21035_vm13, %v2198_v59  ;;  %v14030_v0 = vpop.eup %14029  ;;  %v2030_v39 = vmul.f32 %v14028_v5, %v15643_v56  ;;  %v16093_v36 = vmul.f32 %v2028_v50, %v15794_v18  ;;  %v21037_v8 = vld [vmem:[#allocation78_spill] sm:$0xff]  ;;  %vm21076_vm13 = vmmov %vm21060_vm0 }
 0x351   : > { %v2203_v29 = vrot.slane %v21036_v10, 6  ;;  %v14032_v63 = vpop.eup %14031  ;;  %v2031_v20 = vmul.f32 %v14030_v0, %v15650_v6  ;;  %v16102_v37 = vmul.f32 %v2029_v21, %v15815_v26  ;;  %v21039_v21 = vld [vmem:[#allocation69_spill] sm:$0xff]  ;;  %v21040_v26 = vld [vmem:[#allocation36_spill] sm:$0xff] }
 0x352   : > { %v2201_v56 = vsel %vm16047_vm11, %v2199_v61, %v2200_v2  ;;  %v14034_v50 = vpop.eup %14033  ;;  %v2032_v5 = vmul.f32 %v14032_v63, %v15657_v49  ;;  %v16110_v48 = vmul.f32 %v2030_v39, %v21037_v8  ;;  %v2202_v10 = vrot.slane %v2200_v2, 4  ;;  %v21041_v49 = vld [vmem:[#allocation70_spill] sm:$0xff]  ;;  %v21042_v39 = vld [vmem:[#allocation37_spill] sm:$0xff] }
 0x353   : > { %2341 = vst.msk [vmem:[#allocation2 + $0x18] sm:$0xf] %vm21038_vm15, %v2201_v56  ;;  %v14036_v6 = vpop.eup %14035  ;;  %v2033_v0 = vmul.f32 %v14034_v50, %v21039_v21  ;;  %v16117_v59 = vmul.f32 %v2031_v20, %v21040_v26  ;;  %v2205_v18 = vrot.slane %v2203_v29, 4  ;;  %v21044_v21 = vpack.c.bf16 %v15909_v17, %v15909_v17  ;;  %vm21079_vm15 = vmmov %vm21060_vm0 }
 0x354   : > { %v2034_v63 = vmul.f32 %v14036_v6, %v21041_v49  ;;  %v16123_v8 = vmul.f32 %v2032_v5, %v21042_v39  ;;  %v2204_v56 = vsel %vm16047_vm11, %v2202_v10, %v2203_v29  ;;  %v21045_v5 = vpack.c.bf16 %v15915_v55, %v15915_v55  ;;  %v21047_v49 = vld [vmem:[#allocation42_spill] sm:$0xff] }
 0x355   : > { %v16130_v50 = vmul.f32 %v2033_v0, %v21043_v43  ;;  %v2206_v61 = vrot.slane %v21044_v21, 6  ;;  %2342 = vst.msk [vmem:[#allocation2 + $0x1c] sm:$0xf] %vm21046_vm2, %v2204_v56  ;;  %v21048_v10 = vpack.c.bf16 %v15921_v35, %v15921_v35  ;;  %v21049_v17 = vpack.c.bf16 %v15927_v30, %v15927_v30  ;;  %vm21081_vm2 = vmmov %vm21060_vm0 }
 0x356   : > { %v2209_v6 = vrot.slane %v21045_v5, 6  ;;  %v16142_v2 = vmul.f32 %v2034_v63, %v21047_v49  ;;  %v21050_v35 = vpack.c.bf16 %v15934_v1, %v15934_v1  ;;  %v21053_v20 = vpack.c.bf16 %v15948_v32, %v15948_v32 }
 0x357   : > { %v2212_v0 = vrot.slane %v21048_v10, 6  ;;  %v2215_v21 = vrot.slane %v21049_v17, 6  ;;  %v2207_v56 = vsel %vm16047_vm11, %v2205_v18, %v2206_v61  ;;  %v2208_v5 = vrot.slane %v2206_v61, 4 }
 0x358   : > { %v2211_v63 = vrot.slane %v2209_v6, 4  ;;  %v2218_v10 = vrot.slane %v21050_v35, 6  ;;  %2343 = vst.msk [vmem:[#allocation2 + $0x20] sm:$0xf] %vm21051_vm6, %v2207_v56  ;;  %v21052_v18 = vpack.c.bf16 %v15941_v40, %v15941_v40  ;;  %v2224_v55 = vrot.slane %v21053_v20, 6  ;;  %vm21082_vm6 = vmmov %vm21060_vm0 }
 0x359   : > { %v2214_v29 = vrot.slane %v2212_v0, 4  ;;  %v2217_v43 = vrot.slane %v2215_v21, 4  ;;  %v2210_v30 = vsel %vm16047_vm11, %v2208_v5, %v2209_v6  ;;  %v21054_v6 = vpack.c.bf16 %v15955_v27, %v15955_v27 }
 0x35a   : > { %v2213_v17 = vsel %vm16047_vm11, %v2211_v63, %v2212_v0  ;;  %v2221_v61 = vrot.slane %v21052_v18, 6  ;;  %v2220_v35 = vrot.slane %v2218_v10, 4  ;;  %2344 = vst.msk [vmem:[#allocation2 + $0x24] sm:$0xf] %vm21055_vm3, %v2210_v30  ;;  %v2226_v0 = vrot.slane %v2224_v55, 4  ;;  %vm21085_vm3 = vmmov %vm21060_vm0 }
 0x35b   : > { %v2216_v1 = vsel %vm16047_vm11, %v2214_v29, %v2215_v21  ;;  %v2219_v56 = vsel %vm16047_vm11, %v2217_v43, %v2218_v10  ;;  %v2227_v5 = vrot.slane %v21054_v6, 6  ;;  %2345 = vst.msk [vmem:[#allocation2 + $0x28] sm:$0xf] %vm21056_vm4, %v2213_v17  ;;  %v21057_v32 = vpack.c.bf16 %v15962_v4, %v15962_v4  ;;  %vm21087_vm4 = vmmov %vm21060_vm0 }
 0x35c   : > { %v2223_v40 = vrot.slane %v2221_v61, 4  ;;  %v21058_v29 = vpack.c.bf16 %v15969_v14, %v15969_v14  ;;  %2346 = vst.msk [vmem:[#allocation2 + $0x2c] sm:$0xf] %vm21059_vm5, %v2216_v1  ;;  %v2222_v27 = vsel %vm16047_vm11, %v2220_v35, %v2221_v61  ;;  %v21061_v63 = vpack.c.bf16 %v15976_v38, %v15976_v38  ;;  %vm21088_vm5 = vmmov %vm21060_vm0 }
 0x35d   : > { %v2230_v20 = vrot.slane %v21057_v32, 6  ;;  %2347 = vst.msk [vmem:[#allocation2 + $0x30] sm:$0xf] %vm21060_vm0, %v2219_v56  ;;  %v2229_v43 = vrot.slane %v2227_v5, 4  ;;  %v21062_v4 = vpack.c.bf16 %v15983_v52, %v15983_v52  ;;  %v2228_v17 = vsel %vm16047_vm11, %v2226_v0, %v2227_v5 }
 0x35e   : > { %v2233_v21 = vrot.slane %v21058_v29, 6  ;;  %v2236_v10 = vrot.slane %v21061_v63, 6  ;;  %v2225_v14 = vsel %vm16047_vm11, %v2223_v40, %v2224_v55  ;;  %2348 = vst.msk [vmem:[#allocation2 + $0x34] sm:$0xf] %vm21063_vm7, %v2222_v27  ;;  %v21064_v35 = vpack.c.bf16 %v15990_v54, %v15990_v54  ;;  %vm21091_vm7 = vmmov %vm21060_vm0 }
 0x35f   : > { %v2239_v30 = vrot.slane %v21062_v4, 6  ;;  %v2232_v18 = vrot.slane %v2230_v20, 4  ;;  %v2231_v61 = vsel %vm16047_vm11, %v2229_v43, %v2230_v20  ;;  %2349 = vst.msk [vmem:[#allocation2 + $0x38] sm:$0xf] %vm21065_vm1, %v2225_v14  ;;  %v21067_v5 = vpack.c.bf16 %v15997_v53, %v15997_v53  ;;  %vm21094_vm1 = vmmov %vm21060_vm0 }
 0x360   : > { %v2235_v1 = vrot.slane %v2233_v21, 4  ;;  %v2238_v56 = vrot.slane %v2236_v10, 4  ;;  %v2242_v52 = vrot.slane %v21064_v35, 6  ;;  %2350 = vst.msk [vmem:[#allocation2 + $0x3c] sm:$0xf] %vm21066_vm9, %v2228_v17  ;;  %v21068_v0 = vpack.c.bf16 %v16004_v16, %v16004_v16  ;;  %vm21096_vm9 = vmmov %vm21060_vm0 }
 0x361   : > { %v2241_v38 = vrot.slane %v2239_v30, 4  ;;  %v2234_v55 = vsel %vm16047_vm11, %v2232_v18, %v2233_v21  ;;  %v2245_v40 = vrot.slane %v21067_v5, 6  ;;  %2351 = vst.msk [vmem:[#allocation2 + $0x40] sm:$0xf] %vm21069_vm8, %v2231_v61  ;;  %v21070_v21 = vpack.c.bf16 %v16011_v44, %v16011_v44  ;;  %vm21097_vm8 = vmmov %vm21060_vm0 }
 0x362   : > { %v2237_v6 = vsel %vm16047_vm11, %v2235_v1, %v2236_v10  ;;  %v2248_v32 = vrot.slane %v21068_v0, 6  ;;  %v2240_v54 = vsel %vm16047_vm11, %v2238_v56, %v2239_v30  ;;  %v2244_v29 = vrot.slane %v2242_v52, 4  ;;  %2352 = vst.msk [vmem:[#allocation2 + $0x44] sm:$0xf] %vm21071_vm10, %v2234_v55 }
 0x363   : > { %v2243_v20 = vsel %vm16047_vm11, %v2241_v38, %v2242_v52  ;;  %v2251_v27 = vrot.slane %v21070_v21, 6  ;;  %2353 = vst.msk [vmem:[#allocation2 + $0x48] sm:$0xf] %vm21072_vm12, %v2237_v6  ;;  %v2247_v53 = vrot.slane %v2245_v40, 4  ;;  %v21073_v43 = vpack.c.bf16 %v16018_v23, %v16018_v23  ;;  %vm21100_vm12 = vmmov %vm21060_vm0 }
 0x364   : > { %v2250_v16 = vrot.slane %v2248_v32, 4  ;;  %v21074_v10 = vpack.c.bf16 %v16025_v25, %v16025_v25  ;;  %2354 = vst.msk [vmem:[#allocation2 + $0x4c] sm:$0xf] %vm21075_vm14, %v2240_v54  ;;  %v2246_v44 = vsel %vm16047_vm11, %v2244_v29, %v2245_v40  ;;  %v21077_v14 = vpack.c.bf16 %v16032_v62, %v16032_v62  ;;  %vm21102_vm14 = vmmov %vm21060_vm0 }
 0x365   : > { %v2254_v63 = vrot.slane %v21073_v43, 6  ;;  %2355 = vst.msk [vmem:[#allocation2 + $0x50] sm:$0xf] %vm21076_vm13, %v2243_v20  ;;  %v2253_v30 = vrot.slane %v2251_v27, 4  ;;  %v21078_v23 = vpack.c.bf16 %v16038_v19, %v16038_v19  ;;  %v2249_v25 = vsel %vm16047_vm11, %v2247_v53, %v2248_v32  ;;  %vm21103_vm13 = vmmov %vm21060_vm0 }
 0x366   : > { %v2257_v4 = vrot.slane %v21074_v10, 6  ;;  %v2260_v17 = vrot.slane %v21077_v14, 6  ;;  %v2252_v1 = vsel %vm16047_vm11, %v2250_v16, %v2251_v27  ;;  %2356 = vst.msk [vmem:[#allocation2 + $0x54] sm:$0xf] %vm21079_vm15, %v2246_v44  ;;  %v21080_v52 = vpack.c.bf16 %v16053_v46, %v16053_v46  ;;  %vm21104_vm15 = vmmov %vm21060_vm0 }
 0x367   : > { %v2263_v18 = vrot.slane %v21078_v23, 6  ;;  %v2256_v61 = vrot.slane %v2254_v63, 4  ;;  %v2255_v38 = vsel %vm16047_vm11, %v2253_v30, %v2254_v63  ;;  %2357 = vst.msk [vmem:[#allocation2 + $0x58] sm:$0xf] %vm21081_vm2, %v2249_v25  ;;  %v21083_v5 = vpack.c.bf16 %v16062_v47, %v16062_v47  ;;  %v16293_v30 = vld [vmem:[#allocation2 + $0x14] sm:$0xf]  ;;  %vm21105_vm2 = vmmov %vm21060_vm0 }
 0x368   : > { %v2259_v56 = vrot.slane %v2257_v4, 4  ;;  %v2262_v35 = vrot.slane %v2260_v17, 4  ;;  %v2266_v19 = vrot.slane %v21080_v52, 6  ;;  %2358 = vst.msk [vmem:[#allocation2 + $0x5c] sm:$0xf] %vm21082_vm6, %v2252_v1  ;;  %v21084_v0 = vpack.c.bf16 %v16069_v34, %v16069_v34  ;;  %vm21108_vm6 = vmmov %vm21060_vm0 }
 0x369   : > { %v2265_v62 = vrot.slane %v2263_v18, 4  ;;  %v2258_v55 = vsel %vm16047_vm11, %v2256_v61, %v2257_v4  ;;  %v2269_v40 = vrot.slane %v21083_v5, 6  ;;  %2359 = vst.msk [vmem:[#allocation2 + $0x60] sm:$0xf] %vm21085_vm3, %v2255_v38  ;;  %v21086_v29 = vpack.c.bf16 %v16075_v3, %v16075_v3  ;;  %v16309_v38 = vld [vmem:[#allocation2 + $0x20] sm:$0xff]   ;;  %vm21109_vm3 = vmmov %vm21060_vm0 }
 0x36a   : > { %v2261_v6 = vsel %vm16047_vm11, %v2259_v56, %v2260_v17  ;;  %v2272_v32 = vrot.slane %v21084_v0, 6  ;;  %v2264_v46 = vsel %vm16047_vm11, %v2262_v35, %v2263_v18  ;;  %v2268_v20 = vrot.slane %v2266_v19, 4  ;;  %2360 = vst.msk [vmem:[#allocation2 + $0x64] sm:$0xf] %vm21087_vm4, %v2258_v55  ;;  %v2420_v56 = vld [vmem:[#allocation2 + $0x10] sm:$0xe]  ;;  %vm21110_vm4 = vmmov %vm21060_vm0 }
 0x36b   : > { %v2267_v54 = vsel %vm16047_vm11, %v2265_v62, %v2266_v19  ;;  %v2275_v21 = vrot.slane %v21086_v29, 6  ;;  %2361 = vst.msk [vmem:[#allocation2 + $0x68] sm:$0xf] %vm21088_vm5, %v2261_v6  ;;  %v2271_v47 = vrot.slane %v2269_v40, 4  ;;  %v21089_v27 = vpack.c.bf16 %v16083_v57, %v16083_v57  ;;  %v16322_v6 = vld [vmem:[#allocation2 + $0x28] sm:$0xff]   ;;  %v16339_v29 = vld [vmem:[#allocation2 + $0x30] sm:$0xff]  }
 0x36c   : > { %v2274_v34 = vrot.slane %v2272_v32, 4  ;;  %v21090_v16 = vpack.c.bf16 %v16093_v36, %v16093_v36  ;;  %2362 = vst.msk [vmem:[#allocation2 + $0x6c] sm:$0xf] %vm21060_vm0, %v2264_v46  ;;  %v2270_v3 = vsel %vm16047_vm11, %v2268_v20, %v2269_v40  ;;  %v21092_v10 = vpack.c.bf16 %v16102_v37, %v16102_v37  ;;  %v16295_v36 = vld [vmem:[#allocation2 + $0x18] sm:$0xff]  }
 0x36d   : > { %v2278_v53 = vrot.slane %v21089_v27, 6  ;;  %2363 = vst.msk [vmem:[#allocation2 + $0x70] sm:$0xf] %vm21091_vm7, %v2267_v54  ;;  %v2277_v63 = vrot.slane %v2275_v21, 4  ;;  %v21093_v57 = vpack.c.bf16 %v16110_v48, %v16110_v48  ;;  %v2273_v14 = vsel %vm16047_vm11, %v2271_v47, %v2272_v32  ;;  %v16349_v27 = vld [vmem:[#allocation2 + $0x38] sm:$0xff]  }
 0x36e   : > { %v2281_v43 = vrot.slane %v21090_v16, 6  ;;  %v2284_v4 = vrot.slane %v21092_v10, 6  ;;  %v2276_v17 = vsel %vm16047_vm11, %v2274_v34, %v2275_v21  ;;  %2364 = vst.msk [vmem:[#allocation2 + $0x74] sm:$0xf] %vm21094_vm1, %v2270_v3  ;;  %v21095_v1 = vpack.c.bf16 %v16117_v59, %v16117_v59 }
 0x36f   : > { %v2287_v44 = vrot.slane %v21093_v57, 6  ;;  %v2280_v23 = vrot.slane %v2278_v53, 4  ;;  %v2279_v37 = vsel %vm16047_vm11, %v2277_v63, %v2278_v53  ;;  %2365 = vst.msk [vmem:[#allocation2 + $0x78] sm:$0xf] %vm21096_vm9, %v2273_v14  ;;  %vm2519_vm10 = vsmask.f32 6400 }
 0x370   : > { %v2283_v18 = vrot.slane %v2281_v43, 4  ;;  %v2286_v25 = vrot.slane %v2284_v4, 4  ;;  %v2290_v61 = vrot.slane %v21095_v1, 6  ;;  %2366 = vst.msk [vmem:[#allocation2 + $0x7c] sm:$0xf] %vm21097_vm8, %v2276_v17  ;;  %v21098_v52 = vpack.c.bf16 %v16123_v8, %v16123_v8  ;;  %v16356_v63 = vld [vmem:[#allocation2 + $0x40] sm:$0xff]  }
 0x371   : > { %v2289_v48 = vrot.slane %v2287_v44, 4  ;;  %v2282_v35 = vsel %vm16047_vm11, %v2280_v23, %v2281_v43  ;;  %v21099_v59 = vpack.c.bf16 %v16130_v50, %v16130_v50  ;;  %2367 = vst.msk [vmem:[#allocation2 + $0x80] sm:$0xf] %vm21100_vm12, %v2279_v37  ;;  %v21101_v32 = vpack.c.bf16 %v16142_v2, %v16142_v2 }
 0x372   : > { %v2285_v62 = vsel %vm16047_vm11, %v2283_v18, %v2284_v4  ;;  %v2293_v19 = vrot.slane %v21098_v52, 6  ;;  %v2288_v5 = vsel %vm16047_vm11, %v2286_v25, %v2287_v44  ;;  %v2292_v0 = vrot.slane %v2290_v61, 4  ;;  %2368 = vst.msk [vmem:[#allocation2 + $0x84] sm:$0xf] %vm21102_vm14, %v2282_v35 }
 0x373   : > { %v2296_v55 = vrot.slane %v21099_v59, 6  ;;  %v2291_v40 = vsel %vm16047_vm11, %v2289_v48, %v2290_v61  ;;  %v2299_v8 = vrot.slane %v21101_v32, 6  ;;  %2369 = vst.msk [vmem:[#allocation2 + $0x88] sm:$0xf] %vm21103_vm13, %v2285_v62  ;;  %v10989_v54 = vcombine.low %v2420_v56, %v16293_v30  ;;  %v16382_v61 = vld [vmem:[#allocation2 + $0x48] sm:$0xff]  }
 0x374   : > { %v2295_v50 = vrot.slane %v2293_v19, 4  ;;  %2370 = vst.msk [vmem:[#allocation2 + $0x8c] sm:$0xf] %vm21104_vm15, %v2288_v5  ;;  %v16337_v20 = vshrl.u32 %v16295_v36, 16  ;;  %v2294_v2 = vsel %vm16047_vm11, %v2292_v0, %v2293_v19  ;;  %v16344_v47 = vshll.u32 %v16295_v36, 16  ;;  %21114 = vst [vmem:[#allocation22_spill] sm:$0xff] %v16382_v61 }
 0x375   : > { %v2298_v46 = vrot.slane %v2296_v55, 4  ;;  %2371 = vst.msk [vmem:[#allocation2 + $0x90] sm:$0xf] %vm21105_vm2, %v2291_v40  ;;  %v2301_v21 = vrot.slane %v2299_v8, 4  ;;  %v16347_v34 = vshrl.u32 %v16309_v38, 16  ;;  %v2521_v43 = vshrl.u32 %v10989_v54, 16 }
 0x376   : > { %21106 = vst [vmem:[#allocation48_spill] sm:$0xff] %v16337_v20  ;;  %21107 = vst [vmem:[#allocation50_spill] sm:$0xff] %v16344_v47  ;;  %v2297_v53 = vsel %vm16047_vm11, %v2295_v50, %v2296_v55  ;;  %v2524_v3 = vshll.u32 %v10989_v54, 16  ;;  %vm21111_vm5 = vcmask 25600   ;;  %v2531_v10 = vrot.slane %v16337_v20, 1  ;;  %v16389_v19 = vld [vmem:[#allocation2 + $0x50] sm:$0xff]  }
 0x377   : > { %v2300_v16 = vsel %vm16047_vm11, %v2298_v46, %v2299_v8  ;;  %2372 = vst.msk [vmem:[#allocation2 + $0x94] sm:$0xf] %vm21108_vm6, %v2294_v2  ;;  %v2534_v4 = vrot.slane %v16344_v47, 2  ;;  %v2540_v57 = vrot.slane %v16347_v34, 1  ;;  %v16365_v44 = vshll.u32 %v16309_v38, 16  ;;  %21115 = vst [vmem:[#allocation25_spill] sm:$0xff] %v16389_v19 }
 0x378   : > { %2373 = vst.msk [vmem:[#allocation2 + $0x98] sm:$0xf] %vm21109_vm3, %v2297_v53  ;;  %v2523_v14 = vrot.slane %v2521_v43, 1  ;;  %v2526_v17 = vrot.slane %v2524_v3, 2  ;;  %v16368_v23 = vshrl.u32 %v16322_v6, 16  ;;  %v16371_v18 = vshll.u32 %v16322_v6, 16 }
 0x379   : > { %2374 = vst.msk [vmem:[#allocation2 + $0x9c] sm:$0xf] %vm21110_vm4, %v2300_v16  ;;  %21112 = vst [vmem:[#allocation18_spill] sm:$0xff] %v16365_v44  ;;  %v16373_v37 = vor.u32 %v2534_v4, %v2531_v10  ;;  %v2543_v25 = vrot.slane %v16365_v44, 2  ;;  %v16377_v48 = vshrl.u32 %v16339_v29, 16  ;;  %v16380_v1 = vshll.u32 %v16339_v29, 16 }
 0x37a   : > { %2375 = vst.msk [vmem:[#allocation2 + $0xa0] sm:$0x3] %vm21111_vm5, %v2301_v21  ;;  %v2527_v56 = vor.u32 %v2526_v17, %v2523_v14  ;;  %v2549_v35 = vrot.slane %v16368_v23, 1  ;;  %v2552_v62 = vrot.slane %v16371_v18, 2  ;;  %v16387_v52 = vshrl.u32 %v16349_v27, 16  ;;  %v16396_v0 = vld [vmem:[#allocation2 + $0x58] sm:$0xff]  }
 0x37b   : > { %21113 = vst [vmem:[#allocation21_spill] sm:$0xff] %v16373_v37  ;;  %v2544_v59 = vor.u32 %v2543_v25, %v2540_v57  ;;  %v2558_v55 = vrot.slane %v16377_v48, 1  ;;  %v2561_v5 = vrot.slane %v16380_v1, 2  ;;  %v16394_v40 = vshll.u32 %v16349_v27, 16  ;;  %21117 = vst [vmem:[#allocation29_spill] sm:$0xff] %v16396_v0  ;;  %v16418_v16 = vld [vmem:[#allocation2 + $0x60] sm:$0xff]  }
 0x37c   : > { %v16401_v32 = vld [vmem:[%s20475_s6 + $0x8] sm:$0x3]  ;;  %v2536_v8 = vsel %vm2519_vm10, %v2527_v56, %v16373_v37  ;;  %v2553_v50 = vor.u32 %v2552_v62, %v2549_v35  ;;  %v2567_v46 = vrot.slane %v16387_v52, 1  ;;  %v16407_v54 = vshrl.u32 %v16356_v63, 16  ;;  %21121 = vst [vmem:[#allocation61_spill] sm:$0xff] %v16418_v16  ;;  %v21128_v56 = vld [vmem:[#allocation81_spill] sm:$0xff] }
 0x37d   : > { %21116 = vst [vmem:[#allocation26_spill] sm:$0xff] %v16394_v40  ;;  %21118 = vst [vmem:[#allocation59_spill] sm:$0xff] %v16401_v32  ;;  %vm21119_vm0 = vcmask 31744   ;;  %v16412_v2 = vsel %vm2519_vm10, %v16373_v37, %v2544_v59  ;;  %v2570_v21 = vrot.slane %v16394_v40, 2  ;;  %v16416_v53 = vshll.u32 %v16356_v63, 16  ;;  %v21122_v43 = vld [vmem:[#allocation76_spill] sm:$0xff] }
 0x37e   : > { %12148 = vmatprep.mubr.msk.bf16.mxu0 %vm21119_vm0, %v2536_v8  ;;  %21120 = vst [vmem:[#allocation60_spill] sm:$0xff] %v16412_v2  ;;  %v21123_v3 = vshll.u32 %v21122_v43, 16  ;;  %vm21124_vm7 = vmmov %vm21119_vm0  ;;  %v16425_v4 = vsel %vm2519_vm10, %v2544_v59, %v2553_v50  ;;  %v2576_v57 = vrot.slane %v16407_v54, 1  ;;  %v16429_v14 = vshrl.u32 %v16382_v61, 16  ;;  %v16434_v25 = vld [vmem:[#allocation2 + $0x68] sm:$0xff]   ;;  %v16465_v51 = vld [vmem:[#allocation2 + $0x78] sm:$0xff]  }
 0x37f   : > { %12149 = vmatmul.mubr.msk.bf16.vlgmr.msra.gmra.mrb[8].mxu0 %vm21124_vm7, %v16412_v2  ;;  %21125 = vst [vmem:[#allocation62_spill] sm:$0xff] %v16425_v4  ;;  %v16432_v17 = vshll.u32 %v16382_v61, 16  ;;  %21126 = vst [vmem:[#allocation63_spill] sm:$0xff] %v16434_v25  ;;  %v2579_v35 = vrot.slane %v16416_v53, 2  ;;  %v16441_v62 = vshrl.u32 %v16389_v19, 16  ;;  %v2562_v59 = vor.u32 %v2561_v5, %v2558_v55  ;;  %v16493_v41 = vld [vmem:[#allocation2 + $0x88] sm:$0xff]  }
 0x380   : > { %v2941_v10 = vrot.slane %v21123_v3, 1  ;;  %vm21127_vm1 = vmmov %vm21119_vm0  ;;  %12185 = vmatpush3.bf16.msra.mxu0 %v21128_v56  ;;  %v2571_v8 = vor.u32 %v2570_v21, %v2567_v46  ;;  %v16444_v3 = vshll.u32 %v16389_v19, 16  ;;  %v16447_v42 = vshrl.u32 %v16396_v0, 16  ;;  %v16454_v56 = vld [vmem:[#allocation2 + $0x70] sm:$0xff]   ;;  %21133 = vst [vmem:[#allocation66_spill] sm:$0xff] %v16465_v51 }
 0x381   : > { %12152 = vmatprep.mubr.msk.bf16.mxu0 %vm21127_vm1, %v16425_v4  ;;  %vm21129_vm9 = vcmask 1041408   ;;  %v16452_v49 = vshll.u32 %v16396_v0, 16  ;;  %21130 = vst [vmem:[#allocation64_spill] sm:$0xff] %v16454_v56  ;;  %v21131_v39 = vshrl.u32 %v21122_v43, 16  ;;  %v2580_v55 = vor.u32 %v2579_v35, %v2576_v57  ;;  %v16475_v43 = vld [vmem:[#allocation2 + $0x80] sm:$0xff]   ;;  %21137 = vst [vmem:[#allocation70_spill] sm:$0xff] %v16493_v41 }
 0x382   : > { %13765 = vmatprep.subr.msk.bf16.mxu0 %vm21129_vm9, %v16401_v32  ;;  %v2585_v5 = vrot.slane %v16429_v14, 1  ;;  %v2588_v46 = vrot.slane %v16432_v17, 2  ;;  %v16463_v21 = vshrl.u32 %v16418_v16, 16  ;;  %v2594_v15 = vrot.slane %v16441_v62, 1  ;;  %21134 = vst [vmem:[#allocation67_spill] sm:$0xff] %v16475_v43  ;;  %vm21138_vm8 = vmmov %vm21119_vm0  ;;  %v16505_v31 = vld [vmem:[#allocation2 + $0x90] sm:$0xff]  }
 0x383   : > { %v16458_v26 = vor.u32 %v2941_v10, %v21131_v39  ;;  %v2597_v12 = vrot.slane %v16444_v3, 2  ;;  %v16470_v11 = vshll.u32 %v16418_v16, 16  ;;  %v16473_v39 = vshrl.u32 %v16434_v25, 16  ;;  %21139 = vst [vmem:[#allocation76_spill] sm:$0xff] %v16505_v31  ;;  %vm21140_vm12 = vmmov %vm21119_vm0 }
 0x384   : > { %v16478_v10 = vsel %vm2519_vm10, %v2553_v50, %v2562_v59  ;;  %v16481_v57 = vsel %vm2519_vm10, %v2562_v59, %v2571_v8  ;;  %v2603_v35 = vrot.slane %v16447_v42, 1  ;;  %v16485_v58 = vshll.u32 %v16434_v25, 16  ;;  %vm21147_vm13 = vmmov %vm21119_vm0 }
 0x385   : > { %21132 = vst [vmem:[#allocation65_spill] sm:$0xff] %v16458_v26  ;;  %21135 = vst [vmem:[#allocation68_spill] sm:$0xff] %v16478_v10  ;;  %v2606_v22 = vrot.slane %v16452_v49, 2  ;;  %v2612_v45 = vrot.slane %v16463_v21, 1  ;;  %v2615_v9 = vrot.slane %v16470_v11, 2  ;;  %v16491_v28 = vshrl.u32 %v16454_v56, 16 }
 0x386   : > { %21136 = vst [vmem:[#allocation69_spill] sm:$0xff] %v16481_v57  ;;  %v2621_v50 = vrot.slane %v16473_v39, 1  ;;  %v2624_v59 = vrot.slane %v16485_v58, 2  ;;  %v16500_v60 = vshll.u32 %v16454_v56, 16  ;;  %v16503_v13 = vshrl.u32 %v16465_v51, 16  ;;  %v16521_v26 = vld [vmem:[#allocation2 + $0x98] sm:$0xff]   ;;  %vm21149_vm15 = vmmov %vm21119_vm0 }
 0x387   : > { %12153 = vmatmul.mubr.msk.bf16.gmra.mrb[12].mxu0 %vm21138_vm8, %v16478_v10  ;;  %v16510_v33 = vsel %vm2519_vm10, %v2571_v8, %v2580_v55  ;;  %v2589_v7 = vor.u32 %v2588_v46, %v2585_v5  ;;  %v2630_v24 = vrot.slane %v16491_v28, 1  ;;  %v16514_v10 = vshll.u32 %v16465_v51, 16  ;;  %v16530_v51 = vld [vmem:[#allocation2 + $0xa0] ss:$0 sps:$4 sm:$0x33]   ;;  %vm21160_vm2 = vmmov %vm21119_vm0 }
 0x388   : > { %12156 = vmatprep.mubr.msk.bf16.mxu0 %vm21140_vm12, %v16481_v57  ;;  %21141 = vst [vmem:[#allocation81_spill] sm:$0xff] %v16510_v33  ;;  %v2598_v4 = vor.u32 %v2597_v12, %v2594_v15  ;;  %v2633_v2 = vrot.slane %v16500_v60, 2  ;;  %v2639_v37 = vrot.slane %v16503_v13, 1  ;;  %v16519_v32 = vshrl.u32 %v16475_v43, 16  ;;  %21143 = vst [vmem:[#allocation83_spill] sm:$0xff] %v16530_v51 }
 0x389   : > { %21142 = vst [vmem:[#allocation82_spill] sm:$0xff] %v16514_v10  ;;  %v2607_v57 = vor.u32 %v2606_v22, %v2603_v35  ;;  %v2642_v8 = vrot.slane %v16514_v10, 2  ;;  %v16525_v5 = vshll.u32 %v16475_v43, 16  ;;  %v16528_v46 = vshrl.u32 %v16493_v41, 16  ;;  %vm21162_vm6 = vmmov %vm21119_vm0 }
 0x38a   : > { %vm2935_vm14 = vsmask.f32 7424  ;;  %v2616_v15 = vor.u32 %v2615_v9, %v2612_v45  ;;  %v2625_v12 = vor.u32 %v2624_v59, %v2621_v50  ;;  %v2648_v56 = vrot.slane %v16519_v32, 1  ;;  %vm21173_vm4 = vmmov %vm21119_vm0 }
 0x38b   : > { %v16534_v25 = vshll.u32 %v16493_v41, 16  ;;  %v2634_v16 = vor.u32 %v2633_v2, %v2630_v24  ;;  %v2651_v22 = vrot.slane %v16525_v5, 2  ;;  %v2657_v35 = vrot.slane %v16528_v46, 1  ;;  %vm21176_vm5 = vmmov %vm21119_vm0 }
 0x38c   : > { %v16539_v43 = vshrl.u32 %v16505_v31, 16  ;;  %v2643_v0 = vor.u32 %v2642_v8, %v2639_v37  ;;  %v16543_v61 = vshll.u32 %v16505_v31, 16  ;;  %v16547_v45 = vsel %vm2519_vm10, %v2580_v55, %v2589_v7  ;;  %v2378_v55 = vld [vmem:[#allocation2 + $0x10] sm:$0xf]  ;;  %vm21194_vm7 = vmmov %vm21127_vm1 }
 0x38d   : > { %v2660_v19 = vrot.slane %v16534_v25, 2  ;;  %21145 = vst [vmem:[#allocation85_spill] sm:$0xff] %v16547_v45  ;;  %v16550_v24 = vsel %vm2519_vm10, %v2589_v7, %v2598_v4  ;;  %v2652_v2 = vor.u32 %v2651_v22, %v2648_v56  ;;  %v16556_v37 = vsel %vm2519_vm10, %v2598_v4, %v2607_v57  ;;  %vm21210_vm8 = vmmov %vm21127_vm1 }
 0x38e   : > { %21144 = vst [vmem:[#allocation84_spill] sm:$0xff] %v16543_v61  ;;  %21146 = vst [vmem:[#allocation86_spill] sm:$0xff] %v16550_v24  ;;  %v2666_v8 = vrot.slane %v16539_v43, 1  ;;  %v2669_v9 = vrot.slane %v16543_v61, 2  ;;  %v16565_v7 = vsel %vm2519_vm10, %v2607_v57, %v2616_v15  ;;  %v16568_v56 = vsel %vm2519_vm10, %v2616_v15, %v2625_v12 }
 0x38f   : > { %12157 = vmatmul.mubr.msk.bf16.gmra.mrb[16].mxu0 %vm21147_vm13, %v16510_v33  ;;  %21148 = vst [vmem:[#allocation87_spill] sm:$0xff] %v16556_v37  ;;  %v16558_v59 = vor.u32 %v2660_v19, %v2657_v35  ;;  %21150 = vst [vmem:[#allocation88_spill] sm:$0xff] %v16565_v7  ;;  %v2682_v22 = vshrl.u32 %v16530_v51, 16  ;;  %v16572_v4 = vcombine.low %v2378_v55, %v16293_v30  ;;  %v21154_v50 = vshrl.u32 %v16521_v26, 16 }
 0x390   : > { %12160 = vmatprep.mubr.msk.bf16.mxu0 %vm21149_vm15, %v16547_v45  ;;  %21151 = vst [vmem:[#allocation89_spill] sm:$0xff] %v16568_v56  ;;  %v16575_v19 = vsel %vm2519_vm10, %v2625_v12, %v2634_v16  ;;  %v16578_v35 = vsel %vm2519_vm10, %v2634_v16, %v2643_v0  ;;  %v2951_v57 = vrot.slane %v16344_v47, 1  ;;  %v16584_v33 = vsel %vm2519_vm10, %v2643_v0, %v2652_v2  ;;  %vm21211_vm12 = vmmov %vm21127_vm1 }
 0x391   : > { %21152 = vst [vmem:[#allocation90_spill] sm:$0xff] %v16575_v19  ;;  %21153 = vst [vmem:[#allocation91_spill] sm:$0xff] %v16578_v35  ;;  %v2675_v45 = vrot.slane %v21154_v50, 1  ;;  %v21156_v15 = vshll.u32 %v16521_v26, 16  ;;  %v2685_v55 = vshll.u32 %v16530_v51, 16  ;;  %v20654_v41 = vshll.u32 %v16572_v4, 16 }
 0x392   : > { %21155 = vst [vmem:[#allocation92_spill] sm:$0xff] %v16584_v33  ;;  %v16592_v12 = vsel %vm2519_vm10, %v2652_v2, %v16558_v59  ;;  %v16594_v16 = vor.u32 %v2669_v9, %v2666_v8  ;;  %v2953_v50 = vor.u32 %v2951_v57, %v16337_v20  ;;  %v2954_v47 = vrot.slane %v16365_v44, 1  ;;  %vm21222_vm13 = vmmov %vm21127_vm1 }
 0x393   : > { %v2678_v31 = vrot.slane %v21156_v15, 2  ;;  %21157 = vst [vmem:[#allocation93_spill] sm:$0xff] %v16592_v12  ;;  %v16598_v35 = vrot.slane %v2682_v22, 1  ;;  %v16602_v0 = vrot.slane %v20654_v41, 1  ;;  %v20657_v15 = vshrl.u32 %v16572_v4, 16  ;;  %vm21223_vm15 = vmmov %vm21127_vm1 }
 0x394   : > { %21158 = vst [vmem:[#allocation94_spill] sm:$0xff] %v16594_v16  ;;  %v2957_v33 = vrot.slane %v16371_v18, 1  ;;  %v16607_v51 = vsel %vm2935_vm14, %v2953_v50, %v2954_v47  ;;  %v2956_v9 = vor.u32 %v2954_v47, %v16347_v34  ;;  %v2960_v2 = vrot.slane %v16380_v1, 1 }
 0x395   : > { %21159 = vst [vmem:[#allocation95_spill] sm:$0xff] %v16607_v51  ;;  %v2963_v8 = vrot.slane %v16394_v40, 1  ;;  %v2679_v44 = vor.u32 %v2678_v31, %v2675_v45  ;;  %v2687_v22 = vrot.slane %v2685_v55, 2  ;;  %v2950_v41 = vor.u32 %v20657_v15, %v16602_v0 }
 0x396   : > { %v2959_v20 = vor.u32 %v2957_v33, %v16368_v23  ;;  %v16619_v50 = vsel %vm2935_vm14, %v2956_v9, %v2957_v33  ;;  %v2962_v47 = vor.u32 %v2960_v2, %v16377_v48  ;;  %v2966_v40 = vrot.slane %v16416_v53, 1 }
 0x397   : > { %12161 = vmatmul.mubr.msk.bf16.gmra.mrb[20].mxu0 %vm21160_vm2, %v16550_v24  ;;  %21161 = vst [vmem:[#allocation96_spill] sm:$0xff] %v16619_v50  ;;  %v2965_v51 = vor.u32 %v2963_v8, %v16387_v52  ;;  %v16627_v31 = vsel %vm2935_vm14, %v2950_v41, %v2951_v57  ;;  %v2969_v55 = vrot.slane %v16432_v17, 1  ;;  %v2972_v33 = vrot.slane %v16444_v3, 1  ;;  %vm21225_vm2 = vmmov %vm21127_vm1 }
 0x398   : > { %12164 = vmatprep.mubr.msk.bf16.mxu0 %vm21162_vm6, %v16556_v37  ;;  %21163 = vst [vmem:[#allocation97_spill] sm:$0xff] %v16627_v31  ;;  %v16630_v45 = vsel %vm2935_vm14, %v2959_v20, %v2960_v2  ;;  %vm3244_vm3 = vcmask 1045504   ;;  %v16635_v9 = vsel %vm2935_vm14, %v2962_v47, %v2963_v8  ;;  %v2968_v24 = vor.u32 %v2966_v40, %v16407_v54  ;;  %vm21226_vm6 = vmmov %vm21127_vm1 }
 0x399   : > { %21164 = vst [vmem:[#allocation98_spill] sm:$0xff] %v16630_v45  ;;  %21165 = vst [vmem:[#allocation99_spill] sm:$0xff] %v16635_v9  ;;  %v16638_v15 = vsel %vm2935_vm14, %v2965_v51, %v2966_v40  ;;  %v2975_v37 = vrot.slane %v16452_v49, 1  ;;  %v2971_v41 = vor.u32 %v2969_v55, %v16429_v14  ;;  %v2974_v20 = vor.u32 %v2972_v33, %v16441_v62 }
 0x39a   : > { %21166 = vst [vmem:[#allocation100_spill] sm:$0xff] %v16638_v15  ;;  %v2978_v57 = vrot.slane %v16470_v11, 1  ;;  %v2981_v2 = vrot.slane %v16485_v58, 1  ;;  %v16647_v45 = vsel %vm2935_vm14, %v2968_v24, %v2969_v55  ;;  %v2984_v51 = vrot.slane %v16500_v60, 1 }
 0x39b   : > { %21167 = vst [vmem:[#allocation101_spill] sm:$0xff] %v16647_v45  ;;  %v2977_v8 = vor.u32 %v2975_v37, %v16447_v42  ;;  %v2987_v47 = vrot.slane %v16514_v10, 1  ;;  %v16653_v40 = vsel %vm2935_vm14, %v2971_v41, %v2972_v33  ;;  %v16656_v15 = vsel %vm2935_vm14, %v2974_v20, %v2975_v37 }
 0x39c   : > { %21168 = vst [vmem:[#allocation102_spill] sm:$0xff] %v16653_v40  ;;  %21169 = vst [vmem:[#allocation103_spill] sm:$0xff] %v16656_v15  ;;  %v2980_v9 = vor.u32 %v2978_v57, %v16463_v21  ;;  %v2983_v50 = vor.u32 %v2981_v2, %v16473_v39  ;;  %v2986_v24 = vor.u32 %v2984_v51, %v16491_v28  ;;  %v2990_v45 = vrot.slane %v16525_v5, 1  ;;  %v21206_v40 = vld [vmem:[#allocation83_spill] sm:$0xff] }
 0x39d   : > { %v16661_v31 = vsel %vm2935_vm14, %v2977_v8, %v2978_v57  ;;  %v2989_v55 = vor.u32 %v2987_v47, %v16503_v13  ;;  %v2993_v37 = vrot.slane %v16534_v25, 1  ;;  %v2996_v41 = vrot.slane %v16543_v61, 1 }
 0x39e   : > { %21170 = vst [vmem:[#allocation104_spill] sm:$0xff] %v16661_v31  ;;  %v16667_v10 = vsel %vm2935_vm14, %v2980_v9, %v2981_v2  ;;  %v16670_v33 = vsel %vm2935_vm14, %v2983_v50, %v2984_v51  ;;  %v2688_v20 = vor.u32 %v2687_v22, %v16598_v35  ;;  %v16678_v57 = vsel %vm2935_vm14, %v2986_v24, %v2987_v47  ;;  %v3238_v2 = vld [vmem:[#allocation2 + $0x10] sm:$0xc] }
 0x39f   : > { %21171 = vst [vmem:[#allocation105_spill] sm:$0xff] %v16667_v10  ;;  %21172 = vst [vmem:[#allocation106_spill] sm:$0xff] %v16670_v33  ;;  %12165 = vmatmul.mubr.msk.bf16.gmra.mrb[24].mxu0 %vm21173_vm4, %v16565_v7  ;;  %v16681_v8 = vsel %vm2935_vm14, %v2989_v55, %v2990_v45  ;;  %v2992_v9 = vor.u32 %v2990_v45, %v16519_v32  ;;  %v2995_v50 = vor.u32 %v2993_v37, %v16528_v46  ;;  %vm3519_vm0 = vcmask 1046528  }
 0x3a0   : > { %21174 = vst [vmem:[#allocation107_spill] sm:$0xff] %v16678_v57  ;;  %21175 = vst [vmem:[#allocation108_spill] sm:$0xff] %v16681_v8  ;;  %12168 = vmatprep.mubr.msk.bf16.mxu0 %vm21176_vm5, %v16568_v56  ;;  %v16688_v51 = vor.u32 %v2996_v41, %v16539_v43  ;;  %v16691_v7 = vcombine.low %v3238_v2, %v16293_v30  ;;  %v3246_v35 = vrot.slane %v16295_v36, 2  ;;  %v3248_v47 = vrot.slane %v16309_v38, 2  ;;  %v21188_v8 = vld [vmem:[#allocation29_spill] sm:$0xff] }
 0x3a1   : > { %v16697_v22 = vsel %vm2519_vm10, %v16558_v59, %v16594_v16  ;;  %v16700_v45 = vsel %vm2935_vm14, %v2992_v9, %v2993_v37  ;;  %v3250_v24 = vrot.slane %v16322_v6, 2  ;;  %v16706_v55 = vsel %vm2519_vm10, %v16594_v16, %v2679_v44  ;;  %vm21240_vm5 = vmmov %vm21127_vm1 }
 0x3a2   : > { %21177 = vst [vmem:[#allocation109_spill] sm:$0xff] %v16688_v51  ;;  %21178 = vst [vmem:[#allocation110_spill] sm:$0xff] %v16697_v22  ;;  %v16709_v30 = vsel %vm2935_vm14, %v2995_v50, %v2996_v41  ;;  %v3245_v2 = vrot.slane %v16691_v7, 2  ;;  %v3252_v59 = vrot.slane %v16339_v29, 2  ;;  %v16714_v56 = vsel %vm2519_vm10, %v2679_v44, %v2688_v20  ;;  %v21187_v20 = vld [vmem:[#allocation25_spill] sm:$0xff] }
 0x3a3   : > { %21179 = vst [vmem:[#allocation111_spill] sm:$0xff] %v16700_v45  ;;  %21180 = vst [vmem:[#allocation112_spill] sm:$0xff] %v16709_v30  ;;  %v16717_v37 = vsel %vm3244_vm3, %v3246_v35, %v3248_v47  ;;  %v16720_v9 = vsel %vm3244_vm3, %v3248_v47, %v3250_v24  ;;  %v3254_v51 = vrot.slane %v16349_v27, 2  ;;  %v3256_v50 = vrot.slane %v16356_v63, 2  ;;  %v21185_v30 = vld [vmem:[#allocation22_spill] sm:$0xff] }
 0x3a4   : > { %21181 = vst [vmem:[#allocation113_spill] sm:$0xff] %v16717_v37  ;;  %21182 = vst [vmem:[#allocation114_spill] sm:$0xff] %v16720_v9  ;;  %v16724_v16 = vsel %vm3244_vm3, %v3245_v2, %v3246_v35  ;;  %v16727_v41 = vsel %vm3244_vm3, %v3250_v24, %v3252_v59  ;;  %v3258_v45 = vrot.slane %v21185_v30, 2  ;;  %v3260_v37 = vrot.slane %v21187_v20, 2  ;;  %v21189_v9 = vld [vmem:[#allocation61_spill] sm:$0xff]  ;;  %v21192_v24 = vld [vmem:[#allocation63_spill] sm:$0xff] }
 0x3a5   : > { %21183 = vst [vmem:[#allocation115_spill] sm:$0xff] %v16724_v16  ;;  %21184 = vst [vmem:[#allocation116_spill] sm:$0xff] %v16727_v41  ;;  %v16732_v44 = vsel %vm3244_vm3, %v3252_v59, %v3254_v51  ;;  %v3262_v47 = vrot.slane %v21188_v8, 2  ;;  %v3264_v57 = vrot.slane %v21189_v9, 2  ;;  %v16738_v33 = vsel %vm3244_vm3, %v3254_v51, %v3256_v50  ;;  %v21193_v41 = vld [vmem:[#allocation64_spill] sm:$0xff]  ;;  %v21198_v51 = vld [vmem:[#allocation66_spill] sm:$0xff] }
 0x3a6   : > { %21186 = vst [vmem:[#allocation22_spill] sm:$0xff] %v16732_v44  ;;  %21190 = vst [vmem:[#allocation25_spill] sm:$0xff] %v16738_v33  ;;  %v16741_v35 = vsel %vm3244_vm3, %v3256_v50, %v3258_v45  ;;  %v3266_v2 = vrot.slane %v21192_v24, 2  ;;  %v3268_v16 = vrot.slane %v21193_v41, 2  ;;  %v16748_v59 = vsel %vm3244_vm3, %v3258_v45, %v3260_v37  ;;  %v21199_v50 = vld [vmem:[#allocation91_spill] sm:$0xff] }
 0x3a7   : > { %21191 = vst [vmem:[#allocation29_spill] sm:$0xff] %v16741_v35  ;;  %12169 = vmatmul.mubr.msk.bf16.gmra.mrb[28].mxu0 %vm21194_vm7, %v16575_v19  ;;  %21195 = vst [vmem:[#allocation61_spill] sm:$0xff] %v16748_v59  ;;  %v16751_v44 = vsel %vm3244_vm3, %v3260_v37, %v3262_v47  ;;  %v16754_v10 = vsel %vm3244_vm3, %v3262_v47, %v3264_v57  ;;  %v3270_v33 = vrot.slane %v21198_v51, 2  ;;  %v21202_v19 = vld [vmem:[#allocation67_spill] sm:$0xff]  ;;  %v21203_v59 = vld [vmem:[#allocation70_spill] sm:$0xff]  ;;  %v3280_v61 = vrot.slane %v21206_v40, 2 }
 0x3a8   : > { %21196 = vst [vmem:[#allocation63_spill] sm:$0xff] %v16751_v44  ;;  %21197 = vst [vmem:[#allocation64_spill] sm:$0xff] %v16754_v10  ;;  %12172 = vmatprep.mubr.msk.bf16.mxu0 %vm21127_vm1, %v21199_v50  ;;  %v16760_v35 = vsel %vm3244_vm3, %v3264_v57, %v3266_v2  ;;  %v16763_v31 = vsel %vm3244_vm3, %v3266_v2, %v3268_v16  ;;  %v3272_v45 = vrot.slane %v21202_v19, 2  ;;  %v3274_v15 = vrot.slane %v21203_v59, 2  ;;  %v21205_v47 = vld [vmem:[#allocation76_spill] sm:$0xff] }
 0x3a9   : > { %21200 = vst [vmem:[#allocation66_spill] sm:$0xff] %v16760_v35  ;;  %21201 = vst [vmem:[#allocation117_spill] sm:$0xff] %v16763_v31  ;;  %v16768_v37 = vsel %vm3244_vm3, %v3268_v16, %v3270_v33  ;;  %v3276_v10 = vrot.slane %v21205_v47, 2  ;;  %v3278_v44 = vrot.slane %v16521_v26, 2  ;;  %v20666_v2 = vrot.slane %v16572_v4, 1 }
 0x3aa   : > { %21204 = vst [vmem:[#allocation67_spill] sm:$0xff] %v16768_v37  ;;  %v16774_v50 = vsel %vm3244_vm3, %v3270_v33, %v3272_v45  ;;  %v16777_v57 = vsel %vm3244_vm3, %v3272_v45, %v3274_v15  ;;  %v3523_v31 = vrot.slane %v16295_v36, 1  ;;  %v3525_v40 = vrot.slane %v16309_v38, 1  ;;  %v21208_v33 = vld [vmem:[#allocation65_spill] sm:$0xff]  ;;  %vm21244_vm7 = vmmov %vm21127_vm1 }
 0x3ab   : > { %v16782_v35 = vsel %vm3244_vm3, %v3274_v15, %v3276_v10  ;;  %v16785_v16 = vsel %vm3244_vm3, %v3276_v10, %v3278_v44  ;;  %v16788_v37 = vsel %vm3244_vm3, %v3278_v44, %v3280_v61  ;;  %v16794_v45 = vsel %vm2935_vm14, %v21208_v33, %v16602_v0  ;;  %v16809_v0 = vld [vmem:[#allocation2 + $0x98] ss:$0 sps:$4 sm:$0x11]  }
 0x3ac   : > { %21207 = vst [vmem:[#allocation70_spill] sm:$0xff] %v16785_v16  ;;  %v16799_v36 = vsel %vm3519_vm0, %v20666_v2, %v3523_v31  ;;  %v3527_v15 = vrot.slane %v16322_v6, 1  ;;  %v3529_v10 = vrot.slane %v16339_v29, 1  ;;  %v16804_v16 = vsel %vm3519_vm0, %v3523_v31, %v3525_v40  ;;  %v21209_v31 = vld [vmem:[#allocation92_spill] sm:$0xff] }
 0x3ad   : > { %v3531_v61 = vrot.slane %v16349_v27, 1  ;;  %v3533_v38 = vrot.slane %v16356_v63, 1  ;;  %v3535_v44 = vrot.slane %v21185_v30, 1  ;;  %v3537_v6 = vrot.slane %v21187_v20, 1 }
 0x3ae   : > { %v16812_v33 = vsel %vm3519_vm0, %v3525_v40, %v3527_v15  ;;  %v16815_v2 = vsel %vm3519_vm0, %v3527_v15, %v3529_v10  ;;  %v3539_v29 = vrot.slane %v21188_v8, 1  ;;  %vm3797_vm9 = vsmask.f32 5376 }
 0x3af   : > { %12173 = vmatmul.mubr.msk.bf16.gmra.mrb[32].mxu0 %vm21210_vm8, %v21209_v31  ;;  %v16822_v27 = vsel %vm3519_vm0, %v3529_v10, %v3531_v61  ;;  %v16825_v63 = vsel %vm3519_vm0, %v3531_v61, %v3533_v38  ;;  %v16828_v30 = vsel %vm3519_vm0, %v3533_v38, %v3535_v44  ;;  %v3541_v40 = vrot.slane %v21189_v9, 1  ;;  %vm21250_vm8 = vmmov %vm21225_vm2 }
 0x3b0   : > { %12176 = vmatprep.mubr.msk.bf16.mxu0 %vm21211_vm12, %v16592_v12  ;;  %v16834_v8 = vsel %vm3519_vm0, %v3535_v44, %v3537_v6  ;;  %v16837_v20 = vsel %vm3519_vm0, %v3537_v6, %v3539_v29  ;;  %v3543_v15 = vrot.slane %v21192_v24, 1  ;;  %v3545_v10 = vrot.slane %v21193_v41, 1  ;;  %vm21252_vm12 = vmmov %vm21225_vm2 }
 0x3b1   : > { %v16842_v61 = vsel %vm3519_vm0, %v3539_v29, %v3541_v40  ;;  %v3547_v38 = vrot.slane %v21198_v51, 1  ;;  %v3549_v9 = vrot.slane %v21202_v19, 1  ;;  %v3551_v31 = vrot.slane %v21203_v59, 1 }
 0x3b2   : > { %21212 = vst [vmem:[#allocation76_spill] sm:$0xff] %v16842_v61  ;;  %v16848_v12 = vsel %vm3519_vm0, %v3541_v40, %v3543_v15  ;;  %v16851_v44 = vsel %vm3519_vm0, %v3543_v15, %v3545_v10  ;;  %v3553_v6 = vrot.slane %v21205_v47, 1  ;;  %v3555_v24 = vrot.slane %v16809_v0, 1  ;;  %v21219_v15 = vld [vmem:[#allocation48_spill] sm:$0xff] }
 0x3b3   : > { %21213 = vst [vmem:[#allocation83_spill] sm:$0xff] %v16848_v12  ;;  %21214 = vst [vmem:[#allocation65_spill] sm:$0xff] %v16851_v44  ;;  %v16856_v41 = vsel %vm3519_vm0, %v3545_v10, %v3547_v38  ;;  %v16859_v29 = vsel %vm3519_vm0, %v3547_v38, %v3549_v9  ;;  %v16862_v19 = vsel %vm3519_vm0, %v3549_v9, %v3551_v31  ;;  %v3799_v59 = vshrl.u32 %v16691_v7, 16 }
 0x3b4   : > { %21215 = vst [vmem:[#allocation118_spill] sm:$0xff] %v16856_v41  ;;  %21216 = vst [vmem:[#allocation119_spill] sm:$0xff] %v16859_v29  ;;  %v16866_v51 = vsel %vm3519_vm0, %v3551_v31, %v3553_v6  ;;  %v16869_v40 = vsel %vm3519_vm0, %v3553_v6, %v3555_v24  ;;  %v3802_v47 = vshll.u32 %v16691_v7, 16  ;;  %v3806_v44 = vrot.slane %v21219_v15, 2  ;;  %v21220_v41 = vld [vmem:[#allocation50_spill] sm:$0xff] }
 0x3b5   : > { %21217 = vst [vmem:[#allocation120_spill] sm:$0xff] %v16862_v19  ;;  %21218 = vst [vmem:[#allocation121_spill] sm:$0xff] %v16866_v51  ;;  %v3801_v10 = vrot.slane %v3799_v59, 2  ;;  %v3807_v12 = vrot.slane %v21220_v41, 3  ;;  %v3810_v38 = vrot.slane %v16347_v34, 2  ;;  %v21221_v29 = vld [vmem:[#allocation18_spill] sm:$0xff] }
 0x3b6   : > { %v3811_v9 = vrot.slane %v21221_v29, 3  ;;  %v3804_v19 = vrot.slane %v3802_v47, 3  ;;  %v3814_v61 = vrot.slane %v16368_v23, 2  ;;  %v3815_v31 = vrot.slane %v16371_v18, 3  ;;  %v21224_v59 = vld [vmem:[#allocation26_spill] sm:$0xff] }
 0x3b7   : > { %v3818_v51 = vrot.slane %v16377_v48, 2  ;;  %12177 = vmatmul.mubr.msk.bf16.gmra.mrb[36].mxu0 %vm21222_vm13, %v16697_v22  ;;  %v3808_v7 = vor.u32 %v3807_v12, %v3806_v44  ;;  %v3819_v24 = vrot.slane %v16380_v1, 3  ;;  %v3822_v41 = vrot.slane %v16387_v52, 2  ;;  %vm21254_vm13 = vmmov %vm21225_vm2  ;;  %v21266_v22 = vld [vmem:[#allocation104_spill] sm:$0xff] }
 0x3b8   : > { %v3812_v6 = vor.u32 %v3811_v9, %v3810_v38  ;;  %12180 = vmatprep.mubr.msk.bf16.mxu0 %vm21223_vm15, %v16706_v55  ;;  %v3805_v34 = vor.u32 %v3804_v19, %v3801_v10  ;;  %v3816_v29 = vor.u32 %v3815_v31, %v3814_v61  ;;  %v3823_v23 = vrot.slane %v21224_v59, 3  ;;  %vm21256_vm15 = vmmov %vm21225_vm2 }
 0x3b9   : > { %v3826_v18 = vrot.slane %v16407_v54, 2  ;;  %v3820_v47 = vor.u32 %v3819_v24, %v3818_v51  ;;  %v3827_v12 = vrot.slane %v16416_v53, 3  ;;  %v3830_v44 = vrot.slane %v16429_v14, 2 }
 0x3ba   : > { %v16888_v48 = vsel %vm3797_vm9, %v3808_v7, %v3812_v6  ;;  %v16893_v1 = vsel %vm3797_vm9, %v3805_v34, %v3808_v7  ;;  %v16896_v52 = vsel %vm3797_vm9, %v3812_v6, %v3816_v29  ;;  %v3824_v55 = vor.u32 %v3823_v23, %v3822_v41  ;;  %v21227_v34 = vld [vmem:[#allocation82_spill] sm:$0xff] }
 0x3bb   : > { %v3831_v61 = vrot.slane %v16432_v17, 3  ;;  %v16900_v19 = vsel %vm3797_vm9, %v3816_v29, %v3820_v47  ;;  %v3828_v54 = vor.u32 %v3827_v12, %v3826_v18  ;;  %v3834_v15 = vrot.slane %v16441_v62, 2 }
 0x3bc   : > { %v3835_v51 = vrot.slane %v16444_v3, 3  ;;  %v16905_v53 = vsel %vm3797_vm9, %v3820_v47, %v3824_v55  ;;  %v3838_v10 = vrot.slane %v16447_v42, 2  ;;  %v3839_v38 = vrot.slane %v16452_v49, 3 }
 0x3bd   : > { %v3832_v14 = vor.u32 %v3831_v61, %v3830_v44  ;;  %v16910_v9 = vsel %vm3797_vm9, %v3824_v55, %v3828_v54  ;;  %v3842_v31 = vrot.slane %v16463_v21, 2  ;;  %v3843_v7 = vrot.slane %v16470_v11, 3  ;;  %v21230_v55 = vld [vmem:[#allocation84_spill] sm:$0xff] }
 0x3be   : > { %v3836_v17 = vor.u32 %v3835_v51, %v3834_v15  ;;  %v3840_v3 = vor.u32 %v3839_v38, %v3838_v10  ;;  %v3846_v6 = vrot.slane %v16473_v39, 2  ;;  %v3847_v24 = vrot.slane %v16485_v58, 3 }
 0x3bf   : > { %v16915_v62 = vsel %vm3797_vm9, %v3828_v54, %v3832_v14  ;;  %12181 = vmatmul.mubr.msk.bf16.gmra.mrb[40].mxu0 %vm21225_vm2, %v16714_v56  ;;  %v3844_v49 = vor.u32 %v3843_v7, %v3842_v31  ;;  %v3850_v41 = vrot.slane %v16491_v28, 2  ;;  %v3851_v21 = vrot.slane %v16500_v60, 3  ;;  %v21239_v7 = vld [vmem:[#allocation97_spill] sm:$0xff] }
 0x3c0   : > { %v16922_v42 = vsel %vm3797_vm9, %v3832_v14, %v3836_v17  ;;  %12186 = vmatprep.mubr.msk.bf16.mxu0 %vm21226_vm6, %v16794_v45  ;;  %v16929_v11 = vsel %vm3797_vm9, %v3836_v17, %v3840_v3  ;;  %v3848_v39 = vor.u32 %v3847_v24, %v3846_v6  ;;  %v3854_v58 = vrot.slane %v16503_v13, 2  ;;  %v21234_v14 = vld [vmem:[#allocation59_spill] sm:$0xff]  ;;  %vm21262_vm6 = vmmov %vm21225_vm2 }
 0x3c1   : > { %v3855_v29 = vrot.slane %v21227_v34, 3  ;;  %v16934_v56 = vsel %vm3797_vm9, %v3840_v3, %v3844_v49  ;;  %v3852_v59 = vor.u32 %v3851_v21, %v3850_v41  ;;  %v3858_v23 = vrot.slane %v16519_v32, 2  ;;  %v21243_v24 = vld [vmem:[#allocation95_spill] sm:$0xff]  ;;  %v21251_v34 = vld [vmem:[#allocation98_spill] sm:$0xff] }
 0x3c2   : > { %v3859_v28 = vrot.slane %v16525_v5, 3  ;;  %v16939_v60 = vsel %vm3797_vm9, %v3844_v49, %v3848_v39  ;;  %v3862_v18 = vrot.slane %v16528_v46, 2  ;;  %v3863_v47 = vrot.slane %v16534_v25, 3 }
 0x3c3   : > { %21228 = vst [vmem:[#allocation48_spill] sm:$0xff] %v16939_v60  ;;  %v3856_v45 = vor.u32 %v3855_v29, %v3854_v58  ;;  %v16944_v13 = vsel %vm3797_vm9, %v3848_v39, %v3852_v59  ;;  %v3866_v44 = vrot.slane %v16539_v43, 2  ;;  %v3867_v61 = vrot.slane %v21230_v55, 3  ;;  %v16963_v43 = vld [vmem:[%s20475_s6 + $0x2] sm:$0x3]  ;;  %v21249_v58 = vld [vmem:[#allocation96_spill] sm:$0xff] }
 0x3c4   : > { %21229 = vst [vmem:[#allocation50_spill] sm:$0xff] %v16944_v13  ;;  %v3860_v12 = vor.u32 %v3859_v28, %v3858_v23  ;;  %v3864_v5 = vor.u32 %v3863_v47, %v3862_v18  ;;  %v21232_v54 = vshrl.u32 %v16521_v26, 16  ;;  %v21233_v51 = vshll.u32 %v16521_v26, 16  ;;  %v21253_v29 = vld [vmem:[#allocation99_spill] sm:$0xff]  ;;  %v16999_v28 = vld [vmem:[#allocation2 + $0x28] sm:$0xff]   ;;  %v17003_v18 = vld [vmem:[#allocation2 + $0x38] sm:$0xff]  }
 0x3c5   : > { %v16949_v32 = vsel %vm3797_vm9, %v3852_v59, %v3856_v45  ;;  %vm21235_vm4 = vcmask 1041408   ;;  %v3868_v38 = vor.u32 %v3867_v61, %v3866_v44  ;;  %v21242_v3 = vshrl.u32 %v16572_v4, 16  ;;  %v21255_v59 = vld [vmem:[#allocation100_spill] sm:$0xff]  ;;  %v16997_v23 = vld [vmem:[#allocation2 + $0x20] sm:$0xff]   ;;  %21258 = vst [vmem:[#allocation98_spill] sm:$0xff] %v16999_v28  ;;  %21259 = vst [vmem:[#allocation99_spill] sm:$0xff] %v17003_v18 }
 0x3c6   : > { %21231 = vst [vmem:[#allocation18_spill] sm:$0xff] %v16949_v32  ;;  %v3870_v15 = vrot.slane %v21232_v54, 2  ;;  %v3871_v46 = vrot.slane %v21233_v51, 3  ;;  %v3337_v25 = vsel %vm21235_vm4, %v21234_v14, 0  ;;  %v16958_v10 = vsel %vm3797_vm9, %v3856_v45, %v3860_v12  ;;  %vm21247_vm1 = vmmov %vm21235_vm4  ;;  %v17001_v45 = vld [vmem:[#allocation2 + $0x30] sm:$0xff]   ;;  %v17005_v47 = vld [vmem:[#allocation2 + $0x40] sm:$0xff]  }
 0x3c7   : > { %21236 = vst [vmem:[#allocation26_spill] sm:$0xff] %v16958_v10  ;;  %v16966_v17 = vsel %vm3797_vm9, %v3860_v12, %v3864_v5  ;;  %12187 = vmatmul.mubr.msk.bf16.vlgmr.msra.gmra.mrb[8].mxu0 %vm21240_vm5, %v21239_v7  ;;  %v16973_v26 = vsel %vm3797_vm9, %v3864_v5, %v3868_v38  ;;  %v4128_v6 = vrot.slane %v21242_v3, 1  ;;  %v21246_v41 = vshll.u32 %v16572_v4, 16  ;;  %21257 = vst [vmem:[#allocation96_spill] sm:$0xff] %v16997_v23  ;;  %v17007_v12 = vld [vmem:[#allocation2 + $0x48] sm:$0xff]   ;;  %v21260_v44 = vld [vmem:[#allocation101_spill] sm:$0xff] }
 0x3c8   : > { %21237 = vst [vmem:[#allocation82_spill] sm:$0xff] %v16966_v17  ;;  %v16968_v31 = vor.u32 %v3871_v46, %v3870_v15  ;;  %21241 = vst [vmem:[#allocation59_spill] sm:$0xff] %v16973_v26  ;;  %12190 = vmatprep.mubr.msk.bf16.mxu0 %vm21244_vm7, %v21243_v24  ;;  %12223 = vmatpush3.bf16.msra.mxu0 %v3337_v25  ;;  %v17011_v55 = vld [vmem:[#allocation2 + $0x50] sm:$0xff]   ;;  %v17013_v61 = vld [vmem:[#allocation2 + $0x58] sm:$0xff]   ;;  %vm4909_vm5 = vcmask 1044480   ;;  %v4911_v3 = vrot.slane %v16997_v23, 3 }
 0x3c9   : > { %v4129_v21 = vrot.slane %v21246_v41, 2  ;;  %13766 = vmatprep.subr.msk.bf16.mxu0 %vm21247_vm1, %v16963_v43  ;;  %v21261_v5 = vld [vmem:[#allocation102_spill] sm:$0xff]  ;;  %v17021_v14 = vld [vmem:[#allocation2 + $0x60] sm:$0xff]   ;;  %v17023_v25 = vld [vmem:[#allocation2 + $0x68] sm:$0xff]   ;;  %v4915_v54 = vrot.slane %v17001_v45, 3 }
 0x3ca   : > { %21238 = vst [vmem:[#allocation84_spill] sm:$0xff] %v16968_v31  ;;  %v16981_v49 = vsel %vm3797_vm9, %v3868_v38, %v16968_v31  ;;  %v17025_v38 = vld [vmem:[#allocation2 + $0x1c] sm:$0xf]  ;;  %v17031_v41 = vld [vmem:[#allocation2 + $0x70] sm:$0xff]   ;;  %v17045_v7 = vld [vmem:[#allocation2 + $0x88] sm:$0xff]  }
 0x3cb   : > { %21245 = vst [vmem:[#allocation97_spill] sm:$0xff] %v16981_v49  ;;  %v16987_v39 = vor.u32 %v4129_v21, %v4128_v6  ;;  %21263 = vst [vmem:[#allocation100_spill] sm:$0xff] %v17025_v38  ;;  %v17033_v21 = vld [vmem:[#allocation2 + $0x78] sm:$0xff]   ;;  %v17051_v46 = vld [vmem:[#allocation2 + $0x90] sm:$0xff]   ;;  %v4917_v6 = vrot.slane %v17003_v18, 3 }
 0x3cc   : > { %v17057_v51 = vld [vmem:[#allocation2 + $0x98] sm:$0xff]   ;;  %v21264_v15 = vld [vmem:[#allocation103_spill] sm:$0xff]  ;;  %vm21265_vm4 = vmmov %vm21225_vm2 }
 0x3cd   : > { %21248 = vst [vmem:[#allocation95_spill] sm:$0xff] %v16987_v39  ;;  %v17067_v24 = vld [vmem:[#allocation2 + $0xa0] sm:$0xff]   ;;  %vm21267_vm7 = vmmov %vm21225_vm2  ;;  %v17092_v49 = vsel %vm4909_vm5, %v4915_v54, %v4917_v6 }
 0x3ce   : > { %21271 = vst [vmem:[#allocation104_spill] sm:$0xff] %v17092_v49  ;;  %v21277_v49 = vld [vmem:[#allocation105_spill] sm:$0xff]  ;;  %vm21278_vm1 = vmmov %vm21225_vm2  ;;  %v21301_v60 = vld [vmem:[#allocation107_spill] sm:$0xff] }
 0x3cf   : > { %12191 = vmatmul.mubr.msk.bf16.gmra.mrb[12].mxu0 %vm21250_vm8, %v21249_v58  ;;  %v4903_v58 = vld [vmem:[#allocation2 + $0x18] sm:$0x8]  ;;  %vm21284_vm8 = vmmov %vm21278_vm1 }
 0x3d0   : > { %12194 = vmatprep.mubr.msk.bf16.mxu0 %vm21252_vm12, %v21251_v34  ;;  %v4913_v34 = vrot.slane %v16999_v28, 3  ;;  %vm5223_vm12 = vsmask.f32 4352 }
 0x3d7   : > { %12195 = vmatmul.mubr.msk.bf16.gmra.mrb[16].mxu0 %vm21254_vm13, %v21253_v29  ;;  %v4925_v29 = vrot.slane %v17013_v61, 3  ;;  %vm21302_vm13 = vmmov %vm21278_vm1 }
 0x3d8   : > { %12198 = vmatprep.mubr.msk.bf16.mxu0 %vm21256_vm15, %v21255_v59  ;;  %v4921_v59 = vrot.slane %v17007_v12, 3  ;;  %vm21306_vm15 = vmmov %vm21278_vm1 }
 0x3df   : > { %12199 = vmatmul.mubr.msk.bf16.gmra.mrb[20].mxu0 %vm21225_vm2, %v21260_v44  ;;  %v11164_v44 = vcombine.low %v4903_v58, %v17025_v38  ;;  %v4919_v38 = vrot.slane %v17005_v47, 3  ;;  %vm21326_vm2 = vmmov %vm21278_vm1 }
 0x3e0   : > { %12202 = vmatprep.mubr.msk.bf16.mxu0 %vm21262_vm6, %v21261_v5  ;;  %v17039_v5 = vld [vmem:[#allocation2 + $0x80] sm:$0xff]   ;;  %vm21331_vm6 = vmmov %vm21278_vm1 }
 0x3e1   : > { %v4910_v58 = vrot.slane %v11164_v44, 3  ;;  %v17095_v26 = vsel %vm4909_vm5, %v4917_v6, %v4919_v38  ;;  %v4933_v6 = vrot.slane %v17033_v21, 3 }
 0x3e2   : > { %21272 = vst [vmem:[#allocation122_spill] sm:$0xff] %v17095_v26 }
 0x3e3   : > { %v17081_v31 = vsel %vm4909_vm5, %v4910_v58, %v4911_v3  ;;  %v17098_v58 = vld [vmem:[#allocation2 + $0xa8] ss:$0 sps:$4 sm:$0x77]  }
 0x3e4   : > { %21268 = vst [vmem:[#allocation101_spill] sm:$0xff] %v17081_v31  ;;  %21273 = vst [vmem:[#allocation123_spill] sm:$0xff] %v17098_v58 }
 0x3e7   : > { %12203 = vmatmul.mubr.msk.bf16.gmra.mrb[24].mxu0 %vm21265_vm4, %v21264_v15  ;;  %v17089_v15 = vsel %vm4909_vm5, %v4913_v34, %v4915_v54  ;;  %v4931_v54 = vrot.slane %v17031_v41, 3  ;;  %vm21344_vm4 = vmmov %vm21278_vm1 }
 0x3e8   : > { %12206 = vmatprep.mubr.msk.bf16.mxu0 %vm21267_vm7, %v21266_v22  ;;  %v17084_v22 = vsel %vm4909_vm5, %v4911_v3, %v4913_v34  ;;  %21270 = vst [vmem:[#allocation103_spill] sm:$0xff] %v17089_v15  ;;  %v17101_v3 = vsel %vm4909_vm5, %v4919_v38, %v4921_v59  ;;  %v4927_v34 = vrot.slane %v17021_v14, 3  ;;  %v4929_v15 = vrot.slane %v17023_v25, 3  ;;  %vm21346_vm7 = vmmov %vm21278_vm1 }
 0x3e9   : > { %21269 = vst [vmem:[#allocation102_spill] sm:$0xff] %v17084_v22  ;;  %21274 = vst [vmem:[#allocation124_spill] sm:$0xff] %v17101_v3  ;;  %v4923_v22 = vrot.slane %v17011_v55, 3  ;;  %v4935_v38 = vrot.slane %v17039_v5, 3  ;;  %v4937_v3 = vrot.slane %v17045_v7, 3 }
 0x3ea   : > { %v17120_v31 = vsel %vm4909_vm5, %v4925_v29, %v4927_v34  ;;  %v17123_v17 = vsel %vm4909_vm5, %v4927_v34, %v4929_v15  ;;  %v17126_v10 = vsel %vm4909_vm5, %v4929_v15, %v4931_v54  ;;  %v4941_v34 = vrot.slane %v17057_v51, 3 }
 0x3eb   : > { %v17110_v26 = vsel %vm4909_vm5, %v4921_v59, %v4923_v22  ;;  %v17113_v39 = vsel %vm4909_vm5, %v4923_v22, %v4925_v29  ;;  %21279 = vst [vmem:[#allocation105_spill] sm:$0xff] %v17120_v31  ;;  %21280 = vst [vmem:[#allocation127_spill] sm:$0xff] %v17123_v17  ;;  %v17129_v59 = vsel %vm4909_vm5, %v4931_v54, %v4933_v6  ;;  %v21283_v22 = vld [vmem:[#allocation106_spill] sm:$0xff]  ;;  %v4939_v29 = vrot.slane %v17051_v46, 3 }
 0x3ec   : > { %21275 = vst [vmem:[#allocation125_spill] sm:$0xff] %v17110_v26  ;;  %21276 = vst [vmem:[#allocation126_spill] sm:$0xff] %v17113_v39  ;;  %v17134_v39 = vsel %vm4909_vm5, %v4933_v6, %v4935_v38  ;;  %v4943_v17 = vrot.slane %v17067_v24, 3  ;;  %v4945_v15 = vrot.slane %v17098_v58, 3  ;;  %v5225_v54 = vshrl.u32 %v11164_v44, 16 }
 0x3ed   : > { %21281 = vst [vmem:[#allocation128_spill] sm:$0xff] %v17126_v10  ;;  %21282 = vst [vmem:[#allocation129_spill] sm:$0xff] %v17129_v59  ;;  %v17144_v59 = vsel %vm4909_vm5, %v4937_v3, %v4939_v29  ;;  %v5228_v6 = vshll.u32 %v11164_v44, 16  ;;  %v21292_v26 = vshll.u32 %v16997_v23, 16 }
 0x3ee   : > { %21285 = vst [vmem:[#allocation106_spill] sm:$0xff] %v17134_v39  ;;  %21287 = vst [vmem:[#allocation131_spill] sm:$0xff] %v17144_v59  ;;  %v17152_v39 = vsel %vm4909_vm5, %v4941_v34, %v4943_v17  ;;  %v17155_v10 = vsel %vm4909_vm5, %v4943_v17, %v4945_v15  ;;  %v5227_v31 = vrot.slane %v5225_v54, 3  ;;  %v21297_v17 = vshrl.u32 %v17003_v18, 16 }
 0x3ef   : > { %12207 = vmatmul.mubr.msk.bf16.gmra.mrb[28].mxu0 %vm21278_vm1, %v21277_v49  ;;  %v17137_v49 = vsel %vm4909_vm5, %v4935_v38, %v4937_v3  ;;  %v21289_v38 = vshrl.u32 %v16997_v23, 16  ;;  %21290 = vst [vmem:[#allocation133_spill] sm:$0xff] %v17152_v39  ;;  %21291 = vst [vmem:[#allocation134_spill] sm:$0xff] %v17155_v10  ;;  %v5233_v58 = vrot.slane %v21292_v26, 4  ;;  %v5230_v32 = vrot.slane %v5228_v6, 4 }
 0x3f0   : > { %12210 = vmatprep.mubr.msk.bf16.mxu0 %vm21284_vm8, %v21283_v22  ;;  %21286 = vst [vmem:[#allocation130_spill] sm:$0xff] %v17137_v49  ;;  %v17147_v22 = vsel %vm4909_vm5, %v4939_v29, %v4941_v34  ;;  %v21293_v3 = vshrl.u32 %v16999_v28, 16  ;;  %v21294_v29 = vshll.u32 %v16999_v28, 16  ;;  %v21296_v34 = vshll.u32 %v17001_v45, 16  ;;  %vm21349_vm8 = vmmov %vm21326_vm2 }
 0x3f1   : > { %21288 = vst [vmem:[#allocation132_spill] sm:$0xff] %v17147_v22  ;;  %v5232_v49 = vrot.slane %v21289_v38, 3  ;;  %v21295_v22 = vshrl.u32 %v17001_v45, 16  ;;  %v5244_v15 = vrot.slane %v21297_v17, 3  ;;  %v21298_v54 = vshll.u32 %v17003_v18, 16 }
 0x3f2   : > { %v5236_v59 = vrot.slane %v21293_v3, 3  ;;  %v5237_v44 = vrot.slane %v21294_v29, 4  ;;  %v5241_v39 = vrot.slane %v21296_v34, 4  ;;  %v5231_v6 = vor.u32 %v5230_v32, %v5227_v31 }
 0x3f3   : > { %v5240_v38 = vrot.slane %v21295_v22, 3  ;;  %v5234_v13 = vor.u32 %v5233_v58, %v5232_v49  ;;  %v5245_v26 = vrot.slane %v21298_v54, 4  ;;  %v21299_v3 = vshrl.u32 %v17005_v47, 16  ;;  %v21305_v54 = vld [vmem:[#allocation108_spill] sm:$0xff] }
 0x3f4   : > { %v5238_v10 = vor.u32 %v5237_v44, %v5236_v59  ;;  %v21300_v29 = vshll.u32 %v17005_v47, 16  ;;  %v21303_v22 = vshrl.u32 %v17007_v12, 16  ;;  %v21304_v17 = vshll.u32 %v17007_v12, 16 }
 0x3f5   : > { %v5248_v23 = vrot.slane %v21299_v3, 3  ;;  %v5242_v58 = vor.u32 %v5241_v39, %v5240_v38  ;;  %v5246_v49 = vor.u32 %v5245_v26, %v5244_v15  ;;  %v17184_v32 = vsel %vm5223_vm12, %v5231_v6, %v5234_v13 }
 0x3f6   : > { %v5249_v28 = vrot.slane %v21300_v29, 4  ;;  %v5252_v34 = vrot.slane %v21303_v22, 3  ;;  %v5253_v18 = vrot.slane %v21304_v17, 4  ;;  %v17187_v31 = vsel %vm5223_vm12, %v5234_v13, %v5238_v10 }
 0x3f7   : > { %12211 = vmatmul.mubr.msk.bf16.gmra.mrb[32].mxu0 %vm21302_vm13, %v21301_v60  ;;  %21307 = vst [vmem:[#allocation107_spill] sm:$0xff] %v17187_v31  ;;  %v21308_v60 = vshrl.u32 %v17011_v55, 16  ;;  %v17192_v44 = vsel %vm5223_vm12, %v5238_v10, %v5242_v58  ;;  %v17195_v38 = vsel %vm5223_vm12, %v5242_v58, %v5246_v49  ;;  %v21311_v26 = vshll.u32 %v17011_v55, 16  ;;  %v21325_v31 = vld [vmem:[#allocation111_spill] sm:$0xff]  ;;  %vm21351_vm13 = vmmov %vm21326_vm2 }
 0x3f8   : > { %12214 = vmatprep.mubr.msk.bf16.mxu0 %vm21306_vm15, %v21305_v54  ;;  %v5250_v59 = vor.u32 %v5249_v28, %v5248_v23  ;;  %21309 = vst [vmem:[#allocation108_spill] sm:$0xff] %v17192_v44  ;;  %21310 = vst [vmem:[#allocation135_spill] sm:$0xff] %v17195_v38  ;;  %v5254_v15 = vor.u32 %v5253_v18, %v5252_v34  ;;  %v21313_v13 = vshrl.u32 %v17013_v61, 16  ;;  %v21314_v23 = vshll.u32 %v17013_v61, 16 }
 0x3f9   : > { %v5256_v39 = vrot.slane %v21308_v60, 3  ;;  %v5257_v3 = vrot.slane %v21311_v26, 4  ;;  %v21315_v22 = vshrl.u32 %v17021_v14, 16  ;;  %v21317_v18 = vshll.u32 %v17021_v14, 16 }
 0x3fa   : > { %v17200_v6 = vsel %vm5223_vm12, %v5246_v49, %v5250_v59  ;;  %v5260_v29 = vrot.slane %v21313_v13, 3  ;;  %v5261_v28 = vrot.slane %v21314_v23, 4  ;;  %v17209_v17 = vsel %vm5223_vm12, %v5250_v59, %v5254_v15 }
 0x3fb   : > { %21312 = vst [vmem:[#allocation136_spill] sm:$0xff] %v17200_v6  ;;  %v5264_v10 = vrot.slane %v21315_v22, 3  ;;  %21316 = vst [vmem:[#allocation137_spill] sm:$0xff] %v17209_v17  ;;  %v5258_v58 = vor.u32 %v5257_v3, %v5256_v39  ;;  %v5265_v34 = vrot.slane %v21317_v18, 4  ;;  %v21318_v54 = vshrl.u32 %v17023_v25, 16 }
 0x3fc   : > { %v5262_v60 = vor.u32 %v5261_v28, %v5260_v29  ;;  %v21319_v26 = vshll.u32 %v17023_v25, 16  ;;  %v21320_v6 = vshrl.u32 %v17031_v41, 16  ;;  %v21321_v38 = vshll.u32 %v17031_v41, 16 }
 0x3fd   : > { %v5268_v49 = vrot.slane %v21318_v54, 3  ;;  %v17222_v59 = vsel %vm5223_vm12, %v5254_v15, %v5258_v58  ;;  %v5266_v39 = vor.u32 %v5265_v34, %v5264_v10  ;;  %v21322_v3 = vshrl.u32 %v17033_v21, 16 }
 0x3fe   : > { %v5269_v13 = vrot.slane %v21319_v26, 4  ;;  %v5272_v23 = vrot.slane %v21320_v6, 3  ;;  %v5273_v22 = vrot.slane %v21321_v38, 4  ;;  %v21323_v17 = vshll.u32 %v17033_v21, 16 }
 0x3ff   : > { %v5276_v18 = vrot.slane %v21322_v3, 3  ;;  %v17229_v29 = vsel %vm5223_vm12, %v5258_v58, %v5262_v60  ;;  %v21324_v6 = vshrl.u32 %v17039_v5, 16  ;;  %12215 = vmatmul.mubr.msk.bf16.gmra.mrb[36].mxu0 %vm21326_vm2, %v21325_v31  ;;  %v17236_v38 = vsel %vm5223_vm12, %v5262_v60, %v5266_v39  ;;  %v21330_v58 = vld [vmem:[#allocation112_spill] sm:$0xff] }
 0x400   : > { %v5277_v54 = vrot.slane %v21323_v17, 4  ;;  %v5270_v28 = vor.u32 %v5269_v13, %v5268_v49  ;;  %v5274_v26 = vor.u32 %v5273_v22, %v5272_v23  ;;  %21327 = vst [vmem:[#allocation111_spill] sm:$0xff] %v17236_v38  ;;  %v21328_v10 = vshll.u32 %v17039_v5, 16  ;;  %12218 = vmatprep.mubr.msk.bf16.mxu0 %vm21331_vm6, %v21330_v58  ;;  %vm21355_vm6 = vmmov %vm21326_vm2 }
 0x401   : > { %v5280_v44 = vrot.slane %v21324_v6, 3  ;;  %v21329_v17 = vshrl.u32 %v17045_v7, 16  ;;  %v21334_v31 = vshll.u32 %v17045_v7, 16  ;;  %v21335_v23 = vshrl.u32 %v17051_v46, 16 }
 0x402   : > { %v5278_v15 = vor.u32 %v5277_v54, %v5276_v18  ;;  %v5281_v34 = vrot.slane %v21328_v10, 4  ;;  %v17245_v49 = vsel %vm5223_vm12, %v5266_v39, %v5270_v28  ;;  %v17248_v13 = vsel %vm5223_vm12, %v5270_v28, %v5274_v26 }
 0x403   : > { %v5284_v3 = vrot.slane %v21329_v17, 3  ;;  %21332 = vst [vmem:[#allocation112_spill] sm:$0xff] %v17245_v49  ;;  %21333 = vst [vmem:[#allocation138_spill] sm:$0xff] %v17248_v13  ;;  %v5285_v60 = vrot.slane %v21334_v31, 4  ;;  %v5288_v22 = vrot.slane %v21335_v23, 3  ;;  %v21337_v6 = vshll.u32 %v17051_v46, 16 }
 0x404   : > { %v17255_v18 = vsel %vm5223_vm12, %v5274_v26, %v5278_v15  ;;  %v5282_v54 = vor.u32 %v5281_v34, %v5280_v44  ;;  %v21338_v17 = vshrl.u32 %v17057_v51, 16  ;;  %v21339_v28 = vshll.u32 %v17057_v51, 16 }
 0x405   : > { %21336 = vst [vmem:[#allocation139_spill] sm:$0xff] %v17255_v18  ;;  %v5289_v10 = vrot.slane %v21337_v6, 4  ;;  %v5286_v58 = vor.u32 %v5285_v60, %v5284_v3  ;;  %v21340_v49 = vshrl.u32 %v17067_v24, 16  ;;  %v21341_v38 = vshll.u32 %v17067_v24, 16 }
 0x406   : > { %v5292_v39 = vrot.slane %v21338_v17, 3  ;;  %v5293_v13 = vrot.slane %v21339_v28, 4  ;;  %v17268_v26 = vsel %vm5223_vm12, %v5278_v15, %v5282_v54  ;;  %v21342_v34 = vshll.u32 %v16809_v0, 16  ;;  %v21345_v0 = vld [vmem:[#allocation115_spill] sm:$0xff] }
 0x407   : > { %v5296_v31 = vrot.slane %v21340_v49, 3  ;;  %v5297_v23 = vrot.slane %v21341_v38, 4  ;;  %v5290_v44 = vor.u32 %v5289_v10, %v5288_v22  ;;  %v17273_v18 = vsel %vm5223_vm12, %v5282_v54, %v5286_v58  ;;  %v21343_v49 = vld [vmem:[#allocation109_spill] sm:$0xff]  ;;  %v11086_v22 = vld [vmem:[%s20475_s6 + $0xa] sm:$0x3]  ;;  %v21350_v10 = vld [vmem:[#allocation114_spill] sm:$0xff] }
 0x408   : > { %v3002_v6 = vrot.slane %v21342_v34, 1  ;;  %v5294_v3 = vor.u32 %v5293_v13, %v5292_v39  ;;  %vm21347_vm1 = vcmask 1041408   ;;  %v21348_v54 = vld [vmem:[#allocation113_spill] sm:$0xff]  ;;  %v21353_v39 = vld [vmem:[#allocation116_spill] sm:$0xff] }
 0x409   : > { %v17275_v60 = vor.u32 %v5297_v23, %v5296_v31  ;;  %v17278_v17 = vsel %vm5223_vm12, %v5286_v58, %v5290_v44  ;;  %v3612_v13 = vsel %vm21347_vm1, %v16963_v43, 0  ;;  %vm21352_vm15 = vmmov %vm21347_vm1  ;;  %v21354_v58 = vld [vmem:[#allocation22_spill] sm:$0xff]  ;;  %v21356_v43 = vld [vmem:[#allocation25_spill] sm:$0xff] }
 0x40a   : > { %v3003_v28 = vsel %vm2935_vm14, %v21343_v49, %v3002_v6  ;;  %v17283_v38 = vsel %vm5223_vm12, %v5290_v44, %v5294_v3  ;;  %v21358_v31 = vld [vmem:[#allocation29_spill] sm:$0xff]  ;;  %vm21361_vm1 = vmmov %vm21326_vm2  ;;  %v21362_v44 = vld [vmem:[#allocation63_spill] sm:$0xff] }
 0x40b   : > { %v17287_v15 = vsel %vm5223_vm12, %v5294_v3, %v17275_v60  ;;  %12219 = vmatmul.mubr.msk.bf16.gmra.mrb[40].mxu0 %vm21344_vm4, %v3003_v28  ;;  %vm21357_vm4 = vmmov %vm21326_vm2  ;;  %v21360_v23 = vld [vmem:[#allocation61_spill] sm:$0xff]  ;;  %v21364_v34 = vld [vmem:[#allocation64_spill] sm:$0xff] }
 0x40c   : > { %12224 = vmatprep.mubr.msk.bf16.mxu0 %vm21346_vm7, %v21345_v0  ;;  %vm21359_vm7 = vmmov %vm21326_vm2  ;;  %v21366_v6 = vld [vmem:[#allocation66_spill] sm:$0xff]  ;;  %v21368_v3 = vld [vmem:[#allocation117_spill] sm:$0xff] }
 0x40d   : > { %v21370_v49 = vld [vmem:[#allocation67_spill] sm:$0xff]  ;;  %v2414_v28 = vld [vmem:[#allocation2 + $0x8] sm:$0xe]  ;;  %v14183_v0 = vld [vmem:[#allocation2 + $0xc] sm:$0xf] }
 0x413   : > { %12225 = vmatmul.mubr.msk.bf16.vlgmr.msra.gmra.mrb[8].mxu0 %vm21349_vm8, %v21348_v54  ;;  %vm21363_vm8 = vmmov %vm21361_vm1  ;;  %v21374_v54 = vld [vmem:[#allocation70_spill] sm:$0xff] }
 0x414   : > { %12228 = vmatprep.mubr.msk.bf16.mxu0 %vm21351_vm13, %v21350_v10  ;;  %12261 = vmatpush3.bf16.msra.mxu0 %v3612_v13  ;;  %vm21365_vm13 = vmmov %vm21361_vm1  ;;  %v11067_v13 = vcombine.low %v2414_v28, %v14183_v0  ;;  %v21432_v28 = vld [vmem:[#allocation21_spill] sm:$0xff] }
 0x415   : > { %13767 = vmatprep.subr.msk.bf16.mxu0 %vm21352_vm15, %v11086_v22  ;;  %vm21367_vm15 = vmmov %vm21361_vm1 }
 0x416   : > { %v3520_v10 = vrot.slane %v11067_v13, 1 }
 0x41b   : > { %12229 = vmatmul.mubr.msk.bf16.gmra.mrb[12].mxu0 %vm21326_vm2, %v21353_v39  ;;  %vm21369_vm2 = vmmov %vm21361_vm1  ;;  %v21377_v39 = vrot.slane %v16572_v4, 1  ;;  %v21389_v4 = vld [vmem:[#allocation76_spill] sm:$0xff] }
 0x41c   : > { %12232 = vmatprep.mubr.msk.bf16.mxu0 %vm21355_vm6, %v21354_v58  ;;  %vm21371_vm6 = vmmov %vm21361_vm1 }
 0x423   : > { %12233 = vmatmul.mubr.msk.bf16.gmra.mrb[16].mxu0 %vm21357_vm4, %v21356_v43  ;;  %vm21372_vm4 = vmmov %vm21361_vm1  ;;  %v21425_v43 = vld [vmem:[#allocation97_spill] sm:$0xff] }
 0x424   : > { %12236 = vmatprep.mubr.msk.bf16.mxu0 %vm21359_vm7, %v21358_v31  ;;  %vm21373_vm7 = vmmov %vm21361_vm1 }
 0x42b   : > { %12237 = vmatmul.mubr.msk.bf16.gmra.mrb[20].mxu0 %vm21361_vm1, %v21360_v23 }
 0x42c   : > { %12240 = vmatprep.mubr.msk.bf16.mxu0 %vm21363_vm8, %v21362_v44  ;;  %vm21375_vm8 = vmmov %vm21361_vm1  ;;  %v21427_v44 = vld [vmem:[#allocation84_spill] sm:$0xff] }
 0x433   : > { %12241 = vmatmul.mubr.msk.bf16.gmra.mrb[24].mxu0 %vm21365_vm13, %v21364_v34  ;;  %vm21376_vm13 = vmmov %vm21361_vm1 }
 0x434   : > { %12244 = vmatprep.mubr.msk.bf16.mxu0 %vm21367_vm15, %v21366_v6  ;;  %vm21378_vm15 = vmmov %vm21361_vm1  ;;  %v21429_v6 = vld [vmem:[#allocation95_spill] sm:$0xff] }
 0x435   : > { %v4132_v0 = vsel %vm2519_vm10, %v21429_v6, %v21432_v28 }
 0x43b   : > { %12245 = vmatmul.mubr.msk.bf16.gmra.mrb[28].mxu0 %vm21369_vm2, %v21368_v3  ;;  %vm21379_vm2 = vcmask 1041408  }
 0x43c   : > { %12248 = vmatprep.mubr.msk.bf16.mxu0 %vm21371_vm6, %v21370_v49  ;;  %vm21380_vm6 = vmmov %vm21361_vm1 }
 0x443   : > { %12249 = vmatmul.mubr.msk.bf16.gmra.mrb[32].mxu0 %vm21372_vm4, %v16774_v50  ;;  %v3522_v50 = vsel %vm3519_vm0, %v3520_v10, %v21377_v39  ;;  %vm21381_vm4 = vmmov %vm21361_vm1  ;;  %v21437_v10 = vld [vmem:[#allocation62_spill] sm:$0xff]  ;;  %v21438_v39 = vld [vmem:[#allocation68_spill] sm:$0xff] }
 0x444   : > { %12252 = vmatprep.mubr.msk.bf16.mxu0 %vm21373_vm7, %v16777_v57  ;;  %v3938_v57 = vsel %vm21379_vm2, %v11086_v22, 0  ;;  %vm21382_vm7 = vmmov %vm21379_vm2 }
 0x445   : > { %vm21386_vm2 = vmmov %vm21361_vm1 }
 0x44b   : > { %12253 = vmatmul.mubr.msk.bf16.gmra.mrb[36].mxu0 %vm21361_vm1, %v16782_v35  ;;  %v10987_v35 = vld [vmem:[%s20475_s6 + $0x4] sm:$0x3] }
 0x44c   : > { %12256 = vmatprep.mubr.msk.bf16.mxu0 %vm21375_vm8, %v21374_v54  ;;  %vm21383_vm8 = vmmov %vm21361_vm1  ;;  %v21434_v54 = vld [vmem:[#allocation60_spill] sm:$0xff] }
 0x453   : > { %12257 = vmatmul.mubr.msk.bf16.gmra.mrb[40].mxu0 %vm21376_vm13, %v16788_v37  ;;  %vm21384_vm13 = vmmov %vm21361_vm1  ;;  %v21391_v37 = vld [vmem:[#allocation83_spill] sm:$0xff] }
 0x454   : > { %12262 = vmatprep.mubr.msk.bf16.mxu0 %vm21378_vm15, %v3522_v50  ;;  %vm21385_vm15 = vmmov %vm21361_vm1  ;;  %v21440_v50 = vld [vmem:[#allocation69_spill] sm:$0xff] }
 0x45b   : > { %12263 = vmatmul.mubr.msk.bf16.vlgmr.msra.gmra.mrb[8].mxu0 %vm21380_vm6, %v16799_v36  ;;  %vm21387_vm6 = vmmov %vm21361_vm1  ;;  %v21396_v36 = vld [vmem:[#allocation119_spill] sm:$0xff] }
 0x45c   : > { %12266 = vmatprep.mubr.msk.bf16.mxu0 %vm21381_vm4, %v16804_v16  ;;  %12299 = vmatpush3.bf16.msra.mxu0 %v3938_v57  ;;  %vm21388_vm4 = vmmov %vm21361_vm1  ;;  %v21394_v16 = vld [vmem:[#allocation118_spill] sm:$0xff]  ;;  %v21442_v57 = vld [vmem:[#allocation81_spill] sm:$0xff] }
 0x45d   : > { %13768 = vmatprep.subr.msk.bf16.mxu0 %vm21382_vm7, %v10987_v35  ;;  %vm21390_vm7 = vmmov %vm21361_vm1 }
 0x463   : > { %12267 = vmatmul.mubr.msk.bf16.gmra.mrb[12].mxu0 %vm21361_vm1, %v16812_v33  ;;  %v21398_v33 = vld [vmem:[#allocation120_spill] sm:$0xff] }
 0x464   : > { %12270 = vmatprep.mubr.msk.bf16.mxu0 %vm21383_vm8, %v16815_v2  ;;  %v21392_v2 = vld [vmem:[#allocation65_spill] sm:$0xff]  ;;  %vm21393_vm8 = vmmov %vm21361_vm1 }
 0x46b   : > { %12271 = vmatmul.mubr.msk.bf16.gmra.mrb[16].mxu0 %vm21384_vm13, %v16822_v27  ;;  %vm21395_vm13 = vmmov %vm21361_vm1  ;;  %v21400_v27 = vld [vmem:[#allocation121_spill] sm:$0xff] }
 0x46c   : > { %12274 = vmatprep.mubr.msk.bf16.mxu0 %vm21385_vm15, %v16825_v63  ;;  %vm21397_vm15 = vmmov %vm21361_vm1 }
 0x473   : > { %12275 = vmatmul.mubr.msk.bf16.gmra.mrb[20].mxu0 %vm21386_vm2, %v16828_v30  ;;  %vm21399_vm2 = vmmov %vm21361_vm1  ;;  %v11125_v30 = vld [vmem:[%s20475_s6 + $0xc] sm:$0x3] }
 0x474   : > { %12278 = vmatprep.mubr.msk.bf16.mxu0 %vm21387_vm6, %v16834_v8  ;;  %vm21401_vm6 = vmmov %vm21361_vm1  ;;  %v21414_v8 = vld [vmem:[#allocation48_spill] sm:$0xff] }
 0x47b   : > { %12279 = vmatmul.mubr.msk.bf16.gmra.mrb[24].mxu0 %vm21388_vm4, %v16837_v20  ;;  %vm21402_vm4 = vmmov %vm21361_vm1  ;;  %v21416_v20 = vld [vmem:[#allocation50_spill] sm:$0xff] }
 0x47c   : > { %12282 = vmatprep.mubr.msk.bf16.mxu0 %vm21390_vm7, %v21389_v4  ;;  %vm21403_vm7 = vmmov %vm21361_vm1  ;;  %v21446_v4 = vld [vmem:[#allocation86_spill] sm:$0xff] }
 0x483   : > { %12283 = vmatmul.mubr.msk.bf16.gmra.mrb[28].mxu0 %vm21361_vm1, %v21391_v37  ;;  %vm21404_vm1 = vcmask 1041408   ;;  %v21448_v37 = vld [vmem:[#allocation87_spill] sm:$0xff] }
 0x484   : > { %12286 = vmatprep.mubr.msk.bf16.mxu0 %vm21393_vm8, %v21392_v2  ;;  %v4152_v63 = vsel %vm21404_vm1, %v10987_v35, 0  ;;  %vm21405_vm8 = vmmov %vm21399_vm2  ;;  %v21444_v35 = vld [vmem:[#allocation85_spill] sm:$0xff]  ;;  %v21450_v2 = vld [vmem:[#allocation88_spill] sm:$0xff] }
 0x48b   : > { %12287 = vmatmul.mubr.msk.bf16.gmra.mrb[32].mxu0 %vm21395_vm13, %v21394_v16  ;;  %vm21406_vm13 = vmmov %vm21399_vm2  ;;  %v21452_v16 = vld [vmem:[#allocation89_spill] sm:$0xff] }
 0x48c   : > { %12290 = vmatprep.mubr.msk.bf16.mxu0 %vm21397_vm15, %v21396_v36  ;;  %vm21407_vm15 = vmmov %vm21404_vm1  ;;  %v21453_v36 = vld [vmem:[#allocation90_spill] sm:$0xff] }
 0x48d   : > { %vm21411_vm1 = vmmov %vm21399_vm2 }
 0x493   : > { %12291 = vmatmul.mubr.msk.bf16.gmra.mrb[36].mxu0 %vm21399_vm2, %v21398_v33  ;;  %v4331_v33 = vld [vmem:[#allocation2 + $0x18] sm:$0xc] }
 0x494   : > { %12294 = vmatprep.mubr.msk.bf16.mxu0 %vm21401_vm6, %v21400_v27  ;;  %vm21408_vm6 = vmmov %vm21399_vm2  ;;  %v13822_v27 = vld [vmem:[#allocation2 + $0x98] ss:$0 sps:$4 sm:$0x33]  }
 0x49b   : > { %12295 = vmatmul.mubr.msk.bf16.gmra.mrb[40].mxu0 %vm21402_vm4, %v16869_v40  ;;  %vm21409_vm4 = vmmov %vm21399_vm2  ;;  %v21418_v40 = vld [vmem:[#allocation18_spill] sm:$0xff] }
 0x49c   : > { %12300 = vmatprep.mubr.msk.bf16.mxu0 %vm21403_vm7, %v16893_v1  ;;  %vm21410_vm7 = vmmov %vm21399_vm2  ;;  %v21420_v1 = vld [vmem:[#allocation26_spill] sm:$0xff] }
 0x4a3   : > { %12301 = vmatmul.mubr.msk.bf16.vlgmr.msra.gmra.mrb[8].mxu0 %vm21405_vm8, %v16888_v48  ;;  %vm21412_vm8 = vmmov %vm21411_vm1  ;;  %v13821_v48 = vld [vmem:[#allocation2 + $0xa0] ss:$0 sps:$4 sm:$0x77]  }
 0x4a4   : > { %12304 = vmatprep.mubr.msk.bf16.mxu0 %vm21406_vm13, %v16896_v52  ;;  %12337 = vmatpush3.bf16.msra.mxu0 %v4152_v63  ;;  %vm21413_vm13 = vmmov %vm21411_vm1  ;;  %v21422_v52 = vld [vmem:[#allocation82_spill] sm:$0xff]  ;;  %v21455_v63 = vld [vmem:[#allocation91_spill] sm:$0xff] }
 0x4a5   : > { %13769 = vmatprep.subr.msk.bf16.mxu0 %vm21407_vm15, %v11125_v30  ;;  %vm21415_vm15 = vmmov %vm21411_vm1 }
 0x4ab   : > { %12305 = vmatmul.mubr.msk.bf16.gmra.mrb[12].mxu0 %vm21399_vm2, %v16900_v19  ;;  %vm21417_vm2 = vmmov %vm21411_vm1  ;;  %v3875_v19 = vshrl.u32 %v13821_v48, 16 }
 0x4ac   : > { %12308 = vmatprep.mubr.msk.bf16.mxu0 %vm21408_vm6, %v16905_v53  ;;  %vm21419_vm6 = vmmov %vm21411_vm1  ;;  %v3878_v53 = vshll.u32 %v13821_v48, 16  ;;  %v4137_v48 = vshll.u32 %v13822_v27, 16 }
 0x4b3   : > { %12309 = vmatmul.mubr.msk.bf16.gmra.mrb[16].mxu0 %vm21409_vm4, %v16910_v9  ;;  %vm21421_vm4 = vmmov %vm21411_vm1  ;;  %v4121_v9 = vshrl.u32 %v11067_v13, 16 }
 0x4b4   : > { %12312 = vmatprep.mubr.msk.bf16.mxu0 %vm21410_vm7, %v16915_v62  ;;  %vm21423_vm7 = vmmov %vm21411_vm1  ;;  %v4124_v62 = vshll.u32 %v11067_v13, 16  ;;  %v11163_v13 = vld [vmem:[%s20475_s6 + $0xe] sm:$0x3] }
 0x4b5   : > { %v4123_v22 = vrot.slane %v4121_v9, 1  ;;  %v21460_v9 = vld [vmem:[#allocation93_spill] sm:$0xff] }
 0x4b6   : > { %v4126_v58 = vrot.slane %v4124_v62, 2 }
 0x4b8   : > { %v4127_v23 = vor.u32 %v4126_v58, %v4123_v22 }
 0x4ba   : > { %v4131_v3 = vsel %vm2519_vm10, %v4127_v23, %v21429_v6  ;;  %v21467_v6 = vld [vmem:[#allocation94_spill] sm:$0xff] }
 0x4bb   : > { %12313 = vmatmul.mubr.msk.bf16.gmra.mrb[20].mxu0 %vm21411_vm1, %v16922_v42  ;;  %v3877_v42 = vrot.slane %v3875_v19, 2 }
 0x4bc   : > { %12316 = vmatprep.mubr.msk.bf16.mxu0 %vm21412_vm8, %v16929_v11  ;;  %v3880_v11 = vrot.slane %v3878_v53, 3  ;;  %vm21426_vm8 = vmmov %vm21411_vm1  ;;  %v4139_v53 = vrot.slane %v4137_v48, 2  ;;  %v21481_v48 = vshll.u32 %v17005_v47, 16 }
 0x4be   : > { %v3881_v31 = vor.u32 %v3880_v11, %v3877_v42  ;;  %v21462_v11 = vld [vmem:[#allocation96_spill] sm:$0xff] }
 0x4bf   : > { %v21464_v58 = vshll.u32 %v21462_v11, 16 }
 0x4c0   : > { %v3882_v34 = vsel %vm3797_vm9, %v21427_v44, %v3881_v31  ;;  %v21465_v31 = vld [vmem:[#allocation110_spill] sm:$0xff] }
 0x4c3   : > { %12317 = vmatmul.mubr.msk.bf16.gmra.mrb[24].mxu0 %vm21413_vm13, %v16934_v56  ;;  %v21424_v56 = vld [vmem:[#allocation59_spill] sm:$0xff]  ;;  %vm21428_vm13 = vmmov %vm21411_vm1 }
 0x4c4   : > { %12320 = vmatprep.mubr.msk.bf16.mxu0 %vm21415_vm15, %v21414_v8  ;;  %vm21430_vm15 = vmmov %vm21411_vm1 }
 0x4cb   : > { %12321 = vmatmul.mubr.msk.bf16.gmra.mrb[28].mxu0 %vm21417_vm2, %v21416_v20  ;;  %vm21431_vm2 = vcmask 1041408   ;;  %v21458_v20 = vld [vmem:[#allocation92_spill] sm:$0xff] }
 0x4cc   : > { %12324 = vmatprep.mubr.msk.bf16.mxu0 %vm21419_vm6, %v21418_v40  ;;  %v4688_v49 = vsel %vm21431_vm2, %v11125_v30, 0  ;;  %vm21433_vm6 = vmmov %vm21411_vm1  ;;  %v21457_v30 = vld [vmem:[#allocation100_spill] sm:$0xff]  ;;  %v4134_v40 = vshrl.u32 %v13822_v27, 16 }
 0x4cd   : > { %v11126_v8 = vcombine.low %v4331_v33, %v21457_v30  ;;  %v21476_v33 = vld [vmem:[#allocation99_spill] sm:$0xff] }
 0x4ce   : > { %v4136_v19 = vrot.slane %v4134_v40, 1  ;;  %v21477_v27 = vshrl.u32 %v21476_v33, 16  ;;  %v21478_v30 = vshll.u32 %v21476_v33, 16  ;;  %v21480_v40 = vshrl.u32 %v17005_v47, 16 }
 0x4cf   : > { %v21484_v47 = vmov 0.0|0.0  }
 0x4d0   : > { %v4140_v23 = vor.u32 %v4139_v53, %v4136_v19  ;;  %v5696_v19 = vld [vmem:[%s20477_s8 + $0x8] sm:$0xff] }
 0x4d3   : > { %12325 = vmatmul.mubr.msk.bf16.gmra.mrb[32].mxu0 %vm21421_vm4, %v21420_v1  ;;  %vm21435_vm4 = vmmov %vm21411_vm1  ;;  %v4464_v1 = vshrl.u32 %v11126_v8, 16 }
 0x4d4   : > { %12328 = vmatprep.mubr.msk.bf16.mxu0 %vm21423_vm7, %v21422_v52  ;;  %vm21436_vm7 = vmmov %vm21431_vm2  ;;  %v4467_v52 = vshll.u32 %v11126_v8, 16  ;;  %v4504_v8 = vrot.slane %v21478_v30, 3  ;;  %v21501_v30 = vshll.u32 %v17023_v25, 16 }
 0x4d5   : > { %vm21445_vm2 = vmmov %vm21411_vm1  ;;  %v4466_v62 = vrot.slane %v4464_v1, 2  ;;  %v4513_v1 = vrot.slane %v21481_v48, 3 }
 0x4d6   : > { %v4469_v42 = vrot.slane %v4467_v52, 3  ;;  %v5695_v52 = vld [vmem:[%s20477_s8] sm:$0xff] }
 0x4d7   : > { %v12998_v53 = vpack.c.bf16 %v5696_v19, %v5695_v52 }
 0x4d8   : > { %v4470_v44 = vor.u32 %v4469_v42, %v4466_v62 }
 0x4d9   : > { %12999 = vmatpush3.bf16.msra.mxu1 %v12998_v53  ;;  %v21506_v53 = vshrl.u32 %v17033_v21, 16 }
 0x4da   : > { %13000 = vmatprep.subr.bf16.mxu1 %v21484_v47 }
 0x4db   : > { %12329 = vmatmul.mubr.msk.bf16.gmra.mrb[36].mxu0 %vm21411_vm1, %v21424_v56  ;;  %v21463_v56 = vshrl.u32 %v21462_v11, 16  ;;  %v21485_v11 = vshrl.u32 %v17007_v12, 16 }
 0x4dc   : > { %12332 = vmatprep.mubr.msk.bf16.mxu0 %vm21426_vm8, %v21425_v43  ;;  %vm21439_vm8 = vmmov %vm21411_vm1  ;;  %v4477_v43 = vrot.slane %v21464_v58, 3 }
 0x4dd   : > { %v4474_v22 = vrot.slane %v21463_v56, 2  ;;  %v4519_v56 = vrot.slane %v21485_v11, 2  ;;  %v21508_v11 = vshrl.u32 %v17039_v5, 16 }
 0x4e3   : > { %12333 = vmatmul.mubr.msk.bf16.gmra.mrb[40].mxu0 %vm21428_vm13, %v3882_v34  ;;  %vm21441_vm13 = vmmov %vm21411_vm1  ;;  %v4478_v34 = vor.u32 %v4477_v43, %v4474_v22  ;;  %v21486_v22 = vshll.u32 %v17007_v12, 16  ;;  %v5698_v12 = vld [vmem:[%s20477_s8 + $0x18] sm:$0xff] }
 0x4e4   : > { %12338 = vmatprep.mubr.msk.bf16.mxu0 %vm21430_vm15, %v4131_v3  ;;  %vm21443_vm15 = vmmov %vm21411_vm1  ;;  %v4141_v3 = vsel %vm2519_vm10, %v21467_v6, %v4140_v23  ;;  %v5697_v6 = vld [vmem:[%s20477_s8 + $0x10] sm:$0xff] }
 0x4e5   : > { %v4522_v58 = vrot.slane %v21486_v22, 3 }
 0x4eb   : > { %12339 = vmatmul.mubr.msk.bf16.vlgmr.msra.gmra.mrb[8].mxu0 %vm21433_vm6, %v4132_v0  ;;  %vm21447_vm6 = vmmov %vm21411_vm1 }
 0x4ec   : > { %12342 = vmatprep.mubr.msk.bf16.mxu0 %vm21435_vm4, %v21434_v54  ;;  %12375 = vmatpush3.bf16.msra.mxu0 %v4688_v49  ;;  %vm21449_vm4 = vmmov %vm21411_vm1  ;;  %v21468_v49 = vld [vmem:[#allocation98_spill] sm:$0xff] }
 0x4ed   : > { %13770 = vmatprep.subr.msk.bf16.mxu0 %vm21436_vm7, %v11163_v13  ;;  %vm21451_vm7 = vmmov %vm21411_vm1  ;;  %v21469_v28 = vshrl.u32 %v21468_v49, 16  ;;  %v21470_v54 = vshll.u32 %v21468_v49, 16  ;;  %v4523_v49 = vor.u32 %v4522_v58, %v4519_v56  ;;  %v21509_v56 = vshll.u32 %v17039_v5, 16 }
 0x4ef   : > { %v4483_v0 = vrot.slane %v21469_v28, 2  ;;  %v4585_v22 = vrot.slane %v21509_v56, 3  ;;  %v21555_v56 = vld [vmem:[#allocation132_spill] sm:$0xff] }
 0x4f3   : > { %12343 = vmatmul.mubr.msk.bf16.gmra.mrb[12].mxu0 %vm21411_vm1, %v21437_v10  ;;  %v4486_v10 = vrot.slane %v21470_v54, 3  ;;  %v21491_v54 = vshrl.u32 %v17013_v61, 16 }
 0x4f4   : > { %12346 = vmatprep.mubr.msk.bf16.mxu0 %vm21439_vm8, %v21438_v39  ;;  %vm21454_vm8 = vmmov %vm21411_vm1  ;;  %v4479_v39 = vsel %vm3797_vm9, %v4470_v44, %v4478_v34  ;;  %v21488_v44 = vshll.u32 %v17011_v55, 16 }
 0x4fb   : > { %12347 = vmatmul.mubr.msk.bf16.gmra.mrb[16].mxu0 %vm21441_vm13, %v21440_v50  ;;  %vm21456_vm13 = vmmov %vm21411_vm1  ;;  %v21472_v50 = vshrl.u32 %v17001_v45, 16 }
 0x4fc   : > { %12350 = vmatprep.mubr.msk.bf16.mxu0 %vm21443_vm15, %v21442_v57  ;;  %vm21459_vm15 = vmmov %vm21411_vm1 }
 0x4fd   : > { %v4492_v57 = vrot.slane %v21472_v50, 2 }
 0x503   : > { %12351 = vmatmul.mubr.msk.bf16.gmra.mrb[20].mxu0 %vm21445_vm2, %v21444_v35  ;;  %vm21461_vm2 = vmmov %vm21411_vm1  ;;  %v21473_v35 = vshll.u32 %v17001_v45, 16 }
 0x504   : > { %12354 = vmatprep.mubr.msk.bf16.mxu0 %vm21447_vm6, %v21446_v4  ;;  %vm21466_vm6 = vmmov %vm21411_vm1 }
 0x505   : > { %v4495_v4 = vrot.slane %v21473_v35, 3  ;;  %v21495_v35 = vshrl.u32 %v17021_v14, 16 }
 0x50b   : > { %12355 = vmatmul.mubr.msk.bf16.gmra.mrb[24].mxu0 %vm21449_vm4, %v21448_v37  ;;  %vm21471_vm4 = vmmov %vm21411_vm1  ;;  %v4487_v37 = vor.u32 %v4486_v10, %v4483_v0  ;;  %v4537_v10 = vrot.slane %v21491_v54, 2  ;;  %v21517_v54 = vshrl.u32 %v17057_v51, 16 }
 0x50c   : > { %12358 = vmatprep.mubr.msk.bf16.mxu0 %vm21451_vm7, %v21450_v2  ;;  %vm21474_vm7 = vmmov %vm21411_vm1  ;;  %v4496_v2 = vor.u32 %v4495_v4, %v4492_v57  ;;  %v4546_v4 = vrot.slane %v21495_v35, 2  ;;  %v21521_v35 = vshll.u32 %v17067_v24, 16 }
 0x50e   : > { %v4497_v45 = vsel %vm3797_vm9, %v4487_v37, %v4496_v2 }
 0x513   : > { %12359 = vmatmul.mubr.msk.bf16.gmra.mrb[28].mxu0 %vm21411_vm1, %v21452_v16  ;;  %vm21475_vm1 = vcmask 1041408  }
 0x514   : > { %12362 = vmatprep.mubr.msk.bf16.mxu0 %vm21454_vm8, %v21453_v36  ;;  %v5002_v16 = vsel %vm21475_vm1, %v11163_v13, 0  ;;  %v4488_v36 = vsel %vm3797_vm9, %v4478_v34, %v4487_v37  ;;  %vm21479_vm8 = vmmov %vm21461_vm2  ;;  %v4510_v13 = vrot.slane %v21480_v40, 2  ;;  %v4531_v34 = vrot.slane %v21488_v44, 3 }
 0x515   : > { %v21496_v37 = vshll.u32 %v17021_v14, 16  ;;  %v21512_v44 = vshll.u32 %v17045_v7, 16 }
 0x516   : > { %v4514_v62 = vor.u32 %v4513_v1, %v4510_v13  ;;  %v21504_v13 = vshll.u32 %v17031_v41, 16 }
 0x518   : > { %v4524_v0 = vsel %vm3797_vm9, %v4514_v62, %v4523_v49  ;;  %v4567_v48 = vrot.slane %v21504_v13, 3  ;;  %v21531_v13 = vld [vmem:[#allocation103_spill] sm:$0xff] }
 0x51b   : > { %12363 = vmatmul.mubr.msk.bf16.gmra.mrb[32].mxu0 %vm21456_vm13, %v21455_v63  ;;  %v4501_v63 = vrot.slane %v21477_v27, 2  ;;  %vm21482_vm13 = vmmov %vm21461_vm2  ;;  %v21500_v27 = vshrl.u32 %v17023_v25, 16  ;;  %v4573_v25 = vrot.slane %v21506_v53, 2  ;;  %v21542_v53 = vld [vmem:[#allocation105_spill] sm:$0xff] }
 0x51c   : > { %12366 = vmatprep.mubr.msk.bf16.mxu0 %vm21459_vm15, %v21458_v20  ;;  %v17486_v20 = vld [vmem:[%s20475_s6 + $0x10] sm:$0x3]  ;;  %vm21483_vm15 = vmmov %vm21475_vm1  ;;  %vm21498_vm1 = vmmov 0  }
 0x523   : > { %12367 = vmatmul.mubr.msk.bf16.gmra.mrb[36].mxu0 %vm21461_vm2, %v21460_v9  ;;  %v4505_v9 = vor.u32 %v4504_v8, %v4501_v63  ;;  %v4555_v63 = vrot.slane %v21500_v27, 2  ;;  %v4558_v8 = vrot.slane %v21501_v30, 3 }
 0x524   : > { %12370 = vmatprep.mubr.msk.bf16.mxu0 %vm21466_vm6, %v21465_v31  ;;  %v21487_v31 = vshrl.u32 %v17011_v55, 16  ;;  %vm21489_vm6 = vmmov %vm21461_vm2  ;;  %v5694_v55 = vld [vmem:[%s584_s1] sm:$0x1] }
 0x525   : > { %v4506_v42 = vsel %vm3797_vm9, %v4496_v2, %v4505_v9  ;;  %v4515_v43 = vsel %vm3797_vm9, %v4505_v9, %v4514_v62  ;;  %v4549_v2 = vrot.slane %v21496_v37, 3  ;;  %v4559_v1 = vor.u32 %v4558_v8, %v4555_v63 }
 0x526   : > { %v4528_v23 = vrot.slane %v21487_v31, 2  ;;  %v21507_v9 = vshll.u32 %v17033_v21, 16 }
 0x528   : > { %v4532_v28 = vor.u32 %v4531_v34, %v4528_v23  ;;  %v4576_v62 = vrot.slane %v21507_v9, 3  ;;  %v21511_v23 = vshrl.u32 %v17045_v7, 16  ;;  %v4594_v34 = vrot.slane %v21512_v44, 3  ;;  %v21546_v9 = vld [vmem:[#allocation128_spill] sm:$0xff]  ;;  %v21569_v44 = vld [vmem:[#allocation137_spill] sm:$0xff] }
 0x529   : > { %v4609_v7 = vrot.slane %v21517_v54, 2  ;;  %v21587_v54 = vld [vmem:[#allocation51_spill] sm:$0xff] }
 0x52a   : > { %v4533_v57 = vsel %vm3797_vm9, %v4523_v49, %v4532_v28  ;;  %v4577_v58 = vor.u32 %v4576_v62, %v4573_v25  ;;  %v4591_v21 = vrot.slane %v21511_v23, 2  ;;  %v21544_v25 = vld [vmem:[#allocation127_spill] sm:$0xff]  ;;  %v21548_v62 = vld [vmem:[#allocation129_spill] sm:$0xff] }
 0x52b   : > { %12371 = vmatmul.mubr.msk.bf16.gmra.mrb[40].mxu0 %vm21471_vm4, %v4141_v3  ;;  %v13001_v3 = vpack.c.bf16 %v5698_v12, %v5697_v6  ;;  %vm21493_vm4 = vcmask 261120   ;;  %v21514_v12 = vshrl.u32 %v17051_v46, 16  ;;  %v21565_v23 = vld [vmem:[#allocation135_spill] sm:$0xff] }
 0x52c   : > { %12376 = vmatprep.mubr.msk.bf16.mxu0 %vm21474_vm7, %v4479_v39  ;;  %v21492_v39 = vshll.u32 %v17013_v61, 16  ;;  %vm21494_vm7 = vmmov %vm21461_vm2  ;;  %v4550_v61 = vor.u32 %v4549_v2, %v4546_v4  ;;  %v4621_v4 = vrot.slane %v21521_v35, 3  ;;  %v21523_v2 = vld [vmem:[#allocation123_spill] sm:$0xff] }
 0x52d   : > { %13002 = vmatpush3.bf16.msra.mxu1 %v13001_v3  ;;  %v4600_v5 = vrot.slane %v21514_v12, 2  ;;  %v21515_v3 = vshll.u32 %v17051_v46, 16  ;;  %v21578_v12 = vld [vmem:[#allocation139_spill] sm:$0xff] }
 0x52e   : > { %13035 = vmatprep.subr.bf16.mxu1 %v21484_v47  ;;  %v4540_v50 = vrot.slane %v21492_v39, 3  ;;  %v4560_v19 = vsel %vm3797_vm9, %v4550_v61, %v4559_v1 }
 0x52f   : > { %v4603_v49 = vrot.slane %v21515_v3, 3 }
 0x530   : > { %12497 = vmatmul.mubr.msk.f32.vlgmr.msra.gmra.mrb[8].mxu1 %vm21493_vm4, %v5694_v55  ;;  %vm21513_vm4 = vmmov %vm21461_vm2 }
 0x531   : > { %v4604_v55 = vor.u32 %v4603_v49, %v4600_v5  ;;  %v13843_v5 = vld [vmem:[#allocation2 + $0xa8] ss:$0 sps:$4 sm:$0xff]  }
 0x533   : > { %12377 = vmatmul.mubr.msk.bf16.vlgmr.msra.gmra.mrb[8].mxu0 %vm21479_vm8, %v4488_v36  ;;  %vm21499_vm8 = vmmov %vm21461_vm2  ;;  %v4541_v36 = vor.u32 %v4540_v50, %v4537_v10  ;;  %v21518_v10 = vshll.u32 %v17057_v51, 16 }
 0x534   : > { %12380 = vmatprep.mubr.msk.bf16.mxu0 %vm21482_vm13, %v4497_v45  ;;  %12413 = vmatpush3.bf16.msra.mxu0 %v5002_v16  ;;  %v21497_v16 = vmov 0.0   ;;  %vm21502_vm13 = vmmov %vm21461_vm2  ;;  %v21503_v45 = vshrl.u32 %v17031_v41, 16  ;;  %v4582_v41 = vrot.slane %v21508_v11, 2  ;;  %v21551_v11 = vld [vmem:[#allocation130_spill] sm:$0xff] }
 0x535   : > { %13771 = vmatprep.subr.msk.bf16.mxu0 %vm21483_vm15, %v17486_v20  ;;  %12507 = vmatprep.mubr.msk.f32.mxu1 %vm21498_vm1, %v21497_v16  ;;  %v4542_v33 = vsel %vm3797_vm9, %v4532_v28, %v4541_v36  ;;  %v4551_v14 = vsel %vm3797_vm9, %v4541_v36, %v4550_v61  ;;  %vm21505_vm15 = vmmov %vm21461_vm2  ;;  %v4595_v28 = vor.u32 %v4594_v34, %v4591_v21  ;;  %v4612_v39 = vrot.slane %v21518_v10, 3  ;;  %v21567_v21 = vld [vmem:[#allocation136_spill] sm:$0xff] }
 0x536   : > { %v4564_v40 = vrot.slane %v21503_v45, 2  ;;  %v4625_v36 = vshrl.u32 %v21523_v2, 16  ;;  %v4628_v61 = vshll.u32 %v21523_v2, 16  ;;  %v21574_v34 = vld [vmem:[#allocation112_spill] sm:$0xff] }
 0x537   : > { %v4605_v50 = vsel %vm3797_vm9, %v4595_v28, %v4604_v55  ;;  %v4613_v37 = vor.u32 %v4612_v39, %v4609_v7 }
 0x538   : > { %v4568_v52 = vor.u32 %v4567_v48, %v4564_v40  ;;  %v4627_v27 = vrot.slane %v4625_v36, 2  ;;  %v4630_v63 = vrot.slane %v4628_v61, 3  ;;  %v21529_v40 = vld [vmem:[#allocation102_spill] sm:$0xff]  ;;  %v21533_v48 = vld [vmem:[#allocation104_spill] sm:$0xff] }
 0x539   : > { %v4614_v51 = vsel %vm3797_vm9, %v4604_v55, %v4613_v37 }
 0x53a   : > { %v4578_v31 = vsel %vm3797_vm9, %v4568_v52, %v4577_v58 }
 0x53b   : > { %12381 = vmatmul.mubr.msk.bf16.gmra.mrb[12].mxu0 %vm21461_vm2, %v4506_v42  ;;  %v4569_v42 = vsel %vm3797_vm9, %v4559_v1, %v4568_v52  ;;  %v21535_v1 = vld [vmem:[#allocation122_spill] sm:$0xff]  ;;  %v21536_v52 = vld [vmem:[#allocation124_spill] sm:$0xff] }
 0x53c   : > { %12384 = vmatprep.mubr.msk.bf16.mxu0 %vm21489_vm6, %v4515_v43  ;;  %vm21510_vm6 = vmmov %vm21461_vm2  ;;  %v4586_v43 = vor.u32 %v4585_v22, %v4582_v41  ;;  %v21553_v41 = vld [vmem:[#allocation131_spill] sm:$0xff]  ;;  %v21557_v22 = vld [vmem:[#allocation133_spill] sm:$0xff] }
 0x53e   : > { %v4587_v6 = vsel %vm3797_vm9, %v4577_v58, %v4586_v43  ;;  %v21559_v58 = vld [vmem:[#allocation134_spill] sm:$0xff] }
 0x543   : > { %12385 = vmatmul.mubr.msk.bf16.gmra.mrb[16].mxu0 %vm21494_vm7, %v4524_v0  ;;  %vm21516_vm7 = vmmov %vm21461_vm2  ;;  %v4596_v0 = vsel %vm3797_vm9, %v4586_v43, %v4595_v28  ;;  %v21561_v43 = vld [vmem:[#allocation107_spill] sm:$0xff] }
 0x544   : > { %12388 = vmatprep.mubr.msk.bf16.mxu0 %vm21499_vm8, %v4533_v57  ;;  %vm21519_vm8 = vmmov %vm21461_vm2  ;;  %v21520_v57 = vshrl.u32 %v17067_v24, 16  ;;  %v4631_v24 = vor.u32 %v4630_v63, %v4627_v27 }
 0x546   : > { %v4618_v46 = vrot.slane %v21520_v57, 2 }
 0x54b   : > { %12389 = vmatmul.mubr.msk.bf16.gmra.mrb[20].mxu0 %vm21502_vm13, %v4542_v33  ;;  %vm21522_vm13 = vmmov %vm21461_vm2  ;;  %v4622_v33 = vor.u32 %v4621_v4, %v4618_v46 }
 0x54c   : > { %12392 = vmatprep.mubr.msk.bf16.mxu0 %vm21505_vm15, %v4551_v14  ;;  %vm21524_vm15 = vmmov %vm21461_vm2  ;;  %v21526_v14 = vld [vmem:[#allocation101_spill] sm:$0xff] }
 0x54d   : > { %v4623_v30 = vsel %vm3797_vm9, %v4613_v37, %v4622_v33  ;;  %v4632_v8 = vsel %vm3797_vm9, %v4622_v33, %v4631_v24 }
 0x553   : > { %12393 = vmatmul.mubr.msk.bf16.gmra.mrb[24].mxu0 %vm21461_vm2, %v4560_v19  ;;  %v21538_v19 = vld [vmem:[#allocation125_spill] sm:$0xff] }
 0x554   : > { %12396 = vmatprep.mubr.msk.bf16.mxu0 %vm21510_vm6, %v4569_v42  ;;  %vm21525_vm6 = vmmov %vm21461_vm2  ;;  %v21549_v42 = vld [vmem:[#allocation106_spill] sm:$0xff] }
 0x55b   : > { %12397 = vmatmul.mubr.msk.bf16.gmra.mrb[28].mxu0 %vm21513_vm4, %v4578_v31  ;;  %vm21527_vm4 = vmmov %vm21461_vm2  ;;  %v21563_v31 = vld [vmem:[#allocation108_spill] sm:$0xff] }
 0x55c   : > { %12400 = vmatprep.mubr.msk.bf16.mxu0 %vm21516_vm7, %v4587_v6  ;;  %vm21528_vm7 = vcmask 1041408   ;;  %v21576_v6 = vld [vmem:[#allocation138_spill] sm:$0xff] }
 0x55d   : > { %v5364_v45 = vsel %vm21528_vm7, %v17486_v20, 0  ;;  %v21540_v20 = vld [vmem:[#allocation126_spill] sm:$0xff]  ;;  %vm21541_vm7 = vmmov %vm21461_vm2 }
 0x563   : > { %12401 = vmatmul.mubr.msk.bf16.gmra.mrb[32].mxu0 %vm21519_vm8, %v4596_v0  ;;  %vm21530_vm8 = vmmov %vm21461_vm2  ;;  %v21586_v0 = vmov 0  }
 0x564   : > { %12404 = vmatprep.mubr.msk.bf16.mxu0 %vm21522_vm13, %v4605_v50  ;;  %vm21532_vm13 = vmmov %vm21461_vm2 }
 0x56b   : > { %12405 = vmatmul.mubr.msk.bf16.gmra.mrb[36].mxu0 %vm21524_vm15, %v4614_v51  ;;  %vm21534_vm15 = vmmov %vm21461_vm2 }
 0x56c   : > { %12408 = vmatprep.mubr.msk.bf16.mxu0 %vm21461_vm2, %v4623_v30 }
 0x573   : > { %12409 = vmatmul.mubr.msk.bf16.gmra.mrb[40].mxu0 %vm21525_vm6, %v4632_v8  ;;  %vm21537_vm6 = vmmov %vm21461_vm2 }
 0x574   : > { %12414 = vmatprep.mubr.msk.bf16.mxu0 %vm21527_vm4, %v21526_v14  ;;  %vm21539_vm4 = vmmov %vm21461_vm2 }
 0x57b   : > { %12415 = vmatmul.mubr.msk.bf16.vlgmr.msra.gmra.mrb[8].mxu0 %vm21530_vm8, %v21529_v40  ;;  %vm21543_vm8 = vmmov %vm21461_vm2 }
 0x57c   : > { %12418 = vmatprep.mubr.msk.bf16.mxu0 %vm21532_vm13, %v21531_v13  ;;  %12451 = vmatpush3.bf16.msra.mxu0 %v5364_v45  ;;  %vm21545_vm13 = vmmov %vm21461_vm2 }
 0x583   : > { %12419 = vmatmul.mubr.msk.bf16.gmra.mrb[12].mxu0 %vm21534_vm15, %v21533_v48  ;;  %vm21547_vm15 = vmmov %vm21461_vm2 }
 0x584   : > { %12422 = vmatprep.mubr.msk.bf16.mxu0 %vm21461_vm2, %v21535_v1 }
 0x58b   : > { %12423 = vmatmul.mubr.msk.bf16.gmra.mrb[16].mxu0 %vm21537_vm6, %v21536_v52  ;;  %vm21550_vm6 = vmmov %vm21461_vm2 }
 0x58c   : > { %12426 = vmatprep.mubr.msk.bf16.mxu0 %vm21539_vm4, %v21538_v19  ;;  %vm21552_vm4 = vmmov %vm21461_vm2 }
 0x593   : > { %12427 = vmatmul.mubr.msk.bf16.gmra.mrb[20].mxu0 %vm21541_vm7, %v21540_v20  ;;  %vm21554_vm7 = vmmov %vm21461_vm2 }
 0x594   : > { %12430 = vmatprep.mubr.msk.bf16.mxu0 %vm21543_vm8, %v21542_v53  ;;  %vm21556_vm8 = vmmov %vm21461_vm2 }
 0x59b   : > { %12431 = vmatmul.mubr.msk.bf16.gmra.mrb[24].mxu0 %vm21545_vm13, %v21544_v25  ;;  %vm21558_vm13 = vmmov %vm21461_vm2 }
 0x59c   : > { %12434 = vmatprep.mubr.msk.bf16.mxu0 %vm21547_vm15, %v21546_v9  ;;  %vm21560_vm15 = vmmov %vm21461_vm2 }
 0x5a3   : > { %12435 = vmatmul.mubr.msk.bf16.gmra.mrb[28].mxu0 %vm21461_vm2, %v21548_v62 }
 0x5a4   : > { %12438 = vmatprep.mubr.msk.bf16.mxu0 %vm21550_vm6, %v21549_v42  ;;  %vm21562_vm6 = vmmov %vm21461_vm2 }
 0x5ab   : > { %12439 = vmatmul.mubr.msk.bf16.gmra.mrb[32].mxu0 %vm21552_vm4, %v21551_v11  ;;  %vm21564_vm4 = vmmov %vm21461_vm2 }
 0x5ac   : > { %12442 = vmatprep.mubr.msk.bf16.mxu0 %vm21554_vm7, %v21553_v41  ;;  %vm21566_vm7 = vmmov %vm21461_vm2 }
 0x5b3   : > { %12443 = vmatmul.mubr.msk.bf16.gmra.mrb[36].mxu0 %vm21556_vm8, %v21555_v56  ;;  %vm21568_vm8 = vmmov %vm21461_vm2 }
 0x5b4   : > { %12446 = vmatprep.mubr.msk.bf16.mxu0 %vm21558_vm13, %v21557_v22  ;;  %vm21570_vm13 = vmmov %vm21461_vm2 }
 0x5bb   : > { %12447 = vmatmul.mubr.msk.bf16.gmra.mrb[40].mxu0 %vm21560_vm15, %v21559_v58  ;;  %vm21571_vm15 = vmmov %vm21461_vm2 }
 0x5bc   : > { %12452 = vmatprep.mubr.msk.bf16.mxu0 %vm21461_vm2, %v17184_v32  ;;  %v21572_v32 = vld [vmem:[#allocation111_spill] sm:$0xff] }
 0x5c3   : > { %12453 = vmatmul.mubr.msk.bf16.vlgmr.msra.gmra.mrb[8].mxu0 %vm21562_vm6, %v21561_v43  ;;  %vm21573_vm6 = vmmov %vm21461_vm2 }
 0x5c4   : > { %12456 = vmatprep.mubr.msk.bf16.mxu0 %vm21564_vm4, %v21563_v31  ;;  %vm21575_vm4 = vmmov %vm21461_vm2 }
 0x5cb   : > { %12457 = vmatmul.mubr.msk.bf16.gmra.mrb[12].mxu0 %vm21566_vm7, %v21565_v23  ;;  %vm21577_vm7 = vmmov %vm21461_vm2 }
 0x5cc   : > { %12460 = vmatprep.mubr.msk.bf16.mxu0 %vm21568_vm8, %v21567_v21  ;;  %vm21579_vm8 = vmmov %vm21461_vm2 }
 0x5d3   : > { %12461 = vmatmul.mubr.msk.bf16.gmra.mrb[16].mxu0 %vm21570_vm13, %v21569_v44  ;;  %vm21580_vm13 = vmmov %vm21461_vm2 }
 0x5d4   : > { %12464 = vmatprep.mubr.msk.bf16.mxu0 %vm21571_vm15, %v17222_v59  ;;  %vm21581_vm15 = vmmov %vm21461_vm2  ;;  %v5301_v59 = vshrl.u32 %v13843_v5, 16 }
 0x5d6   : > { %v5303_v3 = vrot.slane %v5301_v59, 3 }
 0x5db   : > { %12465 = vmatmul.mubr.msk.bf16.gmra.mrb[20].mxu0 %vm21461_vm2, %v17229_v29  ;;  %v5304_v29 = vshll.u32 %v13843_v5, 16 }
 0x5dc   : > { %12468 = vmatprep.mubr.msk.bf16.mxu0 %vm21573_vm6, %v21572_v32  ;;  %vm21582_vm6 = vmmov %vm21461_vm2 }
 0x5dd   : > { %v5306_v49 = vrot.slane %v5304_v29, 4 }
 0x5df   : > { %v5307_v28 = vor.u32 %v5306_v49, %v5303_v3 }
 0x5e3   : > { %12469 = vmatmul.mubr.msk.bf16.gmra.mrb[24].mxu0 %vm21575_vm4, %v21574_v34  ;;  %vm21583_vm4 = vmmov %vm21461_vm2 }
 0x5e4   : > { %12472 = vmatprep.mubr.msk.bf16.mxu0 %vm21577_vm7, %v21576_v6  ;;  %vm21584_vm7 = vmmov %vm21461_vm2 }
 0x5eb   : > { %12473 = vmatmul.mubr.msk.bf16.gmra.mrb[28].mxu0 %vm21579_vm8, %v21578_v12  ;;  %vm6893_vm8 = vcmask 60418  }
 0x5ec   : > { %12476 = vmatprep.mubr.msk.bf16.mxu0 %vm21580_vm13, %v17268_v26  ;;  %v5308_v26 = vsel %vm5223_vm12, %v17275_v60, %v5307_v28  ;;  %6894 = vst.msk [vmem:[#allocation3 + $0xa0] sm:$0xc] %vm6893_vm8, %v21586_v0  ;;  %vm6891_vm13 = vcmask 58368   ;;  %v17684_v60 = vld [vmem:[%s20476_s7] ss:$0 sm:$0xff] }
 0x5ed   : > { %6892 = vst.msk [vmem:[#allocation3 + $0x10] sm:$0x3] %vm6891_vm13, %v21586_v0 }
 0x5f3   : > { %12477 = vmatmul.mubr.msk.bf16.gmra.mrb[32].mxu0 %vm21581_vm15, %v17273_v18  ;;  %v21585_v18 = vmov 1.0   ;;  %vm21624_vm15 = vcmask 261120  }
 0x5f4   : > { %12480 = vmatprep.mubr.msk.bf16.mxu0 %vm21461_vm2, %v17278_v17  ;;  %vm21625_vm2 = vmmov %vm21624_vm15 }
 0x5fb   : > { %12481 = vmatmul.mubr.msk.bf16.gmra.mrb[36].mxu0 %vm21582_vm6, %v17283_v38  ;;  %v5699_v38 = vld [vmem:[%s20478_s9] sm:$0x1]  ;;  %vm6169_vm6 = vcmask 64512  }
 0x5fc   : > { %12484 = vmatprep.mubr.msk.bf16.mxu0 %vm21583_vm4, %v17287_v15  ;;  %vm21626_vm4 = vcmask 1041408  }
 0x603   : > { %12485 = vmatmul.mubr.msk.bf16.gmra.mrb[40].mxu0 %vm21584_vm7, %v5308_v26  ;;  %v5769_v55 = vpop.f32.mrb[8].mxu1  ;;  %vm21627_vm7 = vcmask 15360  }
 0x604   : > { %5917 = vmatprep.mubr.f32.mxu0 %v21585_v18  ;;  %v12498_v17 = vpop.f32.mrb[9].mxu1  ;;  %v5770_v15 = vadd.f32 %v5769_v55, %v5699_v38 }
 0x606   : > { %v17687_v7 = vrot.slane %v5770_v15, %v21587_v54 }
 0x696   : > { %v12454_v10 = vpop.f32.mrb[8].mxu0 }
 0x697   : > { %v5660_v39 = vadd.f32 %v12454_v10, %v17684_v60  ;;  %v5400_v50 = vpop.f32.mrb[9].mxu0 }
 0x698   : > { %v5658_v57 = vadd.f32 %v17684_v60, %v5400_v50  ;;  %v12455_v46 = vpop.f32.mrb[10].mxu0  ;;  %v21588_v50 = vld [vmem:[#allocation38_spill] sm:$0xff] }
 0x699   : > { %v17692_v35 = vadd.f32 %v17687_v7, %v5660_v39  ;;  %v5661_v4 = vadd.f32 %v12455_v46, %v17684_v60  ;;  %v5403_v37 = vpop.f32.mrb[11].mxu0  ;;  %v21589_v46 = vld [vmem:[#allocation33_spill] sm:$0xff] }
 0x69a   : > { %v5777_v2 = vadd.f32 %v17687_v7, %v5658_v57  ;;  %v5659_v36 = vadd.f32 %v17684_v60, %v5403_v37  ;;  %v21590_v37 = vld [vmem:[#allocation40_spill] sm:$0xff] }
 0x69b   : > { %v5780_v61 = vadd.f32 %v17687_v7, %v5661_v4 }
 0x69c   : > { %v5778_v33 = vadd.f32 %v17687_v7, %v5659_v36 }
 0x69e   : > { %v12458_v51 = vpop.f32.mrb[12].mxu0  ;;  %v17756_v57 = vmul.f32 %v5778_v33, %v21588_v50 }
 0x69f   : > { %v5664_v27 = vadd.f32 %v12458_v51, %v17684_v60  ;;  %v5416_v63 = vpop.f32.mrb[13].mxu0  ;;  %v21591_v51 = vld [vmem:[#allocation34_spill] sm:$0xff] }
 0x6a0   : > { %v5662_v30 = vadd.f32 %v17684_v60, %v5416_v63  ;;  %v12459_v24 = vpop.f32.mrb[14].mxu0 }
 0x6a1   : > { %v17702_v8 = vadd.f32 %v17687_v7, %v5664_v27  ;;  %v5665_v14 = vadd.f32 %v12459_v24, %v17684_v60  ;;  %v5419_v45 = vpop.f32.mrb[15].mxu0 }
 0x6a2   : > { %v17706_v40 = vadd.f32 %v17687_v7, %v5662_v30  ;;  %v5663_v13 = vadd.f32 %v17684_v60, %v5419_v45  ;;  %v21592_v30 = vld [vmem:[#allocation35_spill] sm:$0xff] }
 0x6a3   : > { %v17710_v48 = vadd.f32 %v17687_v7, %v5665_v14  ;;  %v17768_v24 = vmul.f32 %v5777_v2, %v21592_v30 }
 0x6a4   : > { %v17713_v1 = vadd.f32 %v17687_v7, %v5663_v13  ;;  %v21593_v13 = vld [vmem:[#allocation39_spill] sm:$0xff] }
 0x6a6   : > { %v12462_v52 = vpop.f32.mrb[16].mxu0 }
 0x6a7   : > { %v5668_v19 = vadd.f32 %v12462_v52, %v17684_v60  ;;  %v5432_v20 = vpop.f32.mrb[17].mxu0 }
 0x6a8   : > { %v5666_v53 = vadd.f32 %v17684_v60, %v5432_v20  ;;  %v12463_v25 = vpop.f32.mrb[18].mxu0 }
 0x6a9   : > { %v17718_v9 = vadd.f32 %v17687_v7, %v5668_v19  ;;  %v5669_v62 = vadd.f32 %v12463_v25, %v17684_v60  ;;  %v5435_v42 = vpop.f32.mrb[19].mxu0 }
 0x6aa   : > { %v17722_v11 = vadd.f32 %v17687_v7, %v5666_v53  ;;  %v5667_v41 = vadd.f32 %v17684_v60, %v5435_v42  ;;  %v21594_v53 = vld [vmem:[#allocation44_spill] sm:$0xff] }
 0x6ab   : > { %v17726_v56 = vadd.f32 %v17687_v7, %v5669_v62  ;;  %v17778_v25 = vmul.f32 %v5780_v61, %v21594_v53 }
 0x6ac   : > { %v17729_v22 = vadd.f32 %v17687_v7, %v5667_v41  ;;  %v13005_v41 = vpack.c.bf16 %v17756_v57, %v17768_v24 }
 0x6ae   : > { %v12466_v58 = vpop.f32.mrb[20].mxu0 }
 0x6af   : > { %v5672_v43 = vadd.f32 %v12466_v58, %v17684_v60  ;;  %v5448_v31 = vpop.f32.mrb[21].mxu0 }
 0x6b0   : > { %v5670_v23 = vadd.f32 %v17684_v60, %v5448_v31  ;;  %v12467_v21 = vpop.f32.mrb[22].mxu0 }
 0x6b1   : > { %v17734_v44 = vadd.f32 %v17687_v7, %v5672_v43  ;;  %v5673_v32 = vadd.f32 %v12467_v21, %v17684_v60  ;;  %v5451_v34 = vpop.f32.mrb[23].mxu0 }
 0x6b2   : > { %v17738_v6 = vadd.f32 %v17687_v7, %v5670_v23  ;;  %v5671_v12 = vadd.f32 %v17684_v60, %v5451_v34  ;;  %v21595_v23 = vld [vmem:[#allocation43_spill] sm:$0xff]  ;;  %v21596_v34 = vld [vmem:[#allocation30_spill] sm:$0xff] }
 0x6b3   : > { %v17742_v5 = vadd.f32 %v17687_v7, %v5673_v32  ;;  %v17790_v61 = vmul.f32 %v17692_v35, %v21595_v23  ;;  %v21599_v35 = vld [vmem:[#allocation46_spill] sm:$0xff] }
 0x6b4   : > { %v17745_v59 = vadd.f32 %v17687_v7, %v5671_v12  ;;  %v17796_v12 = vmul.f32 %v17713_v1, %v21596_v34 }
 0x6b6   : > { %v12470_v29 = vpop.f32.mrb[24].mxu0 }
 0x6b7   : > { %v5676_v3 = vadd.f32 %v12470_v29, %v17684_v60  ;;  %v5464_v49 = vpop.f32.mrb[25].mxu0  ;;  %v13009_v29 = vpack.c.bf16 %v17778_v25, %v17790_v61 }
 0x6b8   : > { %v5674_v28 = vadd.f32 %v17684_v60, %v5464_v49  ;;  %v12471_v26 = vpop.f32.mrb[26].mxu0 }
 0x6b9   : > { %v5795_v55 = vadd.f32 %v17687_v7, %v5676_v3  ;;  %v5677_v17 = vadd.f32 %v12471_v26, %v17684_v60  ;;  %v5467_v0 = vpop.f32.mrb[27].mxu0  ;;  %v21597_v3 = vld [vmem:[#allocation45_spill] sm:$0xff] }
 0x6ba   : > { %v5793_v38 = vadd.f32 %v17687_v7, %v5674_v28  ;;  %v5675_v15 = vadd.f32 %v17684_v60, %v5467_v0  ;;  %v21598_v28 = vld [vmem:[#allocation6_spill] sm:$0xff]  ;;  %v21600_v0 = vld [vmem:[#allocation49_spill] sm:$0xff] }
 0x6bb   : > { %v5796_v10 = vadd.f32 %v17687_v7, %v5677_v17  ;;  %v17772_v52 = vmul.f32 %v5795_v55, %v21593_v13 }
 0x6bc   : > { %v5794_v39 = vadd.f32 %v17687_v7, %v5675_v15  ;;  %v17759_v4 = vmul.f32 %v5793_v38, %v21589_v46  ;;  %v17811_v38 = vmul.f32 %v17706_v40, %v21600_v0  ;;  %v21617_v46 = vld [vmem:[#allocation77_spill] sm:$0xff] }
 0x6bd   : > { %v17762_v36 = vmul.f32 %v5796_v10, %v21590_v37  ;;  %v21601_v10 = vld [vmem:[#allocation4_spill] sm:$0xff]  ;;  %v21614_v37 = vld [vmem:[#allocation78_spill] sm:$0xff] }
 0x6be   : > { %v17765_v27 = vmul.f32 %v5794_v39, %v21591_v51  ;;  %v12474_v63 = vpop.f32.mrb[28].mxu0 }
 0x6bf   : > { %v5680_v14 = vadd.f32 %v12474_v63, %v17684_v60  ;;  %v5480_v45 = vpop.f32.mrb[29].mxu0  ;;  %v13007_v31 = vpack.c.bf16 %v17762_v36, %v17772_v52 }
 0x6c0   : > { %v5678_v33 = vadd.f32 %v17684_v60, %v5480_v45  ;;  %v12475_v19 = vpop.f32.mrb[30].mxu0  ;;  %v13003_v20 = vpack.c.bf16 %v17765_v27, %v17759_v4 }
 0x6c1   : > { %v5799_v62 = vadd.f32 %v17687_v7, %v5680_v14  ;;  %v5681_v2 = vadd.f32 %v12475_v19, %v17684_v60  ;;  %v5483_v42 = vpop.f32.mrb[31].mxu0 }
 0x6c2   : > { %v5797_v58 = vadd.f32 %v17687_v7, %v5678_v33  ;;  %v5679_v43 = vadd.f32 %v17684_v60, %v5483_v42  ;;  %13004 = vmatprep.subr.bf16.mxu0 %v13003_v20  ;;  %v21602_v33 = vld [vmem:[#allocation10_spill] sm:$0xff]  ;;  %v13013_v42 = vpack.c.bf16 %v17796_v12, %v17811_v38 }
 0x6c3   : > { %v5800_v21 = vadd.f32 %v17687_v7, %v5681_v2  ;;  %13006 = vmatpush3.bf16.msra.mxu0 %v13005_v41  ;;  %v17815_v39 = vmul.f32 %v5799_v62, %v21601_v10  ;;  %v17822_v19 = vmul.f32 %v17710_v48, %v21602_v33  ;;  %v21611_v10 = vld [vmem:[#allocation54_spill] sm:$0xff] }
 0x6c4   : > { %v5798_v32 = vadd.f32 %v17687_v7, %v5679_v43  ;;  %13008 = vmatprep.subr.bf16.mxu0 %v13007_v31  ;;  %v17801_v49 = vmul.f32 %v5797_v58, %v21597_v3  ;;  %v21603_v43 = vld [vmem:[#allocation9_spill] sm:$0xff] }
 0x6c5   : > { %v17804_v26 = vmul.f32 %v5800_v21, %v21598_v28  ;;  %v17834_v48 = vmul.f32 %v17702_v8, %v21603_v43  ;;  %v21607_v8 = vld [vmem:[#allocation53_spill] sm:$0xff] }
 0x6c6   : > { %v17807_v55 = vmul.f32 %v5798_v32, %v21599_v35  ;;  %v12478_v17 = vpop.f32.mrb[32].mxu0  ;;  %v21604_v32 = vld [vmem:[#allocation56_spill] sm:$0xff]  ;;  %v21612_v35 = vld [vmem:[#allocation75_spill] sm:$0xff] }
 0x6c7   : > { %v5684_v1 = vadd.f32 %v12478_v17, %v17684_v60  ;;  %v5496_v15 = vpop.f32.mrb[33].mxu0  ;;  %13010 = vmatpush3.bf16.msra.mxu0 %v13009_v29  ;;  %v13015_v58 = vpack.c.bf16 %v17804_v26, %v17815_v39  ;;  %v17840_v29 = vmul.f32 %v17729_v22, %v21604_v32  ;;  %v13017_v17 = vpack.c.bf16 %v17822_v19, %v17834_v48 }
 0x6c8   : > { %v5682_v63 = vadd.f32 %v17684_v60, %v5496_v15  ;;  %v12479_v14 = vpop.f32.mrb[34].mxu0  ;;  %v13011_v45 = vpack.c.bf16 %v17807_v55, %v17801_v49  ;;  %v17884_v3 = vmul.f32 %v17745_v59, %v21612_v35 }
 0x6c9   : > { %v5803_v40 = vadd.f32 %v17687_v7, %v5684_v1  ;;  %v5685_v20 = vadd.f32 %v12479_v14, %v17684_v60  ;;  %v5499_v2 = vpop.f32.mrb[35].mxu0  ;;  %v21605_v1 = vld [vmem:[#allocation52_spill] sm:$0xff] }
 0x6ca   : > { %v5801_v62 = vadd.f32 %v17687_v7, %v5682_v63  ;;  %v5683_v41 = vadd.f32 %v17684_v60, %v5499_v2  ;;  %13012 = vmatprep.subr.bf16.mxu0 %v13011_v45  ;;  %v21606_v63 = vld [vmem:[#allocation58_spill] sm:$0xff]  ;;  %v21608_v2 = vld [vmem:[#allocation55_spill] sm:$0xff] }
 0x6cb   : > { %v5804_v31 = vadd.f32 %v17687_v7, %v5685_v20  ;;  %13014 = vmatpush3.bf16.msra.mxu0 %v13013_v42  ;;  %v17855_v42 = vmul.f32 %v17722_v11, %v21608_v2 }
 0x6cc   : > { %v5802_v21 = vadd.f32 %v17687_v7, %v5683_v41  ;;  %13016 = vmatprep.subr.bf16.mxu0 %v13015_v58  ;;  %v17845_v15 = vmul.f32 %v5801_v62, %v21605_v1  ;;  %v21609_v58 = vld [vmem:[#allocation57_spill] sm:$0xff] }
 0x6cd   : > { %v17848_v14 = vmul.f32 %v5804_v31, %v21606_v63  ;;  %v17859_v28 = vmul.f32 %v5803_v40, %v21609_v58 }
 0x6ce   : > { %v17851_v45 = vmul.f32 %v5802_v21, %v21607_v8  ;;  %v12482_v20 = vpop.f32.mrb[36].mxu0  ;;  %v21610_v21 = vld [vmem:[#allocation71_spill] sm:$0xff] }
 0x6cf   : > { %v5688_v22 = vadd.f32 %v12482_v20, %v17684_v60  ;;  %v5512_v41 = vpop.f32.mrb[37].mxu0  ;;  %13018 = vmatpush3.bf16.msra.mxu0 %v13017_v17  ;;  %v17866_v63 = vmul.f32 %v17726_v56, %v21610_v21  ;;  %v13021_v17 = vpack.c.bf16 %v17840_v29, %v17855_v42  ;;  %v13023_v58 = vpack.c.bf16 %v17848_v14, %v17859_v28 }
 0x6d0   : > { %v5686_v62 = vadd.f32 %v17684_v60, %v5512_v41  ;;  %v12483_v1 = vpop.f32.mrb[38].mxu0  ;;  %v13019_v31 = vpack.c.bf16 %v17851_v45, %v17845_v15  ;;  %v17878_v56 = vmul.f32 %v17718_v9, %v21611_v10  ;;  %v21615_v9 = vld [vmem:[#allocation73_spill] sm:$0xff] }
 0x6d1   : > { %v5807_v11 = vadd.f32 %v17687_v7, %v5688_v22  ;;  %v5689_v8 = vadd.f32 %v12483_v1, %v17684_v60  ;;  %v5515_v20 = vpop.f32.mrb[39].mxu0 }
 0x6d2   : > { %v5805_v40 = vadd.f32 %v17687_v7, %v5686_v62  ;;  %v5687_v41 = vadd.f32 %v17684_v60, %v5515_v20  ;;  %13020 = vmatprep.subr.bf16.mxu0 %v13019_v31  ;;  %v13025_v62 = vpack.c.bf16 %v17866_v63, %v17878_v56  ;;  %v21613_v31 = vld [vmem:[#allocation72_spill] sm:$0xff] }
 0x6d3   : > { %v5808_v22 = vadd.f32 %v17687_v7, %v5689_v8  ;;  %13022 = vmatpush3.bf16.msra.mxu0 %v13021_v17  ;;  %v21616_v17 = vld [vmem:[#allocation74_spill] sm:$0xff]  ;;  %v17903_v35 = vmul.f32 %v5807_v11, %v21617_v46 }
 0x6d4   : > { %v5806_v1 = vadd.f32 %v17687_v7, %v5687_v41  ;;  %13024 = vmatprep.subr.bf16.mxu0 %v13023_v58  ;;  %v17889_v20 = vmul.f32 %v5805_v40, %v21613_v31  ;;  %v17899_v58 = vmul.f32 %v17738_v6, %v21616_v17  ;;  %v21619_v17 = vld [vmem:[#allocation79_spill] sm:$0xff] }
 0x6d5   : > { %v17892_v13 = vmul.f32 %v5808_v22, %v21614_v37 }
 0x6d6   : > { %v17895_v51 = vmul.f32 %v5806_v1, %v21615_v9  ;;  %v12486_v8 = vpop.f32.mrb[40].mxu0  ;;  %v21618_v1 = vld [vmem:[#allocation80_spill] sm:$0xff] }
 0x6d7   : > { %v5692_v59 = vadd.f32 %v12486_v8, %v17684_v60  ;;  %v5528_v41 = vpop.f32.mrb[41].mxu0  ;;  %13026 = vmatpush3.bf16.msra.mxu0 %v13025_v62  ;;  %v17910_v37 = vmul.f32 %v17742_v5, %v21618_v1  ;;  %v13029_v62 = vpack.c.bf16 %v17884_v3, %v17899_v58  ;;  %v13031_v46 = vpack.c.bf16 %v17892_v13, %v17903_v35 }
 0x6d8   : > { %v5690_v40 = vadd.f32 %v17684_v60, %v5528_v41  ;;  %v12487_v31 = vpop.f32.mrb[42].mxu0  ;;  %v13027_v22 = vpack.c.bf16 %v17895_v51, %v17889_v20  ;;  %v17922_v5 = vmul.f32 %v17734_v44, %v21619_v17 }
 0x6d9   : > { %v5811_v6 = vadd.f32 %v17687_v7, %v5692_v59  ;;  %v5693_v9 = vadd.f32 %v12487_v31, %v17684_v60  ;;  %v5531_v8 = vpop.f32.mrb[43].mxu0 }
 0x6da   : > { %v5809_v11 = vadd.f32 %v17687_v7, %v5690_v40  ;;  %v5691_v41 = vadd.f32 %v17684_v60, %v5531_v8  ;;  %13028 = vmatprep.subr.bf16.mxu0 %v13027_v22  ;;  %v13033_v1 = vpack.c.bf16 %v17910_v37, %v17922_v5  ;;  %v21620_v40 = vld [vmem:[#allocation36_spill] sm:$0xff]  ;;  %v21621_v60 = vld [vmem:[#allocation37_spill] sm:$0xff]  ;;  %v21622_v8 = vld [vmem:[#allocation42_spill] sm:$0xff] }
 0x6db   : > { %v5812_v59 = vadd.f32 %v17687_v7, %v5693_v9  ;;  %13030 = vmatpush3.bf16.msra.mxu0 %v13029_v62  ;;  %v5994_v62 = vmul.f32 %v17756_v57, %v17756_v57 }
 0x6dc   : > { %v5810_v31 = vadd.f32 %v17687_v7, %v5691_v41  ;;  %13032 = vmatprep.subr.bf16.mxu0 %v13031_v46  ;;  %v17929_v21 = vmul.f32 %v5809_v11, %v21620_v40  ;;  %v6010_v7 = vmul.f32 %v17765_v27, %v17765_v27  ;;  %v21623_v46 = vld [vmem:[#allocation41_spill] sm:$0xff] }
 0x6dd   : > { %v17935_v10 = vmul.f32 %v5812_v59, %v21622_v8  ;;  %v17942_v9 = vmul.f32 %v5811_v6, %v21623_v46  ;;  %v6012_v59 = vmul.f32 %v17762_v36, %v17762_v36  ;;  %v5993_v6 = vmul.f32 %v17768_v24, %v17768_v24 }
 0x6de   : > { %v17932_v22 = vmul.f32 %v5810_v31, %v21621_v60  ;;  %v6011_v31 = vmul.f32 %v17772_v52, %v17772_v52 }
 0x6df   : > { %13034 = vmatpush3.bf16.msra.mxu0 %v13033_v1  ;;  %v6009_v1 = vmul.f32 %v17759_v4, %v17759_v4  ;;  %v13039_v11 = vpack.c.bf16 %v17935_v10, %v17942_v9  ;;  %v13043_v8 = vpack.c.bf16 %v5994_v62, %v5993_v6  ;;  %v5998_v62 = vmul.f32 %v17796_v12, %v17796_v12 }
 0x6e0   : > { %v13036_v44 = vpack.c.bf16 %v17932_v22, %v17929_v21  ;;  %v13045_v46 = vpack.c.bf16 %v6012_v59, %v6011_v31  ;;  %v6016_v59 = vmul.f32 %v17804_v26, %v17804_v26  ;;  %v5997_v31 = vmul.f32 %v17811_v38, %v17811_v38 }
 0x6e1   : > { %v13041_v41 = vpack.c.bf16 %v6010_v7, %v6009_v1  ;;  %v6014_v7 = vmul.f32 %v17807_v55, %v17807_v55  ;;  %v5995_v1 = vmul.f32 %v17790_v61, %v17790_v61 }
 0x6e2   : > { %13037 = vmatpush3.bf16.msra.mxu1 %v13036_v44  ;;  %5918 = vmatmul.mubr.f32.vlgmr.msra.gmra.mrb[44].mxu0 %v21585_v18  ;;  %v5996_v44 = vmul.f32 %v17778_v25, %v17778_v25  ;;  %v13051_v60 = vpack.c.bf16 %v5998_v62, %v5997_v31  ;;  %v6020_v62 = vmul.f32 %v17848_v14, %v17848_v14 }
 0x6e3   : > { %13038 = vmatprep.subr.bf16.mxu1 %v21484_v47 }
 0x6e6   : > { %13040 = vmatpush3.bf16.msra.mxu1 %v13039_v11  ;;  %v6013_v11 = vmul.f32 %v17801_v49, %v17801_v49 }
 0x6e7   : > { %13042 = vmatprep.subr.bf16.mxu1 %v13041_v41  ;;  %v13047_v41 = vpack.c.bf16 %v5996_v44, %v5995_v1  ;;  %v6018_v44 = vmul.f32 %v17851_v45, %v17851_v45  ;;  %v6017_v1 = vmul.f32 %v17845_v15, %v17845_v15 }
 0x6e8   : > { %v13049_v6 = vpack.c.bf16 %v6014_v7, %v6013_v11  ;;  %v5999_v7 = vmul.f32 %v17834_v48, %v17834_v48  ;;  %v6002_v11 = vmul.f32 %v17840_v29, %v17840_v29 }
 0x6e9   : > { %12508 = vmatmul.mubr.msk.f32.vlgmr.msra.gmra.mrb[10].mxu1 %vm21624_vm15, %v21585_v18  ;;  %vm21628_vm15 = vmmov %vm21626_vm4 }
 0x6ea   : > { %13044 = vmatpush3.bf16.msra.mxu1 %v13043_v8  ;;  %6093 = vmatprep.mubr.f32.mxu1 %v21585_v18  ;;  %v6015_v8 = vmul.f32 %v17815_v39, %v17815_v39 }
 0x6eb   : > { %13046 = vmatprep.subr.bf16.mxu1 %v13045_v46  ;;  %v6000_v46 = vmul.f32 %v17822_v19, %v17822_v19 }
 0x6ec   : > { %v13053_v40 = vpack.c.bf16 %v6016_v59, %v6015_v8  ;;  %v6001_v59 = vmul.f32 %v17855_v42, %v17855_v42 }
 0x6ee   : > { %13048 = vmatpush3.bf16.msra.mxu1 %v13047_v41  ;;  %v13055_v41 = vpack.c.bf16 %v6000_v46, %v5999_v7  ;;  %v13059_v31 = vpack.c.bf16 %v6002_v11, %v6001_v59  ;;  %v6022_v46 = vmul.f32 %v17895_v51, %v17895_v51  ;;  %v6021_v7 = vmul.f32 %v17889_v20, %v17889_v20 }
 0x6ef   : > { %13050 = vmatprep.subr.bf16.mxu1 %v13049_v6  ;;  %v13057_v6 = vpack.c.bf16 %v6018_v44, %v6017_v1  ;;  %v6003_v44 = vmul.f32 %v17878_v56, %v17878_v56  ;;  %v6006_v1 = vmul.f32 %v17884_v3, %v17884_v3  ;;  %v6024_v11 = vmul.f32 %v17892_v13, %v17892_v13 }
 0x6f0   : > { %v6023_v59 = vmul.f32 %v17903_v35, %v17903_v35 }
 0x6f2   : > { %13052 = vmatpush3.bf16.msra.mxu1 %v13051_v60  ;;  %v6019_v60 = vmul.f32 %v17859_v28, %v17859_v28 }
 0x6f3   : > { %13054 = vmatprep.subr.bf16.mxu1 %v13053_v40  ;;  %v6004_v40 = vmul.f32 %v17866_v63, %v17866_v63 }
 0x6f4   : > { %v13061_v8 = vpack.c.bf16 %v6020_v62, %v6019_v60  ;;  %v6005_v62 = vmul.f32 %v17899_v58, %v17899_v58  ;;  %v6008_v60 = vmul.f32 %v17910_v37, %v17910_v37 }
 0x6f6   : > { %13056 = vmatpush3.bf16.msra.mxu1 %v13055_v41  ;;  %v13063_v41 = vpack.c.bf16 %v6004_v40, %v6003_v44  ;;  %v6007_v40 = vmul.f32 %v17922_v5, %v17922_v5 }
 0x6f7   : > { %13058 = vmatprep.subr.bf16.mxu1 %v13057_v6  ;;  %v13065_v6 = vpack.c.bf16 %v6022_v46, %v6021_v7  ;;  %v6026_v46 = vmul.f32 %v17932_v22, %v17932_v22  ;;  %v6025_v7 = vmul.f32 %v17929_v21, %v17929_v21 }
 0x6f8   : > { %v13071_v44 = vpack.c.bf16 %v6008_v60, %v6007_v40 }
 0x6fa   : > { %13060 = vmatpush3.bf16.msra.mxu1 %v13059_v31  ;;  %v13067_v31 = vpack.c.bf16 %v6006_v1, %v6005_v62  ;;  %v13074_v1 = vpack.c.bf16 %v6026_v46, %v6025_v7  ;;  %v5851_v62 = vld [vmem:[%s20481_s12] sm:$0xff] }
 0x6fb   : > { %13062 = vmatprep.subr.bf16.mxu1 %v13061_v8  ;;  %v13069_v8 = vpack.c.bf16 %v6024_v11, %v6023_v59 }
 0x6fe   : > { %13064 = vmatpush3.bf16.msra.mxu1 %v13063_v41  ;;  %v6028_v41 = vmul.f32 %v17935_v10, %v17935_v10 }
 0x6ff   : > { %13066 = vmatprep.subr.bf16.mxu1 %v13065_v6  ;;  %v6027_v6 = vmul.f32 %v17942_v9, %v17942_v9 }
 0x701   : > { %v13077_v11 = vpack.c.bf16 %v6028_v41, %v6027_v6  ;;  %v5852_v6 = vld [vmem:[%s20482_s13] sm:$0x3] }
 0x702   : > { %13068 = vmatpush3.bf16.msra.mxu1 %v13067_v31 }
 0x703   : > { %13070 = vmatprep.subr.bf16.mxu1 %v13069_v8 }
 0x706   : > { %13072 = vmatpush3.bf16.msra.mxu1 %v13071_v44 }
 0x707   : > { %13073 = vmatprep.subr.bf16.mxu1 %v21484_v47 }
 0x709   : > { %6094 = vmatmul.mubr.f32.vlgmr.msra.gmra.mrb[12].mxu1 %v21585_v18 }
 0x70a   : > { %13075 = vmatpush3.bf16.msra.mxu1 %v13074_v1  ;;  %12518 = vmatprep.mubr.msk.f32.mxu1 %vm21498_vm1, %v21497_v16 }
 0x70b   : > { %13076 = vmatprep.subr.bf16.mxu1 %v21484_v47 }
 0x70e   : > { %13078 = vmatpush3.bf16.msra.mxu1 %v13077_v11 }
 0x70f   : > { %12521 = vmatprep.subr.mxu1 %v21497_v16 }
 0x711   : > { %12519 = vmatmul.mubr.msk.f32.vlgmr.msra.gmra.mrb[14].mxu1 %vm21625_vm2, %v21585_v18  ;;  %vm21629_vm2 = vmmov %vm21627_vm7 }
 0x712   : > { %12523 = vmatprep.mubr.msk.f32.mxu1 %vm21498_vm1, %v21497_v16  ;;  %12522 = vmatpush3.msra.mxu1 %v5851_v62 }
 0x713   : > { %12526 = vmatprep.subr.mxu1 %v21497_v16 }
 0x7b5   : > { %v11858_v59 = vpop.f32.mrb[44].mxu0 }
 0x7b6   : > { %v11859_v60 = vpop.f32.mrb[45].mxu0 }
 0x7b7   : > { %v11860_v47 = vadd.f32 %v11859_v60, %v11858_v59 }
 0x7bc   : > { %v5989_v31 = vpop.f32.mrb[10].mxu1 }
 0x7bd   : > { %v5990_v8 = vadd.f32 %v11860_v47, %v5989_v31  ;;  %v12509_v40 = vpop.f32.mrb[11].mxu1 }
 0x7bf   : > { %12524 = vmatmul.mubr.msk.f32.vlgmr.msra.gmra.mrb[16].mxu1 %vm6169_vm6, %v5990_v8 }
 0x7c0   : > { %12527 = vmatpush3.msra.mxu1 %v5851_v62  ;;  %12528 = vmatprep.mubr.msk.f32.mxu1 %vm21498_vm1, %v21497_v16 }
 0x7c1   : > { %12531 = vmatprep.subr.mxu1 %v21497_v16 }
 0x7dc   : > { %v11898_v18 = vpop.f32.mrb[12].mxu1 }
 0x7dd   : > { %v11899_v46 = vpop.f32.mrb[13].mxu1 }
 0x7de   : > { %v11900_v44 = vadd.f32 %v11899_v46, %v11898_v18  ;;  %v18055_v18 = vld [vmem:[%s20483_s14] sm:$0xf] }
 0x7e4   : > { %v6165_v7 = vpop.f32.mrb[14].mxu1 }
 0x7e5   : > { %v6166_v41 = vadd.f32 %v11900_v44, %v6165_v7  ;;  %v12520_v1 = vpop.f32.mrb[15].mxu1 }
 0x7e7   : > { %12529 = vmatmul.mubr.msk.f32.vlgmr.msra.gmra.mrb[18].mxu1 %vm6169_vm6, %v6166_v41 }
 0x7e8   : > { %12533 = vmatprep.mubr.msk.f32.mxu1 %vm21498_vm1, %v21497_v16  ;;  %12532 = vmatpush3.msk.msra.mxu1 %vm21626_vm4, %v5852_v6  ;;  %vm21630_vm4 = vcmask 1043456  }
 0x7e9   : > { %12536 = vmatprep.subr.mxu1 %v21497_v16 }
 0x892   : > { %v6239_v11 = vpop.f32.mrb[16].mxu1 }
 0x893   : > { %v6243_v62 = vmul.f32 0.0009765625, %v6239_v11  ;;  %v12525_v59 = vpop.f32.mrb[17].mxu1 }
 0x895   : > { %12534 = vmatmul.mubr.msk.f32.vlgmr.msra.gmra.mrb[20].mxu1 %vm21627_vm7, %v6243_v62  ;;  %v6318_v47 = vmul.f32 %v6243_v62, %v6243_v62 }
 0x896   : > { %12537 = vmatpush3.msk.msra.mxu1 %vm21628_vm15, %v5852_v6  ;;  %12538 = vmatprep.mubr.msk.f32.mxu1 %vm21498_vm1, %v21497_v16  ;;  %vm21631_vm1 = vmmov %vm21630_vm4 }
 0x897   : > { %13773 = vmatprep.subr.msk.bf16.mxu1 %vm21630_vm4, %v18055_v18  ;;  %vm21639_vm7 = vmmov %vm21631_vm1 }
 0x898   : > { %vm21640_vm15 = vmmov %vm21631_vm1 }
 0x899   : > { %vm21655_vm4 = vmmov %vm21631_vm1 }
 0x8ba   : > { %v6313_v60 = vpop.f32.mrb[18].mxu1 }
 0x8bb   : > { %v6317_v31 = vmul.f32 0.0009765625, %v6313_v60  ;;  %v12530_v8 = vpop.f32.mrb[19].mxu1 }
 0x8bd   : > { %v6319_v40 = vsub.f32 %v6317_v31, %v6318_v47 }
 0x8bf   : > { %12539 = vmatmul.mubr.msk.f32.vlgmr.msra.gmra.mrb[22].mxu1 %vm21629_vm2, %v6319_v40  ;;  %vm21643_vm2 = vmmov %vm21631_vm1 }
 0x968   : > { %v6392_v46 = vpop.f32.mrb[20].mxu1 }
 0x969   : > { %v12535_v44 = vpop.f32.mrb[21].mxu1  ;;  %v18060_v1 = vrot.slane %v6392_v46, %v21587_v54 }
 0x96b   : > { %v6400_v6 = vsub.f32 %v17768_v24, %v18060_v1  ;;  %v6401_v11 = vsub.f32 %v17756_v57, %v18060_v1  ;;  %v6402_v62 = vsub.f32 %v17790_v61, %v18060_v1  ;;  %v6403_v59 = vsub.f32 %v17778_v25, %v18060_v1 }
 0x96c   : > { %v6404_v60 = vsub.f32 %v17811_v38, %v18060_v1  ;;  %v6405_v47 = vsub.f32 %v17796_v12, %v18060_v1  ;;  %v6406_v31 = vsub.f32 %v17834_v48, %v18060_v1  ;;  %v6407_v24 = vsub.f32 %v17822_v19, %v18060_v1 }
 0x96d   : > { %v6408_v57 = vsub.f32 %v17855_v42, %v18060_v1  ;;  %v6409_v61 = vsub.f32 %v17840_v29, %v18060_v1  ;;  %v6410_v25 = vsub.f32 %v17878_v56, %v18060_v1  ;;  %v6411_v38 = vsub.f32 %v17866_v63, %v18060_v1 }
 0x96e   : > { %v6412_v12 = vsub.f32 %v17899_v58, %v18060_v1  ;;  %v6413_v48 = vsub.f32 %v17884_v3, %v18060_v1  ;;  %v6414_v19 = vsub.f32 %v17922_v5, %v18060_v1  ;;  %v6415_v42 = vsub.f32 %v17910_v37, %v18060_v1 }
 0x96f   : > { %v6416_v29 = vsub.f32 %v17759_v4, %v18060_v1  ;;  %v6417_v56 = vsub.f32 %v17765_v27, %v18060_v1  ;;  %v6418_v63 = vsub.f32 %v17772_v52, %v18060_v1  ;;  %v6419_v58 = vsub.f32 %v17762_v36, %v18060_v1 }
 0x970   : > { %v6420_v3 = vsub.f32 %v17801_v49, %v18060_v1  ;;  %v6421_v5 = vsub.f32 %v17807_v55, %v18060_v1  ;;  %v6422_v37 = vsub.f32 %v17815_v39, %v18060_v1  ;;  %v6423_v4 = vsub.f32 %v17804_v26, %v18060_v1 }
 0x971   : > { %v6424_v27 = vsub.f32 %v17845_v15, %v18060_v1  ;;  %v6425_v52 = vsub.f32 %v17851_v45, %v18060_v1  ;;  %v6426_v36 = vsub.f32 %v17859_v28, %v18060_v1  ;;  %v6427_v49 = vsub.f32 %v17848_v14, %v18060_v1 }
 0x972   : > { %v6428_v55 = vsub.f32 %v17889_v20, %v18060_v1  ;;  %v6429_v39 = vsub.f32 %v17895_v51, %v18060_v1  ;;  %v6430_v26 = vsub.f32 %v17903_v35, %v18060_v1  ;;  %v6431_v15 = vsub.f32 %v17892_v13, %v18060_v1 }
 0x973   : > { %v6432_v28 = vsub.f32 %v17929_v21, %v18060_v1  ;;  %v6433_v14 = vsub.f32 %v17932_v22, %v18060_v1  ;;  %v6434_v20 = vsub.f32 %v17942_v9, %v18060_v1  ;;  %v6435_v51 = vsub.f32 %v17935_v10, %v18060_v1 }
 0x992   : > { %v6505_v7 = vpop.f32.mrb[22].mxu1 }
 0x993   : > { %v6506_v41 = vadd.f32 1e-05, %v6505_v7  ;;  %v12540_v16 = vpop.f32.mrb[23].mxu1 }
 0x995   : > { %14037 = vrsqrt.f32 %v6506_v41 }
 0x99f   : > { %v14038_v8 = vpop.eup %14037 }
 0x9a0   : > { %v6513_v45 = vrot.slane %v14038_v8, %v21587_v54 }
 0x9a2   : > { %v6514_v40 = vmul.f32 %v6513_v45, %v6400_v6  ;;  %v6515_v46 = vmul.f32 %v6513_v45, %v6401_v11  ;;  %v6516_v35 = vmul.f32 %v6513_v45, %v6402_v62  ;;  %v6517_v44 = vmul.f32 %v6513_v45, %v6403_v59 }
 0x9a3   : > { %v6518_v7 = vmul.f32 %v6513_v45, %v6404_v60  ;;  %v6519_v13 = vmul.f32 %v6513_v45, %v6405_v47  ;;  %v6520_v41 = vmul.f32 %v6513_v45, %v6406_v31  ;;  %v6521_v54 = vmul.f32 %v6513_v45, %v6407_v24 }
 0x9a4   : > { %v6522_v16 = vmul.f32 %v6513_v45, %v6408_v57  ;;  %v6523_v8 = vmul.f32 %v6513_v45, %v6409_v61  ;;  %v6524_v21 = vmul.f32 %v6513_v45, %v6410_v25  ;;  %v6525_v17 = vmul.f32 %v6513_v45, %v6411_v38 }
 0x9a5   : > { %v6526_v32 = vmul.f32 %v6513_v45, %v6412_v12  ;;  %v6527_v22 = vmul.f32 %v6513_v45, %v6413_v48  ;;  %v6528_v2 = vmul.f32 %v6513_v45, %v6414_v19  ;;  %v6529_v33 = vmul.f32 %v6513_v45, %v6415_v42  ;;  %v11213_v42 = vld [vmem:[%s20479_s10] ss:$0 sm:$0xff] }
 0x9a6   : > { %v6530_v9 = vmul.f32 %v6513_v45, %v6416_v29  ;;  %v6531_v43 = vmul.f32 %v6513_v45, %v6417_v56  ;;  %v6532_v34 = vmul.f32 %v6513_v45, %v6418_v63  ;;  %v6533_v10 = vmul.f32 %v6513_v45, %v6419_v58  ;;  %v18141_v29 = vld [vmem:[%s20483_s14 + $0xc] sm:$0xf] }
 0x9a7   : > { %v6534_v1 = vmul.f32 %v6513_v45, %v6420_v3  ;;  %v6535_v6 = vmul.f32 %v6513_v45, %v6421_v5  ;;  %v6536_v11 = vmul.f32 %v6513_v45, %v6422_v37  ;;  %v6537_v62 = vmul.f32 %v6513_v45, %v6423_v4  ;;  %13772 = vmatprep.subr.msk.bf16.mxu0 %vm21631_vm1, %v18141_v29 }
 0x9a8   : > { %v6538_v59 = vmul.f32 %v6513_v45, %v6424_v27  ;;  %v6539_v60 = vmul.f32 %v6513_v45, %v6425_v52  ;;  %v6540_v47 = vmul.f32 %v6513_v45, %v6426_v36  ;;  %v6541_v31 = vmul.f32 %v6513_v45, %v6427_v49  ;;  %v18148_v49 = vld [vmem:[%s20480_s11] ss:$0 sm:$0xff] }
 0x9a9   : > { %v6542_v24 = vmul.f32 %v6513_v45, %v6428_v55  ;;  %v6543_v57 = vmul.f32 %v6513_v45, %v6429_v39  ;;  %v6544_v61 = vmul.f32 %v6513_v45, %v6430_v26  ;;  %v6545_v25 = vmul.f32 %v6513_v45, %v6431_v15 }
 0x9aa   : > { %v6546_v38 = vmul.f32 %v6513_v45, %v6432_v28  ;;  %v6547_v12 = vmul.f32 %v6513_v45, %v6433_v14  ;;  %v6548_v48 = vmul.f32 %v6513_v45, %v6434_v20  ;;  %v6549_v19 = vmul.f32 %v6513_v45, %v6435_v51 }
 0x9ab   : > { %v6556_v56 = vmul.f32 %v11213_v42, %v6514_v40  ;;  %v6557_v63 = vmul.f32 %v11213_v42, %v6515_v46  ;;  %v6558_v58 = vmul.f32 %v11213_v42, %v6516_v35  ;;  %v6559_v3 = vmul.f32 %v11213_v42, %v6517_v44 }
 0x9ac   : > { %v6560_v5 = vmul.f32 %v11213_v42, %v6518_v7  ;;  %v6561_v37 = vmul.f32 %v11213_v42, %v6519_v13  ;;  %v6562_v4 = vmul.f32 %v11213_v42, %v6520_v41  ;;  %v6563_v27 = vmul.f32 %v11213_v42, %v6521_v54 }
 0x9ad   : > { %v6564_v52 = vmul.f32 %v11213_v42, %v6522_v16  ;;  %v6565_v36 = vmul.f32 %v11213_v42, %v6523_v8  ;;  %v6566_v55 = vmul.f32 %v11213_v42, %v6524_v21  ;;  %v6567_v39 = vmul.f32 %v11213_v42, %v6525_v17 }
 0x9ae   : > { %v6568_v26 = vmul.f32 %v11213_v42, %v6526_v32  ;;  %v6569_v15 = vmul.f32 %v11213_v42, %v6527_v22  ;;  %v6570_v45 = vmul.f32 %v11213_v42, %v6528_v2  ;;  %v6571_v28 = vmul.f32 %v11213_v42, %v6529_v33 }
 0x9af   : > { %v6572_v14 = vmul.f32 %v11213_v42, %v6530_v9  ;;  %v6573_v20 = vmul.f32 %v11213_v42, %v6531_v43  ;;  %v6574_v51 = vmul.f32 %v11213_v42, %v6532_v34  ;;  %v18150_v40 = vmul.f32 %v11213_v42, %v6533_v10 }
 0x9b0   : > { %v18152_v46 = vmul.f32 %v11213_v42, %v6534_v1  ;;  %v18154_v35 = vmul.f32 %v11213_v42, %v6535_v6  ;;  %v18156_v44 = vmul.f32 %v11213_v42, %v6536_v11  ;;  %v18159_v7 = vadd.f32 %v18148_v49, %v6556_v56 }
 0x9b1   : > { %v18162_v17 = vadd.f32 %v18148_v49, %v6557_v63  ;;  %v18165_v32 = vadd.f32 %v18148_v49, %v6558_v58  ;;  %v18167_v33 = vmul.f32 %v11213_v42, %v6537_v62  ;;  %v18169_v34 = vmul.f32 %v11213_v42, %v6538_v59 }
 0x9b2   : > { %v18171_v43 = vmul.f32 %v11213_v42, %v6539_v60  ;;  %v18174_v2 = vadd.f32 %v18148_v49, %v6559_v3  ;;  %v18176_v13 = vmul.f32 %v11213_v42, %v6540_v47  ;;  %v18178_v41 = vmul.f32 %v11213_v42, %v6541_v31 }
 0x9b3   : > { %v18180_v54 = vmul.f32 %v11213_v42, %v6542_v24  ;;  %v18183_v16 = vadd.f32 %v18148_v49, %v6560_v5  ;;  %v18185_v8 = vmul.f32 %v11213_v42, %v6543_v57  ;;  %v18187_v21 = vmul.f32 %v11213_v42, %v6544_v61 }
 0x9b4   : > { %v18190_v22 = vadd.f32 %v18148_v49, %v6561_v37  ;;  %v18193_v9 = vadd.f32 %v18148_v49, %v6562_v4  ;;  %v18195_v10 = vmul.f32 %v11213_v42, %v6545_v25  ;;  %v6634_v1 = vsub.f32 0.0, %v18159_v7 }
 0x9b5   : > { %v6635_v6 = vsub.f32 0.0, %v18162_v17  ;;  %v6636_v11 = vsub.f32 0.0, %v18165_v32  ;;  %v18200_v62 = vmul.f32 %v11213_v42, %v6546_v38  ;;  %v18202_v59 = vmul.f32 %v11213_v42, %v6547_v12 }
 0x9b6   : > { %v18205_v60 = vadd.f32 %v18148_v49, %v6563_v27  ;;  %v6637_v47 = vsub.f32 0.0, %v18174_v2  ;;  %v18208_v31 = vmul.f32 %v11213_v42, %v6548_v48  ;;  %v18210_v24 = vmul.f32 %v11213_v42, %v6549_v19 }
 0x9b7   : > { %v18213_v57 = vadd.f32 %v18148_v49, %v6564_v52  ;;  %v6638_v61 = vsub.f32 0.0, %v18183_v16  ;;  %v18217_v25 = vadd.f32 %v18148_v49, %v6565_v36  ;;  %v18220_v38 = vadd.f32 %v18148_v49, %v6566_v55 }
 0x9b8   : > { %v6639_v12 = vsub.f32 0.0, %v18190_v22  ;;  %v6640_v56 = vsub.f32 0.0, %v18193_v9  ;;  %v18225_v48 = vadd.f32 %v18148_v49, %v6567_v39  ;;  %v6670_v19 = vmul.f32 1.442695, %v6634_v1 }
 0x9b9   : > { %v6672_v42 = vmul.f32 1.442695, %v6635_v6  ;;  %v6674_v63 = vmul.f32 1.442695, %v6636_v11  ;;  %v18228_v58 = vadd.f32 %v18148_v49, %v6568_v26  ;;  %v18231_v3 = vadd.f32 %v18148_v49, %v6569_v15 }
 0x9ba   : > { %v6641_v5 = vsub.f32 0.0, %v18205_v60  ;;  %v6676_v37 = vmul.f32 1.442695, %v6637_v47  ;;  %v18235_v4 = vadd.f32 %v18148_v49, %v6570_v45  ;;  %v6642_v27 = vsub.f32 0.0, %v18213_v57 }
 0x9bb   : > { %14039 = vpow2.f32 %v6670_v19  ;;  %v6678_v52 = vmul.f32 1.442695, %v6638_v61  ;;  %v18239_v36 = vadd.f32 %v18148_v49, %v6571_v28  ;;  %v6643_v55 = vsub.f32 0.0, %v18217_v25 }
 0x9bc   : > { %14041 = vpow2.f32 %v6672_v42  ;;  %v6680_v39 = vmul.f32 1.442695, %v6639_v12  ;;  %v18243_v26 = vadd.f32 %v18148_v49, %v6572_v14  ;;  %v6644_v15 = vsub.f32 0.0, %v18220_v38 }
 0x9bd   : > { %14043 = vpow2.f32 %v6674_v63  ;;  %v6682_v1 = vmul.f32 1.442695, %v6640_v56  ;;  %v18247_v45 = vadd.f32 %v18148_v49, %v6573_v20  ;;  %v6645_v6 = vsub.f32 0.0, %v18225_v48 }
 0x9be   : > { %21632 = vst [vmem:[#allocation109_spill] sm:$0xff] %v18243_v26  ;;  %14045 = vpow2.f32 %v6676_v37  ;;  %v6684_v11 = vmul.f32 1.442695, %v6641_v5  ;;  %v18251_v28 = vadd.f32 %v18148_v49, %v6574_v51  ;;  %v6646_v47 = vsub.f32 0.0, %v18228_v58 }
 0x9bf   : > { %21633 = vst [vmem:[#allocation115_spill] sm:$0xff] %v18247_v45  ;;  %14047 = vpow2.f32 %v6678_v52  ;;  %v6686_v61 = vmul.f32 1.442695, %v6642_v27  ;;  %v18256_v14 = vadd.f32 %v18148_v49, %v18150_v40  ;;  %v6647_v12 = vsub.f32 0.0, %v18231_v3 }
 0x9c0   : > { %21634 = vst [vmem:[#allocation113_spill] sm:$0xff] %v18251_v28  ;;  %14049 = vpow2.f32 %v6680_v39  ;;  %v6688_v20 = vmul.f32 1.442695, %v6643_v55  ;;  %v18261_v56 = vadd.f32 %v18148_v49, %v18152_v46  ;;  %v6648_v19 = vsub.f32 0.0, %v18235_v4 }
 0x9c1   : > { %21635 = vst [vmem:[#allocation114_spill] sm:$0xff] %v18256_v14  ;;  %14051 = vpow2.f32 %v6682_v1  ;;  %v6690_v51 = vmul.f32 1.442695, %v6644_v15  ;;  %v18266_v42 = vadd.f32 %v18148_v49, %v18154_v35  ;;  %v6649_v63 = vsub.f32 0.0, %v18239_v36  ;;  %v18279_v35 = vld [vmem:[%s20483_s14 + $0x10] sm:$0xf] }
 0x9c2   : > { %21636 = vst [vmem:[#allocation116_spill] sm:$0xff] %v18261_v56  ;;  %14053 = vpow2.f32 %v6684_v11  ;;  %v6692_v40 = vmul.f32 1.442695, %v6645_v6  ;;  %v18271_v5 = vadd.f32 %v18148_v49, %v18156_v44  ;;  %v6650_v37 = vsub.f32 0.0, %v18243_v26 }
 0x9c3   : > { %21637 = vst [vmem:[#allocation22_spill] sm:$0xff] %v18266_v42  ;;  %14055 = vpow2.f32 %v6686_v61  ;;  %v6694_v46 = vmul.f32 1.442695, %v6646_v47  ;;  %v6651_v27 = vsub.f32 0.0, %v18247_v45  ;;  %v6652_v52 = vsub.f32 0.0, %v18251_v28 }
 0x9c4   : > { %21638 = vst [vmem:[#allocation25_spill] sm:$0xff] %v18271_v5  ;;  %14057 = vpow2.f32 %v6688_v20  ;;  %v6696_v55 = vmul.f32 1.442695, %v6647_v12  ;;  %v6698_v44 = vmul.f32 1.442695, %v6648_v19  ;;  %v7905_v15 = vsel %vm21639_vm7, %v18055_v18, 0 }
 0x9c5   : > { %v18281_v39 = vpop.eup %14039  ;;  %14059 = vpow2.f32 %v6690_v51  ;;  %v7592_v1 = vsel %vm21640_vm15, %v18141_v29, 0  ;;  %v18291_v11 = vadd.f32 %v18148_v49, %v18167_v33  ;;  %v6653_v47 = vsub.f32 0.0, %v18256_v14  ;;  %12580 = vmatpush3.bf16.msra.mxu1 %v7905_v15 }
 0x9c6   : > { %v18287_v6 = vpop.eup %14041  ;;  %14061 = vpow2.f32 %v6692_v40  ;;  %v6700_v61 = vmul.f32 1.442695, %v6649_v63  ;;  %12542 = vmatpush3.bf16.msra.mxu0 %v7592_v1  ;;  %v18298_v18 = vadd.f32 %v18148_v49, %v18169_v34  ;;  %v6654_v29 = vsub.f32 0.0, %v18261_v56  ;;  %13774 = vmatprep.subr.msk.bf16.mxu1 %vm21643_vm2, %v18279_v35 }
 0x9c7   : > { %21641 = vst [vmem:[#allocation29_spill] sm:$0xff] %v18291_v11  ;;  %v18294_v12 = vpop.eup %14043  ;;  %14063 = vpow2.f32 %v6694_v46  ;;  %v6702_v20 = vmul.f32 1.442695, %v6650_v37  ;;  %v18307_v19 = vadd.f32 %v18148_v49, %v18171_v43  ;;  %v6655_v51 = vsub.f32 0.0, %v18266_v42 }
 0x9c8   : > { %21642 = vst [vmem:[#allocation61_spill] sm:$0xff] %v18298_v18  ;;  %v18303_v33 = vpop.eup %14045  ;;  %14065 = vpow2.f32 %v6696_v55  ;;  %v6704_v63 = vmul.f32 1.442695, %v6651_v27  ;;  %v18314_v34 = vadd.f32 %v18148_v49, %v18176_v13  ;;  %v6656_v37 = vsub.f32 0.0, %v18271_v5 }
 0x9c9   : > { %21644 = vst [vmem:[#allocation63_spill] sm:$0xff] %v18307_v19  ;;  %v18310_v40 = vpop.eup %14047  ;;  %14067 = vpow2.f32 %v6698_v44  ;;  %v6706_v46 = vmul.f32 1.442695, %v6652_v52  ;;  %v18321_v43 = vadd.f32 %v18148_v49, %v18178_v41  ;;  %v6657_v1 = vsub.f32 0.0, %v18291_v11 }
 0x9ca   : > { %21645 = vst [vmem:[#allocation64_spill] sm:$0xff] %v18314_v34  ;;  %v18317_v15 = vpop.eup %14049  ;;  %14069 = vpow2.f32 %v6700_v61  ;;  %v6708_v27 = vmul.f32 1.442695, %v6653_v47  ;;  %v18328_v13 = vadd.f32 %v18148_v49, %v18180_v54  ;;  %v6658_v5 = vsub.f32 0.0, %v18298_v18 }
 0x9cb   : > { %21646 = vst [vmem:[#allocation66_spill] sm:$0xff] %v18321_v43  ;;  %v18324_v55 = vpop.eup %14051  ;;  %14071 = vpow2.f32 %v6702_v20  ;;  %v6710_v52 = vmul.f32 1.442695, %v6654_v29  ;;  %v18335_v41 = vadd.f32 %v18148_v49, %v18185_v8  ;;  %v6659_v11 = vsub.f32 0.0, %v18307_v19 }
 0x9cc   : > { %21647 = vst [vmem:[#allocation117_spill] sm:$0xff] %v18328_v13  ;;  %v18331_v44 = vpop.eup %14053  ;;  %14073 = vpow2.f32 %v6704_v63  ;;  %v6712_v47 = vmul.f32 1.442695, %v6655_v51  ;;  %v18342_v54 = vadd.f32 %v18148_v49, %v18187_v21  ;;  %v6660_v18 = vsub.f32 0.0, %v18314_v34 }
 0x9cd   : > { %21648 = vst [vmem:[#allocation67_spill] sm:$0xff] %v18335_v41  ;;  %v18338_v61 = vpop.eup %14055  ;;  %14075 = vpow2.f32 %v6706_v46  ;;  %v6714_v29 = vmul.f32 1.442695, %v6656_v37  ;;  %v18349_v8 = vadd.f32 %v18148_v49, %v18195_v10  ;;  %v6661_v19 = vsub.f32 0.0, %v18321_v43 }
 0x9ce   : > { %21649 = vst [vmem:[#allocation70_spill] sm:$0xff] %v18342_v54  ;;  %v18345_v20 = vpop.eup %14057  ;;  %14077 = vpow2.f32 %v6708_v27  ;;  %v6716_v51 = vmul.f32 1.442695, %v6657_v1  ;;  %v18356_v21 = vadd.f32 %v18148_v49, %v18200_v62  ;;  %v6662_v34 = vsub.f32 0.0, %v18328_v13 }
 0x9cf   : > { %21650 = vst [vmem:[#allocation76_spill] sm:$0xff] %v18349_v8  ;;  %v18352_v63 = vpop.eup %14059  ;;  %14079 = vpow2.f32 %v6710_v52  ;;  %v6718_v37 = vmul.f32 1.442695, %v6658_v5  ;;  %v18363_v10 = vadd.f32 %v18148_v49, %v18202_v59  ;;  %v6663_v43 = vsub.f32 0.0, %v18335_v41 }
 0x9d0   : > { %21651 = vst [vmem:[#allocation83_spill] sm:$0xff] %v18356_v21  ;;  %v18359_v46 = vpop.eup %14061  ;;  %14081 = vpow2.f32 %v6712_v47  ;;  %v6720_v1 = vmul.f32 1.442695, %v6659_v11  ;;  %v18370_v62 = vadd.f32 %v18148_v49, %v18208_v31  ;;  %v6664_v13 = vsub.f32 0.0, %v18342_v54  ;;  %v7224_v47 = vld [vmem:[#allocation3 + $0x8] sm:$0xf] }
 0x9d1   : > { %21652 = vst [vmem:[#allocation65_spill] sm:$0xff] %v18363_v10  ;;  %v18366_v27 = vpop.eup %14063  ;;  %14083 = vpow2.f32 %v6714_v29  ;;  %v6722_v5 = vmul.f32 1.442695, %v6660_v18  ;;  %v18377_v59 = vadd.f32 %v18148_v49, %v18210_v24  ;;  %v6665_v41 = vsub.f32 0.0, %v18349_v8  ;;  %v7225_v54 = vld [vmem:[#allocation3 + $0xc] sm:$0xf] }
 0x9d2   : > { %21653 = vst [vmem:[#allocation118_spill] sm:$0xff] %v18370_v62  ;;  %v18373_v52 = vpop.eup %14065  ;;  %14085 = vpow2.f32 %v6716_v51  ;;  %v6724_v11 = vmul.f32 1.442695, %v6661_v19  ;;  %v6666_v31 = vsub.f32 0.0, %v18356_v21  ;;  %v6726_v56 = vmul.f32 1.442695, %v6662_v34 }
 0x9d3   : > { %21654 = vst [vmem:[#allocation119_spill] sm:$0xff] %v18377_v59  ;;  %v18380_v42 = vpop.eup %14067  ;;  %14087 = vpow2.f32 %v6718_v37  ;;  %v6667_v18 = vsub.f32 0.0, %v18363_v10  ;;  %v6728_v14 = vmul.f32 1.442695, %v6663_v43  ;;  %v6668_v24 = vsub.f32 0.0, %v18370_v62 }
 0x9d4   : > { %v18383_v29 = vpop.eup %14069  ;;  %14089 = vpow2.f32 %v6720_v1  ;;  %v6730_v51 = vmul.f32 1.442695, %v6664_v13  ;;  %v6669_v8 = vsub.f32 0.0, %v18377_v59  ;;  %v6732_v28 = vmul.f32 1.442695, %v6665_v41 }
 0x9d5   : > { %v14072_v49 = vpop.eup %14071  ;;  %14091 = vpow2.f32 %v6722_v5  ;;  %v11291_v21 = vcombine.low %v7224_v47, %v7225_v54  ;;  %v6734_v34 = vmul.f32 1.442695, %v6666_v31  ;;  %v6736_v26 = vmul.f32 1.442695, %v6667_v18 }
 0x9d6   : > { %v14074_v19 = vpop.eup %14073  ;;  %14093 = vpow2.f32 %v6724_v11  ;;  %v6738_v43 = vmul.f32 1.442695, %v6668_v24  ;;  %v6740_v62 = vmul.f32 1.442695, %v6669_v8  ;;  %v6742_v59 = vadd.f32 1.0, %v18281_v39 }
 0x9d7   : > { %v14076_v37 = vpop.eup %14075  ;;  %14095 = vpow2.f32 %v6726_v56  ;;  %v7785_v5 = vshll.u32 %v11291_v21, 16  ;;  %v6743_v41 = vadd.f32 1.0, %v18287_v6  ;;  %v6745_v47 = vadd.f32 1.0, %v18303_v33 }
 0x9d8   : > { %v14078_v45 = vpop.eup %14077  ;;  %14097 = vpow2.f32 %v6728_v14  ;;  %v6744_v14 = vadd.f32 1.0, %v18294_v12  ;;  %v7783_v31 = vshrl.u32 %v11291_v21, 16  ;;  %v6746_v18 = vadd.f32 1.0, %v18310_v40 }
 0x9d9   : > { %v14080_v10 = vpop.eup %14079  ;;  %14099 = vpow2.f32 %v6730_v51  ;;  %v6747_v39 = vadd.f32 1.0, %v18317_v15  ;;  %v6748_v6 = vadd.f32 1.0, %v18324_v55  ;;  %v18397_v12 = vsel %vm21655_vm4, %v18279_v35, 0 }
 0x9da   : > { %v14082_v1 = vpop.eup %14081  ;;  %14101 = vpow2.f32 %v6732_v28  ;;  %v7787_v28 = vrot.slane %v7785_v5, 1  ;;  %v6749_v33 = vadd.f32 1.0, %v18331_v44  ;;  %v6750_v21 = vadd.f32 1.0, %v18338_v61 }
 0x9db   : > { %v14084_v13 = vpop.eup %14083  ;;  %14103 = vpow2.f32 %v6734_v34  ;;  %v6751_v15 = vadd.f32 1.0, %v18345_v20  ;;  %v6752_v51 = vadd.f32 1.0, %v18352_v63  ;;  %v6753_v55 = vadd.f32 1.0, %v18359_v46 }
 0x9dc   : > { %v14086_v11 = vpop.eup %14085  ;;  %14105 = vpow2.f32 %v6736_v26  ;;  %v18401_v40 = vor.u32 %v7787_v28, %v7783_v31  ;;  %v6754_v35 = vadd.f32 1.0, %v18366_v27  ;;  %v6756_v44 = vadd.f32 1.0, %v18380_v42 }
 0x9dd   : > { %v14088_v56 = vpop.eup %14087  ;;  %14107 = vpow2.f32 %v6738_v43  ;;  %v6755_v43 = vadd.f32 1.0, %v18373_v52  ;;  %v6757_v5 = vadd.f32 1.0, %v18383_v29  ;;  %v6761_v63 = vadd.f32 1.0, %v14078_v45 }
 0x9de   : > { %v14090_v54 = vpop.eup %14089  ;;  %14109 = vpow2.f32 %v6740_v62  ;;  %v6762_v31 = vadd.f32 1.0, %v14080_v10  ;;  %v18410_v28 = vadd.f32 1.0, %v14082_v1  ;;  %v18412_v27 = vadd.f32 1.0, %v14084_v13 }
 0x9df   : > { %v14092_v8 = vpop.eup %14091  ;;  %14111 = vrcp.f32 %v6742_v59  ;;  %v18414_v52 = vadd.f32 1.0, %v14086_v11  ;;  %v18418_v29 = vadd.f32 1.0, %v14090_v54 }
 0x9e0   : > { %v14094_v24 = vpop.eup %14093  ;;  %14113 = vrcp.f32 %v6743_v41  ;;  %v6758_v41 = vadd.f32 1.0, %v14072_v49  ;;  %v18420_v49 = vadd.f32 1.0, %v14092_v8 }
 0x9e1   : > { %v14096_v26 = vpop.eup %14095  ;;  %14115 = vrcp.f32 %v6744_v14  ;;  %v6759_v14 = vadd.f32 1.0, %v14074_v19  ;;  %v18422_v45 = vadd.f32 1.0, %v14094_v24 }
 0x9e2   : > { %v14098_v62 = vpop.eup %14097  ;;  %14117 = vrcp.f32 %v6745_v47  ;;  %v6760_v47 = vadd.f32 1.0, %v14076_v37  ;;  %v18424_v10 = vadd.f32 1.0, %v14096_v26 }
 0x9e3   : > { %v14100_v59 = vpop.eup %14099  ;;  %14119 = vrcp.f32 %v6746_v18  ;;  %v18416_v18 = vadd.f32 1.0, %v14088_v56  ;;  %v18426_v37 = vadd.f32 1.0, %v14098_v62 }
 0x9e4   : > { %v14102_v34 = vpop.eup %14101  ;;  %14121 = vrcp.f32 %v6747_v39  ;;  %v18428_v13 = vadd.f32 1.0, %v14100_v59 }
 0x9e5   : > { %v14104_v61 = vpop.eup %14103  ;;  %14123 = vrcp.f32 %v6748_v6  ;;  %v18430_v11 = vadd.f32 1.0, %v14102_v34 }
 0x9e6   : > { %v14106_v20 = vpop.eup %14105  ;;  %14125 = vrcp.f32 %v6749_v33  ;;  %v18433_v8 = vadd.f32 1.0, %v14104_v61  ;;  %v21656_v61 = vld [vmem:[#allocation30_spill] sm:$0xff] }
 0x9e7   : > { %v14108_v46 = vpop.eup %14107  ;;  %14127 = vrcp.f32 %v6750_v21  ;;  %v18435_v39 = vadd.f32 1.0, %v14106_v20 }
 0x9e8   : > { %v14110_v42 = vpop.eup %14109  ;;  %14129 = vrcp.f32 %v6751_v15  ;;  %v18438_v6 = vadd.f32 1.0, %v14108_v46 }
 0x9e9   : > { %v14112_v19 = vpop.eup %14111  ;;  %14131 = vrcp.f32 %v6752_v51  ;;  %v18444_v59 = vadd.f32 1.0, %v14110_v42 }
 0x9ea   : > { %v14114_v1 = vpop.eup %14113  ;;  %14133 = vrcp.f32 %v6753_v55  ;;  %v6850_v56 = vmul.f32 %v14112_v19, %v18159_v7 }
 0x9eb   : > { %v14116_v54 = vpop.eup %14115  ;;  %14135 = vrcp.f32 %v6754_v35  ;;  %v6851_v24 = vmul.f32 %v14114_v1, %v18162_v17 }
 0x9ec   : > { %v14118_v26 = vpop.eup %14117  ;;  %14137 = vrcp.f32 %v6755_v43  ;;  %v6852_v62 = vmul.f32 %v14116_v54, %v18165_v32  ;;  %v18442_v33 = vmul.f32 %v6850_v56, %v21592_v30 }
 0x9ed   : > { %v14120_v21 = vpop.eup %14119  ;;  %14139 = vrcp.f32 %v6756_v44  ;;  %v6853_v7 = vmul.f32 %v14118_v26, %v18174_v2  ;;  %v18448_v15 = vmul.f32 %v6851_v24, %v21588_v50  ;;  %v21660_v24 = vld [vmem:[#allocation56_spill] sm:$0xff] }
 0x9ee   : > { %v14122_v51 = vpop.eup %14121  ;;  %14141 = vrcp.f32 %v6757_v5  ;;  %v6854_v17 = vmul.f32 %v14120_v21, %v18183_v16  ;;  %v18452_v55 = vmul.f32 %v6852_v62, %v21595_v23  ;;  %v11526_v30 = vpack.c.bf16 %v18442_v33, %v18442_v33  ;;  %v21661_v21 = vld [vmem:[#allocation54_spill] sm:$0xff]  ;;  %v21698_v33 = vld [vmem:[#allocation73_spill] sm:$0xff] }
 0x9ef   : > { %v14124_v32 = vpop.eup %14123  ;;  %14143 = vrcp.f32 %v6758_v41  ;;  %v6855_v34 = vmul.f32 %v14122_v51, %v18190_v22  ;;  %v18458_v35 = vmul.f32 %v6853_v7, %v21594_v53  ;;  %v11527_v50 = vpack.c.bf16 %v18448_v15, %v18448_v15 }
 0x9f0   : > { %v14126_v2 = vpop.eup %14125  ;;  %14145 = vrcp.f32 %v6759_v14  ;;  %v6856_v16 = vmul.f32 %v14124_v32, %v18193_v9  ;;  %v18464_v23 = vmul.f32 %v6854_v17, %v21600_v0  ;;  %v11528_v43 = vpack.c.bf16 %v18452_v55, %v18452_v55  ;;  %v21657_v14 = vld [vmem:[#allocation9_spill] sm:$0xff]  ;;  %v21662_v17 = vld [vmem:[#allocation71_spill] sm:$0xff] }
 0x9f1   : > { %v14128_v44 = vpop.eup %14127  ;;  %14147 = vrcp.f32 %v6760_v47  ;;  %v6857_v22 = vmul.f32 %v14126_v2, %v18205_v60  ;;  %v18470_v53 = vmul.f32 %v6855_v34, %v21656_v61  ;;  %v11529_v5 = vpack.c.bf16 %v18458_v35, %v18458_v35  ;;  %v21658_v47 = vld [vmem:[#allocation10_spill] sm:$0xff]  ;;  %v21700_v55 = vld [vmem:[#allocation77_spill] sm:$0xff] }
 0x9f2   : > { %v14130_v41 = vpop.eup %14129  ;;  %14149 = vrcp.f32 %v6761_v63  ;;  %v6858_v9 = vmul.f32 %v14128_v44, %v18213_v57  ;;  %v18476_v0 = vmul.f32 %v6856_v16, %v21657_v14  ;;  %v11530_v20 = vpack.c.bf16 %v18464_v23, %v18464_v23  ;;  %v21659_v63 = vld [vmem:[#allocation55_spill] sm:$0xff]  ;;  %v21663_v2 = vld [vmem:[#allocation74_spill] sm:$0xff]  ;;  %v21708_v35 = vld [vmem:[#allocation41_spill] sm:$0xff] }
 0x9f3   : > { %v14132_v46 = vpop.eup %14131  ;;  %14151 = vrcp.f32 %v6762_v31  ;;  %v6859_v60 = vmul.f32 %v14130_v41, %v18217_v25  ;;  %v18482_v42 = vmul.f32 %v6857_v22, %v21658_v47  ;;  %v11531_v19 = vpack.c.bf16 %v18470_v53, %v18470_v53  ;;  %v21664_v22 = vld [vmem:[#allocation75_spill] sm:$0xff] }
 0x9f4   : > { %v14134_v1 = vpop.eup %14133  ;;  %14153 = vrcp.f32 %v18410_v28  ;;  %v6860_v57 = vmul.f32 %v14132_v46, %v18220_v38  ;;  %v18489_v56 = vmul.f32 %v6858_v9, %v21659_v63  ;;  %v11532_v54 = vpack.c.bf16 %v18476_v0, %v18476_v0  ;;  %v21666_v14 = vld [vmem:[#allocation79_spill] sm:$0xff] }
 0x9f5   : > { %v14136_v31 = vpop.eup %14135  ;;  %14155 = vrcp.f32 %v18412_v27  ;;  %v6861_v25 = vmul.f32 %v14134_v1, %v18225_v48  ;;  %v18496_v26 = vmul.f32 %v6859_v60, %v21660_v24  ;;  %v11533_v62 = vpack.c.bf16 %v18482_v42, %v18482_v42  ;;  %v21668_v1 = vld [vmem:[#allocation80_spill] sm:$0xff]  ;;  %v21670_v24 = vld [vmem:[#allocation33_spill] sm:$0xff] }
 0x9f6   : > { %v14138_v28 = vpop.eup %14137  ;;  %14157 = vrcp.f32 %v18414_v52  ;;  %v6862_v38 = vmul.f32 %v14136_v31, %v18228_v58  ;;  %v18503_v7 = vmul.f32 %v6860_v57, %v21661_v21  ;;  %v11534_v51 = vpack.c.bf16 %v18489_v56, %v18489_v56  ;;  %v21669_v31 = vld [vmem:[#allocation113_spill] sm:$0xff]  ;;  %v21671_v21 = vld [vmem:[#allocation114_spill] sm:$0xff] }
 0x9f7   : > { %v14140_v27 = vpop.eup %14139  ;;  %14159 = vrcp.f32 %v18416_v18  ;;  %v6863_v48 = vmul.f32 %v14138_v28, %v18231_v3  ;;  %v18510_v32 = vmul.f32 %v6861_v25, %v21662_v17  ;;  %v11535_v34 = vpack.c.bf16 %v18496_v26, %v18496_v26 }
 0x9f8   : > { %v14142_v52 = vpop.eup %14141  ;;  %14161 = vrcp.f32 %v18418_v29  ;;  %v6864_v58 = vmul.f32 %v14140_v27, %v18235_v4  ;;  %v18517_v16 = vmul.f32 %v6862_v38, %v21663_v2  ;;  %v11536_v44 = vpack.c.bf16 %v18503_v7, %v18503_v7  ;;  %v21665_v4 = vld [vmem:[#allocation109_spill] sm:$0xff] }
 0x9f9   : > { %v14144_v18 = vpop.eup %14143  ;;  %14163 = vrcp.f32 %v18420_v49  ;;  %v6865_v3 = vmul.f32 %v14142_v52, %v18239_v36  ;;  %v18524_v61 = vmul.f32 %v6863_v48, %v21664_v22  ;;  %v11537_v41 = vpack.c.bf16 %v18510_v32, %v18510_v32  ;;  %v21667_v36 = vld [vmem:[#allocation115_spill] sm:$0xff]  ;;  %v21672_v48 = vld [vmem:[#allocation34_spill] sm:$0xff] }
 0x9fa   : > { %v14146_v29 = vpop.eup %14145  ;;  %14165 = vrcp.f32 %v18422_v45  ;;  %v6866_v9 = vmul.f32 %v14144_v18, %v21665_v4  ;;  %v18531_v46 = vmul.f32 %v6864_v58, %v21666_v14  ;;  %v11538_v60 = vpack.c.bf16 %v18517_v16, %v18517_v16  ;;  %v21673_v58 = vld [vmem:[#allocation116_spill] sm:$0xff]  ;;  %v21674_v18 = vld [vmem:[#allocation39_spill] sm:$0xff] }
 0x9fb   : > { %v14148_v49 = vpop.eup %14147  ;;  %14167 = vrcp.f32 %v18424_v10  ;;  %v6867_v47 = vmul.f32 %v14146_v29, %v21667_v36  ;;  %v18538_v57 = vmul.f32 %v6865_v3, %v21668_v1  ;;  %v11539_v63 = vpack.c.bf16 %v18524_v61, %v18524_v61  ;;  %v21675_v29 = vld [vmem:[#allocation22_spill] sm:$0xff]  ;;  %v21677_v36 = vld [vmem:[#allocation25_spill] sm:$0xff] }
 0x9fc   : > { %v14150_v45 = vpop.eup %14149  ;;  %14169 = vrcp.f32 %v18426_v37  ;;  %v6868_v25 = vmul.f32 %v14148_v49, %v21669_v31  ;;  %v18545_v28 = vmul.f32 %v6866_v9, %v21670_v24  ;;  %v11540_v38 = vpack.c.bf16 %v18531_v46, %v18531_v46  ;;  %v21676_v9 = vld [vmem:[#allocation40_spill] sm:$0xff]  ;;  %v21678_v1 = vld [vmem:[#allocation45_spill] sm:$0xff] }
 0x9fd   : > { %v14152_v10 = vpop.eup %14151  ;;  %14171 = vrcp.f32 %v18428_v13  ;;  %v6869_v27 = vmul.f32 %v14150_v45, %v21671_v21  ;;  %v18552_v17 = vmul.f32 %v6867_v47, %v21672_v48  ;;  %v11541_v52 = vpack.c.bf16 %v18538_v57, %v18538_v57  ;;  %v21681_v48 = vld [vmem:[#allocation61_spill] sm:$0xff] }
 0x9fe   : > { %v14154_v37 = vpop.eup %14153  ;;  %14173 = vrcp.f32 %v18430_v11  ;;  %v6870_v2 = vmul.f32 %v14152_v10, %v21673_v58  ;;  %v18559_v3 = vmul.f32 %v6868_v25, %v21674_v18  ;;  %v11542_v22 = vpack.c.bf16 %v18545_v28, %v18545_v28  ;;  %v21679_v25 = vld [vmem:[#allocation29_spill] sm:$0xff]  ;;  %v21680_v10 = vld [vmem:[#allocation46_spill] sm:$0xff]  ;;  %v21682_v58 = vld [vmem:[#allocation4_spill] sm:$0xff] }
 0x9ff   : > { %v14156_v13 = vpop.eup %14155  ;;  %14175 = vrcp.f32 %v18433_v8  ;;  %v6871_v4 = vmul.f32 %v14154_v37, %v21675_v29  ;;  %v18566_v14 = vmul.f32 %v6869_v27, %v21676_v9  ;;  %v11543_v49 = vpack.c.bf16 %v18552_v17, %v18552_v17  ;;  %v21684_v9 = vld [vmem:[#allocation6_spill] sm:$0xff] }
 0xa00   : > { %v14158_v11 = vpop.eup %14157  ;;  %14177 = vrcp.f32 %v18435_v39  ;;  %v6872_v47 = vmul.f32 %v14156_v13, %v21677_v36  ;;  %v18573_v45 = vmul.f32 %v6870_v2, %v21678_v1  ;;  %v21683_v13 = vld [vmem:[#allocation63_spill] sm:$0xff]  ;;  %v21685_v1 = vld [vmem:[#allocation64_spill] sm:$0xff]  ;;  %v7063_v23 = vrot.slane %v11533_v62, 6 }
 0xa01   : > { %v14160_v8 = vpop.eup %14159  ;;  %14179 = vrcp.f32 %v18438_v6  ;;  %v6873_v24 = vmul.f32 %v14158_v11, %v21679_v25  ;;  %v18580_v21 = vmul.f32 %v6871_v4, %v21680_v10  ;;  %v7066_v0 = vrot.slane %v11534_v51, 6 }
 0xa02   : > { %v14162_v39 = vpop.eup %14161  ;;  %14181 = vrcp.f32 %v18444_v59  ;;  %v6874_v37 = vmul.f32 %v14160_v8, %v21681_v48  ;;  %v18587_v2 = vmul.f32 %v6872_v47, %v21682_v58  ;;  %v7043_v59 = vrot.slane %v11526_v30, 6  ;;  %v21686_v8 = vld [vmem:[#allocation52_spill] sm:$0xff]  ;;  %v21687_v48 = vld [vmem:[#allocation66_spill] sm:$0xff] }
 0xa03   : > { %v14164_v6 = vpop.eup %14163  ;;  %v6875_v29 = vmul.f32 %v14162_v39, %v21683_v13  ;;  %v18593_v4 = vmul.f32 %v6873_v24, %v21684_v9  ;;  %v7045_v24 = vrot.slane %v11527_v50, 6  ;;  %v21688_v13 = vld [vmem:[#allocation53_spill] sm:$0xff]  ;;  %v7069_v62 = vrot.slane %v11535_v34, 6 }
 0xa04   : > { %v14166_v36 = vpop.eup %14165  ;;  %v6876_v47 = vmul.f32 %v14164_v6, %v21685_v1  ;;  %v18602_v25 = vmul.f32 %v6874_v37, %v21686_v8  ;;  %v7044_v30 = vrot.slane %v7043_v59, 4  ;;  %7187 = vst.msk [vmem:[#allocation3 + $0x10] sm:$0xc] %vm6893_vm8, %v7043_v59  ;;  %v21689_v6 = vld [vmem:[#allocation117_spill] sm:$0xff]  ;;  %vm21696_vm8 = vcmask 60416  }
 0xa05   : > { %v14168_v39 = vpop.eup %14167  ;;  %v6877_v58 = vmul.f32 %v14166_v36, %v21687_v48  ;;  %v18611_v9 = vmul.f32 %v6875_v29, %v21688_v13  ;;  %v21690_v8 = vld [vmem:[#allocation57_spill] sm:$0xff]  ;;  %v7047_v50 = vrot.slane %v7045_v24, 4  ;;  %v21691_v48 = vld [vmem:[#allocation67_spill] sm:$0xff]  ;;  %v21692_v13 = vld [vmem:[#allocation58_spill] sm:$0xff]  ;;  %v7071_v26 = vrot.slane %v7069_v62, 4 }
 0xa06   : > { %v14170_v37 = vpop.eup %14169  ;;  %v6878_v1 = vmul.f32 %v14168_v39, %v21689_v6  ;;  %v18618_v10 = vmul.f32 %v6876_v47, %v21690_v8  ;;  %v7046_v18 = vsel %vm16047_vm11, %v7044_v30, %v7045_v24  ;;  %v21694_v6 = vld [vmem:[#allocation70_spill] sm:$0xff]  ;;  %v21695_v8 = vld [vmem:[#allocation72_spill] sm:$0xff]  ;;  %vm21703_vm1 = vmmov %vm21696_vm8  ;;  %v7078_v7 = vrot.slane %v11538_v60, 6 }
 0xa07   : > { %v14172_v36 = vpop.eup %14171  ;;  %v6879_v29 = vmul.f32 %v14170_v37, %v21691_v48  ;;  %v18624_v11 = vmul.f32 %v6877_v58, %v21692_v13  ;;  %v7048_v58 = vrot.slane %v11528_v43, 6  ;;  %7188 = vst.msk [vmem:[#allocation3 + $0x14] sm:$0xf] %vm21696_vm8, %v7046_v18  ;;  %v21697_v48 = vld [vmem:[#allocation76_spill] sm:$0xff]  ;;  %v21702_v30 = vld [vmem:[#allocation78_spill] sm:$0xff]  ;;  %vm21709_vm7 = vmmov %vm21703_vm1  ;;  %v7087_v16 = vrot.slane %v11541_v52, 6 }
 0xa08   : > { %v14174_v39 = vpop.eup %14173  ;;  %v6880_v47 = vmul.f32 %v14172_v36, %v21694_v6  ;;  %v18632_v27 = vmul.f32 %v6878_v1, %v21695_v8  ;;  %v7051_v1 = vrot.slane %v11529_v5, 6  ;;  %v21699_v6 = vld [vmem:[#allocation83_spill] sm:$0xff]  ;;  %vm21711_vm15 = vmmov %vm21703_vm1  ;;  %v7090_v57 = vrot.slane %v11542_v22, 6 }
 0xa09   : > { %v14176_v37 = vpop.eup %14175  ;;  %v6881_v13 = vmul.f32 %v14174_v39, %v21697_v48  ;;  %v18642_v24 = vmul.f32 %v6879_v29, %v21698_v33  ;;  %v7049_v33 = vsel %vm16047_vm11, %v7047_v50, %v7048_v58  ;;  %v21701_v39 = vld [vmem:[#allocation65_spill] sm:$0xff]  ;;  %v7050_v5 = vrot.slane %v7048_v58, 4  ;;  %vm21712_vm2 = vmmov %vm21703_vm1 }
 0xa0a   : > { %v14178_v36 = vpop.eup %14177  ;;  %v6882_v8 = vmul.f32 %v14176_v37, %v21699_v6  ;;  %v18651_v43 = vmul.f32 %v6880_v47, %v21700_v55  ;;  %7189 = vst.msk [vmem:[#allocation3 + $0x18] sm:$0xf] %vm21703_vm1, %v7049_v33  ;;  %v21704_v37 = vld [vmem:[#allocation118_spill] sm:$0xff]  ;;  %v21705_v55 = vld [vmem:[#allocation36_spill] sm:$0xff]  ;;  %v7053_v31 = vrot.slane %v7051_v1, 4  ;;  %vm21713_vm4 = vmmov %vm21703_vm1  ;;  %v7089_v46 = vrot.slane %v7087_v16, 4 }
 0xa0b   : > { %v14180_v29 = vpop.eup %14179  ;;  %v6883_v48 = vmul.f32 %v14178_v36, %v21701_v39  ;;  %v18659_v15 = vmul.f32 %v6881_v13, %v21702_v30  ;;  %v21706_v36 = vld [vmem:[#allocation119_spill] sm:$0xff]  ;;  %v21707_v13 = vld [vmem:[#allocation37_spill] sm:$0xff]  ;;  %v7052_v33 = vsel %vm16047_vm11, %v7050_v5, %v7051_v1  ;;  %vm21714_vm8 = vmmov %vm21703_vm1 }
 0xa0c   : > { %v14182_v47 = vpop.eup %14181  ;;  %v6884_v6 = vmul.f32 %v14180_v29, %v21704_v37  ;;  %v18666_v18 = vmul.f32 %v6882_v8, %v21705_v55  ;;  %v11556_v50 = vpack.c.bf16 %v18651_v43, %v18651_v43  ;;  %v7054_v37 = vrot.slane %v11530_v20, 6  ;;  %7190 = vst.msk [vmem:[#allocation3 + $0x1c] sm:$0xf] %vm21709_vm7, %v7052_v33  ;;  %vm21715_vm7 = vmmov %vm21703_vm1 }
 0xa0d   : > { %v6885_v39 = vmul.f32 %v14182_v47, %v21706_v36  ;;  %v18672_v30 = vmul.f32 %v6883_v48, %v21707_v13  ;;  %v11557_v58 = vpack.c.bf16 %v18659_v15, %v18659_v15  ;;  %v7057_v48 = vrot.slane %v11531_v19, 6  ;;  %v21710_v47 = vld [vmem:[#allocation42_spill] sm:$0xff] }
 0xa0e   : > { %v18679_v29 = vmul.f32 %v6884_v6, %v21708_v35  ;;  %v11558_v8 = vpack.c.bf16 %v18666_v18, %v18666_v18  ;;  %v7060_v35 = vrot.slane %v11532_v54, 6  ;;  %v7055_v20 = vsel %vm16047_vm11, %v7053_v31, %v7054_v37 }
 0xa0f   : > { %v18691_v55 = vmul.f32 %v6885_v39, %v21710_v47  ;;  %v11559_v1 = vpack.c.bf16 %v18672_v30, %v18672_v30  ;;  %v7056_v19 = vrot.slane %v7054_v37, 4  ;;  %v7059_v5 = vrot.slane %v7057_v48, 4  ;;  %7191 = vst.msk [vmem:[#allocation3 + $0x20] sm:$0xf] %vm21711_vm15, %v7055_v20  ;;  %vm21716_vm15 = vmmov %vm21703_vm1 }
 0xa10   : > { %v11560_v53 = vpack.c.bf16 %v18679_v29, %v18679_v29  ;;  %v7062_v36 = vrot.slane %v7060_v35, 4  ;;  %v7065_v39 = vrot.slane %v7063_v23, 4  ;;  %v7072_v31 = vrot.slane %v11536_v44, 6 }
 0xa11   : > { %v11561_v6 = vpack.c.bf16 %v18691_v55, %v18691_v55  ;;  %v7058_v42 = vsel %vm16047_vm11, %v7056_v19, %v7057_v48  ;;  %v7061_v54 = vsel %vm16047_vm11, %v7059_v5, %v7060_v35  ;;  %v7068_v13 = vrot.slane %v7066_v0, 4 }
 0xa12   : > { %v7064_v56 = vsel %vm16047_vm11, %v7062_v36, %v7063_v23  ;;  %v7067_v51 = vsel %vm16047_vm11, %v7065_v39, %v7066_v0  ;;  %v7075_v33 = vrot.slane %v11537_v41, 6  ;;  %7192 = vst.msk [vmem:[#allocation3 + $0x24] sm:$0xf] %vm21712_vm2, %v7058_v42  ;;  %v7074_v34 = vrot.slane %v7072_v31, 4  ;;  %vm21717_vm2 = vmmov %vm21703_vm1 }
 0xa13   : > { %7193 = vst.msk [vmem:[#allocation3 + $0x28] sm:$0xf] %vm21713_vm4, %v7061_v54  ;;  %v7081_v44 = vrot.slane %v11539_v63, 6  ;;  %v7070_v32 = vsel %vm16047_vm11, %v7068_v13, %v7069_v62  ;;  %v7084_v37 = vrot.slane %v11540_v38, 6  ;;  %v7073_v61 = vsel %vm16047_vm11, %v7071_v26, %v7072_v31  ;;  %vm21719_vm4 = vmmov %vm21703_vm1 }
 0xa14   : > { %7194 = vst.msk [vmem:[#allocation3 + $0x2c] sm:$0xf] %vm21714_vm8, %v7064_v56  ;;  %v7077_v41 = vrot.slane %v7075_v33, 4  ;;  %v7076_v60 = vsel %vm16047_vm11, %v7074_v34, %v7075_v33  ;;  %v7080_v63 = vrot.slane %v7078_v7, 4  ;;  %v7093_v23 = vrot.slane %v11543_v49, 6  ;;  %vm21721_vm8 = vmmov %vm21703_vm1 }
 0xa15   : > { %7195 = vst.msk [vmem:[#allocation3 + $0x30] sm:$0xf] %vm21703_vm1, %v7067_v51  ;;  %v7083_v48 = vrot.slane %v7081_v44, 4  ;;  %v7086_v35 = vrot.slane %v7084_v37, 4  ;;  %v21718_v20 = vpack.c.bf16 %v18559_v3, %v18559_v3  ;;  %v7091_v22 = vsel %vm16047_vm11, %v7089_v46, %v7090_v57 }
 0xa16   : > { %7196 = vst.msk [vmem:[#allocation3 + $0x34] sm:$0xf] %vm21715_vm7, %v7070_v32  ;;  %v7079_v47 = vsel %vm16047_vm11, %v7077_v41, %v7078_v7  ;;  %v7082_v38 = vsel %vm16047_vm11, %v7080_v63, %v7081_v44  ;;  %v7092_v5 = vrot.slane %v7090_v57, 4  ;;  %v21720_v36 = vpack.c.bf16 %v18566_v14, %v18566_v14  ;;  %vm21724_vm7 = vmmov %vm21703_vm1 }
 0xa17   : > { %7197 = vst.msk [vmem:[#allocation3 + $0x38] sm:$0xf] %vm21716_vm15, %v7073_v61  ;;  %v7085_v52 = vsel %vm16047_vm11, %v7083_v48, %v7084_v37  ;;  %v7096_v19 = vrot.slane %v21718_v20, 6  ;;  %v7088_v28 = vsel %vm16047_vm11, %v7086_v35, %v7087_v16  ;;  %v7095_v17 = vrot.slane %v7093_v23, 4  ;;  %vm21725_vm15 = vmmov %vm21703_vm1 }
 0xa18   : > { %7198 = vst.msk [vmem:[#allocation3 + $0x3c] sm:$0xf] %vm21717_vm2, %v7076_v60  ;;  %v7099_v39 = vrot.slane %v21720_v36, 6  ;;  %v21722_v49 = vpack.c.bf16 %v18573_v45, %v18573_v45  ;;  %v21723_v42 = vpack.c.bf16 %v18580_v21, %v18580_v21  ;;  %v7094_v14 = vsel %vm16047_vm11, %v7092_v5, %v7093_v23  ;;  %vm21728_vm2 = vmmov %vm21703_vm1 }
 0xa19   : > { %7199 = vst.msk [vmem:[#allocation3 + $0x40] sm:$0xf] %vm21719_vm4, %v7079_v47  ;;  %v7098_v3 = vrot.slane %v7096_v19, 4  ;;  %v21726_v31 = vpack.c.bf16 %v18587_v2, %v18587_v2  ;;  %v21727_v45 = vpack.c.bf16 %v18593_v4, %v18593_v4  ;;  %v7097_v21 = vsel %vm16047_vm11, %v7095_v17, %v7096_v19  ;;  %vm21730_vm4 = vmmov %vm21703_vm1  ;;  %v18842_v19 = vld [vmem:[#allocation3 + $0x14] sm:$0xf]  ;;  %v18856_v17 = vld [vmem:[#allocation3 + $0x18] sm:$0xff]  }
 0xa1a   : > { %7200 = vst.msk [vmem:[#allocation3 + $0x44] sm:$0xf] %vm21721_vm8, %v7082_v38  ;;  %v7102_v0 = vrot.slane %v21722_v49, 6  ;;  %v7105_v54 = vrot.slane %v21723_v42, 6  ;;  %v7101_v62 = vrot.slane %v7099_v39, 4  ;;  %v21729_v44 = vpack.c.bf16 %v18602_v25, %v18602_v25  ;;  %vm21731_vm8 = vmmov %vm21703_vm1 }
 0xa1b   : > { %7201 = vst.msk [vmem:[#allocation3 + $0x48] sm:$0xf] %vm21703_vm1, %v7085_v52  ;;  %v7108_v56 = vrot.slane %v21726_v31, 6  ;;  %v7111_v51 = vrot.slane %v21727_v45, 6  ;;  %v7100_v13 = vsel %vm16047_vm11, %v7098_v3, %v7099_v39  ;;  %v21732_v37 = vpack.c.bf16 %v18611_v9, %v18611_v9  ;;  %v7268_v39 = vld [vmem:[#allocation3 + $0x10] sm:$0xe] }
 0xa1c   : > { %7202 = vst.msk [vmem:[#allocation3 + $0x4c] sm:$0xf] %vm21724_vm7, %v7088_v28  ;;  %v7104_v33 = vrot.slane %v7102_v0, 4  ;;  %v7107_v26 = vrot.slane %v7105_v54, 4  ;;  %v7103_v34 = vsel %vm16047_vm11, %v7101_v62, %v7102_v0  ;;  %v7114_v4 = vrot.slane %v21729_v44, 6  ;;  %vm21735_vm7 = vmmov %vm21703_vm1  ;;  %v18894_v45 = vld [vmem:[#allocation3 + $0x28] sm:$0xff]  }
 0xa1d   : > { %7203 = vst.msk [vmem:[#allocation3 + $0x50] sm:$0xf] %vm21725_vm15, %v7091_v22  ;;  %v7110_v7 = vrot.slane %v7108_v56, 4  ;;  %v7113_v2 = vrot.slane %v7111_v51, 4  ;;  %v7117_v16 = vrot.slane %v21732_v37, 6  ;;  %v21733_v61 = vpack.c.bf16 %v18618_v10, %v18618_v10  ;;  %vm21736_vm15 = vmmov %vm21703_vm1 }
 0xa1e   : > { %7204 = vst.msk [vmem:[#allocation3 + $0x54] sm:$0xf] %vm21728_vm2, %v7094_v14  ;;  %v7106_v32 = vsel %vm16047_vm11, %v7104_v33, %v7105_v54  ;;  %v7109_v41 = vsel %vm16047_vm11, %v7107_v26, %v7108_v56  ;;  %v7116_v48 = vrot.slane %v7114_v4, 4  ;;  %v21734_v47 = vpack.c.bf16 %v18624_v11, %v18624_v11  ;;  %vm21739_vm2 = vmmov %vm21703_vm1  ;;  %v18903_v26 = vld [vmem:[#allocation3 + $0x30] sm:$0xff]  }
 0xa1f   : > { %7205 = vst.msk [vmem:[#allocation3 + $0x58] sm:$0xf] %vm21730_vm4, %v7097_v21  ;;  %v7120_v60 = vrot.slane %v21733_v61, 6  ;;  %v7112_v25 = vsel %vm16047_vm11, %v7110_v7, %v7111_v51  ;;  %v7115_v63 = vsel %vm16047_vm11, %v7113_v2, %v7114_v4  ;;  %v7119_v9 = vrot.slane %v7117_v16, 4  ;;  %vm21740_vm4 = vmmov %vm21703_vm1 }
 0xa20   : > { %7206 = vst.msk [vmem:[#allocation3 + $0x5c] sm:$0xf] %vm21731_vm8, %v7100_v13  ;;  %v7123_v35 = vrot.slane %v21734_v47, 6  ;;  %v21737_v46 = vpack.c.bf16 %v18632_v27, %v18632_v27  ;;  %v21738_v38 = vpack.c.bf16 %v18642_v24, %v18642_v24  ;;  %v7118_v11 = vsel %vm16047_vm11, %v7116_v48, %v7117_v16  ;;  %vm21741_vm8 = vmmov %vm21703_vm1 }
 0xa21   : > { %7207 = vst.msk [vmem:[#allocation3 + $0x60] sm:$0xf] %vm21703_vm1, %v7103_v34  ;;  %v7122_v10 = vrot.slane %v7120_v60, 4  ;;  %v7132_v20 = vrot.slane %v11556_v50, 6  ;;  %v7135_v27 = vrot.slane %v11557_v58, 6  ;;  %v7121_v24 = vsel %vm16047_vm11, %v7119_v9, %v7120_v60  ;;  %v18932_v9 = vld [vmem:[#allocation3 + $0x40] sm:$0xff]  }
 0xa22   : > { %7208 = vst.msk [vmem:[#allocation3 + $0x64] sm:$0xf] %vm21735_vm7, %v7106_v32  ;;  %v7126_v57 = vrot.slane %v21737_v46, 6  ;;  %v7129_v52 = vrot.slane %v21738_v38, 6  ;;  %v7125_v23 = vrot.slane %v7123_v35, 4  ;;  %v7138_v15 = vrot.slane %v11558_v8, 6  ;;  %vm21742_vm7 = vmmov %vm21703_vm1 }
 0xa23   : > { %7209 = vst.msk [vmem:[#allocation3 + $0x68] sm:$0xf] %vm21736_vm15, %v7109_v41  ;;  %v7124_v28 = vsel %vm16047_vm11, %v7122_v10, %v7123_v35  ;;  %v7134_v50 = vrot.slane %v7132_v20, 4  ;;  %v7137_v36 = vrot.slane %v7135_v27, 4  ;;  %v7226_v58 = vld [vmem:[#allocation3 + $0x10] sm:$0xf]  ;;  %vm21743_vm15 = vmmov %vm21703_vm1  ;;  %v11254_v62 = vcombine.low %v7268_v39, %v18842_v19 }
 0xa24   : > { %7210 = vst.msk [vmem:[#allocation3 + $0x6c] sm:$0xf] %vm21739_vm2, %v7112_v25  ;;  %v7128_v22 = vrot.slane %v7126_v57, 4  ;;  %v7131_v5 = vrot.slane %v7129_v52, 4  ;;  %v7127_v43 = vsel %vm16047_vm11, %v7125_v23, %v7126_v57  ;;  %v7141_v0 = vrot.slane %v11559_v1, 6  ;;  %v18869_v8 = vld [vmem:[#allocation3 + $0x20] sm:$0xff]   ;;  %vm21744_vm2 = vmmov %vm21703_vm1 }
 0xa25   : > { %7211 = vst.msk [vmem:[#allocation3 + $0x70] sm:$0xf] %vm21740_vm4, %v7115_v63  ;;  %v7144_v18 = vrot.slane %v11560_v53, 6  ;;  %v7136_v42 = vsel %vm16047_vm11, %v7134_v50, %v7135_v27  ;;  %v7139_v54 = vsel %vm16047_vm11, %v7137_v36, %v7138_v15  ;;  %v7140_v14 = vrot.slane %v7138_v15, 4  ;;  %vm21745_vm4 = vmmov %vm21703_vm1  ;;  %v18930_v35 = vld [vmem:[#allocation3 + $0x38] sm:$0xff]   ;;  %v18967_v15 = vld [vmem:[#allocation3 + $0x48] sm:$0xff]  }
 0xa26   : > { %7212 = vst.msk [vmem:[#allocation3 + $0x74] sm:$0xf] %vm21741_vm8, %v7118_v11  ;;  %v7130_v3 = vsel %vm16047_vm11, %v7128_v22, %v7129_v52  ;;  %v7133_v49 = vsel %vm16047_vm11, %v7131_v5, %v7132_v20  ;;  %v7147_v30 = vrot.slane %v11561_v6, 6  ;;  %v7143_v29 = vrot.slane %v7141_v0, 4  ;;  %vm21746_vm8 = vmmov %vm21703_vm1  ;;  %v18941_v38 = vld [vmem:[%s20483_s14 + $0x4] sm:$0xf] }
 0xa27   : > { %7213 = vst.msk [vmem:[#allocation3 + $0x78] sm:$0xf] %vm21703_vm1, %v7121_v24  ;;  %v7146_v1 = vrot.slane %v7144_v18, 4  ;;  %7219 = vst.msk [vmem:[#allocation3 + $0x90] sm:$0xf] %vm21703_vm1, %v7139_v54  ;;  %v18883_v53 = vcombine.low %v7226_v58, %v18842_v19  ;;  %v7142_v31 = vsel %vm16047_vm11, %v7140_v14, %v7141_v0  ;;  %v18889_v6 = vshrl.u32 %v18856_v17, 16 }
 0xa28   : > { %7214 = vst.msk [vmem:[#allocation3 + $0x7c] sm:$0xf] %vm21742_vm7, %v7124_v28  ;;  %v7149_v55 = vrot.slane %v7147_v30, 4  ;;  %v18892_v56 = vshll.u32 %v18856_v17, 16  ;;  %v7145_v51 = vsel %vm16047_vm11, %v7143_v29, %v7144_v18  ;;  %vm21747_vm7 = vmmov %vm21703_vm1  ;;  %v7368_v34 = vshrl.u32 %v11254_v62, 16  ;;  %v18984_v54 = vld [vmem:[#allocation3 + $0x50] sm:$0xff]  }
 0xa29   : > { %7215 = vst.msk [vmem:[#allocation3 + $0x80] sm:$0xf] %vm21743_vm15, %v7127_v43  ;;  %v7148_v21 = vsel %vm16047_vm11, %v7146_v1, %v7147_v30  ;;  %v20700_v13 = vshll.u32 %v18883_v53, 16  ;;  %v20701_v33 = vshrl.u32 %v18883_v53, 16  ;;  %vm21748_vm15 = vmmov %vm21703_vm1  ;;  %v7371_v7 = vshll.u32 %v11254_v62, 16 }
 0xa2a   : > { %7216 = vst.msk [vmem:[#allocation3 + $0x84] sm:$0xf] %vm21744_vm2, %v7130_v3  ;;  %vm21749_vm2 = vmmov %vm21703_vm1  ;;  %v7378_v2 = vrot.slane %v18889_v6, 1  ;;  %v7381_v59 = vrot.slane %v18892_v56, 2  ;;  %v7797_v4 = vrot.slane %v18892_v56, 1  ;;  %v18914_v32 = vshrl.u32 %v18869_v8, 16 }
 0xa2b   : > { %7217 = vst.msk [vmem:[#allocation3 + $0x88] sm:$0xf] %vm21745_vm4, %v7133_v49  ;;  %v7792_v44 = vrot.slane %v20700_v13, 1  ;;  %v18917_v41 = vshll.u32 %v18869_v8, 16  ;;  %v7370_v37 = vrot.slane %v7368_v34, 1  ;;  %v7373_v16 = vrot.slane %v7371_v7, 2 }
 0xa2c   : > { %7218 = vst.msk [vmem:[#allocation3 + $0x8c] sm:$0xf] %vm21746_vm8, %v7136_v42  ;;  %v18919_v61 = vor.u32 %v7381_v59, %v7378_v2  ;;  %v18922_v60 = vshrl.u32 %v18894_v45, 16  ;;  %v7387_v48 = vrot.slane %v18914_v32, 1  ;;  %v7799_v46 = vor.u32 %v7797_v4, %v18889_v6 }
 0xa2d   : > { %7220 = vst.msk [vmem:[#allocation3 + $0x94] sm:$0xf] %vm21747_vm7, %v7142_v31  ;;  %v7793_v25 = vsel %vm2935_vm14, %v18401_v40, %v7792_v44  ;;  %v7796_v63 = vor.u32 %v20701_v33, %v7792_v44  ;;  %v7390_v47 = vrot.slane %v18917_v41, 2  ;;  %v7374_v10 = vor.u32 %v7373_v16, %v7370_v37 }
 0xa2e   : > { %7221 = vst.msk [vmem:[#allocation3 + $0x98] sm:$0xf] %vm21748_vm15, %v7145_v51  ;;  %21750 = vst [vmem:[#allocation120_spill] sm:$0xff] %v18919_v61  ;;  %12581 = vmatprep.mubr.msk.bf16.mxu1 %vm6169_vm6, %v7793_v25  ;;  %v7800_v57 = vrot.slane %v18917_v41, 1  ;;  %v7396_v40 = vrot.slane %v18922_v60, 1  ;;  %v18945_v23 = vshll.u32 %v18894_v45, 16 }
 0xa2f   : > { %7222 = vst.msk [vmem:[#allocation3 + $0x9c] sm:$0xf] %vm21749_vm2, %v7148_v21  ;;  %v7798_v52 = vsel %vm2935_vm14, %v7796_v63, %v7797_v4  ;;  %v7391_v11 = vor.u32 %v7390_v47, %v7387_v48  ;;  %v18948_v20 = vshrl.u32 %v18903_v26, 16  ;;  %v7383_v27 = vsel %vm2519_vm10, %v7374_v10, %v18919_v61  ;;  %v19022_v48 = vld [vmem:[#allocation3 + $0x60] sm:$0xff]  }
 0xa30   : > { %7223 = vst.msk [vmem:[#allocation3 + $0xa0] sm:$0x3] %vm6891_vm13, %v7149_v55  ;;  %12582 = vmatmul.mubr.msk.bf16.vlgmr.msra.gmra.mrb[24].mxu1 %vm6169_vm6, %v7798_v52  ;;  %v7801_v24 = vsel %vm2935_vm14, %v7799_v46, %v7800_v57  ;;  %v7802_v28 = vor.u32 %v7800_v57, %v18914_v32  ;;  %v18956_v22 = vshll.u32 %v18903_v26, 16  ;;  %12543 = vmatprep.mubr.msk.bf16.mxu0 %vm6169_vm6, %v7383_v27  ;;  %v7399_v43 = vrot.slane %v18945_v23, 2  ;;  %v18996_v55 = vld [vmem:[#allocation3 + $0x58] sm:$0xff]  }
 0xa31   : > { %v18961_v5 = vsel %vm2519_vm10, %v18919_v61, %v7391_v11  ;;  %12585 = vmatprep.mubr.msk.bf16.mxu1 %vm6169_vm6, %v7801_v24  ;;  %v7803_v50 = vrot.slane %v18945_v23, 1  ;;  %v7405_v36 = vrot.slane %v18948_v20, 1  ;;  %12618 = vmatpush3.bf16.msra.mxu1 %v18397_v12  ;;  %v18975_v3 = vshrl.u32 %v18930_v35, 16 }
 0xa32   : > { %21751 = vst [vmem:[#allocation121_spill] sm:$0xff] %v18961_v5  ;;  %12544 = vmatmul.mubr.msk.bf16.vlgmr.msra.gmra.mrb[48].mxu0 %vm6169_vm6, %v18961_v5  ;;  %v7408_v58 = vrot.slane %v18956_v22, 2  ;;  %v7806_v39 = vrot.slane %v18956_v22, 1  ;;  %v18978_v49 = vshll.u32 %v18930_v35, 16  ;;  %v7400_v0 = vor.u32 %v7399_v43, %v7396_v40  ;;  %v19031_v40 = vld [vmem:[#allocation3 + $0x68] sm:$0xff]  }
 0xa33   : > { %v7805_v18 = vor.u32 %v7803_v50, %v18922_v60  ;;  %v18982_v42 = vshrl.u32 %v18932_v9, 16  ;;  %vm21753_vm11 = vcmask 1043456   ;;  %v7414_v14 = vrot.slane %v18975_v3, 1 }
 0xa34   : > { %13775 = vmatprep.subr.msk.bf16.mxu1 %vm21753_vm11, %v18941_v38  ;;  %v7409_v12 = vor.u32 %v7408_v58, %v7405_v36  ;;  %v7417_v30 = vrot.slane %v18978_v49, 2  ;;  %v18991_v29 = vsel %vm2519_vm10, %v7391_v11, %v7400_v0  ;;  %v7804_v1 = vsel %vm2935_vm14, %v7802_v28, %v7803_v50  ;;  %v19042_v28 = vld [vmem:[#allocation3 + $0x70] sm:$0xff]  }
 0xa35   : > { %21752 = vst [vmem:[#allocation48_spill] sm:$0xff] %v18982_v42  ;;  %21754 = vst [vmem:[#allocation50_spill] sm:$0xff] %v18991_v29  ;;  %v7809_v62 = vrot.slane %v18978_v49, 1  ;;  %v7423_v31 = vrot.slane %v18982_v42, 1  ;;  %12547 = vmatprep.mubr.msk.bf16.mxu0 %vm6169_vm6, %v18991_v29  ;;  %v7808_v21 = vor.u32 %v7806_v39, %v18948_v20  ;;  %v19002_v34 = vshll.u32 %v18932_v9, 16  ;;  %v19127_v5 = vld [vmem:[#allocation3 + $0x90] sm:$0xff]  }
 0xa36   : > { %v7418_v51 = vor.u32 %v7417_v30, %v7414_v14  ;;  %v19005_v7 = vshrl.u32 %v18967_v15, 16  ;;  %v19008_v2 = vsel %vm2519_vm10, %v7400_v0, %v7409_v12  ;;  %v7807_v59 = vsel %vm2935_vm14, %v7805_v18, %v7806_v39 }
 0xa37   : > { %21755 = vst [vmem:[#allocation18_spill] sm:$0xff] %v19002_v34  ;;  %21757 = vst [vmem:[#allocation82_spill] sm:$0xff] %v19008_v2  ;;  %v19012_v44 = vshll.u32 %v18967_v15, 16  ;;  %v19015_v4 = vshrl.u32 %v18984_v54, 16  ;;  %v7426_v37 = vrot.slane %v19002_v34, 2  ;;  %v7811_v16 = vor.u32 %v7809_v62, %v18975_v3 }
 0xa38   : > { %21756 = vst [vmem:[#allocation26_spill] sm:$0xff] %v19005_v7  ;;  %12586 = vmatmul.mubr.msk.bf16.gmra.mrb[28].mxu1 %vm6169_vm6, %v7804_v1  ;;  %v7812_v25 = vrot.slane %v19002_v34, 1  ;;  %v7432_v63 = vrot.slane %v19005_v7, 1  ;;  %v19029_v57 = vshll.u32 %v18984_v54, 16  ;;  %v19036_v52 = vsel %vm2519_vm10, %v7409_v12, %v7418_v51 }
 0xa39   : > { %21758 = vst [vmem:[#allocation59_spill] sm:$0xff] %v19012_v44  ;;  %21759 = vst [vmem:[#allocation97_spill] sm:$0xff] %v19015_v4  ;;  %12589 = vmatprep.mubr.msk.bf16.mxu1 %vm6169_vm6, %v7807_v59  ;;  %v7435_v47 = vrot.slane %v19012_v44, 2  ;;  %v7815_v10 = vrot.slane %v19012_v44, 1  ;;  %v7441_v46 = vrot.slane %v19015_v4, 1  ;;  %v7427_v11 = vor.u32 %v7426_v37, %v7423_v31 }
 0xa3a   : > { %21760 = vst [vmem:[#allocation84_spill] sm:$0xff] %v19029_v57  ;;  %12548 = vmatmul.mubr.msk.bf16.gmra.mrb[52].mxu0 %vm6169_vm6, %v19008_v2  ;;  %21761 = vst [vmem:[#allocation95_spill] sm:$0xff] %v19036_v52  ;;  %v7814_v27 = vor.u32 %v7812_v25, %v18982_v42  ;;  %v19040_v24 = vshrl.u32 %v18996_v55, 16  ;;  %v7810_v43 = vsel %vm2935_vm14, %v7808_v21, %v7809_v62  ;;  %v7444_v36 = vrot.slane %v19029_v57, 2 }
 0xa3b   : > { %12551 = vmatprep.mubr.msk.bf16.mxu0 %vm6169_vm6, %v19036_v52  ;;  %v7436_v50 = vor.u32 %v7435_v47, %v7432_v63  ;;  %v7818_v58 = vrot.slane %v19029_v57, 1  ;;  %v7813_v39 = vsel %vm2935_vm14, %v7811_v16, %v7812_v25  ;;  %v7817_v0 = vor.u32 %v7815_v10, %v19005_v7  ;;  %v19159_v57 = vld [vmem:[#allocation3 + $0x98] ss:$0 sps:$4 sm:$0x11]  }
 0xa3c   : > { %21762 = vst [vmem:[#allocation21_spill] sm:$0xff] %v19040_v24  ;;  %v7450_v18 = vrot.slane %v19040_v24, 1  ;;  %v19053_v12 = vshll.u32 %v18996_v55, 16  ;;  %v19056_v14 = vsel %vm2519_vm10, %v7418_v51, %v7427_v11  ;;  %v7816_v30 = vsel %vm2935_vm14, %v7814_v27, %v7815_v10 }
 0xa3d   : > { %21764 = vst [vmem:[#allocation62_spill] sm:$0xff] %v19056_v14  ;;  %v7445_v1 = vor.u32 %v7444_v36, %v7441_v46  ;;  %v7820_v62 = vor.u32 %v7818_v58, %v19015_v4  ;;  %v19063_v59 = vshrl.u32 %v19022_v48, 16  ;;  %v19066_v37 = vshll.u32 %v19022_v48, 16 }
 0xa3e   : > { %21763 = vst [vmem:[#allocation60_spill] sm:$0xff] %v19053_v12  ;;  %v7453_v31 = vrot.slane %v19053_v12, 2  ;;  %v7821_v21 = vrot.slane %v19053_v12, 1  ;;  %v19069_v16 = vsel %vm2519_vm10, %v7427_v11, %v7436_v50  ;;  %v19072_v51 = vshrl.u32 %v19031_v40, 16  ;;  %v19084_v11 = vld [vmem:[#allocation3 + $0x78] sm:$0xff]  }
 0xa3f   : > { %21765 = vst [vmem:[#allocation68_spill] sm:$0xff] %v19063_v59  ;;  %21766 = vst [vmem:[#allocation69_spill] sm:$0xff] %v19066_v37  ;;  %v19075_v25 = vshll.u32 %v19031_v40, 16  ;;  %v19078_v63 = vshrl.u32 %v19042_v28, 16  ;;  %v7819_v47 = vsel %vm2935_vm14, %v7817_v0, %v7818_v58  ;;  %v7459_v46 = vrot.slane %v19063_v59, 1 }
 0xa40   : > { %21767 = vst [vmem:[#allocation81_spill] sm:$0xff] %v19069_v16  ;;  %21768 = vst [vmem:[#allocation85_spill] sm:$0xff] %v19072_v51  ;;  %12590 = vmatmul.mubr.msk.bf16.gmra.mrb[32].mxu1 %vm6169_vm6, %v7810_v43  ;;  %v7454_v10 = vor.u32 %v7453_v31, %v7450_v18  ;;  %v7462_v27 = vrot.slane %v19066_v37, 2  ;;  %v7823_v36 = vor.u32 %v7821_v21, %v19040_v24  ;;  %v7824_v13 = vrot.slane %v19066_v37, 1  ;;  %v19091_v43 = vld [vmem:[#allocation3 + $0x80] sm:$0xff]   ;;  %v19102_v31 = vld [vmem:[#allocation3 + $0x88] sm:$0xff]  }
 0xa41   : > { %21769 = vst [vmem:[#allocation86_spill] sm:$0xff] %v19075_v25  ;;  %21770 = vst [vmem:[#allocation87_spill] sm:$0xff] %v19078_v63  ;;  %12593 = vmatprep.mubr.msk.bf16.mxu1 %vm6169_vm6, %v7813_v39  ;;  %v7468_v33 = vrot.slane %v19072_v51, 1  ;;  %v7471_v52 = vrot.slane %v19075_v25, 2  ;;  %v19096_v58 = vsel %vm2519_vm10, %v7436_v50, %v7445_v1  ;;  %v19099_v0 = vsel %vm2935_vm14, %v7820_v62, %v7821_v21 }
 0xa42   : > { %12552 = vmatmul.mubr.msk.bf16.gmra.mrb[56].mxu0 %vm6169_vm6, %v19056_v14  ;;  %21771 = vst [vmem:[#allocation88_spill] sm:$0xff] %v19096_v58  ;;  %v7463_v39 = vor.u32 %v7462_v27, %v7459_v46  ;;  %v7827_v18 = vrot.slane %v19075_v25, 1  ;;  %v19107_v2 = vsel %vm2519_vm10, %v7445_v1, %v7454_v10  ;;  %v7477_v14 = vrot.slane %v19078_v63, 1 }
 0xa43   : > { %12555 = vmatprep.mubr.msk.bf16.mxu0 %vm6169_vm6, %v19069_v16  ;;  %21772 = vst [vmem:[#allocation89_spill] sm:$0xff] %v19107_v2  ;;  %v7472_v29 = vor.u32 %v7471_v52, %v7468_v33  ;;  %v19111_v50 = vshll.u32 %v19042_v28, 16  ;;  %v7826_v62 = vor.u32 %v7824_v13, %v19063_v59  ;;  %v19116_v46 = vshrl.u32 %v19084_v11, 16 }
 0xa44   : > { %v7829_v21 = vor.u32 %v7827_v18, %v19072_v51  ;;  %v19119_v27 = vshll.u32 %v19084_v11, 16  ;;  %v19122_v16 = vsel %vm2519_vm10, %v7454_v10, %v7463_v39  ;;  %v7825_v33 = vsel %vm2935_vm14, %v7823_v36, %v7824_v13 }
 0xa45   : > { %21773 = vst [vmem:[#allocation90_spill] sm:$0xff] %v19111_v50  ;;  %21774 = vst [vmem:[#allocation91_spill] sm:$0xff] %v19116_v46  ;;  %v7480_v52 = vrot.slane %v19111_v50, 2  ;;  %v7830_v1 = vrot.slane %v19111_v50, 1  ;;  %v7486_v61 = vrot.slane %v19116_v46, 1  ;;  %v19133_v37 = vshrl.u32 %v19091_v43, 16 }
 0xa46   : > { %21775 = vst [vmem:[#allocation100_spill] sm:$0xff] %v19119_v27  ;;  %21776 = vst [vmem:[#allocation92_spill] sm:$0xff] %v19122_v16  ;;  %v7489_v25 = vrot.slane %v19119_v27, 2  ;;  %v7833_v51 = vrot.slane %v19119_v27, 1  ;;  %v19136_v10 = vsel %vm2519_vm10, %v7463_v39, %v7472_v29  ;;  %v19140_v36 = vshll.u32 %v19091_v43, 16  ;;  %v19142_v50 = vld [vmem:[#allocation3 + $0x98] sm:$0xff]  }
 0xa47   : > { %21777 = vst [vmem:[#allocation93_spill] sm:$0xff] %v19133_v37  ;;  %21778 = vst [vmem:[#allocation96_spill] sm:$0xff] %v19136_v10  ;;  %v7481_v59 = vor.u32 %v7480_v52, %v7477_v14  ;;  %v7832_v13 = vor.u32 %v7830_v1, %v19078_v63  ;;  %v19146_v12 = vsel %vm2935_vm14, %v7826_v62, %v7827_v18  ;;  %v7495_v24 = vrot.slane %v19133_v37, 1 }
 0xa48   : > { %21779 = vst [vmem:[#allocation110_spill] sm:$0xff] %v19140_v36  ;;  %12594 = vmatmul.mubr.msk.bf16.gmra.mrb[36].mxu1 %vm6169_vm6, %v7816_v30  ;;  %v19149_v27 = vsel %vm2935_vm14, %v7829_v21, %v7830_v1  ;;  %v19153_v39 = vshrl.u32 %v19102_v31, 16  ;;  %v7490_v14 = vor.u32 %v7489_v25, %v7486_v61  ;;  %v7498_v52 = vrot.slane %v19140_v36, 2  ;;  %v19173_v25 = vld [vmem:[#allocation3 + $0xa0] ss:$0 sps:$4 sm:$0x33]  }
 0xa49   : > { %12597 = vmatprep.mubr.msk.bf16.mxu1 %vm6169_vm6, %v7819_v47  ;;  %v7835_v63 = vor.u32 %v7833_v51, %v19116_v46  ;;  %v7836_v30 = vrot.slane %v19140_v36, 1  ;;  %v19164_v18 = vsel %vm2519_vm10, %v7472_v29, %v7481_v59  ;;  %v19168_v21 = vshll.u32 %v19102_v31, 16 }
 0xa4a   : > { %12556 = vmatmul.mubr.msk.bf16.gmra.mrb[60].mxu0 %vm6169_vm6, %v19096_v58  ;;  %21780 = vst [vmem:[#allocation94_spill] sm:$0xff] %v19164_v18  ;;  %v7504_v62 = vrot.slane %v19153_v39, 1  ;;  %v19171_v61 = vshrl.u32 %v19127_v5, 16  ;;  %v19178_v47 = vsel %vm2935_vm14, %v7832_v13, %v7833_v51  ;;  %v7499_v1 = vor.u32 %v7498_v52, %v7495_v24 }
 0xa4b   : > { %21781 = vst [vmem:[#allocation98_spill] sm:$0xff] %v19168_v21  ;;  %12559 = vmatprep.mubr.msk.bf16.mxu0 %vm6169_vm6, %v19107_v2  ;;  %v7838_v29 = vor.u32 %v7836_v30, %v19133_v37  ;;  %v19182_v58 = vshll.u32 %v19127_v5, 16  ;;  %v7507_v36 = vrot.slane %v19168_v21, 2  ;;  %v7839_v46 = vrot.slane %v19168_v21, 1 }
 0xa4c   : > { %21782 = vst [vmem:[#allocation99_spill] sm:$0xff] %v19171_v61  ;;  %v7513_v4 = vrot.slane %v19171_v61, 1  ;;  %v20732_v44 = vshrl.u32 %v19142_v50, 16  ;;  %v19189_v7 = vsel %vm2519_vm10, %v7481_v59, %v7490_v14  ;;  %v20731_v13 = vshll.u32 %v19142_v50, 16 }
 0xa4d   : > { %21783 = vst [vmem:[#allocation123_spill] sm:$0xff] %v19182_v58  ;;  %21784 = vst [vmem:[#allocation101_spill] sm:$0xff] %v19189_v7  ;;  %v7516_v51 = vrot.slane %v19182_v58, 2  ;;  %v7842_v24 = vrot.slane %v19182_v58, 1  ;;  %v19195_v52 = vsel %vm2519_vm10, %v7490_v14, %v7499_v1  ;;  %v19198_v2 = vsel %vm2935_vm14, %v7835_v63, %v7836_v30  ;;  %v8084_v30 = vld [vmem:[#allocation3 + $0x10] sm:$0xc] }
 0xa4e   : > { %21785 = vst [vmem:[#allocation102_spill] sm:$0xff] %v19195_v52  ;;  %v7508_v21 = vor.u32 %v7507_v36, %v7504_v62  ;;  %v7522_v37 = vrot.slane %v20732_v44, 1  ;;  %v7841_v59 = vor.u32 %v7839_v46, %v19153_v39  ;;  %v7525_v42 = vrot.slane %v20731_v13, 2 }
 0xa4f   : > { %v19202_v34 = vor.u32 %v7516_v51, %v7513_v4  ;;  %v7846_v58 = vshll.u32 %v19159_v57, 16  ;;  %v19211_v14 = vsel %vm2935_vm14, %v7838_v29, %v7839_v46  ;;  %v7844_v63 = vor.u32 %v7842_v24, %v19171_v61 }
 0xa50   : > { %12598 = vmatmul.mubr.msk.bf16.gmra.mrb[40].mxu1 %vm6169_vm6, %v19099_v0  ;;  %v7529_v36 = vshrl.u32 %v19173_v25, 16  ;;  %v7532_v4 = vshll.u32 %v19173_v25, 16  ;;  %v19218_v62 = vsel %vm2519_vm10, %v7499_v1, %v7508_v21  ;;  %v7526_v51 = vor.u32 %v7525_v42, %v7522_v37 }
 0xa51   : > { %21786 = vst [vmem:[#allocation103_spill] sm:$0xff] %v19202_v34  ;;  %12601 = vmatprep.mubr.msk.bf16.mxu1 %vm6169_vm6, %v7825_v33  ;;  %21787 = vst [vmem:[#allocation104_spill] sm:$0xff] %v19218_v62  ;;  %v7848_v13 = vrot.slane %v7846_v58, 1  ;;  %v19221_v44 = vcombine.low %v8084_v30, %v18842_v19  ;;  %v8091_v29 = vrot.slane %v18856_v17, 2  ;;  %v8093_v61 = vrot.slane %v18869_v8, 2 }
 0xa52   : > { %12560 = vmatmul.mubr.msk.bf16.gmra.mrb[64].mxu0 %vm6169_vm6, %v19122_v16  ;;  %v7531_v0 = vrot.slane %v7529_v36, 1  ;;  %v7534_v46 = vrot.slane %v7532_v4, 2  ;;  %v19231_v33 = vsel %vm2519_vm10, %v7508_v21, %v19202_v34  ;;  %v19234_v42 = vsel %vm2935_vm14, %v7841_v59, %v7842_v24 }
 0xa53   : > { %12563 = vmatprep.mubr.msk.bf16.mxu0 %vm6169_vm6, %v19136_v10  ;;  %21788 = vst [vmem:[#allocation122_spill] sm:$0xff] %v19231_v33  ;;  %v8090_v19 = vrot.slane %v19221_v44, 2  ;;  %v8095_v37 = vrot.slane %v18894_v45, 2  ;;  %v19240_v58 = vsel %vm2519_vm10, %v19202_v34, %v7526_v51  ;;  %v19243_v1 = vsel %vm2935_vm14, %v7844_v63, %v7848_v13  ;;  %vm21795_vm14 = vmmov %vm21753_vm11 }
 0xa54   : > { %v19246_v36 = vsel %vm3244_vm3, %v8091_v29, %v8093_v61  ;;  %v8097_v21 = vrot.slane %v18903_v26, 2  ;;  %v8099_v59 = vrot.slane %v18930_v35, 2  ;;  %v8101_v30 = vrot.slane %v18932_v9, 2 }
 0xa55   : > { %v19250_v4 = vsel %vm3244_vm3, %v8090_v19, %v8091_v29  ;;  %v19253_v24 = vsel %vm3244_vm3, %v8093_v61, %v8095_v37  ;;  %v7535_v34 = vor.u32 %v7534_v46, %v7531_v0  ;;  %v8103_v13 = vrot.slane %v18967_v15, 2 }
 0xa56   : > { %v19258_v10 = vsel %vm3244_vm3, %v8095_v37, %v8097_v21  ;;  %v8105_v63 = vrot.slane %v18984_v54, 2  ;;  %v19263_v16 = vsel %vm3244_vm3, %v8097_v21, %v8099_v59  ;;  %v19266_v29 = vsel %vm3244_vm3, %v8099_v59, %v8101_v30 }
 0xa57   : > { %21789 = vst [vmem:[#allocation124_spill] sm:$0xff] %v19266_v29  ;;  %v8107_v61 = vrot.slane %v18996_v55, 2  ;;  %v8109_v19 = vrot.slane %v19022_v48, 2  ;;  %v19273_v0 = vsel %vm3244_vm3, %v8101_v30, %v8103_v13  ;;  %v8111_v37 = vrot.slane %v19031_v40, 2 }
 0xa58   : > { %12602 = vmatmul.mubr.msk.bf16.gmra.mrb[44].mxu1 %vm6169_vm6, %v19146_v12  ;;  %v19276_v46 = vsel %vm3244_vm3, %v8103_v13, %v8105_v63  ;;  %v8113_v21 = vrot.slane %v19042_v28, 2  ;;  %v8115_v12 = vrot.slane %v19084_v11, 2  ;;  %v8117_v30 = vrot.slane %v19091_v43, 2 }
 0xa59   : > { %21790 = vst [vmem:[#allocation125_spill] sm:$0xff] %v19276_v46  ;;  %12605 = vmatprep.mubr.msk.bf16.mxu1 %vm6169_vm6, %v19149_v27  ;;  %v19283_v59 = vsel %vm3244_vm3, %v8105_v63, %v8107_v61  ;;  %v19286_v29 = vsel %vm3244_vm3, %v8107_v61, %v8109_v19  ;;  %v19293_v13 = vsel %vm3244_vm3, %v8109_v19, %v8111_v37  ;;  %v8119_v27 = vrot.slane %v19102_v31, 2 }
 0xa5a   : > { %21791 = vst [vmem:[#allocation126_spill] sm:$0xff] %v19286_v29  ;;  %12564 = vmatmul.mubr.msk.bf16.gmra.mrb[68].mxu0 %vm6169_vm6, %v19164_v18  ;;  %21792 = vst [vmem:[#allocation105_spill] sm:$0xff] %v19293_v13  ;;  %v19296_v46 = vsel %vm3244_vm3, %v8111_v37, %v8113_v21  ;;  %v8121_v63 = vrot.slane %v19127_v5, 2  ;;  %v19303_v61 = vsel %vm3244_vm3, %v8113_v21, %v8115_v12  ;;  %v8123_v18 = vrot.slane %v19142_v50, 2 }
 0xa5b   : > { %21793 = vst [vmem:[#allocation127_spill] sm:$0xff] %v19296_v46  ;;  %12567 = vmatprep.mubr.msk.bf16.mxu0 %vm6169_vm6, %v19189_v7  ;;  %v19306_v29 = vsel %vm3244_vm3, %v8115_v12, %v8117_v30  ;;  %v8125_v19 = vrot.slane %v19173_v25, 2  ;;  %v19311_v37 = vsel %vm3244_vm3, %v8117_v30, %v8119_v27  ;;  %v20739_v13 = vrot.slane %v18883_v53, 1 }
 0xa5c   : > { %21794 = vst [vmem:[#allocation128_spill] sm:$0xff] %v19306_v29  ;;  %v19314_v46 = vsel %vm3244_vm3, %v8119_v27, %v8121_v63  ;;  %v8367_v7 = vrot.slane %v18856_v17, 1  ;;  %v19320_v21 = vsel %vm21795_vm14, %v18941_v38, 0  ;;  %v19323_v12 = vsel %vm3244_vm3, %v8121_v63, %v8123_v18 }
 0xa5d   : > { %v19326_v29 = vsel %vm3244_vm3, %v8123_v18, %v8125_v19  ;;  %v8369_v25 = vrot.slane %v18869_v8, 1  ;;  %v19330_v30 = vsel %vm2519_vm10, %v7526_v51, %v7535_v34  ;;  %v8371_v17 = vrot.slane %v18894_v45, 1  ;;  %vm21832_vm3 = vmmov %vm21753_vm11 }
 0xa5e   : > { %v19335_v27 = vsel %vm3519_vm0, %v20739_v13, %v8367_v7  ;;  %v8373_v38 = vrot.slane %v18903_v26, 1  ;;  %v8375_v18 = vrot.slane %v18930_v35, 1  ;;  %v8377_v19 = vrot.slane %v18932_v9, 1  ;;  %v21807_v13 = vld [vmem:[#allocation69_spill] sm:$0xff] }
 0xa5f   : > { %v19340_v63 = vsel %vm3519_vm0, %v8367_v7, %v8369_v25  ;;  %v8379_v8 = vrot.slane %v18967_v15, 1  ;;  %v19348_v34 = vsel %vm3519_vm0, %v8369_v25, %v8371_v17  ;;  %v8381_v45 = vrot.slane %v18984_v54, 1 }
 0xa60   : > { %12606 = vmatmul.mubr.msk.bf16.gmra.mrb[48].mxu1 %vm6169_vm6, %v19178_v47  ;;  %v19351_v51 = vsel %vm3519_vm0, %v8371_v17, %v8373_v38  ;;  %v8383_v26 = vrot.slane %v18996_v55, 1  ;;  %v19358_v35 = vsel %vm3519_vm0, %v8373_v38, %v8375_v18  ;;  %v19361_v9 = vsel %vm3519_vm0, %v8375_v18, %v8377_v19 }
 0xa61   : > { %12609 = vmatprep.mubr.msk.bf16.mxu1 %vm6169_vm6, %v19198_v2  ;;  %v19364_v15 = vsel %vm3519_vm0, %v8377_v19, %v8379_v8  ;;  %v8385_v7 = vrot.slane %v19022_v48, 1  ;;  %v19370_v54 = vsel %vm3519_vm0, %v8379_v8, %v8381_v45  ;;  %v8387_v2 = vrot.slane %v19031_v40, 1 }
 0xa62   : > { %12568 = vmatmul.mubr.msk.bf16.gmra.mrb[72].mxu0 %vm6169_vm6, %v19195_v52  ;;  %v19373_v55 = vsel %vm3519_vm0, %v8381_v45, %v8383_v26  ;;  %v8389_v47 = vrot.slane %v19042_v28, 1  ;;  %v8391_v48 = vrot.slane %v19084_v11, 1  ;;  %v8393_v17 = vrot.slane %v19091_v43, 1 }
 0xa63   : > { %12571 = vmatprep.mubr.msk.bf16.mxu0 %vm6169_vm6, %v19218_v62  ;;  %v19380_v25 = vsel %vm3519_vm0, %v8383_v26, %v8385_v7  ;;  %v8395_v38 = vrot.slane %v19102_v31, 1  ;;  %v19386_v18 = vsel %vm3519_vm0, %v8385_v7, %v8387_v2  ;;  %v8397_v40 = vrot.slane %v19127_v5, 1  ;;  %v21824_v62 = vld [vmem:[#allocation123_spill] sm:$0xff] }
 0xa64   : > { %v19389_v19 = vsel %vm3519_vm0, %v8387_v2, %v8389_v47  ;;  %v8399_v28 = vrot.slane %v19159_v57, 1  ;;  %v19394_v8 = vsel %vm3519_vm0, %v8389_v47, %v8391_v48  ;;  %v19397_v45 = vsel %vm3519_vm0, %v8391_v48, %v8393_v17 }
 0xa65   : > { %v19400_v11 = vsel %vm3519_vm0, %v8393_v17, %v8395_v38  ;;  %v8642_v43 = vshrl.u32 %v19221_v44, 16  ;;  %v19404_v31 = vsel %vm3519_vm0, %v8395_v38, %v8397_v40  ;;  %v8645_v5 = vshll.u32 %v19221_v44, 16 }
 0xa66   : > { %v19407_v26 = vsel %vm3519_vm0, %v8397_v40, %v8399_v28  ;;  %v8649_v57 = vrot.slane %v18889_v6, 2  ;;  %v8650_v2 = vrot.slane %v18892_v56, 3  ;;  %v8653_v47 = vrot.slane %v18914_v32, 2 }
 0xa67   : > { %v8644_v7 = vrot.slane %v8642_v43, 2  ;;  %v8654_v48 = vrot.slane %v18917_v41, 3  ;;  %v8647_v17 = vrot.slane %v8645_v5, 3  ;;  %v8657_v38 = vrot.slane %v18922_v60, 2  ;;  %v21796_v43 = vld [vmem:[#allocation48_spill] sm:$0xff]  ;;  %v21797_v5 = vld [vmem:[#allocation18_spill] sm:$0xff] }
 0xa68   : > { %12610 = vmatmul.mubr.msk.bf16.gmra.mrb[52].mxu1 %vm6169_vm6, %v19211_v14  ;;  %v8658_v40 = vrot.slane %v18945_v23, 3  ;;  %v8661_v28 = vrot.slane %v18948_v20, 2  ;;  %v8651_v6 = vor.u32 %v8650_v2, %v8649_v57  ;;  %v8662_v56 = vrot.slane %v18956_v22, 3  ;;  %v21798_v57 = vld [vmem:[#allocation26_spill] sm:$0xff] }
 0xa69   : > { %12613 = vmatprep.mubr.msk.bf16.mxu1 %vm6169_vm6, %v19234_v42  ;;  %v8655_v44 = vor.u32 %v8654_v48, %v8653_v47  ;;  %v8665_v32 = vrot.slane %v18975_v3, 2  ;;  %v8648_v41 = vor.u32 %v8647_v17, %v8644_v7  ;;  %v8666_v60 = vrot.slane %v18978_v49, 3  ;;  %v21799_v47 = vld [vmem:[#allocation59_spill] sm:$0xff] }
 0xa6a   : > { %12572 = vmatmul.mubr.msk.bf16.gmra.mrb[76].mxu0 %vm6169_vm6, %v19231_v33  ;;  %v8659_v14 = vor.u32 %v8658_v40, %v8657_v38  ;;  %v8669_v23 = vrot.slane %v21796_v43, 2  ;;  %v8663_v42 = vor.u32 %v8662_v56, %v8661_v28  ;;  %v8670_v22 = vrot.slane %v21797_v5, 3  ;;  %v21800_v38 = vld [vmem:[#allocation97_spill] sm:$0xff]  ;;  %v21801_v28 = vld [vmem:[#allocation84_spill] sm:$0xff]  ;;  %v21821_v33 = vld [vmem:[#allocation98_spill] sm:$0xff] }
 0xa6b   : > { %12575 = vmatprep.mubr.msk.bf16.mxu0 %vm6169_vm6, %v19240_v58  ;;  %v19430_v20 = vsel %vm3797_vm9, %v8651_v6, %v8655_v44  ;;  %v8673_v3 = vrot.slane %v21798_v57, 2  ;;  %v19435_v2 = vsel %vm3797_vm9, %v8648_v41, %v8651_v6  ;;  %v8667_v49 = vor.u32 %v8666_v60, %v8665_v32  ;;  %v21803_v6 = vld [vmem:[#allocation21_spill] sm:$0xff]  ;;  %v21804_v57 = vld [vmem:[#allocation60_spill] sm:$0xff] }
 0xa6c   : > { %v19438_v7 = vsel %vm3797_vm9, %v8655_v44, %v8659_v14  ;;  %v8674_v48 = vrot.slane %v21799_v47, 3  ;;  %v19442_v17 = vsel %vm3797_vm9, %v8659_v14, %v8663_v42  ;;  %v8671_v58 = vor.u32 %v8670_v22, %v8669_v23  ;;  %v21806_v47 = vld [vmem:[#allocation68_spill] sm:$0xff] }
 0xa6d   : > { %v8677_v40 = vrot.slane %v21800_v38, 2  ;;  %v8678_v56 = vrot.slane %v21801_v28, 3  ;;  %v19447_v43 = vsel %vm3797_vm9, %v8663_v42, %v8667_v49  ;;  %v8681_v41 = vrot.slane %v21803_v6, 2  ;;  %v21810_v38 = vld [vmem:[#allocation86_spill] sm:$0xff] }
 0xa6e   : > { %21802 = vst [vmem:[#allocation129_spill] sm:$0xff] %v19447_v43  ;;  %v8675_v5 = vor.u32 %v8674_v48, %v8673_v3  ;;  %v8682_v44 = vrot.slane %v21804_v57, 3  ;;  %v19452_v32 = vsel %vm3797_vm9, %v8667_v49, %v8671_v58  ;;  %v8685_v14 = vrot.slane %v21806_v47, 2  ;;  %v21809_v3 = vld [vmem:[#allocation85_spill] sm:$0xff]  ;;  %v21813_v6 = vld [vmem:[#allocation90_spill] sm:$0xff]  ;;  %v21816_v47 = vld [vmem:[#allocation100_spill] sm:$0xff] }
 0xa6f   : > { %21805 = vst [vmem:[#allocation106_spill] sm:$0xff] %v19452_v32  ;;  %v8679_v60 = vor.u32 %v8678_v56, %v8677_v40  ;;  %v8686_v23 = vrot.slane %v21807_v13, 3  ;;  %v8689_v48 = vrot.slane %v21809_v3, 2  ;;  %v8690_v28 = vrot.slane %v21810_v38, 3  ;;  %v21812_v56 = vld [vmem:[#allocation87_spill] sm:$0xff]  ;;  %v21819_v38 = vld [vmem:[#allocation110_spill] sm:$0xff] }
 0xa70   : > { %12614 = vmatmul.mubr.msk.bf16.gmra.mrb[56].mxu1 %vm6169_vm6, %v19243_v1  ;;  %v19459_v22 = vsel %vm3797_vm9, %v8671_v58, %v8675_v5  ;;  %v8683_v42 = vor.u32 %v8682_v44, %v8681_v41  ;;  %v8693_v13 = vrot.slane %v21812_v56, 2  ;;  %v8694_v57 = vrot.slane %v21813_v6, 3  ;;  %v21815_v41 = vld [vmem:[#allocation91_spill] sm:$0xff] }
 0xa71   : > { %21808 = vst [vmem:[#allocation130_spill] sm:$0xff] %v19459_v22  ;;  %12619 = vmatprep.mubr.msk.bf16.mxu1 %vm6169_vm6, %v19250_v4  ;;  %v19466_v49 = vsel %vm3797_vm9, %v8675_v5, %v8679_v60  ;;  %v8687_v40 = vor.u32 %v8686_v23, %v8685_v14  ;;  %v8691_v58 = vor.u32 %v8690_v28, %v8689_v48  ;;  %v8697_v44 = vrot.slane %v21815_v41, 2  ;;  %v21818_v14 = vld [vmem:[#allocation93_spill] sm:$0xff] }
 0xa72   : > { %21811 = vst [vmem:[#allocation131_spill] sm:$0xff] %v19466_v49  ;;  %12576 = vmatmul.mubr.msk.bf16.gmra.mrb[80].mxu0 %vm6169_vm6, %v19330_v30  ;;  %v19473_v1 = vsel %vm3797_vm9, %v8679_v60, %v8683_v42  ;;  %v8698_v3 = vrot.slane %v21816_v47, 3  ;;  %v8695_v5 = vor.u32 %v8694_v57, %v8693_v13  ;;  %v8701_v23 = vrot.slane %v21818_v14, 2  ;;  %v21823_v47 = vld [vmem:[#allocation99_spill] sm:$0xff] }
 0xa73   : > { %21814 = vst [vmem:[#allocation132_spill] sm:$0xff] %v19473_v1  ;;  %v19478_v4 = vsel %vm3797_vm9, %v8683_v42, %v8687_v40  ;;  %v8702_v56 = vrot.slane %v21819_v38, 3  ;;  %v19483_v6 = vsel %vm3797_vm9, %v8687_v40, %v8691_v58  ;;  %v8705_v60 = vrot.slane %v19153_v39, 2 }
 0xa74   : > { %21817 = vst [vmem:[#allocation133_spill] sm:$0xff] %v19478_v4  ;;  %21820 = vst [vmem:[#allocation134_spill] sm:$0xff] %v19483_v6  ;;  %v8699_v30 = vor.u32 %v8698_v3, %v8697_v44  ;;  %v8706_v48 = vrot.slane %v21821_v33, 3  ;;  %v19488_v28 = vsel %vm3797_vm9, %v8691_v58, %v8695_v5  ;;  %v8709_v42 = vrot.slane %v21823_v47, 2  ;;  %v19502_v33 = vld [vmem:[%s20483_s14 + $0x14] sm:$0xf] }
 0xa75   : > { %21822 = vst [vmem:[#allocation107_spill] sm:$0xff] %v19488_v28  ;;  %v8703_v41 = vor.u32 %v8702_v56, %v8701_v23  ;;  %v8710_v13 = vrot.slane %v21824_v62, 3  ;;  %v21826_v40 = vshrl.u32 %v19142_v50, 16  ;;  %v21827_v44 = vshll.u32 %v19142_v50, 16  ;;  %v19548_v47 = vld [vmem:[#allocation3 + $0x48] sm:$0xff]   ;;  %v19609_v28 = vld [vmem:[#allocation3 + $0xa0] sm:$0xff]  }
 0xa76   : > { %v19493_v57 = vsel %vm3797_vm9, %v8695_v5, %v8699_v30  ;;  %v8707_v14 = vor.u32 %v8706_v48, %v8705_v60  ;;  %v19538_v60 = vld [vmem:[#allocation3 + $0x28] sm:$0xff]   ;;  %v19540_v48 = vld [vmem:[#allocation3 + $0x30] sm:$0xff]   ;;  %v9763_v52 = vrot.slane %v19548_v47, 3  ;;  %vm22030_vm11 = vcmask 31744  }
 0xa77   : > { %21825 = vst [vmem:[#allocation108_spill] sm:$0xff] %v19493_v57  ;;  %v8713_v38 = vrot.slane %v21826_v40, 2  ;;  %v8714_v39 = vrot.slane %v21827_v44, 3  ;;  %v19505_v58 = vsel %vm3797_vm9, %v8699_v30, %v8703_v41  ;;  %v8711_v3 = vor.u32 %v8710_v13, %v8709_v42  ;;  %v19536_v30 = vld [vmem:[#allocation3 + $0x20] sm:$0xff]   ;;  %v19554_v42 = vld [vmem:[#allocation3 + $0x58] sm:$0xff]   ;;  %vm22032_vm14 = vmmov %vm22030_vm11 }
 0xa78   : > { %21828 = vst [vmem:[#allocation135_spill] sm:$0xff] %v19505_v58  ;;  %12620 = vmatmul.mubr.msk.bf16.vlgmr.msra.gmra.mrb[24].mxu1 %vm6169_vm6, %v19246_v36  ;;  %v19510_v62 = vsel %vm3797_vm9, %v8703_v41, %v8707_v14  ;;  %v21834_v36 = vld [vmem:[#allocation124_spill] sm:$0xff]  ;;  %21835 = vst [vmem:[#allocation138_spill] sm:$0xff] %v19536_v30  ;;  %v21836_v41 = vld [vmem:[#allocation125_spill] sm:$0xff] }
 0xa79   : > { %21829 = vst [vmem:[#allocation136_spill] sm:$0xff] %v19510_v62  ;;  %v19512_v5 = vor.u32 %v8714_v39, %v8713_v38  ;;  %12623 = vmatprep.mubr.msk.bf16.mxu1 %vm6169_vm6, %v19253_v24  ;;  %12656 = vmatpush3.bf16.msra.mxu1 %v19320_v21  ;;  %v19518_v50 = vsel %vm3797_vm9, %v8707_v14, %v8711_v3  ;;  %v7262_v24 = vld [vmem:[#allocation3 + $0x8] sm:$0xe]  ;;  %v14184_v21 = vld [vmem:[#allocation3 + $0xc] sm:$0xf]  ;;  %v19560_v44 = vld [vmem:[#allocation3 + $0x60] sm:$0xff]  }
 0xa7a   : > { %21831 = vst [vmem:[#allocation111_spill] sm:$0xff] %v19518_v50  ;;  %13776 = vmatprep.subr.msk.bf16.mxu1 %vm21832_vm3, %v19502_v33  ;;  %v19534_v56 = vcombine.low %v7262_v24, %v14184_v21  ;;  %v19562_v39 = vld [vmem:[#allocation3 + $0x68] sm:$0xff]   ;;  %v19572_v13 = vld [vmem:[#allocation3 + $0x78] sm:$0xff]   ;;  %v19590_v62 = vld [vmem:[#allocation3 + $0x90] sm:$0xff]   ;;  %v9753_v38 = vrot.slane %v19536_v30, 3 }
 0xa7b   : > { %21830 = vst [vmem:[#allocation137_spill] sm:$0xff] %v19512_v5  ;;  %v19524_v23 = vsel %vm3797_vm9, %v8711_v3, %v19512_v5  ;;  %v19564_v3 = vld [vmem:[#allocation3 + $0x1c] sm:$0xf]  ;;  %v9746_v40 = vld [vmem:[#allocation3 + $0x18] sm:$0x8]  ;;  %v19584_v50 = vld [vmem:[#allocation3 + $0x88] sm:$0xff]  }
 0xa7c   : > { %21833 = vst [vmem:[#allocation112_spill] sm:$0xff] %v19524_v23  ;;  %21837 = vst [vmem:[#allocation139_spill] sm:$0xff] %v19564_v3  ;;  %v19596_v58 = vld [vmem:[#allocation3 + $0x98] sm:$0xff]   ;;  %v21838_v57 = vld [vmem:[#allocation126_spill] sm:$0xff]  ;;  %v11429_v5 = vcombine.low %v9746_v40, %v19564_v3  ;;  %v9757_v3 = vrot.slane %v19540_v48, 3 }
 0xa7e   : > { %v9752_v40 = vrot.slane %v11429_v5, 3 }
 0xa80   : > { %12624 = vmatmul.mubr.msk.bf16.gmra.mrb[28].mxu1 %vm6169_vm6, %v19258_v10  ;;  %v19542_v10 = vld [vmem:[#allocation3 + $0x38] sm:$0xff]   ;;  %v19623_v4 = vsel %vm4909_vm5, %v9752_v40, %v9753_v38  ;;  %v9769_v40 = vrot.slane %v19560_v44, 3 }
 0xa81   : > { %12627 = vmatprep.mubr.msk.bf16.mxu1 %vm6169_vm6, %v19263_v16  ;;  %v19546_v16 = vld [vmem:[#allocation3 + $0x40] sm:$0xff]   ;;  %v9759_v23 = vrot.slane %v19542_v10, 3  ;;  %21841 = vst [vmem:[#allocation38_spill] sm:$0xff] %v19623_v4 }
 0xa82   : > { %v9761_v24 = vrot.slane %v19546_v16, 3 }
 0xa83   : > { %v19631_v6 = vsel %vm4909_vm5, %v9757_v3, %v9759_v23 }
 0xa84   : > { %21843 = vst [vmem:[#allocation44_spill] sm:$0xff] %v19631_v6  ;;  %v21848_v6 = vld [vmem:[#allocation127_spill] sm:$0xff] }
 0xa88   : > { %12628 = vmatmul.mubr.msk.bf16.gmra.mrb[32].mxu1 %vm6169_vm6, %v21834_v36  ;;  %v21839_v36 = vld [vmem:[#allocation105_spill] sm:$0xff] }
 0xa89   : > { %12631 = vmatprep.mubr.msk.bf16.mxu1 %vm6169_vm6, %v19273_v0  ;;  %v19552_v0 = vld [vmem:[#allocation3 + $0x50] sm:$0xff]  }
 0xa8a   : > { %v9765_v49 = vrot.slane %v19552_v0, 3 }
 0xa8c   : > { %v19646_v1 = vsel %vm4909_vm5, %v9763_v52, %v9765_v49 }
 0xa8d   : > { %21847 = vst [vmem:[#allocation9_spill] sm:$0xff] %v19646_v1 }
 0xa90   : > { %12632 = vmatmul.mubr.msk.bf16.gmra.mrb[36].mxu1 %vm6169_vm6, %v21836_v41  ;;  %v19570_v41 = vld [vmem:[#allocation3 + $0x70] sm:$0xff]  }
 0xa91   : > { %12635 = vmatprep.mubr.msk.bf16.mxu1 %vm6169_vm6, %v19283_v59  ;;  %v19578_v59 = vld [vmem:[#allocation3 + $0x80] sm:$0xff]  }
 0xa98   : > { %12636 = vmatmul.mubr.msk.bf16.gmra.mrb[40].mxu1 %vm6169_vm6, %v21838_v57  ;;  %v9755_v57 = vrot.slane %v19538_v60, 3 }
 0xa99   : > { %12639 = vmatprep.mubr.msk.bf16.mxu1 %vm6169_vm6, %v21839_v36 }
 0xa9a   : > { %v19617_v36 = vsel %vm4909_vm5, %v9753_v38, %v9755_v57  ;;  %v19626_v14 = vsel %vm4909_vm5, %v9755_v57, %v9757_v3  ;;  %v19639_v38 = vsel %vm4909_vm5, %v9761_v24, %v9763_v52  ;;  %v9767_v57 = vrot.slane %v19554_v42, 3 }
 0xa9b   : > { %21840 = vst [vmem:[#allocation51_spill] sm:$0xff] %v19617_v36  ;;  %21842 = vst [vmem:[#allocation35_spill] sm:$0xff] %v19626_v14  ;;  %v19634_v36 = vsel %vm4909_vm5, %v9759_v23, %v9761_v24  ;;  %v19643_v14 = vld [vmem:[#allocation3 + $0xa8] ss:$0 sps:$4 sm:$0x77]   ;;  %v9771_v3 = vrot.slane %v19562_v39, 3 }
 0xa9c   : > { %21844 = vst [vmem:[#allocation43_spill] sm:$0xff] %v19634_v36  ;;  %21845 = vst [vmem:[#allocation49_spill] sm:$0xff] %v19639_v38  ;;  %v9773_v23 = vrot.slane %v19570_v41, 3  ;;  %v9775_v36 = vrot.slane %v19572_v13, 3  ;;  %v19654_v24 = vsel %vm4909_vm5, %v9765_v49, %v9767_v57  ;;  %v19657_v21 = vsel %vm4909_vm5, %v9767_v57, %v9769_v40 }
 0xa9d   : > { %21846 = vst [vmem:[#allocation30_spill] sm:$0xff] %v19643_v14  ;;  %21849 = vst [vmem:[#allocation10_spill] sm:$0xff] %v19654_v24  ;;  %v9777_v38 = vrot.slane %v19578_v59, 3  ;;  %v9779_v52 = vrot.slane %v19584_v50, 3  ;;  %v19664_v1 = vsel %vm4909_vm5, %v9769_v40, %v9771_v3  ;;  %v9781_v49 = vrot.slane %v19590_v62, 3 }
 0xa9e   : > { %21850 = vst [vmem:[#allocation55_spill] sm:$0xff] %v19657_v21  ;;  %21851 = vst [vmem:[#allocation56_spill] sm:$0xff] %v19664_v1  ;;  %v19667_v4 = vsel %vm4909_vm5, %v9771_v3, %v9773_v23  ;;  %v9783_v24 = vrot.slane %v19596_v58, 3  ;;  %v9787_v3 = vrot.slane %v19643_v14, 3  ;;  %v21862_v14 = vshrl.u32 %v19538_v60, 16 }
 0xa9f   : > { %21852 = vst [vmem:[#allocation54_spill] sm:$0xff] %v19667_v4  ;;  %v19674_v57 = vsel %vm4909_vm5, %v9775_v36, %v9777_v38  ;;  %v19677_v21 = vsel %vm4909_vm5, %v9777_v38, %v9779_v52  ;;  %v19682_v40 = vsel %vm4909_vm5, %v9779_v52, %v9781_v49  ;;  %v10066_v4 = vshrl.u32 %v11429_v5, 16 }
 0xaa0   : > { %12640 = vmatmul.mubr.msk.bf16.gmra.mrb[44].mxu1 %vm6169_vm6, %v21848_v6  ;;  %v19670_v6 = vsel %vm4909_vm5, %v9773_v23, %v9775_v36  ;;  %21854 = vst [vmem:[#allocation74_spill] sm:$0xff] %v19674_v57  ;;  %21855 = vst [vmem:[#allocation75_spill] sm:$0xff] %v19677_v21  ;;  %v10069_v23 = vshll.u32 %v11429_v5, 16  ;;  %v21859_v38 = vshrl.u32 %v19536_v30, 16  ;;  %v21860_v57 = vshll.u32 %v19536_v30, 16 }
 0xaa1   : > { %12643 = vmatprep.mubr.msk.bf16.mxu1 %vm6169_vm6, %v19303_v61  ;;  %21853 = vst [vmem:[#allocation71_spill] sm:$0xff] %v19670_v6  ;;  %v9785_v61 = vrot.slane %v19609_v28, 3  ;;  %21856 = vst [vmem:[#allocation109_spill] sm:$0xff] %v19682_v40  ;;  %v19686_v6 = vsel %vm4909_vm5, %v9781_v49, %v9783_v24  ;;  %v10068_v52 = vrot.slane %v10066_v4, 3  ;;  %v10077_v5 = vrot.slane %v21862_v14, 3 }
 0xaa2   : > { %21857 = vst [vmem:[#allocation79_spill] sm:$0xff] %v19686_v6  ;;  %v10073_v21 = vrot.slane %v21859_v38, 3  ;;  %v10074_v1 = vrot.slane %v21860_v57, 4  ;;  %v10071_v40 = vrot.slane %v10069_v23, 4  ;;  %v21863_v49 = vshll.u32 %v19538_v60, 16 }
 0xaa3   : > { %v19689_v36 = vsel %vm4909_vm5, %v9783_v24, %v9785_v61  ;;  %v19696_v22 = vsel %vm4909_vm5, %v9785_v61, %v9787_v3  ;;  %v21864_v24 = vshrl.u32 %v19540_v48, 16  ;;  %v21865_v38 = vshll.u32 %v19540_v48, 16  ;;  %vm21904_vm5 = vmmov %vm21832_vm3 }
 0xaa4   : > { %21858 = vst [vmem:[#allocation115_spill] sm:$0xff] %v19689_v36  ;;  %21861 = vst [vmem:[#allocation80_spill] sm:$0xff] %v19696_v22  ;;  %v10075_v32 = vor.u32 %v10074_v1, %v10073_v21  ;;  %v10078_v6 = vrot.slane %v21863_v49, 4  ;;  %v10072_v30 = vor.u32 %v10071_v40, %v10068_v52  ;;  %v21866_v57 = vshrl.u32 %v19542_v10, 16  ;;  %v21869_v1 = vld [vmem:[#allocation128_spill] sm:$0xff] }
 0xaa5   : > { %v10081_v36 = vrot.slane %v21864_v24, 3  ;;  %v10082_v43 = vrot.slane %v21865_v38, 4  ;;  %v21867_v4 = vshll.u32 %v19542_v10, 16  ;;  %v21868_v23 = vshrl.u32 %v19546_v16, 16 }
 0xaa6   : > { %v10085_v61 = vrot.slane %v21866_v57, 3  ;;  %v10079_v21 = vor.u32 %v10078_v6, %v10077_v5  ;;  %v21870_v24 = vshll.u32 %v19546_v16, 16  ;;  %v21871_v38 = vshrl.u32 %v19548_v47, 16 }
 0xaa7   : > { %v10086_v3 = vrot.slane %v21867_v4, 4  ;;  %v10089_v14 = vrot.slane %v21868_v23, 3  ;;  %v10083_v49 = vor.u32 %v10082_v43, %v10081_v36  ;;  %v19721_v52 = vsel %vm5223_vm12, %v10072_v30, %v10075_v32 }
 0xaa8   : > { %12644 = vmatmul.mubr.msk.bf16.gmra.mrb[48].mxu1 %vm6169_vm6, %v21869_v1  ;;  %v10090_v22 = vrot.slane %v21870_v24, 4  ;;  %v10093_v40 = vrot.slane %v21871_v38, 3  ;;  %v21872_v4 = vshll.u32 %v19548_v47, 16  ;;  %v21873_v1 = vshrl.u32 %v19552_v0, 16 }
 0xaa9   : > { %12647 = vmatprep.mubr.msk.bf16.mxu1 %vm6169_vm6, %v19311_v37  ;;  %v10087_v57 = vor.u32 %v10086_v3, %v10085_v61  ;;  %v19728_v43 = vsel %vm5223_vm12, %v10075_v32, %v10079_v21  ;;  %v19731_v36 = vsel %vm5223_vm12, %v10079_v21, %v10083_v49  ;;  %v21875_v24 = vshll.u32 %v19552_v0, 16 }
 0xaaa   : > { %v10094_v23 = vrot.slane %v21872_v4, 4  ;;  %v10097_v6 = vrot.slane %v21873_v1, 3  ;;  %21874 = vst [vmem:[#allocation113_spill] sm:$0xff] %v19728_v43  ;;  %v10091_v5 = vor.u32 %v10090_v22, %v10089_v14  ;;  %v21877_v3 = vshrl.u32 %v19554_v42, 16 }
 0xaab   : > { %v10098_v37 = vrot.slane %v21875_v24, 4  ;;  %v19736_v30 = vsel %vm5223_vm12, %v10083_v49, %v10087_v57  ;;  %v21878_v4 = vshll.u32 %v19554_v42, 16  ;;  %v21880_v21 = vshrl.u32 %v19560_v44, 16 }
 0xaac   : > { %21876 = vst [vmem:[#allocation33_spill] sm:$0xff] %v19736_v30  ;;  %v10095_v61 = vor.u32 %v10094_v23, %v10093_v40  ;;  %v10101_v38 = vrot.slane %v21877_v3, 3  ;;  %v19743_v32 = vsel %vm5223_vm12, %v10087_v57, %v10091_v5  ;;  %v21881_v14 = vshll.u32 %v19560_v44, 16 }
 0xaad   : > { %v10102_v1 = vrot.slane %v21878_v4, 4  ;;  %21879 = vst [vmem:[#allocation114_spill] sm:$0xff] %v19743_v32  ;;  %v10099_v43 = vor.u32 %v10098_v37, %v10097_v6  ;;  %v10105_v22 = vrot.slane %v21880_v21, 3  ;;  %v21883_v23 = vshrl.u32 %v19562_v39, 16 }
 0xaae   : > { %v10106_v24 = vrot.slane %v21881_v14, 4  ;;  %v19750_v49 = vsel %vm5223_vm12, %v10091_v5, %v10095_v61  ;;  %v21884_v30 = vshll.u32 %v19562_v39, 16  ;;  %v21885_v37 = vshrl.u32 %v19570_v41, 16 }
 0xaaf   : > { %21882 = vst [vmem:[#allocation34_spill] sm:$0xff] %v19750_v49  ;;  %v10103_v40 = vor.u32 %v10102_v1, %v10101_v38  ;;  %v10109_v3 = vrot.slane %v21883_v23, 3  ;;  %v19757_v57 = vsel %vm5223_vm12, %v10095_v61, %v10099_v43  ;;  %v21886_v32 = vshll.u32 %v19570_v41, 16 }
 0xab0   : > { %v10110_v4 = vrot.slane %v21884_v30, 4  ;;  %v10107_v6 = vor.u32 %v10106_v24, %v10105_v22  ;;  %v10113_v21 = vrot.slane %v21885_v37, 3  ;;  %v21887_v1 = vshrl.u32 %v19572_v13, 16  ;;  %12648 = vmatmul.mubr.msk.bf16.gmra.mrb[52].mxu1 %vm6169_vm6, %v19314_v46 }
 0xab1   : > { %v10114_v14 = vrot.slane %v21886_v32, 4  ;;  %v19764_v5 = vsel %vm5223_vm12, %v10099_v43, %v10103_v40  ;;  %v21888_v49 = vshll.u32 %v19572_v13, 16  ;;  %v21890_v24 = vshrl.u32 %v19578_v59, 16  ;;  %12651 = vmatprep.mubr.msk.bf16.mxu1 %vm6169_vm6, %v19323_v12 }
 0xab2   : > { %v10111_v38 = vor.u32 %v10110_v4, %v10109_v3  ;;  %v10117_v23 = vrot.slane %v21887_v1, 3  ;;  %v19773_v61 = vsel %vm5223_vm12, %v10103_v40, %v10107_v6  ;;  %v21891_v43 = vshll.u32 %v19578_v59, 16 }
 0xab3   : > { %v10118_v30 = vrot.slane %v21888_v49, 4  ;;  %21889 = vst [vmem:[#allocation116_spill] sm:$0xff] %v19773_v61  ;;  %v10115_v22 = vor.u32 %v10114_v14, %v10113_v21  ;;  %v10121_v32 = vrot.slane %v21890_v24, 3  ;;  %v21893_v4 = vshrl.u32 %v19584_v50, 16 }
 0xab4   : > { %v10122_v37 = vrot.slane %v21891_v43, 4  ;;  %v19782_v3 = vsel %vm5223_vm12, %v10107_v6, %v10111_v38  ;;  %v21894_v40 = vshll.u32 %v19584_v50, 16  ;;  %v21896_v24 = vshrl.u32 %v19590_v62, 16 }
 0xab5   : > { %21892 = vst [vmem:[#allocation39_spill] sm:$0xff] %v19782_v3  ;;  %v10119_v49 = vor.u32 %v10118_v30, %v10117_v23  ;;  %v10125_v46 = vrot.slane %v21893_v4, 3  ;;  %v19789_v21 = vsel %vm5223_vm12, %v10111_v38, %v10115_v22  ;;  %v21897_v61 = vshll.u32 %v19590_v62, 16 }
 0xab6   : > { %v10126_v1 = vrot.slane %v21894_v40, 4  ;;  %21895 = vst [vmem:[#allocation22_spill] sm:$0xff] %v19789_v21  ;;  %v10123_v14 = vor.u32 %v10122_v37, %v10121_v32  ;;  %v10129_v43 = vrot.slane %v21896_v24, 3  ;;  %v21898_v30 = vshrl.u32 %v19596_v58, 16 }
 0xab7   : > { %v10130_v12 = vrot.slane %v21897_v61, 4  ;;  %v19796_v6 = vsel %vm5223_vm12, %v10115_v22, %v10119_v49  ;;  %v21899_v3 = vshll.u32 %v19596_v58, 16  ;;  %v21900_v37 = vshrl.u32 %v19609_v28, 16 }
 0xab8   : > { %v10127_v23 = vor.u32 %v10126_v1, %v10125_v46  ;;  %v10133_v4 = vrot.slane %v21898_v30, 3  ;;  %v19803_v38 = vsel %vm5223_vm12, %v10119_v49, %v10123_v14  ;;  %v21901_v21 = vshll.u32 %v19609_v28, 16  ;;  %12652 = vmatmul.mubr.msk.bf16.gmra.mrb[56].mxu1 %vm6169_vm6, %v19326_v29 }
 0xab9   : > { %v10134_v40 = vrot.slane %v21899_v3, 4  ;;  %v10131_v32 = vor.u32 %v10130_v12, %v10129_v43  ;;  %v10137_v24 = vrot.slane %v21900_v37, 3  ;;  %v21902_v49 = vrot.slane %v18883_v53, 1 }
 0xaba   : > { %v10138_v61 = vrot.slane %v21901_v21, 4  ;;  %v19810_v22 = vsel %vm5223_vm12, %v10123_v14, %v10127_v23  ;;  %v21903_v43 = vrot.slane %v19534_v56, 1  ;;  %v8781_v12 = vsel %vm21904_vm5, %v19502_v33, 0  ;;  %v21912_v33 = vld [vmem:[#allocation132_spill] sm:$0xff] }
 0xabb   : > { %v10135_v46 = vor.u32 %v10134_v40, %v10133_v4  ;;  %v19813_v1 = vsel %vm5223_vm12, %v10127_v23, %v10131_v32  ;;  %v11252_v23 = vld [vmem:[%s20483_s14 + $0x8] sm:$0xf] }
 0xabc   : > { %v19815_v30 = vor.u32 %v10138_v61, %v10137_v24  ;;  %v8366_v21 = vsel %vm3519_vm0, %v21903_v43, %v21902_v49  ;;  %vm21905_vm0 = vmmov %vm21832_vm3  ;;  %v21916_v24 = vld [vmem:[#allocation133_spill] sm:$0xff]  ;;  %v21917_v61 = vld [vmem:[#allocation134_spill] sm:$0xff] }
 0xabd   : > { %v19818_v3 = vsel %vm5223_vm12, %v10131_v32, %v10135_v46  ;;  %12657 = vmatprep.mubr.msk.bf16.mxu1 %vm6169_vm6, %v8366_v21  ;;  %vm21906_vm13 = vmmov %vm21905_vm0 }
 0xabe   : > { %v19829_v14 = vsel %vm5223_vm12, %v10135_v46, %v19815_v30  ;;  %vm21907_vm4 = vmmov %vm21905_vm0 }
 0xabf   : > { %vm21943_vm8 = vmmov %vm21905_vm0 }
 0xac0   : > { %12658 = vmatmul.mubr.msk.bf16.vlgmr.msra.gmra.mrb[24].mxu1 %vm6169_vm6, %v19335_v27  ;;  %vm21946_vm1 = vmmov %vm21905_vm0 }
 0xac1   : > { %12661 = vmatprep.mubr.msk.bf16.mxu1 %vm6169_vm6, %v19340_v63  ;;  %12694 = vmatpush3.bf16.msra.mxu1 %v8781_v12  ;;  %v8995_v63 = vsel %vm21906_vm13, %v11252_v23, 0  ;;  %v21922_v12 = vld [vmem:[#allocation107_spill] sm:$0xff]  ;;  %vm21975_vm7 = vmmov %vm21905_vm0 }
 0xac2   : > { %13777 = vmatprep.subr.msk.bf16.mxu1 %vm21905_vm0, %v11252_v23  ;;  %v21923_v23 = vld [vmem:[#allocation108_spill] sm:$0xff]  ;;  %vm22002_vm15 = vmmov %vm21905_vm0 }
 0xac3   : > { %vm22034_vm3 = vmmov %vm22030_vm11 }
 0xac4   : > { %vm22036_vm5 = vmmov %vm22034_vm3 }
 0xac8   : > { %12662 = vmatmul.mubr.msk.bf16.gmra.mrb[28].mxu1 %vm6169_vm6, %v19348_v34 }
 0xac9   : > { %12665 = vmatprep.mubr.msk.bf16.mxu1 %vm6169_vm6, %v19351_v51  ;;  %v19884_v51 = vld [vmem:[%s20483_s14 + $0x18] sm:$0xf] }
 0xad0   : > { %12666 = vmatmul.mubr.msk.bf16.gmra.mrb[32].mxu1 %vm6169_vm6, %v19358_v35 }
 0xad1   : > { %12669 = vmatprep.mubr.msk.bf16.mxu1 %vm6169_vm6, %v19361_v9 }
 0xad8   : > { %12670 = vmatmul.mubr.msk.bf16.gmra.mrb[36].mxu1 %vm6169_vm6, %v19364_v15 }
 0xad9   : > { %12673 = vmatprep.mubr.msk.bf16.mxu1 %vm6169_vm6, %v19370_v54 }
 0xae0   : > { %12674 = vmatmul.mubr.msk.bf16.gmra.mrb[40].mxu1 %vm6169_vm6, %v19373_v55 }
 0xae1   : > { %12677 = vmatprep.mubr.msk.bf16.mxu1 %vm6169_vm6, %v19380_v25  ;;  %v21908_v25 = vld [vmem:[#allocation129_spill] sm:$0xff] }
 0xae8   : > { %12678 = vmatmul.mubr.msk.bf16.gmra.mrb[44].mxu1 %vm6169_vm6, %v19386_v18 }
 0xae9   : > { %12681 = vmatprep.mubr.msk.bf16.mxu1 %vm6169_vm6, %v19389_v19 }
 0xaf0   : > { %12682 = vmatmul.mubr.msk.bf16.gmra.mrb[48].mxu1 %vm6169_vm6, %v19394_v8 }
 0xaf1   : > { %12685 = vmatprep.mubr.msk.bf16.mxu1 %vm6169_vm6, %v19397_v45 }
 0xaf8   : > { %12686 = vmatmul.mubr.msk.bf16.gmra.mrb[52].mxu1 %vm6169_vm6, %v19400_v11  ;;  %v21909_v11 = vld [vmem:[#allocation106_spill] sm:$0xff] }
 0xaf9   : > { %12689 = vmatprep.mubr.msk.bf16.mxu1 %vm6169_vm6, %v19404_v31  ;;  %v21910_v31 = vld [vmem:[#allocation130_spill] sm:$0xff] }
 0xb00   : > { %12690 = vmatmul.mubr.msk.bf16.gmra.mrb[56].mxu1 %vm6169_vm6, %v19407_v26 }
 0xb01   : > { %12695 = vmatprep.mubr.msk.bf16.mxu1 %vm6169_vm6, %v19435_v2 }
 0xb05   : > { %v19874_v29 = vpop.f32.mrb[48].mxu0 }
 0xb06   : > { %v19876_v27 = vpop.f32.mrb[49].mxu0 }
 0xb07   : > { %v19879_v34 = vpop.f32.mrb[50].mxu0 }
 0xb08   : > { %v19886_v35 = vpop.f32.mrb[51].mxu0  ;;  %12696 = vmatmul.mubr.msk.bf16.vlgmr.msra.gmra.mrb[24].mxu1 %vm6169_vm6, %v19430_v20 }
 0xb09   : > { %12699 = vmatprep.mubr.msk.bf16.mxu1 %vm6169_vm6, %v19438_v7  ;;  %12732 = vmatpush3.bf16.msra.mxu1 %v8995_v63 }
 0xb0a   : > { %13778 = vmatprep.subr.msk.bf16.mxu1 %vm21907_vm4, %v19884_v51 }
 0xb0d   : > { %v19894_v9 = vpop.f32.mrb[52].mxu0 }
 0xb0e   : > { %v19896_v15 = vpop.f32.mrb[53].mxu0 }
 0xb0f   : > { %v19898_v54 = vpop.f32.mrb[54].mxu0 }
 0xb10   : > { %v19900_v55 = vpop.f32.mrb[55].mxu0  ;;  %12700 = vmatmul.mubr.msk.bf16.gmra.mrb[28].mxu1 %vm6169_vm6, %v19442_v17  ;;  %v21911_v17 = vld [vmem:[#allocation131_spill] sm:$0xff] }
 0xb11   : > { %12703 = vmatprep.mubr.msk.bf16.mxu1 %vm6169_vm6, %v21908_v25 }
 0xb15   : > { %v19906_v18 = vpop.f32.mrb[56].mxu0 }
 0xb16   : > { %v19908_v19 = vpop.f32.mrb[57].mxu0 }
 0xb17   : > { %v19910_v8 = vpop.f32.mrb[58].mxu0 }
 0xb18   : > { %v19912_v45 = vpop.f32.mrb[59].mxu0  ;;  %12704 = vmatmul.mubr.msk.bf16.gmra.mrb[32].mxu1 %vm6169_vm6, %v21909_v11 }
 0xb19   : > { %12707 = vmatprep.mubr.msk.bf16.mxu1 %vm6169_vm6, %v21910_v31  ;;  %v13868_v31 = vld [vmem:[#allocation3 + $0xa0] ss:$0 sps:$4 sm:$0x77]  }
 0xb1d   : > { %v19918_v26 = vpop.f32.mrb[60].mxu0 }
 0xb1e   : > { %v19920_v20 = vpop.f32.mrb[61].mxu0 }
 0xb1f   : > { %v19922_v2 = vpop.f32.mrb[62].mxu0 }
 0xb20   : > { %v19924_v7 = vpop.f32.mrb[63].mxu0  ;;  %12708 = vmatmul.mubr.msk.bf16.gmra.mrb[36].mxu1 %vm6169_vm6, %v21911_v17 }
 0xb21   : > { %12711 = vmatprep.mubr.msk.bf16.mxu1 %vm6169_vm6, %v21912_v33  ;;  %v21928_v33 = vld [vmem:[#allocation135_spill] sm:$0xff] }
 0xb25   : > { %v19930_v4 = vpop.f32.mrb[64].mxu0 }
 0xb26   : > { %v19932_v40 = vpop.f32.mrb[65].mxu0 }
 0xb27   : > { %21913 = vst [vmem:[#allocation40_spill] sm:$0xff] %v19932_v40  ;;  %v19934_v32 = vpop.f32.mrb[66].mxu0 }
 0xb28   : > { %21914 = vst [vmem:[#allocation25_spill] sm:$0xff] %v19934_v32  ;;  %v19936_v37 = vpop.f32.mrb[67].mxu0  ;;  %12712 = vmatmul.mubr.msk.bf16.gmra.mrb[40].mxu1 %vm6169_vm6, %v21916_v24  ;;  %v21929_v24 = vld [vmem:[#allocation136_spill] sm:$0xff] }
 0xb29   : > { %21915 = vst [vmem:[#allocation45_spill] sm:$0xff] %v19936_v37  ;;  %12715 = vmatprep.mubr.msk.bf16.mxu1 %vm6169_vm6, %v21917_v61  ;;  %v8718_v61 = vshrl.u32 %v13868_v31, 16 }
 0xb2d   : > { %v19942_v46 = vpop.f32.mrb[68].mxu0 }
 0xb2e   : > { %21918 = vst [vmem:[#allocation29_spill] sm:$0xff] %v19942_v46  ;;  %v19944_v49 = vpop.f32.mrb[69].mxu0 }
 0xb2f   : > { %21919 = vst [vmem:[#allocation46_spill] sm:$0xff] %v19944_v49  ;;  %v19946_v43 = vpop.f32.mrb[70].mxu0 }
 0xb30   : > { %21920 = vst [vmem:[#allocation61_spill] sm:$0xff] %v19946_v43  ;;  %v19948_v21 = vpop.f32.mrb[71].mxu0  ;;  %12716 = vmatmul.mubr.msk.bf16.gmra.mrb[44].mxu1 %vm6169_vm6, %v21922_v12  ;;  %v8721_v12 = vshll.u32 %v13868_v31, 16  ;;  %v8720_v43 = vrot.slane %v8718_v61, 2  ;;  %v21935_v31 = vshrl.u32 %v18883_v53, 16 }
 0xb31   : > { %21921 = vst [vmem:[#allocation4_spill] sm:$0xff] %v19948_v21  ;;  %12719 = vmatprep.mubr.msk.bf16.mxu1 %vm6169_vm6, %v21923_v23  ;;  %v8964_v21 = vshrl.u32 %v19534_v56, 16  ;;  %v8967_v23 = vshll.u32 %v19534_v56, 16  ;;  %v21936_v56 = vshll.u32 %v18883_v53, 16 }
 0xb32   : > { %v8971_v37 = vrot.slane %v21935_v31, 1  ;;  %v21952_v31 = vld [vmem:[#allocation88_spill] sm:$0xff] }
 0xb33   : > { %v8969_v46 = vrot.slane %v8967_v23, 2  ;;  %v8972_v32 = vrot.slane %v21936_v56, 2  ;;  %v21953_v56 = vld [vmem:[#allocation89_spill] sm:$0xff] }
 0xb35   : > { %v19954_v63 = vpop.f32.mrb[72].mxu0  ;;  %v8973_v61 = vor.u32 %v8972_v32, %v8971_v37  ;;  %v9531_v32 = vsel %vm21943_vm8, %v19884_v51, 0  ;;  %v21944_v37 = vld [vmem:[#allocation120_spill] sm:$0xff]  ;;  %v21949_v51 = vld [vmem:[#allocation95_spill] sm:$0xff] }
 0xb36   : > { %21924 = vst [vmem:[#allocation63_spill] sm:$0xff] %v19954_v63  ;;  %v19956_v25 = vpop.f32.mrb[73].mxu0 }
 0xb37   : > { %21925 = vst [vmem:[#allocation6_spill] sm:$0xff] %v19956_v25  ;;  %v19958_v11 = vpop.f32.mrb[74].mxu0 }
 0xb38   : > { %21926 = vst [vmem:[#allocation64_spill] sm:$0xff] %v19958_v11  ;;  %v19960_v17 = vpop.f32.mrb[75].mxu0  ;;  %12720 = vmatmul.mubr.msk.bf16.gmra.mrb[48].mxu1 %vm6169_vm6, %v21928_v33  ;;  %v21934_v33 = vld [vmem:[#allocation111_spill] sm:$0xff] }
 0xb39   : > { %21927 = vst [vmem:[#allocation52_spill] sm:$0xff] %v19960_v17  ;;  %12723 = vmatprep.mubr.msk.bf16.mxu1 %vm6169_vm6, %v21929_v24  ;;  %v8723_v17 = vrot.slane %v8721_v12, 3  ;;  %v8966_v24 = vrot.slane %v8964_v21, 1  ;;  %v21941_v21 = vld [vmem:[#allocation137_spill] sm:$0xff] }
 0xb3d   : > { %v19968_v63 = vpop.f32.mrb[76].mxu0 }
 0xb3e   : > { %21930 = vst [vmem:[#allocation66_spill] sm:$0xff] %v19968_v63  ;;  %v19970_v25 = vpop.f32.mrb[77].mxu0  ;;  %v21937_v63 = vld [vmem:[#allocation112_spill] sm:$0xff] }
 0xb3f   : > { %21931 = vst [vmem:[#allocation53_spill] sm:$0xff] %v19970_v25  ;;  %v19972_v11 = vpop.f32.mrb[78].mxu0  ;;  %v8724_v25 = vor.u32 %v8723_v17, %v8720_v43  ;;  %v11428_v43 = vld [vmem:[%s20483_s14 + $0x1c] sm:$0xf] }
 0xb40   : > { %21932 = vst [vmem:[#allocation117_spill] sm:$0xff] %v19972_v11  ;;  %v19974_v49 = vpop.f32.mrb[79].mxu0  ;;  %12724 = vmatmul.mubr.msk.bf16.gmra.mrb[52].mxu1 %vm6169_vm6, %v21934_v33  ;;  %v8970_v11 = vor.u32 %v8969_v46, %v8966_v24  ;;  %v8975_v46 = vsel %vm2519_vm10, %v8973_v61, %v21944_v37  ;;  %v21950_v17 = vld [vmem:[#allocation62_spill] sm:$0xff]  ;;  %v21951_v24 = vld [vmem:[#allocation81_spill] sm:$0xff] }
 0xb41   : > { %21933 = vst [vmem:[#allocation57_spill] sm:$0xff] %v19974_v49  ;;  %12727 = vmatprep.mubr.msk.bf16.mxu1 %vm6169_vm6, %v21937_v63  ;;  %v8725_v23 = vsel %vm3797_vm9, %v21941_v21, %v8724_v25  ;;  %v21945_v63 = vld [vmem:[#allocation121_spill] sm:$0xff]  ;;  %v21947_v25 = vld [vmem:[#allocation50_spill] sm:$0xff]  ;;  %v21955_v21 = vld [vmem:[#allocation96_spill] sm:$0xff] }
 0xb42   : > { %v8974_v53 = vsel %vm2519_vm10, %v8970_v11, %v8973_v61  ;;  %v21948_v11 = vld [vmem:[#allocation82_spill] sm:$0xff]  ;;  %v21954_v61 = vld [vmem:[#allocation92_spill] sm:$0xff]  ;;  %v21957_v37 = vld [vmem:[#allocation101_spill] sm:$0xff] }
 0xb45   : > { %v19984_v12 = vpop.f32.mrb[80].mxu0 }
 0xb46   : > { %21938 = vst [vmem:[#allocation67_spill] sm:$0xff] %v19984_v12  ;;  %v19986_v49 = vpop.f32.mrb[81].mxu0 }
 0xb47   : > { %21939 = vst [vmem:[#allocation58_spill] sm:$0xff] %v19986_v49  ;;  %v19988_v40 = vpop.f32.mrb[82].mxu0 }
 0xb48   : > { %21940 = vst [vmem:[#allocation47_spill] sm:$0xff] %v19988_v40  ;;  %v19992_v33 = vpop.f32.mrb[83].mxu0  ;;  %12728 = vmatmul.mubr.msk.bf16.gmra.mrb[56].mxu1 %vm6169_vm6, %v8725_v23  ;;  %v21956_v23 = vld [vmem:[#allocation94_spill] sm:$0xff] }
 0xb49   : > { %21942 = vst [vmem:[#allocation70_spill] sm:$0xff] %v19992_v33  ;;  %12733 = vmatprep.mubr.msk.bf16.mxu1 %vm6169_vm6, %v8974_v53  ;;  %v9174_v53 = vld [vmem:[#allocation3 + $0x18] sm:$0xc]  ;;  %v21961_v33 = vld [vmem:[#allocation138_spill] sm:$0xff] }
 0xb4a   : > { %v21962_v40 = vshrl.u32 %v21961_v33, 16 }
 0xb4c   : > { %v9317_v49 = vrot.slane %v21962_v40, 2 }
 0xb50   : > { %12734 = vmatmul.mubr.msk.bf16.vlgmr.msra.gmra.mrb[24].mxu1 %vm6169_vm6, %v8975_v46  ;;  %v21958_v46 = vld [vmem:[#allocation139_spill] sm:$0xff] }
 0xb51   : > { %12737 = vmatprep.mubr.msk.bf16.mxu1 %vm6169_vm6, %v21945_v63  ;;  %12770 = vmatpush3.bf16.msra.mxu1 %v9531_v32  ;;  %v13869_v32 = vld [vmem:[#allocation3 + $0x98] ss:$0 sps:$4 sm:$0x33]   ;;  %v11391_v63 = vcombine.low %v9174_v53, %v21958_v46  ;;  %v21964_v46 = vld [vmem:[#allocation122_spill] sm:$0xff] }
 0xb52   : > { %13779 = vmatprep.subr.msk.bf16.mxu1 %vm21946_vm1, %v11428_v43 }
 0xb58   : > { %12738 = vmatmul.mubr.msk.bf16.gmra.mrb[28].mxu1 %vm6169_vm6, %v21947_v25  ;;  %v21959_v25 = vld [vmem:[#allocation102_spill] sm:$0xff] }
 0xb59   : > { %12741 = vmatprep.mubr.msk.bf16.mxu1 %vm6169_vm6, %v21948_v11  ;;  %v8977_v11 = vshrl.u32 %v13869_v32, 16 }
 0xb60   : > { %12742 = vmatmul.mubr.msk.bf16.gmra.mrb[32].mxu1 %vm6169_vm6, %v21949_v51  ;;  %v8980_v51 = vshll.u32 %v13869_v32, 16 }
 0xb61   : > { %12745 = vmatprep.mubr.msk.bf16.mxu1 %vm6169_vm6, %v21950_v17  ;;  %v9307_v17 = vshrl.u32 %v11391_v63, 16 }
 0xb68   : > { %12746 = vmatmul.mubr.msk.bf16.gmra.mrb[36].mxu1 %vm6169_vm6, %v21951_v24  ;;  %v9310_v24 = vshll.u32 %v11391_v63, 16  ;;  %v21965_v63 = vld [vmem:[#allocation103_spill] sm:$0xff] }
 0xb69   : > { %12749 = vmatprep.mubr.msk.bf16.mxu1 %vm6169_vm6, %v21952_v31  ;;  %v8979_v31 = vrot.slane %v8977_v11, 1 }
 0xb70   : > { %12750 = vmatmul.mubr.msk.bf16.gmra.mrb[40].mxu1 %vm6169_vm6, %v21953_v56  ;;  %v8982_v56 = vrot.slane %v8980_v51, 2  ;;  %v21966_v51 = vshrl.u32 %v19538_v60, 16 }
 0xb71   : > { %12753 = vmatprep.mubr.msk.bf16.mxu1 %vm6169_vm6, %v21954_v61  ;;  %v21960_v61 = vld [vmem:[#allocation104_spill] sm:$0xff] }
 0xb78   : > { %12754 = vmatmul.mubr.msk.bf16.gmra.mrb[44].mxu1 %vm6169_vm6, %v21955_v21  ;;  %v9309_v21 = vrot.slane %v9307_v17, 2  ;;  %v21967_v17 = vshll.u32 %v19538_v60, 16  ;;  %v21971_v60 = vshrl.u32 %v19542_v10, 16 }
 0xb79   : > { %12757 = vmatprep.mubr.msk.bf16.mxu1 %vm6169_vm6, %v21956_v23  ;;  %v9312_v23 = vrot.slane %v9310_v24, 3 }
 0xb7a   : > { %v9329_v24 = vrot.slane %v21967_v17, 3 }
 0xb7b   : > { %v9313_v32 = vor.u32 %v9312_v23, %v9309_v21 }
 0xb80   : > { %12758 = vmatmul.mubr.msk.bf16.gmra.mrb[48].mxu1 %vm6169_vm6, %v21957_v37  ;;  %v21963_v37 = vshll.u32 %v21961_v33, 16  ;;  %v21968_v33 = vshrl.u32 %v19540_v48, 16 }
 0xb81   : > { %12761 = vmatprep.mubr.msk.bf16.mxu1 %vm6169_vm6, %v21959_v25  ;;  %v8983_v25 = vor.u32 %v8982_v56, %v8979_v31  ;;  %v21969_v31 = vshll.u32 %v19540_v48, 16 }
 0xb82   : > { %v9320_v53 = vrot.slane %v21963_v37, 3  ;;  %v9335_v37 = vrot.slane %v21968_v33, 2  ;;  %v21977_v33 = vshll.u32 %v19548_v47, 16 }
 0xb83   : > { %v8984_v11 = vsel %vm2519_vm10, %v21965_v63, %v8983_v25  ;;  %v9338_v56 = vrot.slane %v21969_v31, 3  ;;  %vm21970_vm10 = vmmov %vm21905_vm0  ;;  %v21972_v25 = vshll.u32 %v19542_v10, 16  ;;  %v20063_v63 = vld [vmem:[%s20483_s14 + $0x20] sm:$0xf]  ;;  %v21978_v31 = vshrl.u32 %v19552_v0, 16 }
 0xb84   : > { %v9321_v12 = vor.u32 %v9320_v53, %v9317_v49  ;;  %v9844_v23 = vsel %vm21970_vm10, %v11428_v43, 0  ;;  %vm22038_vm0 = vmmov %vm22034_vm3 }
 0xb85   : > { %v9339_v21 = vor.u32 %v9338_v56, %v9335_v37  ;;  %v9365_v37 = vrot.slane %v21977_v33, 3  ;;  %v9371_v56 = vrot.slane %v21978_v31, 2  ;;  %vm22040_vm13 = vmmov %vm22038_vm0 }
 0xb86   : > { %v9322_v40 = vsel %vm3797_vm9, %v9313_v32, %v9321_v12  ;;  %v9347_v32 = vrot.slane %v21972_v25, 3  ;;  %v21981_v25 = vshll.u32 %v19554_v42, 16  ;;  %vm22044_vm4 = vmmov %vm22038_vm0 }
 0xb87   : > { %vm22046_vm8 = vmmov %vm22038_vm0 }
 0xb88   : > { %12762 = vmatmul.mubr.msk.bf16.gmra.mrb[52].mxu1 %vm6169_vm6, %v21960_v61  ;;  %v9326_v61 = vrot.slane %v21966_v51, 2  ;;  %vm22048_vm1 = vmmov %vm22038_vm0 }
 0xb89   : > { %12765 = vmatprep.mubr.msk.bf16.mxu1 %vm6169_vm6, %v21964_v46  ;;  %v9344_v46 = vrot.slane %v21971_v60, 2  ;;  %vm22050_vm10 = vmmov %vm22038_vm0 }
 0xb8a   : > { %v9330_v49 = vor.u32 %v9329_v24, %v9326_v61  ;;  %v21976_v24 = vshrl.u32 %v19548_v47, 16 }
 0xb8b   : > { %v9348_v10 = vor.u32 %v9347_v32, %v9344_v46  ;;  %v21980_v46 = vshrl.u32 %v19554_v42, 16  ;;  %v9383_v32 = vrot.slane %v21981_v25, 3  ;;  %v21991_v25 = vshll.u32 %v19578_v59, 16 }
 0xb8c   : > { %v9331_v53 = vsel %vm3797_vm9, %v9321_v12, %v9330_v49  ;;  %v9340_v48 = vsel %vm3797_vm9, %v9330_v49, %v9339_v21  ;;  %v21974_v12 = vshll.u32 %v19546_v16, 16  ;;  %v21979_v49 = vshll.u32 %v19552_v0, 16 }
 0xb8d   : > { %v9349_v17 = vsel %vm3797_vm9, %v9339_v21, %v9348_v10  ;;  %v9380_v47 = vrot.slane %v21980_v46, 2 }
 0xb8e   : > { %v9356_v51 = vrot.slane %v21974_v12, 3 }
 0xb90   : > { %12766 = vmatmul.mubr.msk.bf16.gmra.mrb[56].mxu1 %vm6169_vm6, %v8984_v11  ;;  %v21973_v11 = vshrl.u32 %v19546_v16, 16 }
 0xb91   : > { %12771 = vmatprep.mubr.msk.bf16.mxu1 %vm6169_vm6, %v9322_v40  ;;  %v9362_v40 = vrot.slane %v21976_v24, 2  ;;  %v21985_v24 = vshll.u32 %v19562_v39, 16 }
 0xb92   : > { %v9353_v43 = vrot.slane %v21973_v11, 2  ;;  %v21982_v11 = vshrl.u32 %v19560_v44, 16 }
 0xb94   : > { %v9357_v61 = vor.u32 %v9356_v51, %v9353_v43  ;;  %v9389_v0 = vrot.slane %v21982_v11, 2  ;;  %v21983_v43 = vshll.u32 %v19560_v44, 16  ;;  %v9384_v51 = vor.u32 %v9383_v32, %v9380_v47 }
 0xb95   : > { %v21990_v47 = vshrl.u32 %v19578_v59, 16  ;;  %v9428_v32 = vrot.slane %v21991_v25, 3 }
 0xb96   : > { %v9358_v16 = vsel %vm3797_vm9, %v9348_v10, %v9357_v61  ;;  %v9392_v12 = vrot.slane %v21983_v43, 3  ;;  %v21992_v43 = vshrl.u32 %v19584_v50, 16 }
 0xb98   : > { %12772 = vmatmul.mubr.msk.bf16.vlgmr.msra.gmra.mrb[24].mxu1 %vm6169_vm6, %v9331_v53  ;;  %v9366_v53 = vor.u32 %v9365_v37, %v9362_v40  ;;  %v9393_v10 = vor.u32 %v9392_v12, %v9389_v0  ;;  %v9401_v40 = vrot.slane %v21985_v24, 3  ;;  %v21986_v37 = vshrl.u32 %v19570_v41, 16 }
 0xb99   : > { %12775 = vmatprep.mubr.msk.bf16.mxu1 %vm6169_vm6, %v9340_v48  ;;  %12808 = vmatpush3.bf16.msra.mxu1 %v9844_v23  ;;  %v9374_v23 = vrot.slane %v21979_v49, 3  ;;  %v21993_v12 = vshll.u32 %v19584_v50, 16 }
 0xb9a   : > { %13780 = vmatprep.subr.msk.bf16.mxu1 %vm21975_vm7, %v20063_v63  ;;  %v9367_v60 = vsel %vm3797_vm9, %v9357_v61, %v9366_v53  ;;  %v9394_v33 = vsel %vm3797_vm9, %v9384_v51, %v9393_v10  ;;  %v9407_v44 = vrot.slane %v21986_v37, 2  ;;  %v21996_v37 = vshrl.u32 %v19596_v58, 16  ;;  %vm22052_vm7 = vmmov %vm22038_vm0 }
 0xb9b   : > { %v9375_v21 = vor.u32 %v9374_v23, %v9371_v56 }
 0xb9c   : > { %v9452_v50 = vrot.slane %v21996_v37, 2  ;;  %v22017_v37 = vld [vmem:[#allocation109_spill] sm:$0xff] }
 0xb9d   : > { %v9376_v48 = vsel %vm3797_vm9, %v9366_v53, %v9375_v21  ;;  %v9385_v61 = vsel %vm3797_vm9, %v9375_v21, %v9384_v51  ;;  %v21988_v53 = vshrl.u32 %v19572_v13, 16  ;;  %v21989_v21 = vshll.u32 %v19572_v13, 16 }
 0xb9e   : > { %v9434_v13 = vrot.slane %v21992_v43, 2  ;;  %v9437_v51 = vrot.slane %v21993_v12, 3  ;;  %v22003_v43 = vld [vmem:[#allocation51_spill] sm:$0xff]  ;;  %v22006_v12 = vld [vmem:[#allocation44_spill] sm:$0xff] }
 0xba0   : > { %12776 = vmatmul.mubr.msk.bf16.gmra.mrb[28].mxu1 %vm6169_vm6, %v9349_v17  ;;  %v21984_v17 = vshrl.u32 %v19562_v39, 16  ;;  %v9416_v39 = vrot.slane %v21988_v53, 2  ;;  %v9438_v24 = vor.u32 %v9437_v51, %v9434_v13  ;;  %v22004_v13 = vld [vmem:[#allocation35_spill] sm:$0xff] }
 0xba1   : > { %12779 = vmatprep.mubr.msk.bf16.mxu1 %vm6169_vm6, %v9358_v16  ;;  %v21987_v16 = vshll.u32 %v19570_v41, 16  ;;  %v9425_v41 = vrot.slane %v21990_v47, 2  ;;  %v22007_v51 = vld [vmem:[#allocation43_spill] sm:$0xff] }
 0xba2   : > { %v9398_v42 = vrot.slane %v21984_v17, 2  ;;  %v21995_v17 = vshll.u32 %v19590_v62, 16 }
 0xba3   : > { %v9410_v31 = vrot.slane %v21987_v16, 3  ;;  %v9429_v11 = vor.u32 %v9428_v32, %v9425_v41 }
 0xba4   : > { %v9402_v56 = vor.u32 %v9401_v40, %v9398_v42  ;;  %v9446_v42 = vrot.slane %v21995_v17, 3  ;;  %v22012_v17 = vld [vmem:[#allocation56_spill] sm:$0xff] }
 0xba5   : > { %v9411_v49 = vor.u32 %v9410_v31, %v9407_v44  ;;  %v21997_v44 = vshll.u32 %v19596_v58, 16 }
 0xba6   : > { %v9403_v23 = vsel %vm3797_vm9, %v9393_v10, %v9402_v56 }
 0xba7   : > { %v9412_v46 = vsel %vm3797_vm9, %v9402_v56, %v9411_v49  ;;  %v9455_v16 = vrot.slane %v21997_v44, 3  ;;  %v21998_v56 = vshrl.u32 %v19609_v28, 16  ;;  %v22019_v44 = vld [vmem:[#allocation115_spill] sm:$0xff] }
 0xba8   : > { %12780 = vmatmul.mubr.msk.bf16.gmra.mrb[32].mxu1 %vm6169_vm6, %v9367_v60  ;;  %v9419_v60 = vrot.slane %v21989_v21, 3 }
 0xba9   : > { %12783 = vmatprep.mubr.msk.bf16.mxu1 %vm6169_vm6, %v9376_v48  ;;  %v9456_v53 = vor.u32 %v9455_v16, %v9452_v50  ;;  %v22018_v50 = vld [vmem:[#allocation79_spill] sm:$0xff]  ;;  %v22020_v16 = vld [vmem:[#allocation80_spill] sm:$0xff] }
 0xbaa   : > { %v9420_v48 = vor.u32 %v9419_v60, %v9416_v39  ;;  %v22000_v39 = vld [vmem:[#allocation30_spill] sm:$0xff] }
 0xbab   : > { %v9468_v21 = vshrl.u32 %v22000_v39, 16  ;;  %v9471_v60 = vshll.u32 %v22000_v39, 16  ;;  %v13890_v39 = vld [vmem:[#allocation3 + $0xa8] ss:$0 sps:$4 sm:$0xff]  }
 0xbac   : > { %v9421_v0 = vsel %vm3797_vm9, %v9411_v49, %v9420_v48  ;;  %v9430_v10 = vsel %vm3797_vm9, %v9420_v48, %v9429_v11  ;;  %v21999_v49 = vshll.u32 %v19609_v28, 16  ;;  %v22001_v48 = vld [vmem:[#allocation38_spill] sm:$0xff] }
 0xbad   : > { %v9470_v47 = vrot.slane %v9468_v21, 2  ;;  %v9473_v41 = vrot.slane %v9471_v60, 3 }
 0xbaf   : > { %v9474_v28 = vor.u32 %v9473_v41, %v9470_v47  ;;  %v22043_v47 = vld [vmem:[#allocation32_spill] sm:$0xff]  ;;  %v22045_v41 = vld [vmem:[#allocation5_spill] sm:$0xff] }
 0xbb0   : > { %12784 = vmatmul.mubr.msk.bf16.gmra.mrb[36].mxu1 %vm6169_vm6, %v9385_v61  ;;  %v21994_v61 = vshrl.u32 %v19590_v62, 16  ;;  %v9461_v62 = vrot.slane %v21998_v56, 2  ;;  %v22022_v56 = vld [vmem:[#allocation113_spill] sm:$0xff] }
 0xbb1   : > { %12787 = vmatprep.mubr.msk.bf16.mxu1 %vm6169_vm6, %v9394_v33  ;;  %v9439_v33 = vsel %vm3797_vm9, %v9429_v11, %v9438_v24  ;;  %v10205_v11 = vsel %vm22002_vm15, %v20063_v63, 0  ;;  %v22008_v63 = vld [vmem:[#allocation49_spill] sm:$0xff]  ;;  %vm22054_vm15 = vmmov %vm22038_vm0 }
 0xbb2   : > { %v9443_v59 = vrot.slane %v21994_v61, 2  ;;  %v22010_v61 = vld [vmem:[#allocation10_spill] sm:$0xff] }
 0xbb4   : > { %v9447_v40 = vor.u32 %v9446_v42, %v9443_v59  ;;  %v22011_v59 = vld [vmem:[#allocation55_spill] sm:$0xff]  ;;  %v22013_v42 = vld [vmem:[#allocation54_spill] sm:$0xff] }
 0xbb6   : > { %v9448_v31 = vsel %vm3797_vm9, %v9438_v24, %v9447_v40  ;;  %v9457_v58 = vsel %vm3797_vm9, %v9447_v40, %v9456_v53  ;;  %v22014_v24 = vld [vmem:[#allocation71_spill] sm:$0xff]  ;;  %v22015_v40 = vld [vmem:[#allocation74_spill] sm:$0xff] }
 0xbb8   : > { %12788 = vmatmul.mubr.msk.bf16.gmra.mrb[40].mxu1 %vm6169_vm6, %v9403_v23  ;;  %v9464_v23 = vrot.slane %v21999_v49, 3  ;;  %v22024_v49 = vld [vmem:[#allocation114_spill] sm:$0xff] }
 0xbb9   : > { %12791 = vmatprep.mubr.msk.bf16.mxu1 %vm6169_vm6, %v9412_v46 }
 0xbba   : > { %v9465_v46 = vor.u32 %v9464_v23, %v9461_v62  ;;  %v22023_v62 = vld [vmem:[#allocation33_spill] sm:$0xff]  ;;  %v22025_v23 = vld [vmem:[#allocation34_spill] sm:$0xff] }
 0xbbc   : > { %v9466_v25 = vsel %vm3797_vm9, %v9456_v53, %v9465_v46  ;;  %v9475_v32 = vsel %vm3797_vm9, %v9465_v46, %v9474_v28  ;;  %vm22005_vm9 = vcmask 1041408   ;;  %v22028_v53 = vld [vmem:[#allocation22_spill] sm:$0xff]  ;;  %v22033_v46 = vld [vmem:[#allocation15_spill] sm:$0xff] }
 0xbbd   : > { %vm22021_vm2 = vmmov %vm22005_vm9  ;;  %v22049_v28 = vld [vmem:[#allocation14_spill] sm:$0xff] }
 0xbc0   : > { %12792 = vmatmul.mubr.msk.bf16.gmra.mrb[44].mxu1 %vm6169_vm6, %v9421_v0  ;;  %v10553_v0 = vld [vmem:[%s20485_s16] sm:$0x3] }
 0xbc1   : > { %12795 = vmatprep.mubr.msk.bf16.mxu1 %vm6169_vm6, %v9430_v10  ;;  %v22009_v10 = vld [vmem:[#allocation9_spill] sm:$0xff] }
 0xbc8   : > { %12796 = vmatmul.mubr.msk.bf16.gmra.mrb[48].mxu1 %vm6169_vm6, %v9439_v33  ;;  %v22016_v33 = vld [vmem:[#allocation75_spill] sm:$0xff] }
 0xbc9   : > { %12799 = vmatprep.mubr.msk.bf16.mxu1 %vm6169_vm6, %v9448_v31  ;;  %v10616_v31 = vsel %vm22021_vm2, %v10553_v0, 0  ;;  %vm22058_vm2 = vmmov %vm22038_vm0 }
 0xbd0   : > { %12800 = vmatmul.mubr.msk.bf16.gmra.mrb[52].mxu1 %vm6169_vm6, %v9457_v58  ;;  %v22035_v58 = vld [vmem:[#allocation17_spill] sm:$0xff] }
 0xbd1   : > { %12803 = vmatprep.mubr.msk.bf16.mxu1 %vm6169_vm6, %v9466_v25  ;;  %v22047_v25 = vld [vmem:[#allocation11_spill] sm:$0xff] }
 0xbd8   : > { %12804 = vmatmul.mubr.msk.bf16.gmra.mrb[56].mxu1 %vm6169_vm6, %v9475_v32  ;;  %v22051_v32 = vld [vmem:[#allocation16_spill] sm:$0xff] }
 0xbd9   : > { %12809 = vmatprep.mubr.msk.bf16.mxu1 %vm6169_vm6, %v22001_v48  ;;  %v22053_v48 = vld [vmem:[#allocation19_spill] sm:$0xff] }
 0xbe0   : > { %12810 = vmatmul.mubr.msk.bf16.vlgmr.msra.gmra.mrb[24].mxu1 %vm6169_vm6, %v22003_v43  ;;  %v22059_v43 = vld [vmem:[#allocation31_spill] sm:$0xff] }
 0xbe1   : > { %12813 = vmatprep.mubr.msk.bf16.mxu1 %vm6169_vm6, %v22004_v13  ;;  %12846 = vmatpush3.bf16.msra.mxu1 %v10205_v11  ;;  %v22055_v11 = vld [vmem:[#allocation23_spill] sm:$0xff] }
 0xbe2   : > { %13781 = vmatprep.subr.msk.bf16.mxu1 %vm22005_vm9, %v10553_v0  ;;  %vm22056_vm9 = vmmov %vm22038_vm0  ;;  %v22057_v0 = vld [vmem:[#allocation27_spill] sm:$0xff] }
 0xbe3   : > { %v22061_v13 = vld [vmem:[#allocation7_spill] sm:$0xff] }
 0xbe8   : > { %12814 = vmatmul.mubr.msk.bf16.gmra.mrb[28].mxu1 %vm6169_vm6, %v22006_v12  ;;  %v22063_v12 = vld [vmem:[#allocation12_spill] sm:$0xff] }
 0xbe9   : > { %12817 = vmatprep.mubr.msk.bf16.mxu1 %vm6169_vm6, %v22007_v51  ;;  %v20273_v51 = vld [vmem:[%s20484_s15] ss:$0 sm:$0xff] }
 0xbf0   : > { %12818 = vmatmul.mubr.msk.bf16.gmra.mrb[32].mxu1 %vm6169_vm6, %v22008_v63  ;;  %v13085_v63 = vadd.f32 %v19879_v34, %v20273_v51 }
 0xbf1   : > { %12821 = vmatprep.mubr.msk.bf16.mxu1 %vm6169_vm6, %v22009_v10  ;;  %v13088_v10 = vadd.f32 %v20273_v51, %v19886_v35 }
 0xbf8   : > { %12822 = vmatmul.mubr.msk.bf16.gmra.mrb[36].mxu1 %vm6169_vm6, %v22010_v61  ;;  %v20283_v61 = vld [vmem:[%s20486_s17] ss:$0 sm:$0xff] }
 0xbf9   : > { %12825 = vmatprep.mubr.msk.bf16.mxu1 %vm6169_vm6, %v22011_v59  ;;  %v13079_v59 = vadd.f32 %v19874_v29, %v20273_v51  ;;  %v13086_v34 = vadd.f32 %v13085_v63, %v20283_v61  ;;  %v13089_v29 = vadd.f32 %v13088_v10, %v20283_v61 }
 0xc00   : > { %12826 = vmatmul.mubr.msk.bf16.gmra.mrb[40].mxu1 %vm6169_vm6, %v22012_v17  ;;  %v13082_v17 = vadd.f32 %v20273_v51, %v19876_v27  ;;  %v13091_v27 = vadd.f32 %v19894_v9, %v20273_v51  ;;  %v13100_v9 = vadd.f32 %v20273_v51, %v19900_v55 }
 0xc01   : > { %12829 = vmatprep.mubr.msk.bf16.mxu1 %vm6169_vm6, %v22013_v42 }
 0xc02   : > { %v13101_v55 = vadd.f32 %v13100_v9, %v20283_v61 }
 0xc08   : > { %12830 = vmatmul.mubr.msk.bf16.gmra.mrb[44].mxu1 %vm6169_vm6, %v22014_v24 }
 0xc09   : > { %12833 = vmatprep.mubr.msk.bf16.mxu1 %vm6169_vm6, %v22015_v40 }
 0xc10   : > { %12834 = vmatmul.mubr.msk.bf16.gmra.mrb[48].mxu1 %vm6169_vm6, %v22016_v33 }
 0xc11   : > { %12837 = vmatprep.mubr.msk.bf16.mxu1 %vm6169_vm6, %v22017_v37 }
 0xc18   : > { %12838 = vmatmul.mubr.msk.bf16.gmra.mrb[52].mxu1 %vm6169_vm6, %v22018_v50 }
 0xc19   : > { %12841 = vmatprep.mubr.msk.bf16.mxu1 %vm6169_vm6, %v22019_v44 }
 0xc20   : > { %12842 = vmatmul.mubr.msk.bf16.gmra.mrb[56].mxu1 %vm6169_vm6, %v22020_v16  ;;  %v13094_v16 = vadd.f32 %v20273_v51, %v19896_v15  ;;  %v13092_v15 = vadd.f32 %v13091_v27, %v20283_v61 }
 0xc21   : > { %12847 = vmatprep.mubr.msk.bf16.mxu1 %vm6169_vm6, %v19721_v52  ;;  %v22026_v52 = vld [vmem:[#allocation116_spill] sm:$0xff] }
 0xc28   : > { %12848 = vmatmul.mubr.msk.bf16.vlgmr.msra.gmra.mrb[24].mxu1 %vm6169_vm6, %v22022_v56 }
 0xc29   : > { %12851 = vmatprep.mubr.msk.bf16.mxu1 %vm6169_vm6, %v19731_v36  ;;  %12884 = vmatpush3.bf16.msra.mxu1 %v10616_v31  ;;  %v22027_v36 = vld [vmem:[#allocation39_spill] sm:$0xff] }
 0xc30   : > { %12852 = vmatmul.mubr.msk.bf16.gmra.mrb[28].mxu1 %vm6169_vm6, %v22023_v62  ;;  %v13097_v62 = vadd.f32 %v19898_v54, %v20273_v51 }
 0xc31   : > { %12855 = vmatprep.mubr.msk.bf16.mxu1 %vm6169_vm6, %v22024_v49 }
 0xc38   : > { %12856 = vmatmul.mubr.msk.bf16.gmra.mrb[32].mxu1 %vm6169_vm6, %v22025_v23  ;;  %v13095_v23 = vadd.f32 %v13094_v16, %v20283_v61 }
 0xc39   : > { %12859 = vmatprep.mubr.msk.bf16.mxu1 %vm6169_vm6, %v19757_v57  ;;  %v10142_v57 = vshrl.u32 %v13890_v39, 16 }
 0xc3b   : > { %v10144_v21 = vrot.slane %v10142_v57, 3  ;;  %v13103_v57 = vadd.f32 %v19906_v18, %v20273_v51 }
 0xc3d   : > { %v13104_v18 = vadd.f32 %v13103_v57, %v20283_v61 }
 0xc40   : > { %12860 = vmatmul.mubr.msk.bf16.gmra.mrb[36].mxu1 %vm6169_vm6, %v19764_v5  ;;  %v10145_v5 = vshll.u32 %v13890_v39, 16 }
 0xc41   : > { %12863 = vmatprep.mubr.msk.bf16.mxu1 %vm6169_vm6, %v22026_v52 }
 0xc42   : > { %v10147_v60 = vrot.slane %v10145_v5, 4 }
 0xc48   : > { %12864 = vmatmul.mubr.msk.bf16.gmra.mrb[40].mxu1 %vm6169_vm6, %v22027_v36  ;;  %v13098_v36 = vadd.f32 %v13097_v62, %v20283_v61  ;;  %v22068_v62 = vld [vmem:[#allocation29_spill] sm:$0xff] }
 0xc49   : > { %12867 = vmatprep.mubr.msk.bf16.mxu1 %vm6169_vm6, %v22028_v53  ;;  %v13139_v9 = vadd.f32 %v22068_v62, %v20273_v51 }
 0xc4b   : > { %v13140_v57 = vadd.f32 %v13139_v9, %v20283_v61 }
 0xc50   : > { %12868 = vmatmul.mubr.msk.bf16.gmra.mrb[44].mxu1 %vm6169_vm6, %v19796_v6  ;;  %v10148_v6 = vor.u32 %v10147_v60, %v10144_v21  ;;  %v13106_v60 = vadd.f32 %v20273_v51, %v19908_v19 }
 0xc51   : > { %12871 = vmatprep.mubr.msk.bf16.mxu1 %vm6169_vm6, %v19803_v38 }
 0xc52   : > { %v10149_v38 = vsel %vm5223_vm12, %v19815_v30, %v10148_v6  ;;  %v22041_v30 = vld [vmem:[#allocation28_spill] sm:$0xff]  ;;  %vm22042_vm12 = vmmov %vm22038_vm0  ;;  %v13107_v19 = vadd.f32 %v13106_v60, %v20283_v61 }
 0xc58   : > { %12872 = vmatmul.mubr.msk.bf16.gmra.mrb[48].mxu1 %vm6169_vm6, %v19810_v22  ;;  %v22029_v22 = vld [vmem:[#allocation8_spill] sm:$0xff] }
 0xc59   : > { %12875 = vmatprep.mubr.msk.bf16.mxu1 %vm6169_vm6, %v19813_v1  ;;  %v22031_v1 = vld [vmem:[#allocation13_spill] sm:$0xff] }
 0xc60   : > { %12876 = vmatmul.mubr.msk.bf16.gmra.mrb[52].mxu1 %vm6169_vm6, %v19818_v3  ;;  %v22037_v3 = vld [vmem:[#allocation20_spill] sm:$0xff] }
 0xc61   : > { %12879 = vmatprep.mubr.msk.bf16.mxu1 %vm6169_vm6, %v19829_v14  ;;  %v22039_v14 = vld [vmem:[#allocation24_spill] sm:$0xff] }
 0xc68   : > { %12880 = vmatmul.mubr.msk.bf16.gmra.mrb[56].mxu1 %vm6169_vm6, %v10149_v38  ;;  %v13109_v38 = vadd.f32 %v19910_v8, %v20273_v51 }
 0xc69   : > { %12885 = vmatprep.mubr.msk.bf16.mxu1 %vm22030_vm11, %v22029_v22  ;;  %vm22060_vm11 = vmmov %vm22038_vm0  ;;  %v13112_v22 = vadd.f32 %v20273_v51, %v19912_v45  ;;  %v13115_v45 = vadd.f32 %v19918_v26, %v20273_v51 }
 0xc6b   : > { %v13116_v26 = vadd.f32 %v13115_v45, %v20283_v61  ;;  %v22074_v45 = vld [vmem:[#allocation64_spill] sm:$0xff] }
 0xc70   : > { %12886 = vmatmul.mubr.msk.bf16.vlgmr.msra.gmra.mrb[24].mxu1 %vm22032_vm14, %v22031_v1  ;;  %vm22062_vm14 = vmmov %vm22038_vm0 }
 0xc71   : > { %12889 = vmatprep.mubr.msk.bf16.mxu1 %vm22034_vm3, %v22033_v46  ;;  %vm22064_vm3 = vmmov %vm22038_vm0 }
 0xc78   : > { %12890 = vmatmul.mubr.msk.bf16.gmra.mrb[28].mxu1 %vm22036_vm5, %v22035_v58 }
 0xc79   : > { %12893 = vmatprep.mubr.msk.bf16.mxu1 %vm22038_vm0, %v22037_v3  ;;  %v13110_v3 = vadd.f32 %v13109_v38, %v20283_v61 }
 0xc80   : > { %12894 = vmatmul.mubr.msk.bf16.gmra.mrb[32].mxu1 %vm22040_vm13, %v22039_v14 }
 0xc81   : > { %12897 = vmatprep.mubr.msk.bf16.mxu1 %vm22042_vm12, %v22041_v30  ;;  %v13113_v30 = vadd.f32 %v13112_v22, %v20283_v61 }
 0xc88   : > { %12898 = vmatmul.mubr.msk.bf16.gmra.mrb[36].mxu1 %vm22044_vm4, %v22043_v47 }
 0xc89   : > { %12901 = vmatprep.mubr.msk.bf16.mxu1 %vm22046_vm8, %v22045_v41 }
 0xc90   : > { %12902 = vmatmul.mubr.msk.bf16.gmra.mrb[40].mxu1 %vm22048_vm1, %v22047_v25  ;;  %v13118_v25 = vadd.f32 %v20273_v51, %v19920_v20 }
 0xc91   : > { %12905 = vmatprep.mubr.msk.bf16.mxu1 %vm22050_vm10, %v22049_v28 }
 0xc92   : > { %v13119_v20 = vadd.f32 %v13118_v25, %v20283_v61 }
 0xc98   : > { %12906 = vmatmul.mubr.msk.bf16.gmra.mrb[44].mxu1 %vm22052_vm7, %v22051_v32  ;;  %v13121_v32 = vadd.f32 %v19922_v2, %v20273_v51 }
 0xc99   : > { %12909 = vmatprep.mubr.msk.bf16.mxu1 %vm22054_vm15, %v22053_v48  ;;  %v13124_v48 = vadd.f32 %v20273_v51, %v19924_v7  ;;  %v13127_v7 = vadd.f32 %v19930_v4, %v20273_v51 }
 0xc9b   : > { %v13125_v63 = vadd.f32 %v13124_v48, %v20283_v61  ;;  %v13128_v4 = vadd.f32 %v13127_v7, %v20283_v61 }
 0xca0   : > { %12910 = vmatmul.mubr.msk.bf16.gmra.mrb[48].mxu1 %vm22056_vm9, %v22055_v11 }
 0xca1   : > { %12913 = vmatprep.mubr.msk.bf16.mxu1 %vm22058_vm2, %v22057_v0 }
 0xca8   : > { %12914 = vmatmul.mubr.msk.bf16.gmra.mrb[52].mxu1 %vm22060_vm11, %v22059_v43 }
 0xca9   : > { %12917 = vmatprep.mubr.msk.bf16.mxu1 %vm22062_vm14, %v22061_v13  ;;  %v13122_v13 = vadd.f32 %v13121_v32, %v20283_v61 }
 0xcb0   : > { %12918 = vmatmul.mubr.msk.bf16.gmra.mrb[56].mxu1 %vm22064_vm3, %v22063_v12 }
 0xd43   : > { %v12887_v42 = vpop.f32.mrb[24].mxu1 }
 0xd44   : > { %v13080_v24 = vadd.f32 %v13079_v59, %v12887_v42  ;;  %v10652_v40 = vpop.f32.mrb[25].mxu1 }
 0xd45   : > { %v13083_v35 = vadd.f32 %v13082_v17, %v10652_v40  ;;  %v12888_v33 = vpop.f32.mrb[26].mxu1  ;;  %v22065_v17 = vld [vmem:[#allocation40_spill] sm:$0xff]  ;;  %v22066_v40 = vld [vmem:[#allocation25_spill] sm:$0xff] }
 0xd46   : > { %v13081_v37 = vadd.f32 %v13080_v24, %v20283_v61  ;;  %v13087_v50 = vadd.f32 %v13086_v34, %v12888_v33  ;;  %v10655_v44 = vpop.f32.mrb[27].mxu1  ;;  %v13130_v42 = vadd.f32 %v20273_v51, %v22065_v17  ;;  %v13133_v34 = vadd.f32 %v22066_v40, %v20273_v51  ;;  %v22079_v40 = vld [vmem:[#allocation57_spill] sm:$0xff] }
 0xd47   : > { %v13084_v31 = vadd.f32 %v13083_v35, %v20283_v61  ;;  %v13090_v56 = vadd.f32 %v13089_v29, %v10655_v44  ;;  %v22067_v35 = vld [vmem:[#allocation45_spill] sm:$0xff] }
 0xd48   : > { %10833 = vst.msk [vmem:[%s20293_s28 + $0x10] sm:$0xff] %vm6169_vm6, %v13081_v37  ;;  %10834 = vst.msk [vmem:[%s20293_s28 + $0x18] sm:$0xff] %vm6169_vm6, %v13087_v50  ;;  %v13136_v33 = vadd.f32 %v20273_v51, %v22067_v35  ;;  %v13131_v27 = vadd.f32 %v13130_v42, %v20283_v61  ;;  %v13134_v44 = vadd.f32 %v13133_v34, %v20283_v61  ;;  %v22078_v42 = vld [vmem:[#allocation117_spill] sm:$0xff] }
 0xd49   : > { %10831 = vst.msk [vmem:[%s20293_s28] sm:$0xff] %vm6169_vm6, %v13084_v31  ;;  %10832 = vst.msk [vmem:[%s20293_s28 + $0x8] sm:$0xff] %vm6169_vm6, %v13090_v56  ;;  %v13172_v34 = vadd.f32 %v20273_v51, %v22079_v40 }
 0xd4a   : > { %v13137_v56 = vadd.f32 %v13136_v33, %v20283_v61 }
 0xd4b   : > { %v12891_v49 = vpop.f32.mrb[28].mxu1 }
 0xd4c   : > { %v13093_v54 = vadd.f32 %v13092_v15, %v12891_v49  ;;  %v10668_v52 = vpop.f32.mrb[29].mxu1 }
 0xd4d   : > { %v13096_v53 = vadd.f32 %v13095_v23, %v10668_v52  ;;  %v12892_v39 = vpop.f32.mrb[30].mxu1  ;;  %v22069_v23 = vld [vmem:[#allocation46_spill] sm:$0xff] }
 0xd4e   : > { %10837 = vst.msk [vmem:[%s20293_s28 + $0x30] sm:$0xff] %vm6169_vm6, %v13093_v54  ;;  %v13099_v5 = vadd.f32 %v13098_v36, %v12892_v39  ;;  %v10671_v21 = vpop.f32.mrb[31].mxu1  ;;  %v13142_v54 = vadd.f32 %v20273_v51, %v22069_v23  ;;  %v22070_v36 = vld [vmem:[#allocation61_spill] sm:$0xff]  ;;  %v22071_v39 = vld [vmem:[#allocation4_spill] sm:$0xff] }
 0xd4f   : > { %10835 = vst.msk [vmem:[%s20293_s28 + $0x20] sm:$0xff] %vm6169_vm6, %v13096_v53  ;;  %v13102_v6 = vadd.f32 %v13101_v55, %v10671_v21  ;;  %v13145_v53 = vadd.f32 %v22070_v36, %v20273_v51  ;;  %v13148_v55 = vadd.f32 %v20273_v51, %v22071_v39  ;;  %v22083_v36 = vld [vmem:[#allocation70_spill] sm:$0xff] }
 0xd50   : > { %10838 = vst.msk [vmem:[%s20293_s28 + $0x38] sm:$0xff] %vm6169_vm6, %v13099_v5  ;;  %v13143_v21 = vadd.f32 %v13142_v54, %v20283_v61  ;;  %v22082_v54 = vld [vmem:[#allocation47_spill] sm:$0xff] }
 0xd51   : > { %10836 = vst.msk [vmem:[%s20293_s28 + $0x28] sm:$0xff] %vm6169_vm6, %v13102_v6  ;;  %v13146_v38 = vadd.f32 %v13145_v53, %v20283_v61  ;;  %v13184_v53 = vadd.f32 %v20273_v51, %v22083_v36 }
 0xd53   : > { %v12895_v1 = vpop.f32.mrb[32].mxu1 }
 0xd54   : > { %v13105_v46 = vadd.f32 %v13104_v18, %v12895_v1  ;;  %v10684_v58 = vpop.f32.mrb[33].mxu1  ;;  %v13149_v1 = vadd.f32 %v13148_v55, %v20283_v61 }
 0xd55   : > { %v13108_v8 = vadd.f32 %v13107_v19, %v10684_v58  ;;  %v12896_v14 = vpop.f32.mrb[34].mxu1  ;;  %v22072_v19 = vld [vmem:[#allocation63_spill] sm:$0xff] }
 0xd56   : > { %10841 = vst.msk [vmem:[%s20293_s28 + $0x50] sm:$0xff] %vm6169_vm6, %v13105_v46  ;;  %v13111_v47 = vadd.f32 %v13110_v3, %v12896_v14  ;;  %v10687_v41 = vpop.f32.mrb[35].mxu1  ;;  %v13151_v46 = vadd.f32 %v22072_v19, %v20273_v51 }
 0xd57   : > { %10839 = vst.msk [vmem:[%s20293_s28 + $0x40] sm:$0xff] %vm6169_vm6, %v13108_v8  ;;  %v13114_v28 = vadd.f32 %v13113_v30, %v10687_v41  ;;  %v22073_v8 = vld [vmem:[#allocation6_spill] sm:$0xff]  ;;  %v22075_v41 = vld [vmem:[#allocation52_spill] sm:$0xff] }
 0xd58   : > { %10842 = vst.msk [vmem:[%s20293_s28 + $0x58] sm:$0xff] %vm6169_vm6, %v13111_v47  ;;  %v13154_v14 = vadd.f32 %v20273_v51, %v22073_v8  ;;  %v13157_v47 = vadd.f32 %v22074_v45, %v20273_v51  ;;  %v13160_v25 = vadd.f32 %v20273_v51, %v22075_v41 }
 0xd59   : > { %10840 = vst.msk [vmem:[%s20293_s28 + $0x48] sm:$0xff] %vm6169_vm6, %v13114_v28  ;;  %v13152_v28 = vadd.f32 %v13151_v46, %v20283_v61 }
 0xd5a   : > { %v13155_v48 = vadd.f32 %v13154_v14, %v20283_v61 }
 0xd5b   : > { %v12899_v11 = vpop.f32.mrb[36].mxu1 }
 0xd5c   : > { %v13117_v0 = vadd.f32 %v13116_v26, %v12899_v11  ;;  %v10700_v43 = vpop.f32.mrb[37].mxu1 }
 0xd5d   : > { %v13120_v2 = vadd.f32 %v13119_v20, %v10700_v43  ;;  %v12900_v12 = vpop.f32.mrb[38].mxu1  ;;  %v13158_v20 = vadd.f32 %v13157_v47, %v20283_v61 }
 0xd5e   : > { %10845 = vst.msk [vmem:[%s20293_s28 + $0x70] sm:$0xff] %vm6169_vm6, %v13117_v0  ;;  %v13123_v10 = vadd.f32 %v13122_v13, %v12900_v12  ;;  %v10703_v59 = vpop.f32.mrb[39].mxu1  ;;  %v13161_v13 = vadd.f32 %v13160_v25, %v20283_v61 }
 0xd5f   : > { %10843 = vst.msk [vmem:[%s20293_s28 + $0x60] sm:$0xff] %vm6169_vm6, %v13120_v2  ;;  %v13126_v24 = vadd.f32 %v13125_v63, %v10703_v59  ;;  %v22076_v2 = vld [vmem:[#allocation66_spill] sm:$0xff] }
 0xd60   : > { %10846 = vst.msk [vmem:[%s20293_s28 + $0x78] sm:$0xff] %vm6169_vm6, %v13123_v10  ;;  %v13163_v12 = vadd.f32 %v22076_v2, %v20273_v51  ;;  %v22077_v10 = vld [vmem:[#allocation53_spill] sm:$0xff] }
 0xd61   : > { %10844 = vst.msk [vmem:[%s20293_s28 + $0x68] sm:$0xff] %vm6169_vm6, %v13126_v24  ;;  %v13166_v59 = vadd.f32 %v20273_v51, %v22077_v10  ;;  %v13169_v24 = vadd.f32 %v22078_v42, %v20273_v51 }
 0xd62   : > { %v13164_v35 = vadd.f32 %v13163_v12, %v20283_v61 }
 0xd63   : > { %v12903_v29 = vpop.f32.mrb[40].mxu1 }
 0xd64   : > { %v13129_v37 = vadd.f32 %v13128_v4, %v12903_v29  ;;  %v10716_v50 = vpop.f32.mrb[41].mxu1  ;;  %v13167_v4 = vadd.f32 %v13166_v59, %v20283_v61 }
 0xd65   : > { %v13132_v16 = vadd.f32 %v13131_v27, %v10716_v50  ;;  %v12904_v31 = vpop.f32.mrb[42].mxu1 }
 0xd66   : > { %10849 = vst.msk [vmem:[%s20293_s28 + $0x90] sm:$0xff] %vm6169_vm6, %v13129_v37  ;;  %v13135_v15 = vadd.f32 %v13134_v44, %v12904_v31  ;;  %v10719_v49 = vpop.f32.mrb[43].mxu1  ;;  %v13170_v37 = vadd.f32 %v13169_v24, %v20283_v61  ;;  %v22080_v31 = vld [vmem:[#allocation67_spill] sm:$0xff] }
 0xd67   : > { %10847 = vst.msk [vmem:[%s20293_s28 + $0x80] sm:$0xff] %vm6169_vm6, %v13132_v16  ;;  %v13138_v52 = vadd.f32 %v13137_v56, %v10719_v49  ;;  %v13173_v16 = vadd.f32 %v13172_v34, %v20283_v61  ;;  %v13175_v56 = vadd.f32 %v22080_v31, %v20273_v51 }
 0xd68   : > { %10850 = vst.msk [vmem:[%s20293_s28 + $0x98] sm:$0xff] %vm6169_vm6, %v13135_v15  ;;  %v22081_v15 = vld [vmem:[#allocation58_spill] sm:$0xff] }
 0xd69   : > { %10848 = vst.msk [vmem:[%s20293_s28 + $0x88] sm:$0xff] %vm6169_vm6, %v13138_v52  ;;  %v13178_v49 = vadd.f32 %v20273_v51, %v22081_v15  ;;  %v13181_v52 = vadd.f32 %v22082_v54, %v20273_v51  ;;  %v13176_v39 = vadd.f32 %v13175_v56, %v20283_v61 }
 0xd6b   : > { %v12907_v5 = vpop.f32.mrb[44].mxu1 }
 0xd6c   : > { %v13141_v60 = vadd.f32 %v13140_v57, %v12907_v5  ;;  %v10732_v6 = vpop.f32.mrb[45].mxu1  ;;  %v13179_v57 = vadd.f32 %v13178_v49, %v20283_v61 }
 0xd6d   : > { %v13144_v22 = vadd.f32 %v13143_v21, %v10732_v6  ;;  %v12908_v18 = vpop.f32.mrb[46].mxu1 }
 0xd6e   : > { %10853 = vst.msk [vmem:[%s20293_s28 + $0xb0] sm:$0xff] %vm6169_vm6, %v13141_v60  ;;  %v13147_v58 = vadd.f32 %v13146_v38, %v12908_v18  ;;  %v10735_v3 = vpop.f32.mrb[47].mxu1  ;;  %v13182_v60 = vadd.f32 %v13181_v52, %v20283_v61 }
 0xd6f   : > { %10851 = vst.msk [vmem:[%s20293_s28 + $0xa0] sm:$0xff] %vm6169_vm6, %v13144_v22  ;;  %v13150_v30 = vadd.f32 %v13149_v1, %v10735_v3  ;;  %v13185_v22 = vadd.f32 %v13184_v53, %v20283_v61 }
 0xd70   : > { %10854 = vst.msk [vmem:[%s20293_s28 + $0xb8] sm:$0xff] %vm6169_vm6, %v13147_v58 }
 0xd71   : > { %10852 = vst.msk [vmem:[%s20293_s28 + $0xa8] sm:$0xff] %vm6169_vm6, %v13150_v30 }
 0xd73   : > { %v12911_v32 = vpop.f32.mrb[48].mxu1 }
 0xd74   : > { %v13153_v26 = vadd.f32 %v13152_v28, %v12911_v32  ;;  %v10748_v11 = vpop.f32.mrb[49].mxu1 }
 0xd75   : > { %v13156_v0 = vadd.f32 %v13155_v48, %v10748_v11  ;;  %v12912_v43 = vpop.f32.mrb[50].mxu1 }
 0xd76   : > { %10857 = vst.msk [vmem:[%s20293_s28 + $0xd0] sm:$0xff] %vm6169_vm6, %v13153_v26  ;;  %v13159_v63 = vadd.f32 %v13158_v20, %v12912_v43  ;;  %v10751_v7 = vpop.f32.mrb[51].mxu1 }
 0xd77   : > { %10855 = vst.msk [vmem:[%s20293_s28 + $0xc0] sm:$0xff] %vm6169_vm6, %v13156_v0  ;;  %v13162_v17 = vadd.f32 %v13161_v13, %v10751_v7 }
 0xd78   : > { %10858 = vst.msk [vmem:[%s20293_s28 + $0xd8] sm:$0xff] %vm6169_vm6, %v13159_v63 }
 0xd79   : > { %10856 = vst.msk [vmem:[%s20293_s28 + $0xc8] sm:$0xff] %vm6169_vm6, %v13162_v17 }
 0xd7b   : > { %v12915_v33 = vpop.f32.mrb[52].mxu1 }
 0xd7c   : > { %v13165_v29 = vadd.f32 %v13164_v35, %v12915_v33  ;;  %v10764_v27 = vpop.f32.mrb[53].mxu1 }
 0xd7d   : > { %v13168_v50 = vadd.f32 %v13167_v4, %v10764_v27  ;;  %v12916_v44 = vpop.f32.mrb[54].mxu1 }
 0xd7e   : > { %10861 = vst.msk [vmem:[%s20293_s28 + $0xf0] sm:$0xff] %vm6169_vm6, %v13165_v29  ;;  %v13171_v62 = vadd.f32 %v13170_v37, %v12916_v44  ;;  %v10767_v9 = vpop.f32.mrb[55].mxu1 }
 0xd7f   : > { %10859 = vst.msk [vmem:[%s20293_s28 + $0xe0] sm:$0xff] %vm6169_vm6, %v13168_v50  ;;  %v13174_v23 = vadd.f32 %v13173_v16, %v10767_v9 }
 0xd80   : > { %10862 = vst.msk [vmem:[%s20293_s28 + $0xf8] sm:$0xff] %vm6169_vm6, %v13171_v62 }
 0xd81   : > { %10860 = vst.msk [vmem:[%s20293_s28 + $0xe8] sm:$0xff] %vm6169_vm6, %v13174_v23 }
 0xd83   : > { %v12919_v55 = vpop.f32.mrb[56].mxu1 }
 0xd84   : > { %v13177_v5 = vadd.f32 %v13176_v39, %v12919_v55  ;;  %v10780_v21 = vpop.f32.mrb[57].mxu1 }
 0xd85   : > { %v13180_v6 = vadd.f32 %v13179_v57, %v10780_v21  ;;  %v12920_v38 = vpop.f32.mrb[58].mxu1 }
 0xd86   : > { %10865 = vst.msk [vmem:[%s20293_s28 + $0x110] sm:$0xff] %vm6169_vm6, %v13177_v5  ;;  %v13183_v51 = vadd.f32 %v13182_v60, %v12920_v38  ;;  %v10783_v18 = vpop.f32.mrb[59].mxu1 }
 0xd87   : > { %10863 = vst.msk [vmem:[%s20293_s28 + $0x100] sm:$0xff] %vm6169_vm6, %v13180_v6  ;;  %v13186_v1 = vadd.f32 %v13185_v22, %v10783_v18 }
 0xd88   : > { %10866 = vst.msk [vmem:[%s20293_s28 + $0x118] sm:$0xff] %vm6169_vm6, %v13183_v51 }
 0xd89   : > { %10864 = vst.msk [vmem:[%s20293_s28 + $0x108] sm:$0xff] %vm6169_vm6, %v13186_v1 }
 0xd8a PF: > { %s28_s27 = sadd.s32 1, %s14191_s27  }
 0xd8b   : > { %p25_p4 = scmp.ge.s32.totalorder %s28_s27, 4  }
 0xd8d   :  { %27 = sbr.rel (!%p25_p4) target bundleno = 4 (0x4), region = 141 }

</bundles_post_ra>
